<compile_context>
chip_gen: v7x
topology: tpu7x:2x2x1
jax: 0.10.0
libtpu: 0.0.40
codegen_flags: <defaults>
</compile_context>

<pallas_src>
import functools

import jax
import jax.numpy as jnp
from jax.experimental import pallas as pl
from jax.experimental.pallas import tpu as pltpu


def _ffn_kernel(x_ref, w1_ref, b1_ref, w2_ref, b2_ref, o_ref):
    # x_ref : (TM, D) bf16     w1_ref: (D, F) bf16     b1_ref: (1, F) f32
    # w2_ref: (F, D) bf16      b2_ref: (1, D) f32      o_ref : (TM, D) f32
    h = jnp.dot(x_ref[...], w1_ref[...], preferred_element_type=jnp.float32)
    h = jnp.maximum(h + b1_ref[...], 0.0)       # bias + ReLU: VPU filler under MXU
    # TODO(synk): training-mode stochastic dropout (pltpu.prng_random_bits mask)
    # is not implemented; eval()-mode dropout == identity is what runs here.
    y = jnp.dot(h.astype(w2_ref.dtype), w2_ref[...],
                preferred_element_type=jnp.float32)
    o_ref[...] = (y + b2_ref[...]).astype(o_ref.dtype)


def _choose_tm(M: int, block_rows: int) -> int:
    """Row-tile size: MXU aligned, and >=2 grid tiles when M allows (v7x megacore)."""
    tm = min(block_rows, M)
    if M >= 512:
        # Multiple of 256: matches v6e/v7x 256-wide MXU and is a multiple of
        # 128 for v5e's 128-wide MXU.
        tm = max(256, (tm // 256) * 256)
    elif M >= 8:
        tm = max(8, (tm // 8) * 8)
    if M >= 16 and pl.cdiv(M, tm) < 2:
        # Expose at least 2 row tiles so the "parallel" axis can shard across
        # both v7x TensorCores (harmless on single-TC chips).
        tm = max(8, ((M // 2) // 8) * 8)
    return tm


def _ffn_pallas(x2, w1, b1_2d, w2, b2_2d, tm, n_tiles, out_dtype,
                single_buffer_weights: bool):
    Mp, D = x2.shape
    _, F = w1.shape

    # Constant index_map operands (weights/biases): double-buffering buys
    # nothing, so request single buffering to halve their resident VMEM.
    resident = (
        dict(pipeline_mode=pl.Buffered(1)) if single_buffer_weights else {}
    )

    cost = pl.CostEstimate(
        flops=4 * Mp * D * F,                       # two (Mp,D)x(D,F)-class matmuls
        transcendentals=0,
        bytes_accessed=(x2.size * x2.dtype.itemsize
                        + Mp * D * jnp.dtype(out_dtype).itemsize
                        + w1.size * w1.dtype.itemsize
                        + w2.size * w2.dtype.itemsize
                        + b1_2d.size * b1_2d.dtype.itemsize
                        + b2_2d.size * b2_2d.dtype.itemsize),
    )

    return pl.pallas_call(
        _ffn_kernel,
        out_shape=jax.ShapeDtypeStruct((Mp, D), out_dtype),
        grid_spec=pltpu.PrefetchScalarGridSpec(
            num_scalar_prefetch=0,
            grid=(n_tiles,),
            in_specs=[
                pl.BlockSpec((tm, D), lambda i: (i, 0)),              # x row tile
                pl.BlockSpec((D, F), lambda i: (0, 0), **resident),   # W1 (resident)
                pl.BlockSpec((1, F), lambda i: (0, 0), **resident),   # b1
                pl.BlockSpec((F, D), lambda i: (0, 0), **resident),   # W2 (resident)
                pl.BlockSpec((1, D), lambda i: (0, 0), **resident),   # b2
            ],
            out_specs=pl.BlockSpec((tm, D), lambda i: (i, 0)),
        ),
        compiler_params=pltpu.CompilerParams(
            dimension_semantics=("parallel",),
            vmem_limit_bytes=48 * 1024 * 1024,   # > 32 MiB default, < v7x 64 MiB phys
        ),
        cost_estimate=cost,
    )(x2, w1, b1_2d, w2, b2_2d)


def feed_forward(x: jnp.ndarray,
                 w1: jnp.ndarray, b1: jnp.ndarray,
                 w2: jnp.ndarray, b2: jnp.ndarray,
                 *, block_rows: int = 512) -> jnp.ndarray:
    """
    x  : (batch, seq_len, d_model) float32
    w1 : (d_model, d_ff), b1: (d_ff,)
    w2 : (d_ff, d_model), b2: (d_model,)
    returns (batch, seq_len, d_model) in x.dtype
    """
    B, S, D = x.shape
    D_in, F = w1.shape
    assert D_in == D and w2.shape == (F, D)
    assert b1.shape == (F,) and b2.shape == (D,)

    M = B * S
    # Lane-dense 2-D layout; bf16 activations/weights feed the MXU natively,
    # accumulation stays f32 inside the kernel. Biases stay f32.
    x2 = x.reshape(M, D).astype(jnp.bfloat16)
    w1_b = w1.astype(jnp.bfloat16)
    w2_b = w2.astype(jnp.bfloat16)
    b1_2d = b1.reshape(1, F).astype(jnp.float32)
    b2_2d = b2.reshape(1, D).astype(jnp.float32)

    tm = _choose_tm(M, block_rows)
    n_tiles = pl.cdiv(M, tm)
    Mp = n_tiles * tm
    if Mp != M:
        # TODO(synk): padded rows of the ragged final tile are computed and then
        # sliced off; could be masked via scalar prefetch of the real row count.
        x2 = jnp.pad(x2, ((0, Mp - M), (0, 0)))

    call = functools.partial(_ffn_pallas, x2, w1_b, b1_2d, w2_b, b2_2d,
                             tm, n_tiles, x.dtype)
    try:
        out2 = call(single_buffer_weights=True)
    except Exception:
        # Fallback if this JAX build rejects pl.Buffered(1) on resident operands.
        out2 = call(single_buffer_weights=False)

    if Mp != M:
        out2 = out2[:M]
    return out2.reshape(B, S, D)


if __name__ == "__main__":
    # Small shapes consistent with the module spec: d_model=512, d_ff=2048.
    batch, seq_len, d_model, d_ff = 2, 8, 512, 2048

    key = jax.random.PRNGKey(0)
    kx, k1, k2, k3, k4 = jax.random.split(key, 5)
    x = jax.random.normal(kx, (batch, seq_len, d_model), dtype=jnp.float32)
    w1 = jax.random.normal(k1, (d_model, d_ff), dtype=jnp.float32) * 0.02
    b1 = jax.random.normal(k2, (d_ff,), dtype=jnp.float32) * 0.02
    w2 = jax.random.normal(k3, (d_ff, d_model), dtype=jnp.float32) * 0.02
    b2 = jax.random.normal(k4, (d_model,), dtype=jnp.float32) * 0.02

    out = feed_forward(x, w1, b1, w2, b2)
    out = jax.block_until_ready(out)

    # Plain-JAX f32 reference (eval-mode dropout == identity). Tolerance is
    # loosened because the kernel matmuls run in bf16 (f32 accumulation).
    h_ref = jnp.maximum(jnp.einsum("bsd,df->bsf", x, w1) + b1, 0.0)
    ref = jnp.einsum("bsf,fd->bsd", h_ref, w2) + b2

    assert out.shape == (batch, seq_len, d_model)
    max_err = float(jnp.max(jnp.abs(out - ref)))
    assert jnp.allclose(out, ref, atol=5e-2, rtol=5e-2), max_err

    print("KERNEL_OK")
</pallas_src>

<mosaic_0001>
module attributes {stable_mosaic.version = 11 : i64} {
  func.func @_ffn_kernel(%arg0: i32, %arg1: memref<8x512xbf16, #tpu.memory_space<vmem>>, %arg2: memref<512x2048xbf16, #tpu.memory_space<vmem>>, %arg3: memref<1x2048xf32, #tpu.memory_space<vmem>>, %arg4: memref<2048x512xbf16, #tpu.memory_space<vmem>>, %arg5: memref<1x512xf32, #tpu.memory_space<vmem>>, %arg6: memref<8x512xf32, #tpu.memory_space<vmem>>) attributes {dimension_semantics = [#tpu.dimension_semantics<parallel>], iteration_bounds = array<i64: 2>, scalar_prefetch = 0 : i64, scratch_operands = 0 : i64, tpu.core_type = #tpu.core_type<tc>, window_params = [{transform_indices = @transform_0, window_bounds = array<i64: 8, 512>}, {pipeline_mode = #tpu.pipeline_mode<synchronous>, transform_indices = @transform_1, window_bounds = array<i64: 512, 2048>}, {pipeline_mode = #tpu.pipeline_mode<synchronous>, transform_indices = @transform_2, window_bounds = array<i64: 1, 2048>}, {pipeline_mode = #tpu.pipeline_mode<synchronous>, transform_indices = @transform_3, window_bounds = array<i64: 2048, 512>}, {pipeline_mode = #tpu.pipeline_mode<synchronous>, transform_indices = @transform_4, window_bounds = array<i64: 1, 512>}, {transform_indices = @transform_5, window_bounds = array<i64: 8, 512>}]} {
    %c0 = arith.constant 0 : index
    %c0_0 = arith.constant 0 : index
    %0 = vector.load %arg1[%c0, %c0_0] : memref<8x512xbf16, #tpu.memory_space<vmem>>, vector<8x512xbf16>
    %c0_1 = arith.constant 0 : index
    %c0_2 = arith.constant 0 : index
    %1 = vector.load %arg2[%c0_1, %c0_2] : memref<512x2048xbf16, #tpu.memory_space<vmem>>, vector<512x2048xbf16>
    %cst = arith.constant dense<0.000000e+00> : vector<8x2048xf32>
    %2 = tpu.matmul %0, %1, %cst {dimension_numbers = #tpu.dot_dimension_numbers<[1], [0], [0], [1], [0, 0, 1, 1], [], []>} : vector<8x512xbf16>, vector<512x2048xbf16>, vector<8x2048xf32> -> vector<8x2048xf32>
    %c0_3 = arith.constant 0 : index
    %c0_4 = arith.constant 0 : index
    %3 = vector.load %arg3[%c0_3, %c0_4] : memref<1x2048xf32, #tpu.memory_space<vmem>>, vector<1x2048xf32>
    %4 = vector.broadcast %3 : vector<1x2048xf32> to vector<8x2048xf32>
    %5 = arith.addf %2, %4 : vector<8x2048xf32>
    %cst_5 = arith.constant 0.000000e+00 : f32
    %6 = vector.broadcast %cst_5 : f32 to vector<8x2048xf32>
    %7 = arith.maximumf %5, %6 : vector<8x2048xf32>
    %8 = arith.truncf %7 : vector<8x2048xf32> to vector<8x2048xbf16>
    %c0_6 = arith.constant 0 : index
    %c0_7 = arith.constant 0 : index
    %9 = vector.load %arg4[%c0_6, %c0_7] : memref<2048x512xbf16, #tpu.memory_space<vmem>>, vector<2048x512xbf16>
    %cst_8 = arith.constant dense<0.000000e+00> : vector<8x512xf32>
    %10 = tpu.matmul %8, %9, %cst_8 {dimension_numbers = #tpu.dot_dimension_numbers<[1], [0], [0], [1], [0, 0, 1, 1], [], []>} : vector<8x2048xbf16>, vector<2048x512xbf16>, vector<8x512xf32> -> vector<8x512xf32>
    %c0_9 = arith.constant 0 : index
    %c0_10 = arith.constant 0 : index
    %11 = vector.load %arg5[%c0_9, %c0_10] : memref<1x512xf32, #tpu.memory_space<vmem>>, vector<1x512xf32>
    %12 = vector.broadcast %11 : vector<1x512xf32> to vector<8x512xf32>
    %13 = arith.addf %10, %12 : vector<8x512xf32>
    %c0_11 = arith.constant 0 : index
    %c0_12 = arith.constant 0 : index
    %14 = vector.load %arg6[%c0_11, %c0_12] : memref<8x512xf32, #tpu.memory_space<vmem>>, vector<8x512xf32>
    tpu.vector_store %arg6[%c0_11, %c0_12], %13 {strides = array<i32>} : memref<8x512xf32, #tpu.memory_space<vmem>>, vector<8x512xf32>,
    return
  }
  func.func @transform_0(%arg0: i32) -> (i32, i32) {
    %c0_i32 = arith.constant 0 : i32
    %c0_i32_0 = arith.constant 0 : i32
    return %arg0, %c0_i32 : i32, i32
  }
  func.func @transform_1(%arg0: i32) -> (i32, i32) {
    %c0_i32 = arith.constant 0 : i32
    %c0_i32_0 = arith.constant 0 : i32
    %c0_i32_1 = arith.constant 0 : i32
    return %c0_i32, %c0_i32_0 : i32, i32
  }
  func.func @transform_2(%arg0: i32) -> (i32, i32) {
    %c0_i32 = arith.constant 0 : i32
    %c0_i32_0 = arith.constant 0 : i32
    %c0_i32_1 = arith.constant 0 : i32
    return %c0_i32, %c0_i32_0 : i32, i32
  }
  func.func @transform_3(%arg0: i32) -> (i32, i32) {
    %c0_i32 = arith.constant 0 : i32
    %c0_i32_0 = arith.constant 0 : i32
    %c0_i32_1 = arith.constant 0 : i32
    return %c0_i32, %c0_i32_0 : i32, i32
  }
  func.func @transform_4(%arg0: i32) -> (i32, i32) {
    %c0_i32 = arith.constant 0 : i32
    %c0_i32_0 = arith.constant 0 : i32
    %c0_i32_1 = arith.constant 0 : i32
    return %c0_i32, %c0_i32_0 : i32, i32
  }
  func.func @transform_5(%arg0: i32) -> (i32, i32) {
    %c0_i32 = arith.constant 0 : i32
    %c0_i32_0 = arith.constant 0 : i32
    return %arg0, %c0_i32 : i32, i32
  }
}

module attributes {stable_mosaic.version = 11 : i64} {
  func.func @_ffn_kernel(%arg0: i32, %arg1: memref<8x512xbf16, #tpu.memory_space<vmem>>, %arg2: memref<512x2048xbf16, #tpu.memory_space<vmem>>, %arg3: memref<1x2048xf32, #tpu.memory_space<vmem>>, %arg4: memref<2048x512xbf16, #tpu.memory_space<vmem>>, %arg5: memref<1x512xf32, #tpu.memory_space<vmem>>, %arg6: memref<8x512xf32, #tpu.memory_space<vmem>>) attributes {dimension_semantics = [#tpu.dimension_semantics<parallel>], iteration_bounds = array<i64: 2>, scalar_prefetch = 0 : i64, scratch_operands = 0 : i64, tpu.core_type = #tpu.core_type<tc>, window_params = [{transform_indices = @transform_0, window_bounds = array<i64: 8, 512>}, {pipeline_mode = #tpu.pipeline_mode<synchronous>, transform_indices = @transform_1, window_bounds = array<i64: 512, 2048>}, {pipeline_mode = #tpu.pipeline_mode<synchronous>, transform_indices = @transform_2, window_bounds = array<i64: 1, 2048>}, {pipeline_mode = #tpu.pipeline_mode<synchronous>, transform_indices = @transform_3, window_bounds = array<i64: 2048, 512>}, {pipeline_mode = #tpu.pipeline_mode<synchronous>, transform_indices = @transform_4, window_bounds = array<i64: 1, 512>}, {transform_indices = @transform_5, window_bounds = array<i64: 8, 512>}]} {
    %c0 = arith.constant 0 : index
    %c0_0 = arith.constant 0 : index
    %0 = vector.load %arg1[%c0, %c0_0] : memref<8x512xbf16, #tpu.memory_space<vmem>>, vector<8x512xbf16>
    %c0_1 = arith.constant 0 : index
    %c0_2 = arith.constant 0 : index
    %1 = vector.load %arg2[%c0_1, %c0_2] : memref<512x2048xbf16, #tpu.memory_space<vmem>>, vector<512x2048xbf16>
    %cst = arith.constant dense<0.000000e+00> : vector<8x2048xf32>
    %2 = tpu.matmul %0, %1, %cst {dimension_numbers = #tpu.dot_dimension_numbers<[1], [0], [0], [1], [0, 0, 1, 1], [], []>} : vector<8x512xbf16>, vector<512x2048xbf16>, vector<8x2048xf32> -> vector<8x2048xf32>
    %c0_3 = arith.constant 0 : index
    %c0_4 = arith.constant 0 : index
    %3 = vector.load %arg3[%c0_3, %c0_4] : memref<1x2048xf32, #tpu.memory_space<vmem>>, vector<1x2048xf32>
    %4 = vector.broadcast %3 : vector<1x2048xf32> to vector<8x2048xf32>
    %5 = arith.addf %2, %4 : vector<8x2048xf32>
    %cst_5 = arith.constant 0.000000e+00 : f32
    %6 = vector.broadcast %cst_5 : f32 to vector<8x2048xf32>
    %7 = arith.maximumf %5, %6 : vector<8x2048xf32>
    %8 = arith.truncf %7 : vector<8x2048xf32> to vector<8x2048xbf16>
    %c0_6 = arith.constant 0 : index
    %c0_7 = arith.constant 0 : index
    %9 = vector.load %arg4[%c0_6, %c0_7] : memref<2048x512xbf16, #tpu.memory_space<vmem>>, vector<2048x512xbf16>
    %cst_8 = arith.constant dense<0.000000e+00> : vector<8x512xf32>
    %10 = tpu.matmul %8, %9, %cst_8 {dimension_numbers = #tpu.dot_dimension_numbers<[1], [0], [0], [1], [0, 0, 1, 1], [], []>} : vector<8x2048xbf16>, vector<2048x512xbf16>, vector<8x512xf32> -> vector<8x512xf32>
    %c0_9 = arith.constant 0 : index
    %c0_10 = arith.constant 0 : index
    %11 = vector.load %arg5[%c0_9, %c0_10] : memref<1x512xf32, #tpu.memory_space<vmem>>, vector<1x512xf32>
    %12 = vector.broadcast %11 : vector<1x512xf32> to vector<8x512xf32>
    %13 = arith.addf %10, %12 : vector<8x512xf32>
    %c0_11 = arith.constant 0 : index
    %c0_12 = arith.constant 0 : index
    %14 = vector.load %arg6[%c0_11, %c0_12] : memref<8x512xf32, #tpu.memory_space<vmem>>, vector<8x512xf32>
    tpu.vector_store %arg6[%c0_11, %c0_12], %13 {strides = array<i32>} : memref<8x512xf32, #tpu.memory_space<vmem>>, vector<8x512xf32>,
    return
  }
  func.func @transform_0(%arg0: i32) -> (i32, i32) {
    %c0_i32 = arith.constant 0 : i32
    %c0_i32_0 = arith.constant 0 : i32
    return %arg0, %c0_i32 : i32, i32
  }
  func.func @transform_1(%arg0: i32) -> (i32, i32) {
    %c0_i32 = arith.constant 0 : i32
    %c0_i32_0 = arith.constant 0 : i32
    %c0_i32_1 = arith.constant 0 : i32
    return %c0_i32, %c0_i32_0 : i32, i32
  }
  func.func @transform_2(%arg0: i32) -> (i32, i32) {
    %c0_i32 = arith.constant 0 : i32
    %c0_i32_0 = arith.constant 0 : i32
    %c0_i32_1 = arith.constant 0 : i32
    return %c0_i32, %c0_i32_0 : i32, i32
  }
  func.func @transform_3(%arg0: i32) -> (i32, i32) {
    %c0_i32 = arith.constant 0 : i32
    %c0_i32_0 = arith.constant 0 : i32
    %c0_i32_1 = arith.constant 0 : i32
    return %c0_i32, %c0_i32_0 : i32, i32
  }
  func.func @transform_4(%arg0: i32) -> (i32, i32) {
    %c0_i32 = arith.constant 0 : i32
    %c0_i32_0 = arith.constant 0 : i32
    %c0_i32_1 = arith.constant 0 : i32
    return %c0_i32, %c0_i32_0 : i32, i32
  }
  func.func @transform_5(%arg0: i32) -> (i32, i32) {
    %c0_i32 = arith.constant 0 : i32
    %c0_i32_0 = arith.constant 0 : i32
    return %arg0, %c0_i32 : i32, i32
  }
}

</mosaic_0001>

<bundles_post_ra>
// kernel: tpu_custom_call.1
= control target key start
LH: loop header
LB: loop body
LE: loop exit
PB: predicated region body
PF: predicated region fallthrough
CT: control target
= control target key end

     0   :  { %10 = vsyncpa [#allocation3], 0  ;;  %s10760_s0 = inlined_call_operand.hbm [shape: bf16[16,512], index: 0, kind: input, shape index: {}]   ;;  %s10761_s1 = inlined_call_operand.hbm [shape: bf16[512,2048], index: 1, kind: input, shape index: {}]   ;;  %s10762_s2 = inlined_call_operand.hbm [shape: f32[1,2048], index: 2, kind: input, shape index: {}]   ;;  %s10763_s3 = inlined_call_operand.hbm [shape: bf16[2048,512], index: 3, kind: input, shape index: {}]   ;;  %s10764_s4 = inlined_call_operand.hbm [shape: f32[1,512], index: 4, kind: input, shape index: {}]   ;;  %s10765_s5 = inlined_call_operand.hbm [shape: f32[16,512], index: 5, kind: output, shape index: {}]  }
   0x1   :  { %12 = vsyncpa [#allocation3 + $0x1], 0 }
   0x2   :  { %13 = vsyncpa [#allocation6], 0 }
   0x3   :  { %14 = vsyncpa [#allocation9], 0 }
   0x4   :  { %15 = vsyncpa [#allocation4], 0 }
   0x5   :  { %17 = vsyncpa [#allocation4 + $0x1], 0  ;;  %s10315_s18 = smov 0   ;;  %s10317_s19 = smov 0  }
   0x6   :  { %s10319_s20 = smov 0   ;;  %s10321_s21 = smov 0  }
   0x7 LB: > { %s10275_s22 = smov [#allocation5]   ;;  %s10336_s24 = sadd.s32 4294967295, %s10273_s21   ;;  %s10273_s21 = sphi %s10321_s21, %s10789_s21   ;;  %s10269_s20 = sphi %s10319_s20, %s10788_s20   ;;  %s10265_s19 = sphi %s10317_s19, %s10787_s19   ;;  %s10261_s18 = sphi %s10315_s18, %s10786_s18  }
   0x8   : > { %s176_s23 = sshll.u32 %s10275_s22, 4  ;;  %p8033_p0 = scmp.ge.s32.totalorder %s10273_s21, 1  ;;  %s10341_s23 = int_to_ptr.vmem [resolvable:$true] %s176_s23 }
   0x9   : > { %p10766_p1 = scmp.eq.s32.totalorder %s10336_s24, 0  ;;  %p164_p2 = scmp.lt.s32.totalorder %s10273_s21, 3 }
   0xa   : > { %s10276_s26 = smov [#allocation8]   ;;  %s10277_s29 = smov [#allocation7]  }
   0xb   : > { %p10343_p3 = pnand %p8033_p0, %p164_p2  ;;  %s200_s27 = sshll.u32 %s10276_s26, 4  ;;  %s10356_s27 = int_to_ptr.vmem [resolvable:$true] %s200_s27 }
   0xc   : > { %s10358_s30 = sshll.u32 %s10277_s29, 4  ;;  %s10057_s8 = scalar_lea.hbm %s10761_s1, 65536  ;;  %s191_s30 = int_to_ptr.vmem [resolvable:$true] %s10358_s30 }
   0xd   : > { %s10769_s25 = scalar_select %p10343_p3, 1, 0 }
   0xe   : > { %p9212_p5 = pneg %p10343_p3  ;;  %p10058_p7 = scmp.ne.s32.totalorder %s10761_s1, %s10057_s8 }
   0xf   : > { %p10064_p11 = scmp.lt.u32.totalorder %s10057_s8, %s10761_s1 }
  0x10   : > { %p10352_p6 = pnand %p9212_p5, %p10766_p1 }
  0x12   : > { %p10368_p8 = pneg %p10352_p6 }
  0x14   : > { %p10060_p9 = pnand %p10368_p8, %p10058_p7 }
  0x16   : > { %p10061_p10 = pneg %p10060_p9 }
  0x18   : > { %p10066_p12 = pnand %p10064_p11, %p10061_p10 }
  0x1a   : > { %10069 = shalt.err (!%p10066_p12)
}
  0x1b   : > { %s10070_s14 = scalar_lea.vmem %s10341_s23, 65536  ;;  %p10078_p5 = scmp.lt.s32.totalorder %s10341_s23, %s10341_s23 }
  0x1c   : > { %p10071_p13 = scmp.ne.s32.totalorder %s10341_s23, %s10070_s14  ;;  %p10079_p4 = scmp.lt.s32.totalorder %s10070_s14, %s10070_s14 }
  0x1e   : > { %p10073_p0 = pnand %p10071_p13, %p10368_p8  ;;  %p10080_p7 = por %p10079_p4, %p10078_p5 }
  0x20   : > { %p10074_p2 = pneg %p10073_p0 }
  0x22   : > { %p10081_p9 = pnand %p10080_p7, %p10074_p2 }
  0x24   : > { %10084 = shalt.err (!%p10081_p9)
}
  0x25   : > { %s10278_s15 = smov 1024   ;;  %s10279_s16 = smov 64  }
  0x26   : > { %9215 = dma.hbm_to_vmem [thread:$0]  (!%p10352_p6), %s10761_s1, 65536, %s10341_s23, [#allocation6], %s10278_s15, %s10278_s15, %s10279_s16  }
  0x27   : > { %s10085_s6 = scalar_lea.hbm %s10763_s3, 65536 }
  0x28   : > { %p10086_p4 = scmp.ne.s32.totalorder %s10763_s3, %s10085_s6  ;;  %p10092_p12 = scmp.lt.u32.totalorder %s10085_s6, %s10763_s3 }
  0x2a   : > { %p10088_p10 = pnand %p10086_p4, %p10368_p8 }
  0x2c   : > { %p10089_p11 = pneg %p10088_p10 }
  0x2e   : > { %p10094_p13 = pnand %p10092_p12, %p10089_p11 }
  0x30   : > { %10097 = shalt.err (!%p10094_p13)
}
  0x31   : > { %s10098_s23 = scalar_lea.vmem %s10356_s27, 65536  ;;  %p10106_p7 = scmp.lt.s32.totalorder %s10356_s27, %s10356_s27 }
  0x32   : > { %p10099_p0 = scmp.ne.s32.totalorder %s10356_s27, %s10098_s23  ;;  %p10107_p9 = scmp.lt.s32.totalorder %s10098_s23, %s10098_s23 }
  0x34   : > { %p10101_p2 = pnand %p10099_p0, %p10368_p8  ;;  %p10108_p4 = por %p10107_p9, %p10106_p7 }
  0x36   : > { %p10102_p5 = pneg %p10101_p2 }
  0x38   : > { %p10109_p10 = pnand %p10108_p4, %p10102_p5 }
  0x3a   : > { %10112 = shalt.err (!%p10109_p10)
}
  0x3b   : > { %s10280_s12 = smov 256   ;;  %s10281_s13 = smov 16  }
  0x3c   : > { %9221 = dma.hbm_to_vmem [thread:$0]  (!%p10352_p6), %s10763_s3, 65536, %s10356_s27, [#allocation9], %s10280_s12, %s10280_s12, %s10281_s13  }
  0x3d   : > { %s10113_s22 = scalar_lea.hbm %s10762_s2, 256 }
  0x3e   : > { %p10114_p11 = scmp.ne.s32.totalorder %s10762_s2, %s10113_s22  ;;  %p10120_p0 = scmp.lt.u32.totalorder %s10113_s22, %s10762_s2 }
  0x40   : > { %p10116_p12 = pnand %p10114_p11, %p10368_p8 }
  0x42   : > { %p10117_p13 = pneg %p10116_p12 }
  0x44   : > { %p10122_p2 = pnand %p10120_p0, %p10117_p13 }
  0x46   : > { %10125 = shalt.err (!%p10122_p2)
}
  0x47   : > { %s10126_s8 = scalar_lea.vmem %s191_s30, 256  ;;  %p10134_p4 = scmp.lt.s32.totalorder %s191_s30, %s191_s30 }
  0x48   : > { %p10127_p5 = scmp.ne.s32.totalorder %s191_s30, %s10126_s8  ;;  %p10135_p10 = scmp.lt.s32.totalorder %s10126_s8, %s10126_s8 }
  0x4a   : > { %p10129_p7 = pnand %p10127_p5, %p10368_p8  ;;  %p10136_p1 = por %p10135_p10, %p10134_p4 }
  0x4c   : > { %p10130_p9 = pneg %p10129_p7 }
  0x4e   : > { %p10137_p3 = pnand %p10136_p1, %p10130_p9 }
  0x50   : > { %10140 = shalt.err (!%p10137_p3)
}
  0x51   : > { %9218 = dma.hbm_to_vmem [thread:$0]  (!%p10352_p6), %s10762_s2, 256, %s191_s30, [#allocation6]  }
  0x52   : > { %s10282_s10 = smov [#allocation10]   ;;  %s10141_s14 = scalar_lea.hbm %s10764_s4, 64 }
  0x53   : > { %s214_s23 = sshll.u32 %s10282_s10, 4  ;;  %p10142_p11 = scmp.ne.s32.totalorder %s10764_s4, %s10141_s14  ;;  %s215_s23 = int_to_ptr.vmem [resolvable:$true] %s214_s23 }
  0x54   : > { %p10148_p12 = scmp.lt.u32.totalorder %s10141_s14, %s10764_s4 }
  0x55   : > { %p10144_p1 = pnand %p10142_p11, %p10368_p8 }
  0x57   : > { %p10145_p3 = pneg %p10144_p1 }
  0x59   : > { %p10150_p13 = pnand %p10148_p12, %p10145_p3 }
  0x5b   : > { %10153 = shalt.err (!%p10150_p13)
}
  0x5c   : > { %s10154_s30 = scalar_lea.vmem %s215_s23, 64  ;;  %p10162_p7 = scmp.lt.s32.totalorder %s215_s23, %s215_s23 }
  0x5d   : > { %p10155_p0 = scmp.ne.s32.totalorder %s215_s23, %s10154_s30  ;;  %p10163_p9 = scmp.lt.s32.totalorder %s10154_s30, %s10154_s30 }
  0x5f   : > { %p10157_p2 = pnand %p10155_p0, %p10368_p8  ;;  %p10164_p4 = por %p10163_p9, %p10162_p7 }
  0x61   : > { %p10158_p5 = pneg %p10157_p2 }
  0x63   : > { %p10165_p10 = pnand %p10164_p4, %p10158_p5 }
  0x65   : > { %10168 = shalt.err (!%p10165_p10)
}
  0x66   : > { %9224 = dma.hbm_to_vmem [thread:$0]  (!%p10352_p6), %s10764_s4, 64, %s215_s23, [#allocation9]  }
  0x67   : > { %s8032_s11 = sadd.s32 4294967294, %s10273_s21   ;;  %s10451_s28 = sadd.s32 1, %s10273_s21  }
  0x68   : > { %s27_s6 = ssub.s32 %s10273_s21, %s10451_s28  ;;  %s30_s7 = sadd.s32 1, %s10269_s20 }
  0x69   : > { %p28_p8 = scmp.eq.s32.totalorder %s27_s6, 0  ;;  %p37_p11 = scmp.ne.s32.totalorder %s10269_s20, %s10265_s19 }
  0x6a   : > { %p38_p1 = scmp.eq.s32.totalorder %s10273_s21, 0  ;;  %p43_p3 = scmp.ne.s32.totalorder %s10265_s19, %s10261_s18 }
  0x6b   : > { %s10462_s8 = scalar_select %p28_p8, %s10269_s20, %s30_s7  }
  0x6c   : > { %p10464_p12 = por %p38_p1, %p37_p11  ;;  %p10773_p13 = scmp.eq.s32.totalorder %s10336_s24, 0 }
  0x6d   : > { %p151_p0 = scmp.eq.s32.totalorder %s10336_s24, 1  ;;  %p157_p2 = scmp.eq.s32.totalorder %s8032_s11, 1 }
  0x6e   : > { %p10470_p6 = por %p10773_p13, %p43_p3  ;;  %p9237_p5 = scmp.lt.s32.totalorder %s10273_s21, 2 }
  0x6f   : > { %s225_s10 = sand.u32 1, %s10269_s20   ;;  %p10477_p7 = por %p151_p0, %p37_p11 }
  0x70   : > { %p10481_p9 = por %p157_p2, %p43_p3  ;;  %s8039_s13 = sshll.u32 %s225_s10, 4 }
  0x71   : > { %s10775_s23 = scalar_select %p10477_p7, 1, 0 }
  0x72   : > { %s10776_s12 = scalar_select %p10481_p9, 1, 0 }
  0x73   : > { %s9082_s14 = sshll.u32 %s10273_s21, 8  ;;  %s229_s22 = scalar_lea.vmem [#allocation2], %s8039_s13 }
  0x74   : > { %s10489_s17 = scalar_lea.hbm %s10760_s0, %s9082_s14  ;;  %s237_s30 = sshll.u32 %s229_s22, 4  ;;  %s10491_s30 = int_to_ptr.vmem [resolvable:$true] %s237_s30 }
  0x75   : > { %p10495_p4 = pnand %p9237_p5, %p10464_p12  ;;  %s226_s29 = scalar_lea.sflag [#allocation3], %s225_s10 }
  0x76   : > { %s10169_s11 = scalar_lea.hbm %s10489_s17, 256  ;;  %s10174_s13 = scalar_lea.hbm %s10760_s0, 512 }
  0x77   : > { %p10170_p10 = scmp.ne.s32.totalorder %s10489_s17, %s10169_s11  ;;  %p10171_p8 = pneg %p10495_p4 }
  0x78   : > { %p10175_p3 = scmp.lt.u32.totalorder %s10489_s17, %s10760_s0  ;;  %p10176_p12 = scmp.lt.u32.totalorder %s10174_s13, %s10169_s11 }
  0x79   : > { %p10172_p11 = pnand %p10171_p8, %p10170_p10  ;;  %p10178_p0 = scmp.lt.u32.totalorder %s10169_s11, %s10489_s17 }
  0x7a   : > { %p10177_p13 = por %p10176_p12, %p10175_p3 }
  0x7b   : > { %p10173_p1 = pneg %p10172_p11 }
  0x7c   : > { %p10179_p2 = por %p10178_p0, %p10177_p13 }
  0x7e   : > { %p10180_p5 = pnand %p10179_p2, %p10173_p1 }
  0x80   : > { %10183 = shalt.err (!%p10180_p5)
}
  0x81   : > { %s10184_s10 = scalar_lea.vmem %s10491_s30, 256  ;;  %s10283_s15 = smov [#allocation2]  }
  0x82   : > { %p10185_p10 = scmp.ne.s32.totalorder %s10491_s30, %s10184_s10  ;;  %s10189_s16 = sshll.u32 %s10283_s15, 4  ;;  %s10190_s16 = int_to_ptr.vmem [resolvable:$false] %s10189_s16 }
  0x83   : > { %s10191_s22 = scalar_lea.vmem %s10190_s16, 512  ;;  %p10192_p7 = scmp.lt.s32.totalorder %s10491_s30, %s10190_s16 }
  0x84   : > { %p10187_p11 = pnand %p10185_p10, %p10171_p8  ;;  %p10193_p3 = scmp.lt.s32.totalorder %s10191_s22, %s10184_s10 }
  0x86   : > { %p10188_p9 = pneg %p10187_p11  ;;  %p10194_p12 = por %p10193_p3, %p10192_p7 }
  0x88   : > { %p10195_p13 = pnand %p10194_p12, %p10188_p9 }
  0x8a   : > { %10198 = shalt.err (!%p10195_p13)
}
  0x8b   : > { %9228 = dma.hbm_to_vmem [thread:$0]  (!%p10495_p4), %s10489_s17, 256, %s10491_s30, %s226_s29  }
  0x8c   : > { %p10778_p1 = scmp.ne.s32.totalorder %s10769_s25, 0 }
  0x8d   : > { %s10527_s11 = sand.u32 (!%p10778_p1), 1, %s10265_s19  }
  0x8e   : > { %246 = sbr.rel (%p10778_p1) target bundleno = 1414 (0x586), region = 40  ;;  %s8043_s6 = sshll.u32 (!%p10778_p1), %s10527_s11, 4 }
  0x8f   : > { %s249_s7 = scalar_lea.sflag (!%p10778_p1), [#allocation3], %s10527_s11  ;;  %s10531_s13 = scalar_lea.vmem (!%p10778_p1), [#allocation2], %s8043_s6 }
  0x95   : > { %10244 = dma.done.wait (%p10470_p6), %s249_s7, 256  }
  0x96   : > { %10246 = vsyncadd (%p10470_p6), %s249_s7, 4294967040  ;;  %p10779_p7 = scmp.eq.s32.totalorder %s10336_s24, 0 }
  0x98   : > { %10248 = dma.done.wait (%p10779_p7), [#allocation6], 65792   ;;  %p10780_p9 = pmov %p10779_p7 }
  0x99   : > { %p10781_p4 = pmov %p10779_p7 }
  0x9a   : > { %10250 = vsyncadd (%p10780_p9), [#allocation6], 4294901504 }
  0x9b   : > { %10252 = dma.done.wait (%p10781_p4), [#allocation9], 65600   ;;  %p10782_p8 = pmov %p10781_p4 }
  0x9c   : > { %v297_v0 = vld [vmem:[#allocation5] sm:$0xff]  ;;  %v298_v2 = vld [vmem:[#allocation5 + $0x8] sm:$0xff]  ;;  %s8048_s25 = sshll.u32 %s10527_s11, 5  ;;  %s9083_s9 = sshll.u32 %s10336_s24, 9 }
  0x9d   : > { %10254 = vsyncadd (%p10782_p8), [#allocation9], 4294901696  ;;  %v305_v1 = vld [vmem:[#allocation5 + $0x40] sm:$0xff]  ;;  %v306_v4 = vld [vmem:[#allocation5 + $0x48] sm:$0xff]  ;;  %s294_s17 = scalar_lea.vmem [#allocation11], %s8048_s25  ;;  %s10716_s27 = scalar_lea.hbm %s10765_s5, %s9083_s9 }
  0x9e   : > { %v8054_v3 = vcombine.high %v297_v0, %v305_v1  ;;  %v8053_v5 = vcombine.low %v297_v0, %v305_v1  ;;  %v313_v6 = vld [vmem:[#allocation5 + $0x80] sm:$0xff]  ;;  %v8056_v8 = vcombine.high %v298_v2, %v306_v4  ;;  %v8055_v9 = vcombine.low %v298_v2, %v306_v4  ;;  %v314_v11 = vld [vmem:[#allocation5 + $0x88] sm:$0xff]  ;;  %s7924_s30 = sshll.u32 %s294_s17, 4  ;;  %s7910_s24 = scalar_lea.sflag [#allocation4], %s10527_s11  ;;  %s10718_s30 = int_to_ptr.vmem [resolvable:$true] %s7924_s30 }
  0x9f   : > { %v321_v7 = vld [vmem:[#allocation5 + $0xc0] sm:$0xff]  ;;  %v322_v12 = vld [vmem:[#allocation5 + $0xc8] sm:$0xff]  ;;  %s10199_s14 = scalar_lea.vmem %s10718_s30, 512  ;;  %p10783_p0 = scmp.ne.s32.totalorder %s10775_s23, 0 }
  0xa0   : > { %v8070_v10 = vcombine.high %v313_v6, %v321_v7  ;;  %v329_v13 = vld [vmem:[#allocation5 + $0x100] sm:$0xff]  ;;  %3467 = vmatprep.subr.bf16.mxu0 %v8054_v3  ;;  %v8072_v14 = vcombine.high %v314_v11, %v322_v12  ;;  %v330_v16 = vld [vmem:[#allocation5 + $0x108] sm:$0xff]  ;;  %3549 = vmatprep.subr.bf16.mxu1 %v8056_v8  ;;  %v8069_v18 = vcombine.low %v313_v6, %v321_v7  ;;  %p10200_p6 = scmp.ne.s32.totalorder %s10718_s30, %s10199_s14  ;;  %s10284_s10 = smov [#allocation11]  }
  0xa1   : > { %v337_v15 = vld [vmem:[#allocation5 + $0x140] sm:$0xff]  ;;  %v338_v17 = vld [vmem:[#allocation5 + $0x148] sm:$0xff]  ;;  %3468 = vmatpush1.bf16.msra.mxu0 %v8053_v5  ;;  %3550 = vmatpush1.bf16.msra.mxu1 %v8055_v9  ;;  %v8071_v19 = vcombine.low %v314_v11, %v322_v12  ;;  %s10203_s15 = sshll.u32 %s10284_s10, 4  ;;  %s10204_s15 = int_to_ptr.vmem [resolvable:$false] %s10203_s15 }
  0xa2   : > { %3469 = vmatprep.subr.bf16.mxu0 %v8070_v10  ;;  %v8086_v20 = vcombine.high %v329_v13, %v337_v15  ;;  %3551 = vmatprep.subr.bf16.mxu1 %v8072_v14  ;;  %v8088_v21 = vcombine.high %v330_v16, %v338_v17  ;;  %v345_v22 = vld [vmem:[#allocation5 + $0x180] sm:$0xff]  ;;  %v346_v24 = vld [vmem:[#allocation5 + $0x188] sm:$0xff]  ;;  %v8085_v26 = vcombine.low %v329_v13, %v337_v15  ;;  %p10201_p2 = pnand %p10200_p6, %p10783_p0  ;;  %s10205_s16 = scalar_lea.vmem %s10204_s15, 1024 }
  0xa3   : > { %v353_v23 = vld [vmem:[#allocation5 + $0x1c0] sm:$0xff]  ;;  %v354_v25 = vld [vmem:[#allocation5 + $0x1c8] sm:$0xff]  ;;  %v8087_v27 = vcombine.low %v330_v16, %v338_v17  ;;  %p10206_p10 = scmp.lt.s32.totalorder %s10718_s30, %s10204_s15  ;;  %p10207_p11 = scmp.lt.s32.totalorder %s10205_s16, %s10199_s14 }
  0xa4   : > { %v8102_v28 = vcombine.high %v345_v22, %v353_v23  ;;  %v8104_v29 = vcombine.high %v346_v24, %v354_v25  ;;  %v361_v30 = vld [vmem:[#allocation5 + $0x200] sm:$0xff]  ;;  %v362_v32 = vld [vmem:[#allocation5 + $0x208] sm:$0xff]  ;;  %v8101_v34 = vcombine.low %v345_v22, %v353_v23  ;;  %v8103_v35 = vcombine.low %v346_v24, %v354_v25  ;;  %p10202_p5 = pneg %p10201_p2 }
  0xa5   : > { %3470 = vmatpush1.bf16.msra.mxu0 %v8069_v18  ;;  %3552 = vmatpush1.bf16.msra.mxu1 %v8071_v19  ;;  %v369_v31 = vld [vmem:[#allocation5 + $0x240] sm:$0xff]  ;;  %v370_v33 = vld [vmem:[#allocation5 + $0x248] sm:$0xff]  ;;  %p10208_p3 = por %p10207_p11, %p10206_p10 }
  0xa6   : > { %3471 = vmatprep.subr.bf16.mxu0 %v8086_v20  ;;  %3553 = vmatprep.subr.bf16.mxu1 %v8088_v21  ;;  %v8118_v36 = vcombine.high %v361_v30, %v369_v31  ;;  %v8120_v37 = vcombine.high %v362_v32, %v370_v33  ;;  %v377_v38 = vld [vmem:[#allocation5 + $0x280] sm:$0xff]  ;;  %v378_v40 = vld [vmem:[#allocation5 + $0x288] sm:$0xff]  ;;  %v8117_v42 = vcombine.low %v361_v30, %v369_v31 }
  0xa7   : > { %v385_v39 = vld [vmem:[#allocation5 + $0x2c0] sm:$0xff]  ;;  %v386_v41 = vld [vmem:[#allocation5 + $0x2c8] sm:$0xff]  ;;  %v8119_v43 = vcombine.low %v362_v32, %v370_v33  ;;  %p10209_p12 = pnand %p10208_p3, %p10202_p5 }
  0xa8   : > { %v8134_v44 = vcombine.high %v377_v38, %v385_v39  ;;  %v8136_v45 = vcombine.high %v378_v40, %v386_v41  ;;  %v393_v46 = vld [vmem:[#allocation5 + $0x300] sm:$0xff]  ;;  %v394_v48 = vld [vmem:[#allocation5 + $0x308] sm:$0xff]  ;;  %v8133_v50 = vcombine.low %v377_v38, %v385_v39  ;;  %v8135_v51 = vcombine.low %v378_v40, %v386_v41 }
  0xa9   : > { %3472 = vmatpush1.bf16.msra.mxu0 %v8085_v26  ;;  %3554 = vmatpush1.bf16.msra.mxu1 %v8087_v27  ;;  %v401_v47 = vld [vmem:[#allocation5 + $0x340] sm:$0xff]  ;;  %v402_v49 = vld [vmem:[#allocation5 + $0x348] sm:$0xff] }
  0xaa   : > { %3473 = vmatprep.subr.bf16.mxu0 %v8102_v28  ;;  %3555 = vmatprep.subr.bf16.mxu1 %v8104_v29  ;;  %v8150_v52 = vcombine.high %v393_v46, %v401_v47  ;;  %v10546_v53 = vld [vmem:[%s10531_s13] sm:$0xff]  ;;  %v8152_v54 = vcombine.high %v394_v48, %v402_v49  ;;  %v410_v58 = vld [vmem:[#allocation5 + $0x388] sm:$0xff]  ;;  %v8149_v60 = vcombine.low %v393_v46, %v401_v47 }
  0xab   : > { %v409_v55 = vld [vmem:[#allocation5 + $0x380] sm:$0xff]  ;;  %v10550_v57 = vcombine.high %v10546_v53, %v10546_v53  ;;  %v418_v59 = vld [vmem:[#allocation5 + $0x3c8] sm:$0xff]  ;;  %v8151_v61 = vcombine.low %v394_v48, %v402_v49 }
  0xac   : > { %v417_v56 = vld [vmem:[#allocation5 + $0x3c0] sm:$0xff]  ;;  %v8168_v63 = vcombine.high %v410_v58, %v418_v59  ;;  %v426_v2 = vld [vmem:[#allocation5 + $0x408] sm:$0xff]  ;;  %v8167_v5 = vcombine.low %v410_v58, %v418_v59 }
  0xad   : > { %3474 = vmatpush1.bf16.msra.mxu0 %v8101_v34  ;;  %3556 = vmatpush1.bf16.msra.mxu1 %v8103_v35  ;;  %v8166_v62 = vcombine.high %v409_v55, %v417_v56  ;;  %v425_v0 = vld [vmem:[#allocation5 + $0x400] sm:$0xff]  ;;  %v434_v3 = vld [vmem:[#allocation5 + $0x448] sm:$0xff]  ;;  %v8165_v4 = vcombine.low %v409_v55, %v417_v56 }
  0xae   : > { %3475 = vmatprep.subr.bf16.mxu0 %v8118_v36  ;;  %3557 = vmatprep.subr.bf16.mxu1 %v8120_v37  ;;  %v433_v1 = vld [vmem:[#allocation5 + $0x440] sm:$0xff]  ;;  %v8184_v7 = vcombine.high %v426_v2, %v434_v3  ;;  %v442_v10 = vld [vmem:[#allocation5 + $0x488] sm:$0xff]  ;;  %v8183_v13 = vcombine.low %v426_v2, %v434_v3 }
  0xaf   : > { %3499 = vmatprep.mubr.bf16.mxu0 %v10550_v57  ;;  %3581 = vmatprep.mubr.bf16.mxu1 %v10550_v57  ;;  %v8182_v6 = vcombine.high %v425_v0, %v433_v1  ;;  %v441_v8 = vld [vmem:[#allocation5 + $0x480] sm:$0xff]  ;;  %v450_v11 = vld [vmem:[#allocation5 + $0x4c8] sm:$0xff]  ;;  %v8181_v12 = vcombine.low %v425_v0, %v433_v1 }
  0xb0   : > { %v449_v9 = vld [vmem:[#allocation5 + $0x4c0] sm:$0xff]  ;;  %v8200_v15 = vcombine.high %v442_v10, %v450_v11  ;;  %v458_v18 = vld [vmem:[#allocation5 + $0x508] sm:$0xff]  ;;  %v8199_v21 = vcombine.low %v442_v10, %v450_v11 }
  0xb1   : > { %3476 = vmatpush1.bf16.msra.mxu0 %v8117_v42  ;;  %3558 = vmatpush1.bf16.msra.mxu1 %v8119_v43  ;;  %v8198_v14 = vcombine.high %v441_v8, %v449_v9  ;;  %v457_v16 = vld [vmem:[#allocation5 + $0x500] sm:$0xff]  ;;  %v466_v19 = vld [vmem:[#allocation5 + $0x548] sm:$0xff]  ;;  %v8197_v20 = vcombine.low %v441_v8, %v449_v9 }
  0xb2   : > { %3477 = vmatprep.subr.bf16.mxu0 %v8134_v44  ;;  %3559 = vmatprep.subr.bf16.mxu1 %v8136_v45  ;;  %v465_v17 = vld [vmem:[#allocation5 + $0x540] sm:$0xff]  ;;  %v8216_v23 = vcombine.high %v458_v18, %v466_v19  ;;  %v474_v26 = vld [vmem:[#allocation5 + $0x588] sm:$0xff]  ;;  %v8215_v29 = vcombine.low %v458_v18, %v466_v19 }
  0xb3   : > { %v8214_v22 = vcombine.high %v457_v16, %v465_v17  ;;  %v473_v24 = vld [vmem:[#allocation5 + $0x580] sm:$0xff]  ;;  %v482_v27 = vld [vmem:[#allocation5 + $0x5c8] sm:$0xff]  ;;  %v8213_v28 = vcombine.low %v457_v16, %v465_v17 }
  0xb4   : > { %v481_v25 = vld [vmem:[#allocation5 + $0x5c0] sm:$0xff]  ;;  %v8232_v31 = vcombine.high %v474_v26, %v482_v27  ;;  %v490_v34 = vld [vmem:[#allocation5 + $0x608] sm:$0xff]  ;;  %v8231_v37 = vcombine.low %v474_v26, %v482_v27 }
  0xb5   : > { %3478 = vmatpush1.bf16.msra.mxu0 %v8133_v50  ;;  %3560 = vmatpush1.bf16.msra.mxu1 %v8135_v51  ;;  %v8230_v30 = vcombine.high %v473_v24, %v481_v25  ;;  %v489_v32 = vld [vmem:[#allocation5 + $0x600] sm:$0xff]  ;;  %v498_v35 = vld [vmem:[#allocation5 + $0x648] sm:$0xff]  ;;  %v8229_v36 = vcombine.low %v473_v24, %v481_v25 }
  0xb6   : > { %3479 = vmatprep.subr.bf16.mxu0 %v8150_v52  ;;  %3561 = vmatprep.subr.bf16.mxu1 %v8152_v54  ;;  %v497_v33 = vld [vmem:[#allocation5 + $0x640] sm:$0xff]  ;;  %v8248_v39 = vcombine.high %v490_v34, %v498_v35  ;;  %v506_v42 = vld [vmem:[#allocation5 + $0x688] sm:$0xff]  ;;  %v8247_v45 = vcombine.low %v490_v34, %v498_v35 }
  0xb7   : > { %v8246_v38 = vcombine.high %v489_v32, %v497_v33  ;;  %v505_v40 = vld [vmem:[#allocation5 + $0x680] sm:$0xff]  ;;  %v514_v43 = vld [vmem:[#allocation5 + $0x6c8] sm:$0xff]  ;;  %v8245_v44 = vcombine.low %v489_v32, %v497_v33 }
  0xb8   : > { %v513_v41 = vld [vmem:[#allocation5 + $0x6c0] sm:$0xff]  ;;  %v8264_v47 = vcombine.high %v506_v42, %v514_v43  ;;  %v522_v50 = vld [vmem:[#allocation5 + $0x708] sm:$0xff]  ;;  %v8263_v54 = vcombine.low %v506_v42, %v514_v43 }
  0xb9   : > { %3480 = vmatpush1.bf16.msra.mxu0 %v8149_v60  ;;  %3562 = vmatpush1.bf16.msra.mxu1 %v8151_v61  ;;  %v8262_v46 = vcombine.high %v505_v40, %v513_v41  ;;  %v521_v48 = vld [vmem:[#allocation5 + $0x700] sm:$0xff]  ;;  %v530_v51 = vld [vmem:[#allocation5 + $0x748] sm:$0xff]  ;;  %v8261_v52 = vcombine.low %v505_v40, %v513_v41 }
  0xba   : > { %3481 = vmatprep.subr.bf16.mxu0 %v8166_v62  ;;  %3563 = vmatprep.subr.bf16.mxu1 %v8168_v63  ;;  %v529_v49 = vld [vmem:[#allocation5 + $0x740] sm:$0xff]  ;;  %v8280_v56 = vcombine.high %v522_v50, %v530_v51  ;;  %v538_v60 = vld [vmem:[#allocation5 + $0x788] sm:$0xff]  ;;  %v8279_v63 = vcombine.low %v522_v50, %v530_v51 }
  0xbb   : > { %v8278_v55 = vcombine.high %v521_v48, %v529_v49  ;;  %v537_v58 = vld [vmem:[#allocation5 + $0x780] sm:$0xff]  ;;  %v546_v61 = vld [vmem:[#allocation5 + $0x7c8] sm:$0xff]  ;;  %v8277_v62 = vcombine.low %v521_v48, %v529_v49 }
  0xbc   : > { %v545_v59 = vld [vmem:[#allocation5 + $0x7c0] sm:$0xff]  ;;  %v8296_v1 = vcombine.high %v538_v60, %v546_v61 }
  0xbd   : > { %3482 = vmatpush1.bf16.msra.mxu0 %v8165_v4  ;;  %3564 = vmatpush1.bf16.msra.mxu1 %v8167_v5  ;;  %v8294_v0 = vcombine.high %v537_v58, %v545_v59  ;;  %v553_v2 = vld [vmem:[#allocation5 + $0x800] sm:$0xff]  ;;  %v554_v4 = vld [vmem:[#allocation5 + $0x808] sm:$0xff] }
  0xbe   : > { %3483 = vmatprep.subr.bf16.mxu0 %v8182_v6  ;;  %3565 = vmatprep.subr.bf16.mxu1 %v8184_v7  ;;  %v561_v3 = vld [vmem:[#allocation5 + $0x840] sm:$0xff]  ;;  %v562_v5 = vld [vmem:[#allocation5 + $0x848] sm:$0xff]  ;;  %v8293_v6 = vcombine.low %v537_v58, %v545_v59  ;;  %v8295_v7 = vcombine.low %v538_v60, %v546_v61 }
  0xbf   : > { %v8310_v8 = vcombine.high %v553_v2, %v561_v3  ;;  %v8312_v9 = vcombine.high %v554_v4, %v562_v5  ;;  %v569_v10 = vld [vmem:[#allocation5 + $0x880] sm:$0xff]  ;;  %v8309_v16 = vcombine.low %v553_v2, %v561_v3  ;;  %v8311_v17 = vcombine.low %v554_v4, %v562_v5 }
  0xc0   : > { %v577_v11 = vld [vmem:[#allocation5 + $0x8c0] sm:$0xff] }
  0xc1   : > { %3484 = vmatpush1.bf16.msra.mxu0 %v8181_v12  ;;  %3566 = vmatpush1.bf16.msra.mxu1 %v8183_v13  ;;  %v10556_v12 = vcombine.low %v10546_v53, %v10546_v53  ;;  %v570_v13 = vld [vmem:[#allocation5 + $0x888] sm:$0xff]  ;;  %v8326_v18 = vcombine.high %v569_v10, %v577_v11  ;;  %v585_v19 = vld [vmem:[#allocation5 + $0x900] sm:$0xff]  ;;  %v8325_v24 = vcombine.low %v569_v10, %v577_v11 }
  0xc2   : > { %3485 = vmatprep.subr.bf16.mxu0 %v8198_v14  ;;  %3567 = vmatprep.subr.bf16.mxu1 %v8200_v15  ;;  %v578_v14 = vld [vmem:[#allocation5 + $0x8c8] sm:$0xff]  ;;  %v601_v27 = vld [vmem:[#allocation5 + $0x980] sm:$0xff] }
  0xc3   : > { %v10559_v15 = vld [vmem:[%s10531_s13 + $0x8] sm:$0xff]  ;;  %v8327_v25 = vcombine.low %v570_v13, %v578_v14  ;;  %v617_v35 = vld [vmem:[#allocation5 + $0xa00] sm:$0xff] }
  0xc4   : > { %v10563_v53 = vcombine.high %v10559_v15, %v10559_v15  ;;  %v633_v43 = vld [vmem:[#allocation5 + $0xa80] sm:$0xff] }
  0xc5   : > { %3486 = vmatpush1.bf16.msra.mxu0 %v8197_v20  ;;  %3568 = vmatpush1.bf16.msra.mxu1 %v8199_v21  ;;  %v593_v20 = vld [vmem:[#allocation5 + $0x940] sm:$0xff]  ;;  %v586_v21 = vld [vmem:[#allocation5 + $0x908] sm:$0xff] }
  0xc6   : > { %3487 = vmatprep.subr.bf16.mxu0 %v8214_v22  ;;  %3569 = vmatprep.subr.bf16.mxu1 %v8216_v23  ;;  %v8328_v22 = vcombine.high %v570_v13, %v578_v14  ;;  %v594_v23 = vld [vmem:[#allocation5 + $0x948] sm:$0xff]  ;;  %v8342_v26 = vcombine.high %v585_v19, %v593_v20  ;;  %v8341_v32 = vcombine.low %v585_v19, %v593_v20  ;;  %v649_v51 = vld [vmem:[#allocation5 + $0xb00] sm:$0xff] }
  0xc7   : > { %v8343_v33 = vcombine.low %v586_v21, %v594_v23  ;;  %v665_v61 = vld [vmem:[#allocation5 + $0xb80] sm:$0xff]  ;;  %v706_v19 = vld [vmem:[#allocation5 + $0xcc8] sm:$0xff] }
  0xc8   : > { %v681_v5 = vld [vmem:[#allocation5 + $0xc00] sm:$0xff] }
  0xc9   : > { %3488 = vmatpush1.bf16.msra.mxu0 %v8213_v28  ;;  %3570 = vmatpush1.bf16.msra.mxu1 %v8215_v29  ;;  %v609_v28 = vld [vmem:[#allocation5 + $0x9c0] sm:$0xff]  ;;  %v602_v29 = vld [vmem:[#allocation5 + $0x988] sm:$0xff] }
  0xca   : > { %3489 = vmatprep.subr.bf16.mxu0 %v8230_v30  ;;  %3571 = vmatprep.subr.bf16.mxu1 %v8232_v31  ;;  %v8344_v30 = vcombine.high %v586_v21, %v594_v23  ;;  %v610_v31 = vld [vmem:[#allocation5 + $0x9c8] sm:$0xff]  ;;  %v8358_v34 = vcombine.high %v601_v27, %v609_v28  ;;  %v8357_v40 = vcombine.low %v601_v27, %v609_v28  ;;  %v697_v14 = vld [vmem:[#allocation5 + $0xc80] sm:$0xff] }
  0xcb   : > { %v8359_v41 = vcombine.low %v602_v29, %v610_v31  ;;  %v713_v23 = vld [vmem:[#allocation5 + $0xd00] sm:$0xff]  ;;  %v722_v27 = vld [vmem:[#allocation5 + $0xd48] sm:$0xff] }
  0xcd   : > { %3490 = vmatpush1.bf16.msra.mxu0 %v8229_v36  ;;  %3572 = vmatpush1.bf16.msra.mxu1 %v8231_v37  ;;  %v625_v36 = vld [vmem:[#allocation5 + $0xa40] sm:$0xff]  ;;  %v618_v37 = vld [vmem:[#allocation5 + $0xa08] sm:$0xff] }
  0xce   : > { %3491 = vmatprep.subr.bf16.mxu0 %v8246_v38  ;;  %3573 = vmatprep.subr.bf16.mxu1 %v8248_v39  ;;  %v8360_v38 = vcombine.high %v602_v29, %v610_v31  ;;  %v626_v39 = vld [vmem:[#allocation5 + $0xa48] sm:$0xff]  ;;  %v8374_v42 = vcombine.high %v617_v35, %v625_v36  ;;  %v8373_v48 = vcombine.low %v617_v35, %v625_v36  ;;  %v729_v31 = vld [vmem:[#allocation5 + $0xd80] sm:$0xff] }
  0xcf   : > { %v8375_v49 = vcombine.low %v618_v37, %v626_v39  ;;  %v738_v35 = vld [vmem:[#allocation5 + $0xdc8] sm:$0xff] }
  0xd1   : > { %3492 = vmatpush1.bf16.msra.mxu0 %v8245_v44  ;;  %3574 = vmatpush1.bf16.msra.mxu1 %v8247_v45  ;;  %v641_v44 = vld [vmem:[#allocation5 + $0xac0] sm:$0xff]  ;;  %v634_v45 = vld [vmem:[#allocation5 + $0xa88] sm:$0xff] }
  0xd2   : > { %3493 = vmatprep.subr.bf16.mxu0 %v8262_v46  ;;  %3575 = vmatprep.subr.bf16.mxu1 %v8264_v47  ;;  %v8376_v46 = vcombine.high %v618_v37, %v626_v39  ;;  %v642_v47 = vld [vmem:[#allocation5 + $0xac8] sm:$0xff]  ;;  %v8390_v50 = vcombine.high %v633_v43, %v641_v44  ;;  %v8389_v58 = vcombine.low %v633_v43, %v641_v44  ;;  %v745_v39 = vld [vmem:[#allocation5 + $0xe00] sm:$0xff] }
  0xd3   : > { %v8391_v59 = vcombine.low %v634_v45, %v642_v47  ;;  %v754_v43 = vld [vmem:[#allocation5 + $0xe48] sm:$0xff] }
  0xd5   : > { %3494 = vmatpush1.bf16.msra.mxu0 %v8261_v52  ;;  %3576 = vmatpush1.bf16.msra.mxu1 %v8263_v54  ;;  %v657_v52 = vld [vmem:[#allocation5 + $0xb40] sm:$0xff]  ;;  %v650_v54 = vld [vmem:[#allocation5 + $0xb08] sm:$0xff] }
  0xd6   : > { %3495 = vmatprep.subr.bf16.mxu0 %v8278_v55  ;;  %3577 = vmatprep.subr.bf16.mxu1 %v8280_v56  ;;  %v8392_v55 = vcombine.high %v634_v45, %v642_v47  ;;  %v658_v56 = vld [vmem:[#allocation5 + $0xb48] sm:$0xff]  ;;  %v8406_v60 = vcombine.high %v649_v51, %v657_v52  ;;  %v8405_v2 = vcombine.low %v649_v51, %v657_v52  ;;  %v761_v47 = vld [vmem:[#allocation5 + $0xe80] sm:$0xff] }
  0xd7   : > { %v8407_v3 = vcombine.low %v650_v54, %v658_v56  ;;  %v770_v51 = vld [vmem:[#allocation5 + $0xec8] sm:$0xff] }
  0xd9   : > { %3496 = vmatpush1.bf16.msra.mxu0 %v8277_v62  ;;  %3578 = vmatpush1.bf16.msra.mxu1 %v8279_v63  ;;  %v673_v62 = vld [vmem:[#allocation5 + $0xbc0] sm:$0xff]  ;;  %v666_v63 = vld [vmem:[#allocation5 + $0xb88] sm:$0xff] }
  0xda   : > { %3497 = vmatprep.subr.bf16.mxu0 %v8294_v0  ;;  %3579 = vmatprep.subr.bf16.mxu1 %v8296_v1  ;;  %v8408_v0 = vcombine.high %v650_v54, %v658_v56  ;;  %v674_v1 = vld [vmem:[#allocation5 + $0xbc8] sm:$0xff]  ;;  %v8422_v4 = vcombine.high %v665_v61, %v673_v62  ;;  %v8421_v10 = vcombine.low %v665_v61, %v673_v62  ;;  %v777_v56 = vld [vmem:[#allocation5 + $0xf00] sm:$0xff] }
  0xdb   : > { %v8423_v11 = vcombine.low %v666_v63, %v674_v1  ;;  %v786_v61 = vld [vmem:[#allocation5 + $0xf48] sm:$0xff] }
  0xdd   : > { %3498 = vmatpush1.bf16.msra.mxu0 %v8293_v6  ;;  %3580 = vmatpush1.bf16.msra.mxu1 %v8295_v7  ;;  %v689_v6 = vld [vmem:[#allocation5 + $0xc40] sm:$0xff]  ;;  %v682_v7 = vld [vmem:[#allocation5 + $0xc08] sm:$0xff] }
  0xde   : > { %3508 = vmatprep.subr.bf16.mxu0 %v8310_v8  ;;  %3590 = vmatprep.subr.bf16.mxu1 %v8312_v9  ;;  %v8424_v8 = vcombine.high %v666_v63, %v674_v1  ;;  %v690_v9 = vld [vmem:[#allocation5 + $0xc48] sm:$0xff]  ;;  %v8438_v13 = vcombine.high %v681_v5, %v689_v6  ;;  %v8437_v20 = vcombine.low %v681_v5, %v689_v6  ;;  %v793_v1 = vld [vmem:[#allocation5 + $0xf80] sm:$0xff] }
  0xdf   : > { %v8439_v21 = vcombine.low %v682_v7, %v690_v9  ;;  %v802_v5 = vld [vmem:[#allocation5 + $0xfc8] sm:$0xff] }
  0xe0   : > { %3500 = vmatmul.mubr.bf16.vlgmr.msra.gmra.mrb[0].mxu0 %v10556_v12  ;;  %3582 = vmatmul.mubr.bf16.vlgmr.msra.gmra.mrb[0].mxu1 %v10556_v12 }
  0xe1   : > { %3509 = vmatpush1.bf16.msra.mxu0 %v8309_v16  ;;  %3591 = vmatpush1.bf16.msra.mxu1 %v8311_v17  ;;  %v705_v16 = vld [vmem:[#allocation5 + $0xcc0] sm:$0xff]  ;;  %v698_v17 = vld [vmem:[#allocation5 + $0xc88] sm:$0xff] }
  0xe2   : > { %3510 = vmatprep.subr.bf16.mxu0 %v8326_v18  ;;  %3592 = vmatprep.subr.bf16.mxu1 %v8328_v22  ;;  %v8440_v18 = vcombine.high %v682_v7, %v690_v9  ;;  %v8454_v22 = vcombine.high %v697_v14, %v705_v16  ;;  %v8453_v28 = vcombine.low %v697_v14, %v705_v16  ;;  %v299_v9 = vld [vmem:[#allocation5 + $0x10] sm:$0xff]  ;;  %v308_v14 = vld [vmem:[#allocation5 + $0x58] sm:$0xff] }
  0xe3   : > { %3540 = vmatprep.mubr.bf16.mxu0 %v10563_v53  ;;  %3622 = vmatprep.mubr.bf16.mxu1 %v10563_v53  ;;  %v8455_v29 = vcombine.low %v698_v17, %v706_v19 }
  0xe5   : > { %3511 = vmatpush1.bf16.msra.mxu0 %v8325_v24  ;;  %3593 = vmatpush1.bf16.msra.mxu1 %v8327_v25  ;;  %v721_v24 = vld [vmem:[#allocation5 + $0xd40] sm:$0xff]  ;;  %v714_v25 = vld [vmem:[#allocation5 + $0xd08] sm:$0xff] }
  0xe6   : > { %3512 = vmatprep.subr.bf16.mxu0 %v8342_v26  ;;  %3594 = vmatprep.subr.bf16.mxu1 %v8344_v30  ;;  %v8456_v26 = vcombine.high %v698_v17, %v706_v19  ;;  %v8470_v30 = vcombine.high %v713_v23, %v721_v24  ;;  %v8469_v36 = vcombine.low %v713_v23, %v721_v24  ;;  %v315_v19 = vld [vmem:[#allocation5 + $0x90] sm:$0xff]  ;;  %v324_v23 = vld [vmem:[#allocation5 + $0xd8] sm:$0xff] }
  0xe7   : > { %v8471_v37 = vcombine.low %v714_v25, %v722_v27  ;;  %v10571_v24 = vcombine.low %v10559_v15, %v10559_v15 }
  0xe9   : > { %3513 = vmatpush1.bf16.msra.mxu0 %v8341_v32  ;;  %3595 = vmatpush1.bf16.msra.mxu1 %v8343_v33  ;;  %v737_v32 = vld [vmem:[#allocation5 + $0xdc0] sm:$0xff]  ;;  %v730_v33 = vld [vmem:[#allocation5 + $0xd88] sm:$0xff] }
  0xea   : > { %3514 = vmatprep.subr.bf16.mxu0 %v8358_v34  ;;  %3596 = vmatprep.subr.bf16.mxu1 %v8360_v38  ;;  %v8472_v34 = vcombine.high %v714_v25, %v722_v27  ;;  %v8486_v38 = vcombine.high %v729_v31, %v737_v32  ;;  %v8485_v44 = vcombine.low %v729_v31, %v737_v32  ;;  %v340_v32 = vld [vmem:[#allocation5 + $0x158] sm:$0xff] }
  0xeb   : > { %v8487_v45 = vcombine.low %v730_v33, %v738_v35 }
  0xed   : > { %3515 = vmatpush1.bf16.msra.mxu0 %v8357_v40  ;;  %3597 = vmatpush1.bf16.msra.mxu1 %v8359_v41  ;;  %v753_v40 = vld [vmem:[#allocation5 + $0xe40] sm:$0xff]  ;;  %v746_v41 = vld [vmem:[#allocation5 + $0xe08] sm:$0xff] }
  0xee   : > { %3516 = vmatprep.subr.bf16.mxu0 %v8374_v42  ;;  %3598 = vmatprep.subr.bf16.mxu1 %v8376_v46  ;;  %v8488_v42 = vcombine.high %v730_v33, %v738_v35  ;;  %v8502_v46 = vcombine.high %v745_v39, %v753_v40  ;;  %v8501_v52 = vcombine.low %v745_v39, %v753_v40  ;;  %v347_v35 = vld [vmem:[#allocation5 + $0x190] sm:$0xff]  ;;  %v356_v39 = vld [vmem:[#allocation5 + $0x1d8] sm:$0xff] }
  0xef   : > { %v8503_v54 = vcombine.low %v746_v41, %v754_v43 }
  0xf1   : > { %3517 = vmatpush1.bf16.msra.mxu0 %v8373_v48  ;;  %3599 = vmatpush1.bf16.msra.mxu1 %v8375_v49  ;;  %v769_v48 = vld [vmem:[#allocation5 + $0xec0] sm:$0xff]  ;;  %v762_v49 = vld [vmem:[#allocation5 + $0xe88] sm:$0xff] }
  0xf2   : > { %3518 = vmatprep.subr.bf16.mxu0 %v8390_v50  ;;  %3600 = vmatprep.subr.bf16.mxu1 %v8392_v55  ;;  %v8504_v50 = vcombine.high %v746_v41, %v754_v43  ;;  %v8518_v55 = vcombine.high %v761_v47, %v769_v48  ;;  %v8517_v62 = vcombine.low %v761_v47, %v769_v48  ;;  %v363_v43 = vld [vmem:[#allocation5 + $0x210] sm:$0xff]  ;;  %v372_v47 = vld [vmem:[#allocation5 + $0x258] sm:$0xff] }
  0xf3   : > { %v8519_v63 = vcombine.low %v762_v49, %v770_v51 }
  0xf5   : > { %3519 = vmatpush1.bf16.msra.mxu0 %v8389_v58  ;;  %3601 = vmatpush1.bf16.msra.mxu1 %v8391_v59  ;;  %v785_v58 = vld [vmem:[#allocation5 + $0xf40] sm:$0xff]  ;;  %v778_v59 = vld [vmem:[#allocation5 + $0xf08] sm:$0xff] }
  0xf6   : > { %3520 = vmatprep.subr.bf16.mxu0 %v8406_v60  ;;  %3602 = vmatprep.subr.bf16.mxu1 %v8408_v0  ;;  %v8520_v60 = vcombine.high %v762_v49, %v770_v51  ;;  %v8534_v0 = vcombine.high %v777_v56, %v785_v58  ;;  %v8533_v6 = vcombine.low %v777_v56, %v785_v58  ;;  %v379_v51 = vld [vmem:[#allocation5 + $0x290] sm:$0xff]  ;;  %v388_v56 = vld [vmem:[#allocation5 + $0x2d8] sm:$0xff] }
  0xf7   : > { %v8535_v7 = vcombine.low %v778_v59, %v786_v61 }
  0xf9   : > { %3521 = vmatpush1.bf16.msra.mxu0 %v8405_v2  ;;  %3603 = vmatpush1.bf16.msra.mxu1 %v8407_v3  ;;  %v801_v2 = vld [vmem:[#allocation5 + $0xfc0] sm:$0xff]  ;;  %v794_v3 = vld [vmem:[#allocation5 + $0xf88] sm:$0xff] }
  0xfa   : > { %3522 = vmatprep.subr.bf16.mxu0 %v8422_v4  ;;  %3604 = vmatprep.subr.bf16.mxu1 %v8424_v8  ;;  %v8536_v4 = vcombine.high %v778_v59, %v786_v61  ;;  %v8550_v8 = vcombine.high %v793_v1, %v801_v2  ;;  %v8549_v16 = vcombine.low %v793_v1, %v801_v2  ;;  %v395_v61 = vld [vmem:[#allocation5 + $0x310] sm:$0xff]  ;;  %v404_v1 = vld [vmem:[#allocation5 + $0x358] sm:$0xff] }
  0xfb   : > { %v8551_v17 = vcombine.low %v794_v3, %v802_v5 }
  0xfd   : > { %3523 = vmatpush1.bf16.msra.mxu0 %v8421_v10  ;;  %3605 = vmatpush1.bf16.msra.mxu1 %v8423_v11  ;;  %v307_v10 = vld [vmem:[#allocation5 + $0x50] sm:$0xff]  ;;  %v300_v11 = vld [vmem:[#allocation5 + $0x18] sm:$0xff] }
  0xfe   : > { %3524 = vmatprep.subr.bf16.mxu0 %v8438_v13  ;;  %3606 = vmatprep.subr.bf16.mxu1 %v8440_v18  ;;  %v8552_v13 = vcombine.high %v794_v3, %v802_v5  ;;  %v8058_v18 = vcombine.high %v299_v9, %v307_v10  ;;  %v8057_v25 = vcombine.low %v299_v9, %v307_v10  ;;  %v411_v5 = vld [vmem:[#allocation5 + $0x390] sm:$0xff]  ;;  %v420_v9 = vld [vmem:[#allocation5 + $0x3d8] sm:$0xff] }
 0x101   : > { %3525 = vmatpush1.bf16.msra.mxu0 %v8437_v20  ;;  %3607 = vmatpush1.bf16.msra.mxu1 %v8439_v21  ;;  %v323_v20 = vld [vmem:[#allocation5 + $0xd0] sm:$0xff]  ;;  %v316_v21 = vld [vmem:[#allocation5 + $0x98] sm:$0xff] }
 0x102   : > { %3526 = vmatprep.subr.bf16.mxu0 %v8454_v22  ;;  %3608 = vmatprep.subr.bf16.mxu1 %v8456_v26  ;;  %v8060_v22 = vcombine.high %v300_v11, %v308_v14  ;;  %v8059_v26 = vcombine.low %v300_v11, %v308_v14  ;;  %v8074_v27 = vcombine.high %v315_v19, %v323_v20  ;;  %v427_v14 = vld [vmem:[#allocation5 + $0x410] sm:$0xff] }
 0x103   : > { %v8076_v31 = vcombine.high %v316_v21, %v324_v23  ;;  %v8073_v33 = vcombine.low %v315_v19, %v323_v20  ;;  %v8075_v15 = vcombine.low %v316_v21, %v324_v23  ;;  %v436_v19 = vld [vmem:[#allocation5 + $0x458] sm:$0xff]  ;;  %v443_v23 = vld [vmem:[#allocation5 + $0x490] sm:$0xff] }
 0x105   : > { %3527 = vmatpush1.bf16.msra.mxu0 %v8453_v28  ;;  %3609 = vmatpush1.bf16.msra.mxu1 %v8455_v29  ;;  %v331_v28 = vld [vmem:[#allocation5 + $0x110] sm:$0xff] }
 0x106   : > { %3528 = vmatprep.subr.bf16.mxu0 %v8470_v30  ;;  %3610 = vmatprep.subr.bf16.mxu1 %v8472_v34  ;;  %v339_v29 = vld [vmem:[#allocation5 + $0x150] sm:$0xff]  ;;  %v332_v30 = vld [vmem:[#allocation5 + $0x118] sm:$0xff] }
 0x107   : > { %v8090_v34 = vcombine.high %v331_v28, %v339_v29  ;;  %v8089_v40 = vcombine.low %v331_v28, %v339_v29  ;;  %v8091_v41 = vcombine.low %v332_v30, %v340_v32  ;;  %v452_v28 = vld [vmem:[#allocation5 + $0x4d8] sm:$0xff] }
 0x109   : > { %3529 = vmatpush1.bf16.msra.mxu0 %v8469_v36  ;;  %3611 = vmatpush1.bf16.msra.mxu1 %v8471_v37  ;;  %v355_v36 = vld [vmem:[#allocation5 + $0x1d0] sm:$0xff]  ;;  %v348_v37 = vld [vmem:[#allocation5 + $0x198] sm:$0xff] }
 0x10a   : > { %3530 = vmatprep.subr.bf16.mxu0 %v8486_v38  ;;  %3612 = vmatprep.subr.bf16.mxu1 %v8488_v42  ;;  %v8092_v38 = vcombine.high %v332_v30, %v340_v32  ;;  %v8106_v42 = vcombine.high %v347_v35, %v355_v36  ;;  %v8105_v48 = vcombine.low %v347_v35, %v355_v36  ;;  %v459_v32 = vld [vmem:[#allocation5 + $0x510] sm:$0xff]  ;;  %v468_v35 = vld [vmem:[#allocation5 + $0x558] sm:$0xff] }
 0x10b   : > { %v8107_v49 = vcombine.low %v348_v37, %v356_v39 }
 0x10d   : > { %3531 = vmatpush1.bf16.msra.mxu0 %v8485_v44  ;;  %3613 = vmatpush1.bf16.msra.mxu1 %v8487_v45  ;;  %v371_v44 = vld [vmem:[#allocation5 + $0x250] sm:$0xff]  ;;  %v364_v45 = vld [vmem:[#allocation5 + $0x218] sm:$0xff] }
 0x10e   : > { %3532 = vmatprep.subr.bf16.mxu0 %v8502_v46  ;;  %3614 = vmatprep.subr.bf16.mxu1 %v8504_v50  ;;  %v8108_v46 = vcombine.high %v348_v37, %v356_v39  ;;  %v8122_v50 = vcombine.high %v363_v43, %v371_v44  ;;  %v8121_v58 = vcombine.low %v363_v43, %v371_v44  ;;  %v475_v39 = vld [vmem:[#allocation5 + $0x590] sm:$0xff]  ;;  %v484_v43 = vld [vmem:[#allocation5 + $0x5d8] sm:$0xff] }
 0x10f   : > { %v8123_v59 = vcombine.low %v364_v45, %v372_v47 }
 0x111   : > { %3533 = vmatpush1.bf16.msra.mxu0 %v8501_v52  ;;  %3615 = vmatpush1.bf16.msra.mxu1 %v8503_v54  ;;  %v387_v52 = vld [vmem:[#allocation5 + $0x2d0] sm:$0xff]  ;;  %v380_v54 = vld [vmem:[#allocation5 + $0x298] sm:$0xff] }
 0x112   : > { %3534 = vmatprep.subr.bf16.mxu0 %v8518_v55  ;;  %3616 = vmatprep.subr.bf16.mxu1 %v8520_v60  ;;  %v8124_v55 = vcombine.high %v364_v45, %v372_v47  ;;  %v8138_v60 = vcombine.high %v379_v51, %v387_v52  ;;  %v8137_v2 = vcombine.low %v379_v51, %v387_v52  ;;  %v491_v47 = vld [vmem:[#allocation5 + $0x610] sm:$0xff]  ;;  %v500_v51 = vld [vmem:[#allocation5 + $0x658] sm:$0xff] }
 0x113   : > { %v8139_v3 = vcombine.low %v380_v54, %v388_v56 }
 0x115   : > { %3535 = vmatpush1.bf16.msra.mxu0 %v8517_v62  ;;  %3617 = vmatpush1.bf16.msra.mxu1 %v8519_v63  ;;  %v403_v62 = vld [vmem:[#allocation5 + $0x350] sm:$0xff]  ;;  %v396_v63 = vld [vmem:[#allocation5 + $0x318] sm:$0xff] }
 0x116   : > { %3536 = vmatprep.subr.bf16.mxu0 %v8534_v0  ;;  %3618 = vmatprep.subr.bf16.mxu1 %v8536_v4  ;;  %v8140_v0 = vcombine.high %v380_v54, %v388_v56  ;;  %v8154_v4 = vcombine.high %v395_v61, %v403_v62  ;;  %v8153_v10 = vcombine.low %v395_v61, %v403_v62  ;;  %v507_v56 = vld [vmem:[#allocation5 + $0x690] sm:$0xff]  ;;  %v516_v61 = vld [vmem:[#allocation5 + $0x6d8] sm:$0xff] }
 0x117   : > { %v8155_v11 = vcombine.low %v396_v63, %v404_v1 }
 0x119   : > { %3537 = vmatpush1.bf16.msra.mxu0 %v8533_v6  ;;  %3619 = vmatpush1.bf16.msra.mxu1 %v8535_v7  ;;  %v419_v6 = vld [vmem:[#allocation5 + $0x3d0] sm:$0xff]  ;;  %v412_v7 = vld [vmem:[#allocation5 + $0x398] sm:$0xff] }
 0x11a   : > { %3538 = vmatprep.subr.bf16.mxu0 %v8550_v8  ;;  %3620 = vmatprep.subr.bf16.mxu1 %v8552_v13  ;;  %v8156_v8 = vcombine.high %v396_v63, %v404_v1  ;;  %v8170_v13 = vcombine.high %v411_v5, %v419_v6  ;;  %v8169_v20 = vcombine.low %v411_v5, %v419_v6  ;;  %v523_v1 = vld [vmem:[#allocation5 + $0x710] sm:$0xff]  ;;  %v532_v5 = vld [vmem:[#allocation5 + $0x758] sm:$0xff] }
 0x11b   : > { %v8171_v21 = vcombine.low %v412_v7, %v420_v9 }
 0x11d   : > { %3539 = vmatpush1.bf16.msra.mxu0 %v8549_v16  ;;  %3621 = vmatpush1.bf16.msra.mxu1 %v8551_v17  ;;  %v435_v16 = vld [vmem:[#allocation5 + $0x450] sm:$0xff]  ;;  %v428_v17 = vld [vmem:[#allocation5 + $0x418] sm:$0xff] }
 0x11e   : > { %3631 = vmatprep.subr.bf16.mxu0 %v8058_v18  ;;  %3713 = vmatprep.subr.bf16.mxu1 %v8060_v22  ;;  %v8172_v18 = vcombine.high %v412_v7, %v420_v9  ;;  %v8186_v22 = vcombine.high %v427_v14, %v435_v16  ;;  %v8185_v29 = vcombine.low %v427_v14, %v435_v16  ;;  %v539_v9 = vld [vmem:[#allocation5 + $0x790] sm:$0xff]  ;;  %v548_v14 = vld [vmem:[#allocation5 + $0x7d8] sm:$0xff] }
 0x11f   : > { %v8187_v30 = vcombine.low %v428_v17, %v436_v19 }
 0x120   : > { %3541 = vmatmul.mubr.bf16.vlgmr.msra.gmra.mrb[0].mxu0 %v10571_v24  ;;  %3623 = vmatmul.mubr.bf16.vlgmr.msra.gmra.mrb[0].mxu1 %v10571_v24 }
 0x121   : > { %3632 = vmatpush1.bf16.msra.mxu0 %v8057_v25  ;;  %3714 = vmatpush1.bf16.msra.mxu1 %v8059_v26  ;;  %v451_v25 = vld [vmem:[#allocation5 + $0x4d0] sm:$0xff]  ;;  %v444_v26 = vld [vmem:[#allocation5 + $0x498] sm:$0xff] }
 0x122   : > { %3633 = vmatprep.subr.bf16.mxu0 %v8074_v27  ;;  %3715 = vmatprep.subr.bf16.mxu1 %v8076_v31  ;;  %v8188_v27 = vcombine.high %v428_v17, %v436_v19  ;;  %v8202_v31 = vcombine.high %v443_v23, %v451_v25  ;;  %v8201_v36 = vcombine.low %v443_v23, %v451_v25  ;;  %v555_v19 = vld [vmem:[#allocation5 + $0x810] sm:$0xff]  ;;  %v564_v23 = vld [vmem:[#allocation5 + $0x858] sm:$0xff] }
 0x123   : > { %3663 = vmatprep.mubr.bf16.mxu0 %v10550_v57  ;;  %3745 = vmatprep.mubr.bf16.mxu1 %v10550_v57  ;;  %v8203_v37 = vcombine.low %v444_v26, %v452_v28 }
 0x125   : > { %3634 = vmatpush1.bf16.msra.mxu0 %v8073_v33  ;;  %3716 = vmatpush1.bf16.msra.mxu1 %v8075_v15  ;;  %v467_v33 = vld [vmem:[#allocation5 + $0x550] sm:$0xff]  ;;  %v460_v15 = vld [vmem:[#allocation5 + $0x518] sm:$0xff] }
 0x126   : > { %3635 = vmatprep.subr.bf16.mxu0 %v8090_v34  ;;  %3717 = vmatprep.subr.bf16.mxu1 %v8092_v38  ;;  %v8204_v34 = vcombine.high %v444_v26, %v452_v28  ;;  %v8218_v38 = vcombine.high %v459_v32, %v467_v33  ;;  %v8217_v44 = vcombine.low %v459_v32, %v467_v33  ;;  %v571_v28 = vld [vmem:[#allocation5 + $0x890] sm:$0xff]  ;;  %v580_v32 = vld [vmem:[#allocation5 + $0x8d8] sm:$0xff] }
 0x127   : > { %v8219_v45 = vcombine.low %v460_v15, %v468_v35 }
 0x129   : > { %3636 = vmatpush1.bf16.msra.mxu0 %v8089_v40  ;;  %3718 = vmatpush1.bf16.msra.mxu1 %v8091_v41  ;;  %v483_v40 = vld [vmem:[#allocation5 + $0x5d0] sm:$0xff]  ;;  %v476_v41 = vld [vmem:[#allocation5 + $0x598] sm:$0xff] }
 0x12a   : > { %3637 = vmatprep.subr.bf16.mxu0 %v8106_v42  ;;  %3719 = vmatprep.subr.bf16.mxu1 %v8108_v46  ;;  %v8220_v42 = vcombine.high %v460_v15, %v468_v35  ;;  %v8234_v46 = vcombine.high %v475_v39, %v483_v40  ;;  %v8233_v52 = vcombine.low %v475_v39, %v483_v40  ;;  %v587_v35 = vld [vmem:[#allocation5 + $0x910] sm:$0xff]  ;;  %v596_v39 = vld [vmem:[#allocation5 + $0x958] sm:$0xff] }
 0x12b   : > { %v8235_v54 = vcombine.low %v476_v41, %v484_v43 }
 0x12d   : > { %3638 = vmatpush1.bf16.msra.mxu0 %v8105_v48  ;;  %3720 = vmatpush1.bf16.msra.mxu1 %v8107_v49  ;;  %v499_v48 = vld [vmem:[#allocation5 + $0x650] sm:$0xff]  ;;  %v492_v49 = vld [vmem:[#allocation5 + $0x618] sm:$0xff] }
 0x12e   : > { %3639 = vmatprep.subr.bf16.mxu0 %v8122_v50  ;;  %3721 = vmatprep.subr.bf16.mxu1 %v8124_v55  ;;  %v8236_v50 = vcombine.high %v476_v41, %v484_v43  ;;  %v8250_v55 = vcombine.high %v491_v47, %v499_v48  ;;  %v8249_v62 = vcombine.low %v491_v47, %v499_v48  ;;  %v603_v43 = vld [vmem:[#allocation5 + $0x990] sm:$0xff]  ;;  %v612_v47 = vld [vmem:[#allocation5 + $0x9d8] sm:$0xff] }
 0x12f   : > { %v8251_v63 = vcombine.low %v492_v49, %v500_v51 }
 0x131   : > { %3640 = vmatpush1.bf16.msra.mxu0 %v8121_v58  ;;  %3722 = vmatpush1.bf16.msra.mxu1 %v8123_v59  ;;  %v515_v58 = vld [vmem:[#allocation5 + $0x6d0] sm:$0xff]  ;;  %v508_v59 = vld [vmem:[#allocation5 + $0x698] sm:$0xff] }
 0x132   : > { %3641 = vmatprep.subr.bf16.mxu0 %v8138_v60  ;;  %3723 = vmatprep.subr.bf16.mxu1 %v8140_v0  ;;  %v8252_v60 = vcombine.high %v492_v49, %v500_v51  ;;  %v8266_v0 = vcombine.high %v507_v56, %v515_v58  ;;  %v8265_v6 = vcombine.low %v507_v56, %v515_v58  ;;  %v619_v51 = vld [vmem:[#allocation5 + $0xa10] sm:$0xff]  ;;  %v628_v56 = vld [vmem:[#allocation5 + $0xa58] sm:$0xff] }
 0x133   : > { %v8267_v7 = vcombine.low %v508_v59, %v516_v61 }
 0x135   : > { %3642 = vmatpush1.bf16.msra.mxu0 %v8137_v2  ;;  %3724 = vmatpush1.bf16.msra.mxu1 %v8139_v3  ;;  %v531_v2 = vld [vmem:[#allocation5 + $0x750] sm:$0xff]  ;;  %v524_v3 = vld [vmem:[#allocation5 + $0x718] sm:$0xff] }
 0x136   : > { %3643 = vmatprep.subr.bf16.mxu0 %v8154_v4  ;;  %3725 = vmatprep.subr.bf16.mxu1 %v8156_v8  ;;  %v8268_v4 = vcombine.high %v508_v59, %v516_v61  ;;  %v8282_v8 = vcombine.high %v523_v1, %v531_v2  ;;  %v8281_v16 = vcombine.low %v523_v1, %v531_v2  ;;  %v635_v61 = vld [vmem:[#allocation5 + $0xa90] sm:$0xff]  ;;  %v644_v1 = vld [vmem:[#allocation5 + $0xad8] sm:$0xff] }
 0x137   : > { %v8283_v17 = vcombine.low %v524_v3, %v532_v5 }
 0x139   : > { %3644 = vmatpush1.bf16.msra.mxu0 %v8153_v10  ;;  %3726 = vmatpush1.bf16.msra.mxu1 %v8155_v11  ;;  %v547_v10 = vld [vmem:[#allocation5 + $0x7d0] sm:$0xff]  ;;  %v540_v11 = vld [vmem:[#allocation5 + $0x798] sm:$0xff] }
 0x13a   : > { %3645 = vmatprep.subr.bf16.mxu0 %v8170_v13  ;;  %3727 = vmatprep.subr.bf16.mxu1 %v8172_v18  ;;  %v8284_v13 = vcombine.high %v524_v3, %v532_v5  ;;  %v8298_v18 = vcombine.high %v539_v9, %v547_v10  ;;  %v8297_v25 = vcombine.low %v539_v9, %v547_v10  ;;  %v651_v5 = vld [vmem:[#allocation5 + $0xb10] sm:$0xff]  ;;  %v660_v9 = vld [vmem:[#allocation5 + $0xb58] sm:$0xff] }
 0x13b   : > { %v8299_v26 = vcombine.low %v540_v11, %v548_v14 }
 0x13d   : > { %3646 = vmatpush1.bf16.msra.mxu0 %v8169_v20  ;;  %3728 = vmatpush1.bf16.msra.mxu1 %v8171_v21  ;;  %v563_v20 = vld [vmem:[#allocation5 + $0x850] sm:$0xff]  ;;  %v556_v21 = vld [vmem:[#allocation5 + $0x818] sm:$0xff] }
 0x13e   : > { %3647 = vmatprep.subr.bf16.mxu0 %v8186_v22  ;;  %3729 = vmatprep.subr.bf16.mxu1 %v8188_v27  ;;  %v8300_v22 = vcombine.high %v540_v11, %v548_v14  ;;  %v8314_v27 = vcombine.high %v555_v19, %v563_v20  ;;  %v8313_v33 = vcombine.low %v555_v19, %v563_v20  ;;  %v667_v14 = vld [vmem:[#allocation5 + $0xb90] sm:$0xff]  ;;  %v676_v19 = vld [vmem:[#allocation5 + $0xbd8] sm:$0xff] }
 0x13f   : > { %v8315_v15 = vcombine.low %v556_v21, %v564_v23 }
 0x141   : > { %3648 = vmatpush1.bf16.msra.mxu0 %v8185_v29  ;;  %3730 = vmatpush1.bf16.msra.mxu1 %v8187_v30  ;;  %v579_v29 = vld [vmem:[#allocation5 + $0x8d0] sm:$0xff]  ;;  %v572_v30 = vld [vmem:[#allocation5 + $0x898] sm:$0xff] }
 0x142   : > { %3649 = vmatprep.subr.bf16.mxu0 %v8202_v31  ;;  %3731 = vmatprep.subr.bf16.mxu1 %v8204_v34  ;;  %v8316_v31 = vcombine.high %v556_v21, %v564_v23  ;;  %v8330_v34 = vcombine.high %v571_v28, %v579_v29  ;;  %v8329_v40 = vcombine.low %v571_v28, %v579_v29  ;;  %v683_v23 = vld [vmem:[#allocation5 + $0xc10] sm:$0xff]  ;;  %v692_v28 = vld [vmem:[#allocation5 + $0xc58] sm:$0xff] }
 0x143   : > { %v8331_v41 = vcombine.low %v572_v30, %v580_v32 }
 0x145   : > { %3650 = vmatpush1.bf16.msra.mxu0 %v8201_v36  ;;  %3732 = vmatpush1.bf16.msra.mxu1 %v8203_v37  ;;  %v595_v36 = vld [vmem:[#allocation5 + $0x950] sm:$0xff]  ;;  %v588_v37 = vld [vmem:[#allocation5 + $0x918] sm:$0xff] }
 0x146   : > { %3651 = vmatprep.subr.bf16.mxu0 %v8218_v38  ;;  %3733 = vmatprep.subr.bf16.mxu1 %v8220_v42  ;;  %v8332_v38 = vcombine.high %v572_v30, %v580_v32  ;;  %v8346_v42 = vcombine.high %v587_v35, %v595_v36  ;;  %v8345_v48 = vcombine.low %v587_v35, %v595_v36  ;;  %v699_v32 = vld [vmem:[#allocation5 + $0xc90] sm:$0xff]  ;;  %v708_v35 = vld [vmem:[#allocation5 + $0xcd8] sm:$0xff] }
 0x147   : > { %v8347_v49 = vcombine.low %v588_v37, %v596_v39 }
 0x149   : > { %3652 = vmatpush1.bf16.msra.mxu0 %v8217_v44  ;;  %3734 = vmatpush1.bf16.msra.mxu1 %v8219_v45  ;;  %v611_v44 = vld [vmem:[#allocation5 + $0x9d0] sm:$0xff]  ;;  %v604_v45 = vld [vmem:[#allocation5 + $0x998] sm:$0xff] }
 0x14a   : > { %3653 = vmatprep.subr.bf16.mxu0 %v8234_v46  ;;  %3735 = vmatprep.subr.bf16.mxu1 %v8236_v50  ;;  %v8348_v46 = vcombine.high %v588_v37, %v596_v39  ;;  %v8362_v50 = vcombine.high %v603_v43, %v611_v44  ;;  %v8361_v58 = vcombine.low %v603_v43, %v611_v44  ;;  %v715_v39 = vld [vmem:[#allocation5 + $0xd10] sm:$0xff]  ;;  %v724_v43 = vld [vmem:[#allocation5 + $0xd58] sm:$0xff] }
 0x14b   : > { %v8363_v59 = vcombine.low %v604_v45, %v612_v47 }
 0x14d   : > { %3654 = vmatpush1.bf16.msra.mxu0 %v8233_v52  ;;  %3736 = vmatpush1.bf16.msra.mxu1 %v8235_v54  ;;  %v627_v52 = vld [vmem:[#allocation5 + $0xa50] sm:$0xff]  ;;  %v620_v54 = vld [vmem:[#allocation5 + $0xa18] sm:$0xff] }
 0x14e   : > { %3655 = vmatprep.subr.bf16.mxu0 %v8250_v55  ;;  %3737 = vmatprep.subr.bf16.mxu1 %v8252_v60  ;;  %v8364_v55 = vcombine.high %v604_v45, %v612_v47  ;;  %v8378_v60 = vcombine.high %v619_v51, %v627_v52  ;;  %v8377_v2 = vcombine.low %v619_v51, %v627_v52  ;;  %v731_v47 = vld [vmem:[#allocation5 + $0xd90] sm:$0xff]  ;;  %v740_v51 = vld [vmem:[#allocation5 + $0xdd8] sm:$0xff] }
 0x14f   : > { %v8379_v3 = vcombine.low %v620_v54, %v628_v56 }
 0x151   : > { %3656 = vmatpush1.bf16.msra.mxu0 %v8249_v62  ;;  %3738 = vmatpush1.bf16.msra.mxu1 %v8251_v63  ;;  %v643_v62 = vld [vmem:[#allocation5 + $0xad0] sm:$0xff]  ;;  %v636_v63 = vld [vmem:[#allocation5 + $0xa98] sm:$0xff] }
 0x152   : > { %3657 = vmatprep.subr.bf16.mxu0 %v8266_v0  ;;  %3739 = vmatprep.subr.bf16.mxu1 %v8268_v4  ;;  %v8380_v0 = vcombine.high %v620_v54, %v628_v56  ;;  %v8394_v4 = vcombine.high %v635_v61, %v643_v62  ;;  %v8393_v10 = vcombine.low %v635_v61, %v643_v62  ;;  %v747_v56 = vld [vmem:[#allocation5 + $0xe10] sm:$0xff]  ;;  %v756_v61 = vld [vmem:[#allocation5 + $0xe58] sm:$0xff] }
 0x153   : > { %v8395_v11 = vcombine.low %v636_v63, %v644_v1 }
 0x155   : > { %3658 = vmatpush1.bf16.msra.mxu0 %v8265_v6  ;;  %3740 = vmatpush1.bf16.msra.mxu1 %v8267_v7  ;;  %v659_v6 = vld [vmem:[#allocation5 + $0xb50] sm:$0xff]  ;;  %v652_v7 = vld [vmem:[#allocation5 + $0xb18] sm:$0xff] }
 0x156   : > { %3659 = vmatprep.subr.bf16.mxu0 %v8282_v8  ;;  %3741 = vmatprep.subr.bf16.mxu1 %v8284_v13  ;;  %v8396_v8 = vcombine.high %v636_v63, %v644_v1  ;;  %v8410_v13 = vcombine.high %v651_v5, %v659_v6  ;;  %v8409_v20 = vcombine.low %v651_v5, %v659_v6  ;;  %v763_v1 = vld [vmem:[#allocation5 + $0xe90] sm:$0xff]  ;;  %v772_v5 = vld [vmem:[#allocation5 + $0xed8] sm:$0xff] }
 0x157   : > { %v8411_v21 = vcombine.low %v652_v7, %v660_v9 }
 0x159   : > { %3660 = vmatpush1.bf16.msra.mxu0 %v8281_v16  ;;  %3742 = vmatpush1.bf16.msra.mxu1 %v8283_v17  ;;  %v675_v16 = vld [vmem:[#allocation5 + $0xbd0] sm:$0xff]  ;;  %v8412_v17 = vcombine.high %v652_v7, %v660_v9 }
 0x15a   : > { %3661 = vmatprep.subr.bf16.mxu0 %v8298_v18  ;;  %3743 = vmatprep.subr.bf16.mxu1 %v8300_v22  ;;  %v668_v18 = vld [vmem:[#allocation5 + $0xb98] sm:$0xff]  ;;  %v8426_v22 = vcombine.high %v667_v14, %v675_v16  ;;  %v8425_v29 = vcombine.low %v667_v14, %v675_v16  ;;  %v779_v9 = vld [vmem:[#allocation5 + $0xf10] sm:$0xff] }
 0x15b   : > { %v8427_v30 = vcombine.low %v668_v18, %v676_v19  ;;  %v788_v14 = vld [vmem:[#allocation5 + $0xf58] sm:$0xff] }
 0x15d   : > { %3662 = vmatpush1.bf16.msra.mxu0 %v8297_v25  ;;  %3744 = vmatpush1.bf16.msra.mxu1 %v8299_v26  ;;  %v691_v25 = vld [vmem:[#allocation5 + $0xc50] sm:$0xff]  ;;  %v684_v26 = vld [vmem:[#allocation5 + $0xc18] sm:$0xff] }
 0x15e   : > { %3672 = vmatprep.subr.bf16.mxu0 %v8314_v27  ;;  %3754 = vmatprep.subr.bf16.mxu1 %v8316_v31  ;;  %v8428_v27 = vcombine.high %v668_v18, %v676_v19  ;;  %v8442_v31 = vcombine.high %v683_v23, %v691_v25  ;;  %v8441_v36 = vcombine.low %v683_v23, %v691_v25  ;;  %v795_v19 = vld [vmem:[#allocation5 + $0xf90] sm:$0xff]  ;;  %v804_v23 = vld [vmem:[#allocation5 + $0xfd8] sm:$0xff] }
 0x15f   : > { %v8443_v37 = vcombine.low %v684_v26, %v692_v28 }
 0x160   : > { %3664 = vmatmul.mubr.bf16.vlgmr.msra.gmra.mrb[4].mxu0 %v10556_v12  ;;  %3746 = vmatmul.mubr.bf16.vlgmr.msra.gmra.mrb[4].mxu1 %v10556_v12 }
 0x161   : > { %3673 = vmatpush1.bf16.msra.mxu0 %v8313_v33  ;;  %3755 = vmatpush1.bf16.msra.mxu1 %v8315_v15  ;;  %v707_v33 = vld [vmem:[#allocation5 + $0xcd0] sm:$0xff]  ;;  %v700_v15 = vld [vmem:[#allocation5 + $0xc98] sm:$0xff] }
 0x162   : > { %3674 = vmatprep.subr.bf16.mxu0 %v8330_v34  ;;  %3756 = vmatprep.subr.bf16.mxu1 %v8332_v38  ;;  %v8444_v34 = vcombine.high %v684_v26, %v692_v28  ;;  %v8458_v38 = vcombine.high %v699_v32, %v707_v33  ;;  %v8457_v44 = vcombine.low %v699_v32, %v707_v33  ;;  %v301_v28 = vld [vmem:[#allocation5 + $0x20] sm:$0xff]  ;;  %v310_v32 = vld [vmem:[#allocation5 + $0x68] sm:$0xff] }
 0x163   : > { %3704 = vmatprep.mubr.bf16.mxu0 %v10563_v53  ;;  %3786 = vmatprep.mubr.bf16.mxu1 %v10563_v53  ;;  %v8459_v45 = vcombine.low %v700_v15, %v708_v35 }
 0x165   : > { %3675 = vmatpush1.bf16.msra.mxu0 %v8329_v40  ;;  %3757 = vmatpush1.bf16.msra.mxu1 %v8331_v41  ;;  %v723_v40 = vld [vmem:[#allocation5 + $0xd50] sm:$0xff]  ;;  %v716_v41 = vld [vmem:[#allocation5 + $0xd18] sm:$0xff] }
 0x166   : > { %3676 = vmatprep.subr.bf16.mxu0 %v8346_v42  ;;  %3758 = vmatprep.subr.bf16.mxu1 %v8348_v46  ;;  %v8460_v42 = vcombine.high %v700_v15, %v708_v35  ;;  %v8474_v46 = vcombine.high %v715_v39, %v723_v40  ;;  %v8473_v52 = vcombine.low %v715_v39, %v723_v40  ;;  %v317_v35 = vld [vmem:[#allocation5 + $0xa0] sm:$0xff]  ;;  %v326_v39 = vld [vmem:[#allocation5 + $0xe8] sm:$0xff] }
 0x167   : > { %v8475_v54 = vcombine.low %v716_v41, %v724_v43 }
 0x169   : > { %3677 = vmatpush1.bf16.msra.mxu0 %v8345_v48  ;;  %3759 = vmatpush1.bf16.msra.mxu1 %v8347_v49  ;;  %v739_v48 = vld [vmem:[#allocation5 + $0xdd0] sm:$0xff]  ;;  %v732_v49 = vld [vmem:[#allocation5 + $0xd98] sm:$0xff] }
 0x16a   : > { %3678 = vmatprep.subr.bf16.mxu0 %v8362_v50  ;;  %3760 = vmatprep.subr.bf16.mxu1 %v8364_v55  ;;  %v8476_v50 = vcombine.high %v716_v41, %v724_v43  ;;  %v8490_v55 = vcombine.high %v731_v47, %v739_v48  ;;  %v8489_v62 = vcombine.low %v731_v47, %v739_v48  ;;  %v333_v43 = vld [vmem:[#allocation5 + $0x120] sm:$0xff]  ;;  %v342_v47 = vld [vmem:[#allocation5 + $0x168] sm:$0xff] }
 0x16b   : > { %v8491_v63 = vcombine.low %v732_v49, %v740_v51 }
 0x16d   : > { %3679 = vmatpush1.bf16.msra.mxu0 %v8361_v58  ;;  %3761 = vmatpush1.bf16.msra.mxu1 %v8363_v59  ;;  %v755_v58 = vld [vmem:[#allocation5 + $0xe50] sm:$0xff]  ;;  %v748_v59 = vld [vmem:[#allocation5 + $0xe18] sm:$0xff] }
 0x16e   : > { %3680 = vmatprep.subr.bf16.mxu0 %v8378_v60  ;;  %3762 = vmatprep.subr.bf16.mxu1 %v8380_v0  ;;  %v8492_v60 = vcombine.high %v732_v49, %v740_v51  ;;  %v8506_v0 = vcombine.high %v747_v56, %v755_v58  ;;  %v8505_v6 = vcombine.low %v747_v56, %v755_v58  ;;  %v349_v51 = vld [vmem:[#allocation5 + $0x1a0] sm:$0xff]  ;;  %v358_v56 = vld [vmem:[#allocation5 + $0x1e8] sm:$0xff] }
 0x16f   : > { %v8507_v7 = vcombine.low %v748_v59, %v756_v61 }
 0x171   : > { %3681 = vmatpush1.bf16.msra.mxu0 %v8377_v2  ;;  %3763 = vmatpush1.bf16.msra.mxu1 %v8379_v3  ;;  %v771_v2 = vld [vmem:[#allocation5 + $0xed0] sm:$0xff]  ;;  %v764_v3 = vld [vmem:[#allocation5 + $0xe98] sm:$0xff] }
 0x172   : > { %3682 = vmatprep.subr.bf16.mxu0 %v8394_v4  ;;  %3764 = vmatprep.subr.bf16.mxu1 %v8396_v8  ;;  %v8508_v4 = vcombine.high %v748_v59, %v756_v61  ;;  %v8522_v8 = vcombine.high %v763_v1, %v771_v2  ;;  %v8521_v16 = vcombine.low %v763_v1, %v771_v2  ;;  %v365_v61 = vld [vmem:[#allocation5 + $0x220] sm:$0xff]  ;;  %v374_v1 = vld [vmem:[#allocation5 + $0x268] sm:$0xff] }
 0x175   : > { %3683 = vmatpush1.bf16.msra.mxu0 %v8393_v10  ;;  %3765 = vmatpush1.bf16.msra.mxu1 %v8395_v11  ;;  %v787_v10 = vld [vmem:[#allocation5 + $0xf50] sm:$0xff]  ;;  %v780_v11 = vld [vmem:[#allocation5 + $0xf18] sm:$0xff] }
 0x176   : > { %3684 = vmatprep.subr.bf16.mxu0 %v8410_v13  ;;  %3766 = vmatprep.subr.bf16.mxu1 %v8412_v17  ;;  %v8524_v13 = vcombine.high %v764_v3, %v772_v5  ;;  %v8523_v17 = vcombine.low %v764_v3, %v772_v5  ;;  %v8538_v18 = vcombine.high %v779_v9, %v787_v10  ;;  %v381_v5 = vld [vmem:[#allocation5 + $0x2a0] sm:$0xff] }
 0x177   : > { %v8537_v25 = vcombine.low %v779_v9, %v787_v10  ;;  %v8539_v26 = vcombine.low %v780_v11, %v788_v14  ;;  %v390_v9 = vld [vmem:[#allocation5 + $0x2e8] sm:$0xff] }
 0x179   : > { %3685 = vmatpush1.bf16.msra.mxu0 %v8409_v20  ;;  %3767 = vmatpush1.bf16.msra.mxu1 %v8411_v21  ;;  %v803_v20 = vld [vmem:[#allocation5 + $0xfd0] sm:$0xff]  ;;  %v796_v21 = vld [vmem:[#allocation5 + $0xf98] sm:$0xff] }
 0x17a   : > { %3686 = vmatprep.subr.bf16.mxu0 %v8426_v22  ;;  %3768 = vmatprep.subr.bf16.mxu1 %v8428_v27  ;;  %v8540_v22 = vcombine.high %v780_v11, %v788_v14  ;;  %v8554_v27 = vcombine.high %v795_v19, %v803_v20  ;;  %v8553_v33 = vcombine.low %v795_v19, %v803_v20  ;;  %v397_v14 = vld [vmem:[#allocation5 + $0x320] sm:$0xff]  ;;  %v406_v19 = vld [vmem:[#allocation5 + $0x368] sm:$0xff] }
 0x17b   : > { %v8555_v15 = vcombine.low %v796_v21, %v804_v23 }
 0x17d   : > { %3687 = vmatpush1.bf16.msra.mxu0 %v8425_v29  ;;  %3769 = vmatpush1.bf16.msra.mxu1 %v8427_v30  ;;  %v309_v29 = vld [vmem:[#allocation5 + $0x60] sm:$0xff]  ;;  %v302_v30 = vld [vmem:[#allocation5 + $0x28] sm:$0xff] }
 0x17e   : > { %3688 = vmatprep.subr.bf16.mxu0 %v8442_v31  ;;  %3770 = vmatprep.subr.bf16.mxu1 %v8444_v34  ;;  %v8556_v31 = vcombine.high %v796_v21, %v804_v23  ;;  %v8062_v34 = vcombine.high %v301_v28, %v309_v29  ;;  %v8061_v40 = vcombine.low %v301_v28, %v309_v29  ;;  %v413_v23 = vld [vmem:[#allocation5 + $0x3a0] sm:$0xff]  ;;  %v422_v28 = vld [vmem:[#allocation5 + $0x3e8] sm:$0xff] }
 0x17f   : > { %v8063_v41 = vcombine.low %v302_v30, %v310_v32 }
 0x181   : > { %3689 = vmatpush1.bf16.msra.mxu0 %v8441_v36  ;;  %3771 = vmatpush1.bf16.msra.mxu1 %v8443_v37  ;;  %v325_v36 = vld [vmem:[#allocation5 + $0xe0] sm:$0xff]  ;;  %v318_v37 = vld [vmem:[#allocation5 + $0xa8] sm:$0xff] }
 0x182   : > { %3690 = vmatprep.subr.bf16.mxu0 %v8458_v38  ;;  %3772 = vmatprep.subr.bf16.mxu1 %v8460_v42  ;;  %v8064_v38 = vcombine.high %v302_v30, %v310_v32  ;;  %v8078_v42 = vcombine.high %v317_v35, %v325_v36  ;;  %v8077_v48 = vcombine.low %v317_v35, %v325_v36  ;;  %v429_v32 = vld [vmem:[#allocation5 + $0x420] sm:$0xff]  ;;  %v438_v35 = vld [vmem:[#allocation5 + $0x468] sm:$0xff] }
 0x183   : > { %v8079_v49 = vcombine.low %v318_v37, %v326_v39 }
 0x185   : > { %3691 = vmatpush1.bf16.msra.mxu0 %v8457_v44  ;;  %3773 = vmatpush1.bf16.msra.mxu1 %v8459_v45  ;;  %v341_v44 = vld [vmem:[#allocation5 + $0x160] sm:$0xff]  ;;  %v334_v45 = vld [vmem:[#allocation5 + $0x128] sm:$0xff] }
 0x186   : > { %3692 = vmatprep.subr.bf16.mxu0 %v8474_v46  ;;  %3774 = vmatprep.subr.bf16.mxu1 %v8476_v50  ;;  %v8080_v46 = vcombine.high %v318_v37, %v326_v39  ;;  %v8094_v50 = vcombine.high %v333_v43, %v341_v44  ;;  %v8093_v58 = vcombine.low %v333_v43, %v341_v44  ;;  %v445_v39 = vld [vmem:[#allocation5 + $0x4a0] sm:$0xff]  ;;  %v454_v43 = vld [vmem:[#allocation5 + $0x4e8] sm:$0xff] }
 0x187   : > { %v8095_v59 = vcombine.low %v334_v45, %v342_v47 }
 0x189   : > { %3693 = vmatpush1.bf16.msra.mxu0 %v8473_v52  ;;  %3775 = vmatpush1.bf16.msra.mxu1 %v8475_v54  ;;  %v357_v52 = vld [vmem:[#allocation5 + $0x1e0] sm:$0xff]  ;;  %v350_v54 = vld [vmem:[#allocation5 + $0x1a8] sm:$0xff] }
 0x18a   : > { %3694 = vmatprep.subr.bf16.mxu0 %v8490_v55  ;;  %3776 = vmatprep.subr.bf16.mxu1 %v8492_v60  ;;  %v8096_v55 = vcombine.high %v334_v45, %v342_v47  ;;  %v8110_v60 = vcombine.high %v349_v51, %v357_v52  ;;  %v8109_v2 = vcombine.low %v349_v51, %v357_v52  ;;  %v461_v47 = vld [vmem:[#allocation5 + $0x520] sm:$0xff]  ;;  %v470_v51 = vld [vmem:[#allocation5 + $0x568] sm:$0xff] }
 0x18b   : > { %v8111_v3 = vcombine.low %v350_v54, %v358_v56 }
 0x18d   : > { %3695 = vmatpush1.bf16.msra.mxu0 %v8489_v62  ;;  %3777 = vmatpush1.bf16.msra.mxu1 %v8491_v63  ;;  %v373_v62 = vld [vmem:[#allocation5 + $0x260] sm:$0xff]  ;;  %v366_v63 = vld [vmem:[#allocation5 + $0x228] sm:$0xff] }
 0x18e   : > { %3696 = vmatprep.subr.bf16.mxu0 %v8506_v0  ;;  %3778 = vmatprep.subr.bf16.mxu1 %v8508_v4  ;;  %v8112_v0 = vcombine.high %v350_v54, %v358_v56  ;;  %v8126_v4 = vcombine.high %v365_v61, %v373_v62  ;;  %v8125_v10 = vcombine.low %v365_v61, %v373_v62  ;;  %v477_v56 = vld [vmem:[#allocation5 + $0x5a0] sm:$0xff]  ;;  %v486_v61 = vld [vmem:[#allocation5 + $0x5e8] sm:$0xff] }
 0x18f   : > { %v8127_v11 = vcombine.low %v366_v63, %v374_v1 }
 0x191   : > { %3697 = vmatpush1.bf16.msra.mxu0 %v8505_v6  ;;  %3779 = vmatpush1.bf16.msra.mxu1 %v8507_v7  ;;  %v389_v6 = vld [vmem:[#allocation5 + $0x2e0] sm:$0xff]  ;;  %v382_v7 = vld [vmem:[#allocation5 + $0x2a8] sm:$0xff] }
 0x192   : > { %3698 = vmatprep.subr.bf16.mxu0 %v8522_v8  ;;  %3780 = vmatprep.subr.bf16.mxu1 %v8524_v13  ;;  %v8128_v8 = vcombine.high %v366_v63, %v374_v1  ;;  %v8142_v13 = vcombine.high %v381_v5, %v389_v6  ;;  %v8141_v20 = vcombine.low %v381_v5, %v389_v6  ;;  %v493_v1 = vld [vmem:[#allocation5 + $0x620] sm:$0xff]  ;;  %v502_v5 = vld [vmem:[#allocation5 + $0x668] sm:$0xff] }
 0x193   : > { %v8143_v21 = vcombine.low %v382_v7, %v390_v9 }
 0x195   : > { %3699 = vmatpush1.bf16.msra.mxu0 %v8521_v16  ;;  %3781 = vmatpush1.bf16.msra.mxu1 %v8523_v17  ;;  %v405_v16 = vld [vmem:[#allocation5 + $0x360] sm:$0xff]  ;;  %v398_v17 = vld [vmem:[#allocation5 + $0x328] sm:$0xff] }
 0x196   : > { %3700 = vmatprep.subr.bf16.mxu0 %v8538_v18  ;;  %3782 = vmatprep.subr.bf16.mxu1 %v8540_v22  ;;  %v8144_v18 = vcombine.high %v382_v7, %v390_v9  ;;  %v8158_v22 = vcombine.high %v397_v14, %v405_v16  ;;  %v8157_v29 = vcombine.low %v397_v14, %v405_v16  ;;  %v509_v9 = vld [vmem:[#allocation5 + $0x6a0] sm:$0xff]  ;;  %v518_v14 = vld [vmem:[#allocation5 + $0x6e8] sm:$0xff] }
 0x197   : > { %v8159_v30 = vcombine.low %v398_v17, %v406_v19 }
 0x199   : > { %3701 = vmatpush1.bf16.msra.mxu0 %v8537_v25  ;;  %3783 = vmatpush1.bf16.msra.mxu1 %v8539_v26  ;;  %v421_v25 = vld [vmem:[#allocation5 + $0x3e0] sm:$0xff]  ;;  %v414_v26 = vld [vmem:[#allocation5 + $0x3a8] sm:$0xff] }
 0x19a   : > { %3702 = vmatprep.subr.bf16.mxu0 %v8554_v27  ;;  %3784 = vmatprep.subr.bf16.mxu1 %v8556_v31  ;;  %v8160_v27 = vcombine.high %v398_v17, %v406_v19  ;;  %v8174_v31 = vcombine.high %v413_v23, %v421_v25  ;;  %v8173_v36 = vcombine.low %v413_v23, %v421_v25  ;;  %v525_v19 = vld [vmem:[#allocation5 + $0x720] sm:$0xff]  ;;  %v534_v23 = vld [vmem:[#allocation5 + $0x768] sm:$0xff] }
 0x19b   : > { %v8175_v37 = vcombine.low %v414_v26, %v422_v28 }
 0x19d   : > { %3703 = vmatpush1.bf16.msra.mxu0 %v8553_v33  ;;  %3785 = vmatpush1.bf16.msra.mxu1 %v8555_v15  ;;  %v437_v33 = vld [vmem:[#allocation5 + $0x460] sm:$0xff]  ;;  %v430_v15 = vld [vmem:[#allocation5 + $0x428] sm:$0xff] }
 0x19e   : > { %3795 = vmatprep.subr.bf16.mxu0 %v8062_v34  ;;  %3877 = vmatprep.subr.bf16.mxu1 %v8064_v38  ;;  %v8176_v34 = vcombine.high %v414_v26, %v422_v28  ;;  %v8190_v38 = vcombine.high %v429_v32, %v437_v33  ;;  %v8189_v44 = vcombine.low %v429_v32, %v437_v33  ;;  %v541_v28 = vld [vmem:[#allocation5 + $0x7a0] sm:$0xff]  ;;  %v550_v32 = vld [vmem:[#allocation5 + $0x7e8] sm:$0xff] }
 0x19f   : > { %v8191_v45 = vcombine.low %v430_v15, %v438_v35 }
 0x1a0   : > { %3705 = vmatmul.mubr.bf16.vlgmr.msra.gmra.mrb[4].mxu0 %v10571_v24  ;;  %3787 = vmatmul.mubr.bf16.vlgmr.msra.gmra.mrb[4].mxu1 %v10571_v24 }
 0x1a1   : > { %3796 = vmatpush1.bf16.msra.mxu0 %v8061_v40  ;;  %3878 = vmatpush1.bf16.msra.mxu1 %v8063_v41  ;;  %v453_v40 = vld [vmem:[#allocation5 + $0x4e0] sm:$0xff]  ;;  %v446_v41 = vld [vmem:[#allocation5 + $0x4a8] sm:$0xff] }
 0x1a2   : > { %3797 = vmatprep.subr.bf16.mxu0 %v8078_v42  ;;  %3879 = vmatprep.subr.bf16.mxu1 %v8080_v46  ;;  %v8192_v42 = vcombine.high %v430_v15, %v438_v35  ;;  %v8206_v46 = vcombine.high %v445_v39, %v453_v40  ;;  %v8205_v52 = vcombine.low %v445_v39, %v453_v40  ;;  %v557_v35 = vld [vmem:[#allocation5 + $0x820] sm:$0xff]  ;;  %v566_v39 = vld [vmem:[#allocation5 + $0x868] sm:$0xff] }
 0x1a3   : > { %3827 = vmatprep.mubr.bf16.mxu0 %v10550_v57  ;;  %3909 = vmatprep.mubr.bf16.mxu1 %v10550_v57  ;;  %v8207_v54 = vcombine.low %v446_v41, %v454_v43 }
 0x1a5   : > { %3798 = vmatpush1.bf16.msra.mxu0 %v8077_v48  ;;  %3880 = vmatpush1.bf16.msra.mxu1 %v8079_v49  ;;  %v469_v48 = vld [vmem:[#allocation5 + $0x560] sm:$0xff]  ;;  %v462_v49 = vld [vmem:[#allocation5 + $0x528] sm:$0xff] }
 0x1a6   : > { %3799 = vmatprep.subr.bf16.mxu0 %v8094_v50  ;;  %3881 = vmatprep.subr.bf16.mxu1 %v8096_v55  ;;  %v8208_v50 = vcombine.high %v446_v41, %v454_v43  ;;  %v8222_v55 = vcombine.high %v461_v47, %v469_v48  ;;  %v8221_v62 = vcombine.low %v461_v47, %v469_v48  ;;  %v573_v43 = vld [vmem:[#allocation5 + $0x8a0] sm:$0xff]  ;;  %v582_v47 = vld [vmem:[#allocation5 + $0x8e8] sm:$0xff] }
 0x1a7   : > { %v8223_v63 = vcombine.low %v462_v49, %v470_v51 }
 0x1a9   : > { %3800 = vmatpush1.bf16.msra.mxu0 %v8093_v58  ;;  %3882 = vmatpush1.bf16.msra.mxu1 %v8095_v59  ;;  %v485_v58 = vld [vmem:[#allocation5 + $0x5e0] sm:$0xff]  ;;  %v478_v59 = vld [vmem:[#allocation5 + $0x5a8] sm:$0xff] }
 0x1aa   : > { %3801 = vmatprep.subr.bf16.mxu0 %v8110_v60  ;;  %3883 = vmatprep.subr.bf16.mxu1 %v8112_v0  ;;  %v8224_v60 = vcombine.high %v462_v49, %v470_v51  ;;  %v8238_v0 = vcombine.high %v477_v56, %v485_v58  ;;  %v8237_v6 = vcombine.low %v477_v56, %v485_v58  ;;  %v598_v56 = vld [vmem:[#allocation5 + $0x968] sm:$0xff] }
 0x1ab   : > { %v8239_v7 = vcombine.low %v478_v59, %v486_v61 }
 0x1ad   : > { %3802 = vmatpush1.bf16.msra.mxu0 %v8109_v2  ;;  %3884 = vmatpush1.bf16.msra.mxu1 %v8111_v3  ;;  %v501_v2 = vld [vmem:[#allocation5 + $0x660] sm:$0xff]  ;;  %v494_v3 = vld [vmem:[#allocation5 + $0x628] sm:$0xff] }
 0x1ae   : > { %3803 = vmatprep.subr.bf16.mxu0 %v8126_v4  ;;  %3885 = vmatprep.subr.bf16.mxu1 %v8128_v8  ;;  %v8240_v4 = vcombine.high %v478_v59, %v486_v61  ;;  %v8254_v8 = vcombine.high %v493_v1, %v501_v2  ;;  %v8253_v16 = vcombine.low %v493_v1, %v501_v2  ;;  %v614_v1 = vld [vmem:[#allocation5 + $0x9e8] sm:$0xff] }
 0x1af   : > { %v8255_v17 = vcombine.low %v494_v3, %v502_v5 }
 0x1b1   : > { %3804 = vmatpush1.bf16.msra.mxu0 %v8125_v10  ;;  %3886 = vmatpush1.bf16.msra.mxu1 %v8127_v11  ;;  %v517_v10 = vld [vmem:[#allocation5 + $0x6e0] sm:$0xff]  ;;  %v510_v11 = vld [vmem:[#allocation5 + $0x6a8] sm:$0xff] }
 0x1b2   : > { %3805 = vmatprep.subr.bf16.mxu0 %v8142_v13  ;;  %3887 = vmatprep.subr.bf16.mxu1 %v8144_v18  ;;  %v8256_v13 = vcombine.high %v494_v3, %v502_v5  ;;  %v8270_v18 = vcombine.high %v509_v9, %v517_v10  ;;  %v8269_v25 = vcombine.low %v509_v9, %v517_v10  ;;  %v630_v9 = vld [vmem:[#allocation5 + $0xa68] sm:$0xff] }
 0x1b3   : > { %v8271_v26 = vcombine.low %v510_v11, %v518_v14 }
 0x1b5   : > { %3806 = vmatpush1.bf16.msra.mxu0 %v8141_v20  ;;  %3888 = vmatpush1.bf16.msra.mxu1 %v8143_v21  ;;  %v533_v20 = vld [vmem:[#allocation5 + $0x760] sm:$0xff]  ;;  %v526_v21 = vld [vmem:[#allocation5 + $0x728] sm:$0xff] }
 0x1b6   : > { %3807 = vmatprep.subr.bf16.mxu0 %v8158_v22  ;;  %3889 = vmatprep.subr.bf16.mxu1 %v8160_v27  ;;  %v8272_v22 = vcombine.high %v510_v11, %v518_v14  ;;  %v8286_v27 = vcombine.high %v525_v19, %v533_v20  ;;  %v8285_v33 = vcombine.low %v525_v19, %v533_v20  ;;  %v646_v19 = vld [vmem:[#allocation5 + $0xae8] sm:$0xff] }
 0x1b7   : > { %v8287_v15 = vcombine.low %v526_v21, %v534_v23 }
 0x1b9   : > { %3808 = vmatpush1.bf16.msra.mxu0 %v8157_v29  ;;  %3890 = vmatpush1.bf16.msra.mxu1 %v8159_v30  ;;  %v549_v29 = vld [vmem:[#allocation5 + $0x7e0] sm:$0xff]  ;;  %v542_v30 = vld [vmem:[#allocation5 + $0x7a8] sm:$0xff] }
 0x1ba   : > { %3809 = vmatprep.subr.bf16.mxu0 %v8174_v31  ;;  %3891 = vmatprep.subr.bf16.mxu1 %v8176_v34  ;;  %v8288_v31 = vcombine.high %v526_v21, %v534_v23  ;;  %v8302_v34 = vcombine.high %v541_v28, %v549_v29  ;;  %v8301_v40 = vcombine.low %v541_v28, %v549_v29  ;;  %v662_v28 = vld [vmem:[#allocation5 + $0xb68] sm:$0xff] }
 0x1bb   : > { %v8303_v41 = vcombine.low %v542_v30, %v550_v32 }
 0x1bd   : > { %3810 = vmatpush1.bf16.msra.mxu0 %v8173_v36  ;;  %3892 = vmatpush1.bf16.msra.mxu1 %v8175_v37  ;;  %v565_v36 = vld [vmem:[#allocation5 + $0x860] sm:$0xff]  ;;  %v558_v37 = vld [vmem:[#allocation5 + $0x828] sm:$0xff] }
 0x1be   : > { %3811 = vmatprep.subr.bf16.mxu0 %v8190_v38  ;;  %3893 = vmatprep.subr.bf16.mxu1 %v8192_v42  ;;  %v8304_v38 = vcombine.high %v542_v30, %v550_v32  ;;  %v8318_v42 = vcombine.high %v557_v35, %v565_v36  ;;  %v8317_v48 = vcombine.low %v557_v35, %v565_v36 }
 0x1bf   : > { %v8319_v49 = vcombine.low %v558_v37, %v566_v39 }
 0x1c1   : > { %3812 = vmatpush1.bf16.msra.mxu0 %v8189_v44  ;;  %3894 = vmatpush1.bf16.msra.mxu1 %v8191_v45  ;;  %v581_v44 = vld [vmem:[#allocation5 + $0x8e0] sm:$0xff]  ;;  %v574_v45 = vld [vmem:[#allocation5 + $0x8a8] sm:$0xff] }
 0x1c2   : > { %3813 = vmatprep.subr.bf16.mxu0 %v8206_v46  ;;  %3895 = vmatprep.subr.bf16.mxu1 %v8208_v50  ;;  %v8320_v46 = vcombine.high %v558_v37, %v566_v39  ;;  %v8334_v50 = vcombine.high %v573_v43, %v581_v44  ;;  %v8336_v51 = vcombine.high %v574_v45, %v582_v47  ;;  %v670_v37 = vld [vmem:[#allocation5 + $0xba8] sm:$0xff] }
 0x1c3   : > { %v8333_v58 = vcombine.low %v573_v43, %v581_v44  ;;  %v8335_v59 = vcombine.low %v574_v45, %v582_v47 }
 0x1c5   : > { %3814 = vmatpush1.bf16.msra.mxu0 %v8205_v52  ;;  %3896 = vmatpush1.bf16.msra.mxu1 %v8207_v54  ;;  %v589_v52 = vld [vmem:[#allocation5 + $0x920] sm:$0xff] }
 0x1c6   : > { %3815 = vmatprep.subr.bf16.mxu0 %v8222_v55  ;;  %3897 = vmatprep.subr.bf16.mxu1 %v8224_v60  ;;  %v597_v54 = vld [vmem:[#allocation5 + $0x960] sm:$0xff]  ;;  %v590_v55 = vld [vmem:[#allocation5 + $0x928] sm:$0xff] }
 0x1c7   : > { %v8350_v60 = vcombine.high %v589_v52, %v597_v54  ;;  %v8352_v61 = vcombine.high %v590_v55, %v598_v56  ;;  %v8349_v2 = vcombine.low %v589_v52, %v597_v54  ;;  %v8351_v3 = vcombine.low %v590_v55, %v598_v56 }
 0x1c9   : > { %3816 = vmatpush1.bf16.msra.mxu0 %v8221_v62  ;;  %3898 = vmatpush1.bf16.msra.mxu1 %v8223_v63  ;;  %v605_v62 = vld [vmem:[#allocation5 + $0x9a0] sm:$0xff] }
 0x1ca   : > { %3817 = vmatprep.subr.bf16.mxu0 %v8238_v0  ;;  %3899 = vmatprep.subr.bf16.mxu1 %v8240_v4  ;;  %v613_v63 = vld [vmem:[#allocation5 + $0x9e0] sm:$0xff]  ;;  %v606_v0 = vld [vmem:[#allocation5 + $0x9a8] sm:$0xff] }
 0x1cb   : > { %v8366_v4 = vcombine.high %v605_v62, %v613_v63  ;;  %v8368_v5 = vcombine.high %v606_v0, %v614_v1  ;;  %v8365_v10 = vcombine.low %v605_v62, %v613_v63  ;;  %v8367_v11 = vcombine.low %v606_v0, %v614_v1 }
 0x1cd   : > { %3818 = vmatpush1.bf16.msra.mxu0 %v8237_v6  ;;  %3900 = vmatpush1.bf16.msra.mxu1 %v8239_v7  ;;  %v621_v6 = vld [vmem:[#allocation5 + $0xa20] sm:$0xff] }
 0x1ce   : > { %3819 = vmatprep.subr.bf16.mxu0 %v8254_v8  ;;  %3901 = vmatprep.subr.bf16.mxu1 %v8256_v13  ;;  %v629_v7 = vld [vmem:[#allocation5 + $0xa60] sm:$0xff]  ;;  %v622_v8 = vld [vmem:[#allocation5 + $0xa28] sm:$0xff] }
 0x1cf   : > { %v8382_v13 = vcombine.high %v621_v6, %v629_v7  ;;  %v8384_v14 = vcombine.high %v622_v8, %v630_v9  ;;  %v8381_v20 = vcombine.low %v621_v6, %v629_v7  ;;  %v8383_v21 = vcombine.low %v622_v8, %v630_v9 }
 0x1d1   : > { %3820 = vmatpush1.bf16.msra.mxu0 %v8253_v16  ;;  %3902 = vmatpush1.bf16.msra.mxu1 %v8255_v17  ;;  %v637_v16 = vld [vmem:[#allocation5 + $0xaa0] sm:$0xff] }
 0x1d2   : > { %3821 = vmatprep.subr.bf16.mxu0 %v8270_v18  ;;  %3903 = vmatprep.subr.bf16.mxu1 %v8272_v22  ;;  %v645_v17 = vld [vmem:[#allocation5 + $0xae0] sm:$0xff]  ;;  %v638_v18 = vld [vmem:[#allocation5 + $0xaa8] sm:$0xff] }
 0x1d3   : > { %v8398_v22 = vcombine.high %v637_v16, %v645_v17  ;;  %v8400_v23 = vcombine.high %v638_v18, %v646_v19  ;;  %v8397_v29 = vcombine.low %v637_v16, %v645_v17  ;;  %v8399_v30 = vcombine.low %v638_v18, %v646_v19 }
 0x1d5   : > { %3822 = vmatpush1.bf16.msra.mxu0 %v8269_v25  ;;  %3904 = vmatpush1.bf16.msra.mxu1 %v8271_v26  ;;  %v653_v25 = vld [vmem:[#allocation5 + $0xb20] sm:$0xff] }
 0x1d6   : > { %3823 = vmatprep.subr.bf16.mxu0 %v8286_v27  ;;  %3905 = vmatprep.subr.bf16.mxu1 %v8288_v31  ;;  %v661_v26 = vld [vmem:[#allocation5 + $0xb60] sm:$0xff]  ;;  %v654_v27 = vld [vmem:[#allocation5 + $0xb28] sm:$0xff] }
 0x1d7   : > { %v8414_v31 = vcombine.high %v653_v25, %v661_v26  ;;  %v8415_v44 = vcombine.low %v654_v27, %v662_v28 }
 0x1d9   : > { %3824 = vmatpush1.bf16.msra.mxu0 %v8285_v33  ;;  %3906 = vmatpush1.bf16.msra.mxu1 %v8287_v15  ;;  %v8416_v33 = vcombine.high %v654_v27, %v662_v28  ;;  %v669_v15 = vld [vmem:[#allocation5 + $0xba0] sm:$0xff] }
 0x1da   : > { %3825 = vmatprep.subr.bf16.mxu0 %v8302_v34  ;;  %3907 = vmatprep.subr.bf16.mxu1 %v8304_v38  ;;  %v677_v34 = vld [vmem:[#allocation5 + $0xbe0] sm:$0xff]  ;;  %v678_v38 = vld [vmem:[#allocation5 + $0xbe8] sm:$0xff] }
 0x1db   : > { %v8430_v45 = vcombine.high %v669_v15, %v677_v34  ;;  %v8432_v47 = vcombine.high %v670_v37, %v678_v38  ;;  %v8429_v52 = vcombine.low %v669_v15, %v677_v34  ;;  %v8431_v54 = vcombine.low %v670_v37, %v678_v38 }
 0x1dd   : > { %3826 = vmatpush1.bf16.msra.mxu0 %v8301_v40  ;;  %3908 = vmatpush1.bf16.msra.mxu1 %v8303_v41  ;;  %v8413_v41 = vcombine.low %v653_v25, %v661_v26 }
 0x1de   : > { %3836 = vmatprep.subr.bf16.mxu0 %v8318_v42  ;;  %3918 = vmatprep.subr.bf16.mxu1 %v8320_v46 }
 0x1e0   : > { %3828 = vmatmul.mubr.bf16.vlgmr.msra.gmra.mrb[8].mxu0 %v10556_v12  ;;  %3910 = vmatmul.mubr.bf16.vlgmr.msra.gmra.mrb[8].mxu1 %v10556_v12 }
 0x1e1   : > { %3837 = vmatpush1.bf16.msra.mxu0 %v8317_v48  ;;  %3919 = vmatpush1.bf16.msra.mxu1 %v8319_v49  ;;  %v685_v48 = vld [vmem:[#allocation5 + $0xc20] sm:$0xff] }
 0x1e2   : > { %3838 = vmatprep.subr.bf16.mxu0 %v8334_v50  ;;  %3920 = vmatprep.subr.bf16.mxu1 %v8336_v51  ;;  %v693_v49 = vld [vmem:[#allocation5 + $0xc60] sm:$0xff]  ;;  %v686_v50 = vld [vmem:[#allocation5 + $0xc28] sm:$0xff] }
 0x1e3   : > { %3868 = vmatprep.mubr.bf16.mxu0 %v10563_v53  ;;  %3950 = vmatprep.mubr.bf16.mxu1 %v10563_v53  ;;  %v694_v51 = vld [vmem:[#allocation5 + $0xc68] sm:$0xff]  ;;  %v8446_v55 = vcombine.high %v685_v48, %v693_v49  ;;  %v8445_v62 = vcombine.low %v685_v48, %v693_v49  ;;  %v797_v48 = vld [vmem:[#allocation5 + $0xfa0] sm:$0xff] }
 0x1e4   : > { %v8448_v56 = vcombine.high %v686_v50, %v694_v51  ;;  %v8447_v63 = vcombine.low %v686_v50, %v694_v51  ;;  %v805_v49 = vld [vmem:[#allocation5 + $0xfe0] sm:$0xff]  ;;  %v798_v50 = vld [vmem:[#allocation5 + $0xfa8] sm:$0xff] }
 0x1e5   : > { %3839 = vmatpush1.bf16.msra.mxu0 %v8333_v58  ;;  %3921 = vmatpush1.bf16.msra.mxu1 %v8335_v59  ;;  %v701_v58 = vld [vmem:[#allocation5 + $0xca0] sm:$0xff]  ;;  %v806_v51 = vld [vmem:[#allocation5 + $0xfe8] sm:$0xff] }
 0x1e6   : > { %3840 = vmatprep.subr.bf16.mxu0 %v8350_v60  ;;  %3922 = vmatprep.subr.bf16.mxu1 %v8352_v61  ;;  %v709_v59 = vld [vmem:[#allocation5 + $0xce0] sm:$0xff]  ;;  %v702_v60 = vld [vmem:[#allocation5 + $0xca8] sm:$0xff] }
 0x1e7   : > { %v710_v61 = vld [vmem:[#allocation5 + $0xce8] sm:$0xff]  ;;  %v8462_v0 = vcombine.high %v701_v58, %v709_v59  ;;  %v8461_v6 = vcombine.low %v701_v58, %v709_v59  ;;  %v303_v58 = vld [vmem:[#allocation5 + $0x30] sm:$0xff] }
 0x1e8   : > { %v8464_v1 = vcombine.high %v702_v60, %v710_v61  ;;  %v8463_v7 = vcombine.low %v702_v60, %v710_v61  ;;  %v311_v59 = vld [vmem:[#allocation5 + $0x70] sm:$0xff]  ;;  %v304_v60 = vld [vmem:[#allocation5 + $0x38] sm:$0xff] }
 0x1e9   : > { %3841 = vmatpush1.bf16.msra.mxu0 %v8349_v2  ;;  %3923 = vmatpush1.bf16.msra.mxu1 %v8351_v3  ;;  %v717_v2 = vld [vmem:[#allocation5 + $0xd20] sm:$0xff]  ;;  %v312_v61 = vld [vmem:[#allocation5 + $0x78] sm:$0xff] }
 0x1ea   : > { %3842 = vmatprep.subr.bf16.mxu0 %v8366_v4  ;;  %3924 = vmatprep.subr.bf16.mxu1 %v8368_v5  ;;  %v725_v3 = vld [vmem:[#allocation5 + $0xd60] sm:$0xff]  ;;  %v718_v4 = vld [vmem:[#allocation5 + $0xd28] sm:$0xff] }
 0x1eb   : > { %v726_v5 = vld [vmem:[#allocation5 + $0xd68] sm:$0xff]  ;;  %v8478_v8 = vcombine.high %v717_v2, %v725_v3  ;;  %v8477_v16 = vcombine.low %v717_v2, %v725_v3  ;;  %v319_v2 = vld [vmem:[#allocation5 + $0xb0] sm:$0xff] }
 0x1ec   : > { %v8480_v9 = vcombine.high %v718_v4, %v726_v5  ;;  %v8479_v17 = vcombine.low %v718_v4, %v726_v5  ;;  %v327_v3 = vld [vmem:[#allocation5 + $0xf0] sm:$0xff]  ;;  %v320_v4 = vld [vmem:[#allocation5 + $0xb8] sm:$0xff] }
 0x1ed   : > { %3843 = vmatpush1.bf16.msra.mxu0 %v8365_v10  ;;  %3925 = vmatpush1.bf16.msra.mxu1 %v8367_v11  ;;  %v733_v10 = vld [vmem:[#allocation5 + $0xda0] sm:$0xff]  ;;  %v328_v5 = vld [vmem:[#allocation5 + $0xf8] sm:$0xff] }
 0x1ee   : > { %3844 = vmatprep.subr.bf16.mxu0 %v8382_v13  ;;  %3926 = vmatprep.subr.bf16.mxu1 %v8384_v14  ;;  %v741_v11 = vld [vmem:[#allocation5 + $0xde0] sm:$0xff]  ;;  %v734_v13 = vld [vmem:[#allocation5 + $0xda8] sm:$0xff] }
 0x1ef   : > { %v742_v14 = vld [vmem:[#allocation5 + $0xde8] sm:$0xff]  ;;  %v8494_v18 = vcombine.high %v733_v10, %v741_v11  ;;  %v8493_v25 = vcombine.low %v733_v10, %v741_v11  ;;  %v335_v10 = vld [vmem:[#allocation5 + $0x130] sm:$0xff] }
 0x1f0   : > { %v8496_v19 = vcombine.high %v734_v13, %v742_v14  ;;  %v8495_v26 = vcombine.low %v734_v13, %v742_v14  ;;  %v343_v11 = vld [vmem:[#allocation5 + $0x170] sm:$0xff]  ;;  %v336_v13 = vld [vmem:[#allocation5 + $0x138] sm:$0xff] }
 0x1f1   : > { %3845 = vmatpush1.bf16.msra.mxu0 %v8381_v20  ;;  %3927 = vmatpush1.bf16.msra.mxu1 %v8383_v21  ;;  %v749_v20 = vld [vmem:[#allocation5 + $0xe20] sm:$0xff]  ;;  %v344_v14 = vld [vmem:[#allocation5 + $0x178] sm:$0xff] }
 0x1f2   : > { %3846 = vmatprep.subr.bf16.mxu0 %v8398_v22  ;;  %3928 = vmatprep.subr.bf16.mxu1 %v8400_v23  ;;  %v757_v21 = vld [vmem:[#allocation5 + $0xe60] sm:$0xff]  ;;  %v750_v22 = vld [vmem:[#allocation5 + $0xe28] sm:$0xff] }
 0x1f3   : > { %v10589_v32 = vpop.f32.mrb[0].mxu0  ;;  %v10591_v35 = vpop.f32.mrb[0].mxu1  ;;  %v758_v23 = vld [vmem:[#allocation5 + $0xe68] sm:$0xff]  ;;  %v8510_v27 = vcombine.high %v749_v20, %v757_v21  ;;  %v8509_v15 = vcombine.low %v749_v20, %v757_v21  ;;  %v351_v20 = vld [vmem:[#allocation5 + $0x1b0] sm:$0xff] }
 0x1f4   : > { %v10593_v36 = vpop.f32.mrb[1].mxu0  ;;  %v10595_v39 = vpop.f32.mrb[1].mxu1  ;;  %v8512_v28 = vcombine.high %v750_v22, %v758_v23  ;;  %v8511_v34 = vcombine.low %v750_v22, %v758_v23  ;;  %v359_v21 = vld [vmem:[#allocation5 + $0x1f0] sm:$0xff]  ;;  %v352_v22 = vld [vmem:[#allocation5 + $0x1b8] sm:$0xff] }
 0x1f5   : > { %v3546_v40 = vpop.f32.mrb[2].mxu0  ;;  %3847 = vmatpush1.bf16.msra.mxu0 %v8397_v29  ;;  %v3628_v42 = vpop.f32.mrb[2].mxu1  ;;  %3929 = vmatpush1.bf16.msra.mxu1 %v8399_v30  ;;  %v765_v29 = vld [vmem:[#allocation5 + $0xea0] sm:$0xff]  ;;  %v360_v23 = vld [vmem:[#allocation5 + $0x1f8] sm:$0xff] }
 0x1f6   : > { %v3547_v43 = vpop.f32.mrb[3].mxu0  ;;  %3848 = vmatprep.subr.bf16.mxu0 %v8414_v31  ;;  %v3629_v46 = vpop.f32.mrb[3].mxu1  ;;  %3930 = vmatprep.subr.bf16.mxu1 %v8416_v33  ;;  %v773_v30 = vld [vmem:[#allocation5 + $0xee0] sm:$0xff]  ;;  %v766_v31 = vld [vmem:[#allocation5 + $0xea8] sm:$0xff] }
 0x1f7   : > { %v774_v33 = vld [vmem:[#allocation5 + $0xee8] sm:$0xff]  ;;  %v8526_v37 = vcombine.high %v765_v29, %v773_v30  ;;  %v781_v40 = vld [vmem:[#allocation5 + $0xf20] sm:$0xff] }
 0x1f8   : > { %v8528_v38 = vcombine.high %v766_v31, %v774_v33  ;;  %v782_v42 = vld [vmem:[#allocation5 + $0xf28] sm:$0xff] }
 0x1f9   : > { %3849 = vmatpush1.bf16.msra.mxu0 %v8413_v41  ;;  %3931 = vmatpush1.bf16.msra.mxu1 %v8415_v44  ;;  %v789_v41 = vld [vmem:[#allocation5 + $0xf60] sm:$0xff]  ;;  %v790_v43 = vld [vmem:[#allocation5 + $0xf68] sm:$0xff]  ;;  %v8525_v44 = vcombine.low %v765_v29, %v773_v30  ;;  %v367_v29 = vld [vmem:[#allocation5 + $0x230] sm:$0xff] }
 0x1fa   : > { %3850 = vmatprep.subr.bf16.mxu0 %v8430_v45  ;;  %3932 = vmatprep.subr.bf16.mxu1 %v8432_v47  ;;  %v8527_v45 = vcombine.low %v766_v31, %v774_v33  ;;  %v8542_v46 = vcombine.high %v781_v40, %v789_v41  ;;  %v8544_v47 = vcombine.high %v782_v42, %v790_v43  ;;  %v375_v30 = vld [vmem:[#allocation5 + $0x270] sm:$0xff]  ;;  %v368_v31 = vld [vmem:[#allocation5 + $0x238] sm:$0xff] }
 0x1fb   : > { %v376_v33 = vld [vmem:[#allocation5 + $0x278] sm:$0xff] }
 0x1fd   : > { %3851 = vmatpush1.bf16.msra.mxu0 %v8429_v52  ;;  %3933 = vmatpush1.bf16.msra.mxu1 %v8431_v54  ;;  %v8541_v52 = vcombine.low %v781_v40, %v789_v41  ;;  %v8543_v54 = vcombine.low %v782_v42, %v790_v43  ;;  %v391_v40 = vld [vmem:[#allocation5 + $0x2f0] sm:$0xff]  ;;  %v384_v41 = vld [vmem:[#allocation5 + $0x2b8] sm:$0xff]  ;;  %v8129_v43 = vcombine.low %v367_v29, %v375_v30 }
 0x1fe   : > { %3852 = vmatprep.subr.bf16.mxu0 %v8446_v55  ;;  %3934 = vmatprep.subr.bf16.mxu1 %v8448_v56  ;;  %v8558_v55 = vcombine.high %v797_v48, %v805_v49  ;;  %v8560_v56 = vcombine.high %v798_v50, %v806_v51  ;;  %v392_v42 = vld [vmem:[#allocation5 + $0x2f8] sm:$0xff] }
 0x201   : > { %3853 = vmatpush1.bf16.msra.mxu0 %v8445_v62  ;;  %3935 = vmatpush1.bf16.msra.mxu1 %v8447_v63  ;;  %v8557_v62 = vcombine.low %v797_v48, %v805_v49  ;;  %v8559_v63 = vcombine.low %v798_v50, %v806_v51  ;;  %v407_v48 = vld [vmem:[#allocation5 + $0x370] sm:$0xff]  ;;  %v400_v49 = vld [vmem:[#allocation5 + $0x338] sm:$0xff] }
 0x202   : > { %3854 = vmatprep.subr.bf16.mxu0 %v8462_v0  ;;  %3936 = vmatprep.subr.bf16.mxu1 %v8464_v1  ;;  %v8066_v0 = vcombine.high %v303_v58, %v311_v59  ;;  %v8068_v1 = vcombine.high %v304_v60, %v312_v61  ;;  %v408_v50 = vld [vmem:[#allocation5 + $0x378] sm:$0xff] }
 0x205   : > { %3855 = vmatpush1.bf16.msra.mxu0 %v8461_v6  ;;  %3937 = vmatpush1.bf16.msra.mxu1 %v8463_v7  ;;  %v8065_v6 = vcombine.low %v303_v58, %v311_v59  ;;  %v8067_v7 = vcombine.low %v304_v60, %v312_v61  ;;  %v423_v58 = vld [vmem:[#allocation5 + $0x3f0] sm:$0xff]  ;;  %v416_v59 = vld [vmem:[#allocation5 + $0x3b8] sm:$0xff] }
 0x206   : > { %3856 = vmatprep.subr.bf16.mxu0 %v8478_v8  ;;  %3938 = vmatprep.subr.bf16.mxu1 %v8480_v9  ;;  %v8082_v8 = vcombine.high %v319_v2, %v327_v3  ;;  %v8084_v9 = vcombine.high %v320_v4, %v328_v5  ;;  %v424_v60 = vld [vmem:[#allocation5 + $0x3f8] sm:$0xff] }
 0x209   : > { %3857 = vmatpush1.bf16.msra.mxu0 %v8477_v16  ;;  %3939 = vmatpush1.bf16.msra.mxu1 %v8479_v17  ;;  %v8081_v16 = vcombine.low %v319_v2, %v327_v3  ;;  %v8083_v17 = vcombine.low %v320_v4, %v328_v5  ;;  %v439_v2 = vld [vmem:[#allocation5 + $0x470] sm:$0xff]  ;;  %v432_v3 = vld [vmem:[#allocation5 + $0x438] sm:$0xff] }
 0x20a   : > { %3858 = vmatprep.subr.bf16.mxu0 %v8494_v18  ;;  %3940 = vmatprep.subr.bf16.mxu1 %v8496_v19  ;;  %v8098_v18 = vcombine.high %v335_v10, %v343_v11  ;;  %v8100_v19 = vcombine.high %v336_v13, %v344_v14  ;;  %v440_v4 = vld [vmem:[#allocation5 + $0x478] sm:$0xff] }
 0x20d   : > { %3859 = vmatpush1.bf16.msra.mxu0 %v8493_v25  ;;  %3941 = vmatpush1.bf16.msra.mxu1 %v8495_v26  ;;  %v8097_v25 = vcombine.low %v335_v10, %v343_v11  ;;  %v8099_v26 = vcombine.low %v336_v13, %v344_v14  ;;  %v455_v10 = vld [vmem:[#allocation5 + $0x4f0] sm:$0xff]  ;;  %v448_v11 = vld [vmem:[#allocation5 + $0x4b8] sm:$0xff] }
 0x20e   : > { %3860 = vmatprep.subr.bf16.mxu0 %v8510_v27  ;;  %3942 = vmatprep.subr.bf16.mxu1 %v8512_v28  ;;  %v8114_v27 = vcombine.high %v351_v20, %v359_v21  ;;  %v8116_v28 = vcombine.high %v352_v22, %v360_v23  ;;  %v456_v13 = vld [vmem:[#allocation5 + $0x4f8] sm:$0xff] }
 0x211   : > { %3861 = vmatpush1.bf16.msra.mxu0 %v8509_v15  ;;  %3943 = vmatpush1.bf16.msra.mxu1 %v8511_v34  ;;  %v8113_v15 = vcombine.low %v351_v20, %v359_v21  ;;  %v8115_v34 = vcombine.low %v352_v22, %v360_v23  ;;  %v471_v20 = vld [vmem:[#allocation5 + $0x570] sm:$0xff]  ;;  %v464_v21 = vld [vmem:[#allocation5 + $0x538] sm:$0xff] }
 0x212   : > { %3862 = vmatprep.subr.bf16.mxu0 %v8526_v37  ;;  %3944 = vmatprep.subr.bf16.mxu1 %v8528_v38  ;;  %v8130_v37 = vcombine.high %v367_v29, %v375_v30  ;;  %v383_v38 = vld [vmem:[#allocation5 + $0x2b0] sm:$0xff]  ;;  %v472_v22 = vld [vmem:[#allocation5 + $0x578] sm:$0xff] }
 0x213   : > { %v8145_v51 = vcombine.low %v383_v38, %v391_v40  ;;  %v487_v29 = vld [vmem:[#allocation5 + $0x5f0] sm:$0xff]  ;;  %v480_v30 = vld [vmem:[#allocation5 + $0x5b8] sm:$0xff] }
 0x215   : > { %3863 = vmatpush1.bf16.msra.mxu0 %v8525_v44  ;;  %3945 = vmatpush1.bf16.msra.mxu1 %v8527_v45  ;;  %v8131_v44 = vcombine.low %v368_v31, %v376_v33  ;;  %v8146_v45 = vcombine.high %v383_v38, %v391_v40  ;;  %v503_v38 = vld [vmem:[#allocation5 + $0x670] sm:$0xff]  ;;  %v496_v40 = vld [vmem:[#allocation5 + $0x638] sm:$0xff] }
 0x216   : > { %3864 = vmatprep.subr.bf16.mxu0 %v8542_v46  ;;  %3946 = vmatprep.subr.bf16.mxu1 %v8544_v47  ;;  %v8148_v46 = vcombine.high %v384_v41, %v392_v42  ;;  %v399_v47 = vld [vmem:[#allocation5 + $0x330] sm:$0xff] }
 0x217   : > { %v8161_v61 = vcombine.low %v399_v47, %v407_v48 }
 0x219   : > { %3865 = vmatpush1.bf16.msra.mxu0 %v8541_v52  ;;  %3947 = vmatpush1.bf16.msra.mxu1 %v8543_v54  ;;  %v8147_v52 = vcombine.low %v384_v41, %v392_v42  ;;  %v8162_v54 = vcombine.high %v399_v47, %v407_v48  ;;  %v504_v41 = vld [vmem:[#allocation5 + $0x678] sm:$0xff]  ;;  %v519_v47 = vld [vmem:[#allocation5 + $0x6f0] sm:$0xff] }
 0x21a   : > { %3866 = vmatprep.subr.bf16.mxu0 %v8558_v55  ;;  %3948 = vmatprep.subr.bf16.mxu1 %v8560_v56  ;;  %v8164_v55 = vcombine.high %v400_v49, %v408_v50  ;;  %v415_v56 = vld [vmem:[#allocation5 + $0x3b0] sm:$0xff]  ;;  %v512_v48 = vld [vmem:[#allocation5 + $0x6b8] sm:$0xff] }
 0x21b   : > { %v8177_v5 = vcombine.low %v415_v56, %v423_v58 }
 0x21d   : > { %3867 = vmatpush1.bf16.msra.mxu0 %v8557_v62  ;;  %3949 = vmatpush1.bf16.msra.mxu1 %v8559_v63  ;;  %v8163_v62 = vcombine.low %v400_v49, %v408_v50  ;;  %v8178_v63 = vcombine.high %v415_v56, %v423_v58  ;;  %v520_v49 = vld [vmem:[#allocation5 + $0x6f8] sm:$0xff]  ;;  %v535_v56 = vld [vmem:[#allocation5 + $0x770] sm:$0xff] }
 0x21e   : > { %3959 = vmatprep.subr.bf16.mxu0 %v8066_v0  ;;  %4041 = vmatprep.subr.bf16.mxu1 %v8068_v1  ;;  %v8180_v0 = vcombine.high %v416_v59, %v424_v60  ;;  %v431_v1 = vld [vmem:[#allocation5 + $0x430] sm:$0xff]  ;;  %v528_v58 = vld [vmem:[#allocation5 + $0x738] sm:$0xff] }
 0x21f   : > { %v8193_v14 = vcombine.low %v431_v1, %v439_v2 }
 0x220   : > { %3869 = vmatmul.mubr.bf16.vlgmr.msra.gmra.mrb[8].mxu0 %v10571_v24  ;;  %3951 = vmatmul.mubr.bf16.vlgmr.msra.gmra.mrb[8].mxu1 %v10571_v24 }
 0x221   : > { %3960 = vmatpush1.bf16.msra.mxu0 %v8065_v6  ;;  %4042 = vmatpush1.bf16.msra.mxu1 %v8067_v7  ;;  %v8179_v6 = vcombine.low %v416_v59, %v424_v60  ;;  %v8194_v7 = vcombine.high %v431_v1, %v439_v2  ;;  %v536_v59 = vld [vmem:[#allocation5 + $0x778] sm:$0xff]  ;;  %v551_v1 = vld [vmem:[#allocation5 + $0x7f0] sm:$0xff] }
 0x222   : > { %3961 = vmatprep.subr.bf16.mxu0 %v8082_v8  ;;  %4043 = vmatprep.subr.bf16.mxu1 %v8084_v9  ;;  %v8196_v8 = vcombine.high %v432_v3, %v440_v4  ;;  %v447_v9 = vld [vmem:[#allocation5 + $0x4b0] sm:$0xff]  ;;  %v544_v2 = vld [vmem:[#allocation5 + $0x7b8] sm:$0xff] }
 0x223   : > { %3991 = vmatprep.mubr.bf16.mxu0 %v10550_v57  ;;  %4073 = vmatprep.mubr.bf16.mxu1 %v10550_v57  ;;  %v8132_v57 = vcombine.high %v368_v31, %v376_v33  ;;  %v8209_v23 = vcombine.low %v447_v9, %v455_v10  ;;  %v488_v31 = vld [vmem:[#allocation5 + $0x5f8] sm:$0xff] }
 0x225   : > { %3962 = vmatpush1.bf16.msra.mxu0 %v8081_v16  ;;  %4044 = vmatpush1.bf16.msra.mxu1 %v8083_v17  ;;  %v8195_v16 = vcombine.low %v432_v3, %v440_v4  ;;  %v8210_v17 = vcombine.high %v447_v9, %v455_v10  ;;  %v552_v3 = vld [vmem:[#allocation5 + $0x7f8] sm:$0xff]  ;;  %v567_v9 = vld [vmem:[#allocation5 + $0x870] sm:$0xff] }
 0x226   : > { %3963 = vmatprep.subr.bf16.mxu0 %v8098_v18  ;;  %4045 = vmatprep.subr.bf16.mxu1 %v8100_v19  ;;  %v8212_v18 = vcombine.high %v448_v11, %v456_v13  ;;  %v463_v19 = vld [vmem:[#allocation5 + $0x530] sm:$0xff]  ;;  %v560_v10 = vld [vmem:[#allocation5 + $0x838] sm:$0xff] }
 0x227   : > { %v8225_v33 = vcombine.low %v463_v19, %v471_v20 }
 0x229   : > { %3964 = vmatpush1.bf16.msra.mxu0 %v8097_v25  ;;  %4046 = vmatpush1.bf16.msra.mxu1 %v8099_v26  ;;  %v8211_v25 = vcombine.low %v448_v11, %v456_v13  ;;  %v8226_v26 = vcombine.high %v463_v19, %v471_v20  ;;  %v568_v11 = vld [vmem:[#allocation5 + $0x878] sm:$0xff]  ;;  %v583_v19 = vld [vmem:[#allocation5 + $0x8f0] sm:$0xff] }
 0x22a   : > { %3965 = vmatprep.subr.bf16.mxu0 %v8114_v27  ;;  %4047 = vmatprep.subr.bf16.mxu1 %v8116_v28  ;;  %v8228_v27 = vcombine.high %v464_v21, %v472_v22  ;;  %v479_v28 = vld [vmem:[#allocation5 + $0x5b0] sm:$0xff]  ;;  %v576_v20 = vld [vmem:[#allocation5 + $0x8b8] sm:$0xff] }
 0x22b   : > { %v8241_v42 = vcombine.low %v479_v28, %v487_v29 }
 0x22d   : > { %3966 = vmatpush1.bf16.msra.mxu0 %v8113_v15  ;;  %4048 = vmatpush1.bf16.msra.mxu1 %v8115_v34  ;;  %v8227_v15 = vcombine.low %v464_v21, %v472_v22  ;;  %v8242_v34 = vcombine.high %v479_v28, %v487_v29  ;;  %v584_v21 = vld [vmem:[#allocation5 + $0x8f8] sm:$0xff]  ;;  %v599_v28 = vld [vmem:[#allocation5 + $0x970] sm:$0xff] }
 0x22e   : > { %3967 = vmatprep.subr.bf16.mxu0 %v8130_v37  ;;  %4049 = vmatprep.subr.bf16.mxu1 %v8132_v57  ;;  %v8244_v37 = vcombine.high %v480_v30, %v488_v31  ;;  %v495_v57 = vld [vmem:[#allocation5 + $0x630] sm:$0xff]  ;;  %v592_v29 = vld [vmem:[#allocation5 + $0x938] sm:$0xff] }
 0x22f   : > { %v8257_v50 = vcombine.low %v495_v57, %v503_v38 }
 0x231   : > { %3968 = vmatpush1.bf16.msra.mxu0 %v8129_v43  ;;  %4050 = vmatpush1.bf16.msra.mxu1 %v8131_v44  ;;  %v8243_v43 = vcombine.low %v480_v30, %v488_v31  ;;  %v8258_v44 = vcombine.high %v495_v57, %v503_v38  ;;  %v600_v30 = vld [vmem:[#allocation5 + $0x978] sm:$0xff]  ;;  %v615_v57 = vld [vmem:[#allocation5 + $0x9f0] sm:$0xff] }
 0x232   : > { %3969 = vmatprep.subr.bf16.mxu0 %v8146_v45  ;;  %4051 = vmatprep.subr.bf16.mxu1 %v8148_v46  ;;  %v8260_v45 = vcombine.high %v496_v40, %v504_v41  ;;  %v511_v46 = vld [vmem:[#allocation5 + $0x6b0] sm:$0xff]  ;;  %v608_v38 = vld [vmem:[#allocation5 + $0x9b8] sm:$0xff] }
 0x233   : > { %v8273_v60 = vcombine.low %v511_v46, %v519_v47 }
 0x235   : > { %3970 = vmatpush1.bf16.msra.mxu0 %v8145_v51  ;;  %4052 = vmatpush1.bf16.msra.mxu1 %v8147_v52  ;;  %v8259_v51 = vcombine.low %v496_v40, %v504_v41  ;;  %v8274_v52 = vcombine.high %v511_v46, %v519_v47  ;;  %v616_v40 = vld [vmem:[#allocation5 + $0x9f8] sm:$0xff] }
 0x236   : > { %3971 = vmatprep.subr.bf16.mxu0 %v8162_v54  ;;  %4053 = vmatprep.subr.bf16.mxu1 %v8164_v55  ;;  %v8276_v54 = vcombine.high %v512_v48, %v520_v49  ;;  %v527_v55 = vld [vmem:[#allocation5 + $0x730] sm:$0xff]  ;;  %v624_v46 = vld [vmem:[#allocation5 + $0xa38] sm:$0xff] }
 0x237   : > { %v8289_v4 = vcombine.low %v527_v55, %v535_v56  ;;  %v632_v47 = vld [vmem:[#allocation5 + $0xa78] sm:$0xff] }
 0x239   : > { %3972 = vmatpush1.bf16.msra.mxu0 %v8161_v61  ;;  %4054 = vmatpush1.bf16.msra.mxu1 %v8163_v62  ;;  %v8275_v61 = vcombine.low %v512_v48, %v520_v49  ;;  %v8290_v62 = vcombine.high %v527_v55, %v535_v56  ;;  %v8371_v49 = vcombine.low %v608_v38, %v616_v40  ;;  %v648_v55 = vld [vmem:[#allocation5 + $0xaf8] sm:$0xff] }
 0x23a   : > { %3973 = vmatprep.subr.bf16.mxu0 %v8178_v63  ;;  %4055 = vmatprep.subr.bf16.mxu1 %v8180_v0  ;;  %v8292_v63 = vcombine.high %v528_v58, %v536_v59  ;;  %v543_v0 = vld [vmem:[#allocation5 + $0x7b0] sm:$0xff] }
 0x23b   : > { %v8305_v13 = vcombine.low %v543_v0, %v551_v1 }
 0x23d   : > { %3974 = vmatpush1.bf16.msra.mxu0 %v8177_v5  ;;  %4056 = vmatpush1.bf16.msra.mxu1 %v8179_v6  ;;  %v8291_v5 = vcombine.low %v528_v58, %v536_v59  ;;  %v8306_v6 = vcombine.high %v543_v0, %v551_v1  ;;  %v8387_v58 = vcombine.low %v624_v46, %v632_v47  ;;  %v664_v0 = vld [vmem:[#allocation5 + $0xb78] sm:$0xff] }
 0x23e   : > { %3975 = vmatprep.subr.bf16.mxu0 %v8194_v7  ;;  %4057 = vmatprep.subr.bf16.mxu1 %v8196_v8  ;;  %v8308_v7 = vcombine.high %v544_v2, %v552_v3  ;;  %v559_v8 = vld [vmem:[#allocation5 + $0x830] sm:$0xff] }
 0x23f   : > { %v8321_v22 = vcombine.low %v559_v8, %v567_v9 }
 0x241   : > { %3976 = vmatpush1.bf16.msra.mxu0 %v8193_v14  ;;  %4058 = vmatpush1.bf16.msra.mxu1 %v8195_v16  ;;  %v8307_v14 = vcombine.low %v544_v2, %v552_v3  ;;  %v8322_v16 = vcombine.high %v559_v8, %v567_v9 }
 0x242   : > { %3977 = vmatprep.subr.bf16.mxu0 %v8210_v17  ;;  %4059 = vmatprep.subr.bf16.mxu1 %v8212_v18  ;;  %v8324_v17 = vcombine.high %v560_v10, %v568_v11  ;;  %v575_v18 = vld [vmem:[#allocation5 + $0x8b0] sm:$0xff] }
 0x243   : > { %v8337_v31 = vcombine.low %v575_v18, %v583_v19 }
 0x245   : > { %3978 = vmatpush1.bf16.msra.mxu0 %v8209_v23  ;;  %4060 = vmatpush1.bf16.msra.mxu1 %v8211_v25  ;;  %v8323_v23 = vcombine.low %v560_v10, %v568_v11  ;;  %v8338_v25 = vcombine.high %v575_v18, %v583_v19  ;;  %v672_v10 = vld [vmem:[#allocation5 + $0xbb8] sm:$0xff] }
 0x246   : > { %3979 = vmatprep.subr.bf16.mxu0 %v8226_v26  ;;  %4061 = vmatprep.subr.bf16.mxu1 %v8228_v27  ;;  %v8340_v26 = vcombine.high %v576_v20, %v584_v21  ;;  %v591_v27 = vld [vmem:[#allocation5 + $0x930] sm:$0xff]  ;;  %v680_v11 = vld [vmem:[#allocation5 + $0xbf8] sm:$0xff] }
 0x247   : > { %v8353_v41 = vcombine.low %v591_v27, %v599_v28 }
 0x249   : > { %3980 = vmatpush1.bf16.msra.mxu0 %v8225_v33  ;;  %4062 = vmatpush1.bf16.msra.mxu1 %v8227_v15  ;;  %v8339_v33 = vcombine.low %v576_v20, %v584_v21  ;;  %v8354_v15 = vcombine.high %v591_v27, %v599_v28  ;;  %v696_v27 = vld [vmem:[#allocation5 + $0xc78] sm:$0xff] }
 0x24a   : > { %3981 = vmatprep.subr.bf16.mxu0 %v8242_v34  ;;  %4063 = vmatprep.subr.bf16.mxu1 %v8244_v37  ;;  %v8356_v34 = vcombine.high %v592_v29, %v600_v30  ;;  %v607_v37 = vld [vmem:[#allocation5 + $0x9b0] sm:$0xff] }
 0x24b   : > { %v8369_v48 = vcombine.low %v607_v37, %v615_v57 }
 0x24d   : > { %3982 = vmatpush1.bf16.msra.mxu0 %v8241_v42  ;;  %4064 = vmatpush1.bf16.msra.mxu1 %v8243_v43  ;;  %v8370_v42 = vcombine.high %v607_v37, %v615_v57  ;;  %v8372_v43 = vcombine.high %v608_v38, %v616_v40  ;;  %v712_v37 = vld [vmem:[#allocation5 + $0xcf8] sm:$0xff] }
 0x24e   : > { %3983 = vmatprep.subr.bf16.mxu0 %v8258_v44  ;;  %4065 = vmatprep.subr.bf16.mxu1 %v8260_v45  ;;  %v623_v44 = vld [vmem:[#allocation5 + $0xa30] sm:$0xff] }
 0x24f   : > { %v631_v45 = vld [vmem:[#allocation5 + $0xa70] sm:$0xff] }
 0x250   : > { %v8385_v56 = vcombine.low %v623_v44, %v631_v45 }
 0x251   : > { %3984 = vmatpush1.bf16.msra.mxu0 %v8257_v50  ;;  %4066 = vmatpush1.bf16.msra.mxu1 %v8259_v51  ;;  %v8386_v50 = vcombine.high %v623_v44, %v631_v45  ;;  %v639_v51 = vld [vmem:[#allocation5 + $0xab0] sm:$0xff]  ;;  %v728_v44 = vld [vmem:[#allocation5 + $0xd78] sm:$0xff] }
 0x252   : > { %3985 = vmatprep.subr.bf16.mxu0 %v8274_v52  ;;  %4067 = vmatprep.subr.bf16.mxu1 %v8276_v54  ;;  %v647_v52 = vld [vmem:[#allocation5 + $0xaf0] sm:$0xff]  ;;  %v640_v54 = vld [vmem:[#allocation5 + $0xab8] sm:$0xff] }
 0x253   : > { %v8402_v59 = vcombine.high %v639_v51, %v647_v52  ;;  %v8401_v1 = vcombine.low %v639_v51, %v647_v52  ;;  %v8403_v2 = vcombine.low %v640_v54, %v648_v55  ;;  %v744_v51 = vld [vmem:[#allocation5 + $0xdf8] sm:$0xff] }
 0x255   : > { %3986 = vmatpush1.bf16.msra.mxu0 %v8273_v60  ;;  %4068 = vmatpush1.bf16.msra.mxu1 %v8275_v61  ;;  %v8404_v60 = vcombine.high %v640_v54, %v648_v55  ;;  %v655_v61 = vld [vmem:[#allocation5 + $0xb30] sm:$0xff] }
 0x256   : > { %3987 = vmatprep.subr.bf16.mxu0 %v8290_v62  ;;  %4069 = vmatprep.subr.bf16.mxu1 %v8292_v63  ;;  %v663_v62 = vld [vmem:[#allocation5 + $0xb70] sm:$0xff]  ;;  %v656_v63 = vld [vmem:[#allocation5 + $0xb38] sm:$0xff] }
 0x257   : > { %v8418_v3 = vcombine.high %v655_v61, %v663_v62  ;;  %v8419_v19 = vcombine.low %v656_v63, %v664_v0 }
 0x259   : > { %3988 = vmatpush1.bf16.msra.mxu0 %v8289_v4  ;;  %4070 = vmatpush1.bf16.msra.mxu1 %v8291_v5  ;;  %v8420_v5 = vcombine.high %v656_v63, %v664_v0 }
 0x25a   : > { %3989 = vmatprep.subr.bf16.mxu0 %v8306_v6  ;;  %4071 = vmatprep.subr.bf16.mxu1 %v8308_v7  ;;  %v671_v6 = vld [vmem:[#allocation5 + $0xbb0] sm:$0xff] }
 0x25b   : > { %v679_v7 = vld [vmem:[#allocation5 + $0xbf0] sm:$0xff] }
 0x25c   : > { %v8434_v20 = vcombine.high %v671_v6, %v679_v7  ;;  %v8433_v28 = vcombine.low %v671_v6, %v679_v7  ;;  %v768_v7 = vld [vmem:[#allocation5 + $0xeb8] sm:$0xff] }
 0x25d   : > { %3990 = vmatpush1.bf16.msra.mxu0 %v8305_v13  ;;  %4072 = vmatpush1.bf16.msra.mxu1 %v8307_v14 }
 0x25e   : > { %4000 = vmatprep.subr.bf16.mxu0 %v8322_v16  ;;  %4082 = vmatprep.subr.bf16.mxu1 %v8324_v17  ;;  %v8417_v16 = vcombine.low %v655_v61, %v663_v62  ;;  %v752_v61 = vld [vmem:[#allocation5 + $0xe38] sm:$0xff] }
 0x25f   : > { %v760_v62 = vld [vmem:[#allocation5 + $0xe78] sm:$0xff] }
 0x260   : > { %3992 = vmatmul.mubr.bf16.vlgmr.msra.gmra.mrb[12].mxu0 %v10556_v12  ;;  %4074 = vmatmul.mubr.bf16.vlgmr.msra.gmra.mrb[12].mxu1 %v10556_v12  ;;  %v8355_v12 = vcombine.low %v592_v29, %v600_v30  ;;  %v8435_v29 = vcombine.low %v672_v10, %v680_v11 }
 0x261   : > { %4001 = vmatpush1.bf16.msra.mxu0 %v8321_v22  ;;  %4083 = vmatpush1.bf16.msra.mxu1 %v8323_v23  ;;  %v8436_v22 = vcombine.high %v672_v10, %v680_v11  ;;  %v687_v23 = vld [vmem:[#allocation5 + $0xc30] sm:$0xff]  ;;  %v776_v10 = vld [vmem:[#allocation5 + $0xef8] sm:$0xff] }
 0x262   : > { %4002 = vmatprep.subr.bf16.mxu0 %v8338_v25  ;;  %4084 = vmatprep.subr.bf16.mxu1 %v8340_v26  ;;  %v695_v25 = vld [vmem:[#allocation5 + $0xc70] sm:$0xff]  ;;  %v688_v26 = vld [vmem:[#allocation5 + $0xc38] sm:$0xff] }
 0x263   : > { %4032 = vmatprep.mubr.bf16.mxu0 %v10563_v53  ;;  %4114 = vmatprep.mubr.bf16.mxu1 %v10563_v53  ;;  %v8388_v53 = vcombine.high %v624_v46, %v632_v47  ;;  %v8450_v30 = vcombine.high %v687_v23, %v695_v25  ;;  %v8449_v57 = vcombine.low %v687_v23, %v695_v25  ;;  %v10618_v23 = vld [vmem:[#allocation7] sm:$0xff] }
 0x264   : > { %v8451_v38 = vcombine.low %v688_v26, %v696_v27 }
 0x265   : > { %4003 = vmatpush1.bf16.msra.mxu0 %v8337_v31  ;;  %4085 = vmatpush1.bf16.msra.mxu1 %v8339_v33  ;;  %v8452_v31 = vcombine.high %v688_v26, %v696_v27  ;;  %v703_v33 = vld [vmem:[#allocation5 + $0xcb0] sm:$0xff]  ;;  %v8531_v26 = vcombine.low %v768_v7, %v776_v10 }
 0x266   : > { %4004 = vmatprep.subr.bf16.mxu0 %v8354_v15  ;;  %4086 = vmatprep.subr.bf16.mxu1 %v8356_v34  ;;  %v711_v15 = vld [vmem:[#allocation5 + $0xcf0] sm:$0xff]  ;;  %v704_v34 = vld [vmem:[#allocation5 + $0xcb8] sm:$0xff] }
 0x267   : > { %v8466_v40 = vcombine.high %v703_v33, %v711_v15  ;;  %v8465_v45 = vcombine.low %v703_v33, %v711_v15  ;;  %v8467_v46 = vcombine.low %v704_v34, %v712_v37  ;;  %v800_v33 = vld [vmem:[#allocation5 + $0xfb8] sm:$0xff] }
 0x268   : > { %v808_v15 = vld [vmem:[#allocation5 + $0xff8] sm:$0xff] }
 0x269   : > { %4005 = vmatpush1.bf16.msra.mxu0 %v8353_v41  ;;  %4087 = vmatpush1.bf16.msra.mxu1 %v8355_v12  ;;  %v8468_v41 = vcombine.high %v704_v34, %v712_v37  ;;  %v719_v12 = vld [vmem:[#allocation5 + $0xd30] sm:$0xff] }
 0x26a   : > { %4006 = vmatprep.subr.bf16.mxu0 %v8370_v42  ;;  %4088 = vmatprep.subr.bf16.mxu1 %v8372_v43  ;;  %v727_v42 = vld [vmem:[#allocation5 + $0xd70] sm:$0xff]  ;;  %v720_v43 = vld [vmem:[#allocation5 + $0xd38] sm:$0xff] }
 0x26b   : > { %v8482_v47 = vcombine.high %v719_v12, %v727_v42  ;;  %v8481_v52 = vcombine.low %v719_v12, %v727_v42  ;;  %v8483_v54 = vcombine.low %v720_v43, %v728_v44  ;;  %v8563_v12 = vcombine.low %v800_v33, %v808_v15  ;;  %v9289_v42 = vld [vmem:[#allocation8 + $0x4] ss:$16 sps:$4 sm:$0xff]  }
 0x26d   : > { %4007 = vmatpush1.bf16.msra.mxu0 %v8369_v48  ;;  %4089 = vmatpush1.bf16.msra.mxu1 %v8371_v49  ;;  %v8484_v48 = vcombine.high %v720_v43, %v728_v44  ;;  %v735_v49 = vld [vmem:[#allocation5 + $0xdb0] sm:$0xff]  ;;  %v9292_v43 = vld [vmem:[#allocation8 + $0xc] ss:$16 sps:$4 sm:$0xff]  }
 0x26e   : > { %4008 = vmatprep.subr.bf16.mxu0 %v8386_v50  ;;  %4090 = vmatprep.subr.bf16.mxu1 %v8388_v53  ;;  %v743_v50 = vld [vmem:[#allocation5 + $0xdf0] sm:$0xff]  ;;  %v736_v53 = vld [vmem:[#allocation5 + $0xdb8] sm:$0xff] }
 0x26f   : > { %v8498_v55 = vcombine.high %v735_v49, %v743_v50  ;;  %v8497_v63 = vcombine.low %v735_v49, %v743_v50  ;;  %v8499_v0 = vcombine.low %v736_v53, %v744_v51  ;;  %v9293_v49 = vld [vmem:[#allocation8 + $0x20] ss:$16 sps:$4 sm:$0xff]   ;;  %v9296_v50 = vld [vmem:[#allocation8 + $0x28] ss:$16 sps:$4 sm:$0xff]  }
 0x271   : > { %4009 = vmatpush1.bf16.msra.mxu0 %v8385_v56  ;;  %4091 = vmatpush1.bf16.msra.mxu1 %v8387_v58  ;;  %v8500_v56 = vcombine.high %v736_v53, %v744_v51  ;;  %v751_v58 = vld [vmem:[#allocation5 + $0xe30] sm:$0xff]  ;;  %v9304_v51 = vld [vmem:[#allocation8 + $0x4c] ss:$16 sps:$4 sm:$0xff]  }
 0x272   : > { %4010 = vmatprep.subr.bf16.mxu0 %v8402_v59  ;;  %4092 = vmatprep.subr.bf16.mxu1 %v8404_v60  ;;  %v759_v59 = vld [vmem:[#allocation5 + $0xe70] sm:$0xff]  ;;  %v813_v60 = vlaneseq }
 0x273   : > { %v10605_v4 = vpop.f32.mrb[4].mxu0  ;;  %v10607_v8 = vpop.f32.mrb[4].mxu1  ;;  %v8513_v11 = vcombine.low %v751_v58, %v759_v59  ;;  %v9301_v53 = vld [vmem:[#allocation8 + $0x44] ss:$16 sps:$4 sm:$0xff]  }
 0x274   : > { %v10609_v9 = vpop.f32.mrb[5].mxu0  ;;  %v10611_v13 = vpop.f32.mrb[5].mxu1  ;;  %v10613_v6 = vshrl.u32 %v813_v60, 7  ;;  %v9316_v60 = vld [vmem:[#allocation8 + $0x8c] ss:$16 sps:$4 sm:$0xff]  }
 0x275   : > { %v3710_v14 = vpop.f32.mrb[6].mxu0  ;;  %4011 = vmatpush1.bf16.msra.mxu0 %v8401_v1  ;;  %v3792_v17 = vpop.f32.mrb[6].mxu1  ;;  %4093 = vmatpush1.bf16.msra.mxu1 %v8403_v2  ;;  %v8514_v1 = vcombine.high %v751_v58, %v759_v59  ;;  %v8516_v2 = vcombine.high %v752_v61, %v760_v62  ;;  %v9308_v58 = vld [vmem:[#allocation8 + $0x68] ss:$16 sps:$4 sm:$0xff]   ;;  %v9313_v59 = vld [vmem:[#allocation8 + $0x84] ss:$16 sps:$4 sm:$0xff]  }
 0x276   : > { %v3711_v18 = vpop.f32.mrb[7].mxu0  ;;  %4012 = vmatprep.subr.bf16.mxu0 %v8418_v3  ;;  %v3793_v21 = vpop.f32.mrb[7].mxu1  ;;  %4094 = vmatprep.subr.bf16.mxu1 %v8420_v5  ;;  %v767_v3 = vld [vmem:[#allocation5 + $0xeb0] sm:$0xff]  ;;  %v8515_v14 = vcombine.low %v752_v61, %v760_v62  ;;  %v8532_v17 = vcombine.high %v768_v7, %v776_v10  ;;  %v9314_v62 = vld [vmem:[#allocation8 + $0x88] ss:$16 sps:$4 sm:$0xff]  }
 0x277   : > { %v775_v5 = vld [vmem:[#allocation5 + $0xef0] sm:$0xff]  ;;  %v784_v21 = vld [vmem:[#allocation5 + $0xf38] sm:$0xff] }
 0x278   : > { %v783_v18 = vld [vmem:[#allocation5 + $0xf30] sm:$0xff]  ;;  %v8529_v25 = vcombine.low %v767_v3, %v775_v5  ;;  %v9326_v10 = vld [vmem:[#allocation8 + $0xc8] ss:$16 sps:$4 sm:$0xff]  }
 0x279   : > { %4013 = vmatpush1.bf16.msra.mxu0 %v8417_v16  ;;  %4095 = vmatpush1.bf16.msra.mxu1 %v8419_v19  ;;  %v8530_v16 = vcombine.high %v767_v3, %v775_v5  ;;  %v791_v19 = vld [vmem:[#allocation5 + $0xf70] sm:$0xff]  ;;  %v9328_v5 = vld [vmem:[#allocation8 + $0xcc] ss:$16 sps:$4 sm:$0xff]  }
 0x27a   : > { %4014 = vmatprep.subr.bf16.mxu0 %v8434_v20  ;;  %4096 = vmatprep.subr.bf16.mxu1 %v8436_v22  ;;  %v10616_v20 = vsub.s32 1, %v10613_v6  ;;  %v792_v22 = vld [vmem:[#allocation5 + $0xf78] sm:$0xff]  ;;  %v8546_v27 = vcombine.high %v783_v18, %v791_v19  ;;  %v8545_v34 = vcombine.low %v783_v18, %v791_v19  ;;  %v9311_v61 = vld [vmem:[#allocation8 + $0x80] ss:$16 sps:$4 sm:$0xff]   ;;  %v9325_v3 = vld [vmem:[#allocation8 + $0xc4] ss:$16 sps:$4 sm:$0xff]  }
 0x27b   : > { %v8547_v37 = vcombine.low %v784_v21, %v792_v22  ;;  %v9323_v7 = vld [vmem:[#allocation8 + $0xc0] ss:$16 sps:$4 sm:$0xff]   ;;  %v9337_v18 = vld [vmem:[#allocation8 + $0x104] ss:$16 sps:$4 sm:$0xff]   ;;  %v9340_v19 = vld [vmem:[#allocation8 + $0x10c] ss:$16 sps:$4 sm:$0xff]  }
 0x27d   : > { %4015 = vmatpush1.bf16.msra.mxu0 %v8433_v28  ;;  %4097 = vmatpush1.bf16.msra.mxu1 %v8435_v29  ;;  %v8548_v28 = vcombine.high %v784_v21, %v792_v22  ;;  %v799_v29 = vld [vmem:[#allocation5 + $0xfb0] sm:$0xff]  ;;  %v9338_v22 = vld [vmem:[#allocation8 + $0x108] ss:$16 sps:$4 sm:$0xff]  }
 0x27e   : > { %4016 = vmatprep.subr.bf16.mxu0 %v8450_v30  ;;  %4098 = vmatprep.subr.bf16.mxu1 %v8452_v31  ;;  %v807_v30 = vld [vmem:[#allocation5 + $0xff0] sm:$0xff]  ;;  %v820_v31 = vrot.slane %v10618_v23, %v10616_v20 }
 0x27f   : > { %v9335_v21 = vld [vmem:[#allocation8 + $0x100] ss:$16 sps:$4 sm:$0xff]  }
 0x281   : > { %4017 = vmatpush1.bf16.msra.mxu0 %v8449_v57  ;;  %4099 = vmatpush1.bf16.msra.mxu1 %v8451_v38  ;;  %v8562_v57 = vcombine.high %v799_v29, %v807_v30  ;;  %v8564_v38 = vcombine.high %v800_v33, %v808_v15  ;;  %v9350_v33 = vld [vmem:[#allocation8 + $0x148] ss:$16 sps:$4 sm:$0xff]   ;;  %v9355_v15 = vld [vmem:[#allocation8 + $0x164] ss:$16 sps:$4 sm:$0xff]  }
 0x282   : > { %4018 = vmatprep.subr.bf16.mxu0 %v8466_v40  ;;  %4100 = vmatprep.subr.bf16.mxu1 %v8468_v41  ;;  %v9085_v40 = vadd.f32 %v10593_v36, %v820_v31  ;;  %v8561_v41 = vcombine.low %v799_v29, %v807_v30  ;;  %v9298_v36 = vld [vmem:[#allocation8 + $0x2c] ss:$16 sps:$4 sm:$0xff]   ;;  %v9349_v29 = vld [vmem:[#allocation8 + $0x144] ss:$16 sps:$4 sm:$0xff]   ;;  %v9347_v31 = vld [vmem:[#allocation8 + $0x140] ss:$16 sps:$4 sm:$0xff]  }
 0x283   : > { %v9352_v30 = vld [vmem:[#allocation8 + $0x14c] ss:$16 sps:$4 sm:$0xff]  }
 0x284   : > { %v4124_v44 = vmax.f32 %v9085_v40, 0.0  ;;  %v9364_v40 = vld [vmem:[#allocation8 + $0x18c] ss:$16 sps:$4 sm:$0xff]  }
 0x285   : > { %4019 = vmatpush1.bf16.msra.mxu0 %v8465_v45  ;;  %4101 = vmatpush1.bf16.msra.mxu1 %v8467_v46  ;;  %v9287_v45 = vld [vmem:[#allocation8] ss:$16 sps:$4 sm:$0xff]   ;;  %v9290_v46 = vld [vmem:[#allocation8 + $0x8] ss:$16 sps:$4 sm:$0xff]  }
 0x286   : > { %4020 = vmatprep.subr.bf16.mxu0 %v8482_v47  ;;  %4102 = vmatprep.subr.bf16.mxu1 %v8484_v48  ;;  %v9295_v47 = vld [vmem:[#allocation8 + $0x24] ss:$16 sps:$4 sm:$0xff]   ;;  %v4140_v48 = vpack.c.bf16 %v4124_v44, %v4124_v44  ;;  %v9370_v44 = vld [vmem:[#allocation8 + $0x1ac] ss:$16 sps:$4 sm:$0xff]  }
 0x289   : > { %4021 = vmatpush1.bf16.msra.mxu0 %v8481_v52  ;;  %4103 = vmatpush1.bf16.msra.mxu1 %v8483_v54  ;;  %v9299_v52 = vld [vmem:[#allocation8 + $0x40] ss:$16 sps:$4 sm:$0xff]   ;;  %v9302_v54 = vld [vmem:[#allocation8 + $0x48] ss:$16 sps:$4 sm:$0xff]  }
 0x28a   : > { %4022 = vmatprep.subr.bf16.mxu0 %v8498_v55  ;;  %4104 = vmatprep.subr.bf16.mxu1 %v8500_v56  ;;  %v9307_v55 = vld [vmem:[#allocation8 + $0x64] ss:$16 sps:$4 sm:$0xff]   ;;  %v9310_v56 = vld [vmem:[#allocation8 + $0x6c] ss:$16 sps:$4 sm:$0xff]  }
 0x28d   : > { %4023 = vmatpush1.bf16.msra.mxu0 %v8497_v63  ;;  %4105 = vmatpush1.bf16.msra.mxu1 %v8499_v0  ;;  %v9319_v63 = vld [vmem:[#allocation8 + $0xa4] ss:$16 sps:$4 sm:$0xff]   ;;  %v9322_v0 = vld [vmem:[#allocation8 + $0xac] ss:$16 sps:$4 sm:$0xff]  }
 0x28e   : > { %4024 = vmatprep.subr.bf16.mxu0 %v8514_v1  ;;  %4106 = vmatprep.subr.bf16.mxu1 %v8516_v2  ;;  %v9317_v1 = vld [vmem:[#allocation8 + $0xa0] ss:$16 sps:$4 sm:$0xff]   ;;  %v9320_v2 = vld [vmem:[#allocation8 + $0xa8] ss:$16 sps:$4 sm:$0xff]  }
 0x291   : > { %4025 = vmatpush1.bf16.msra.mxu0 %v8513_v11  ;;  %4107 = vmatpush1.bf16.msra.mxu1 %v8515_v14  ;;  %v9331_v11 = vld [vmem:[#allocation8 + $0xe4] ss:$16 sps:$4 sm:$0xff]   ;;  %v9334_v14 = vld [vmem:[#allocation8 + $0xec] ss:$16 sps:$4 sm:$0xff]  }
 0x292   : > { %4026 = vmatprep.subr.bf16.mxu0 %v8530_v16  ;;  %4108 = vmatprep.subr.bf16.mxu1 %v8532_v17  ;;  %v9329_v16 = vld [vmem:[#allocation8 + $0xe0] ss:$16 sps:$4 sm:$0xff]   ;;  %v9332_v17 = vld [vmem:[#allocation8 + $0xe8] ss:$16 sps:$4 sm:$0xff]  }
 0x295   : > { %4027 = vmatpush1.bf16.msra.mxu0 %v8529_v25  ;;  %4109 = vmatpush1.bf16.msra.mxu1 %v8531_v26  ;;  %v9343_v25 = vld [vmem:[#allocation8 + $0x124] ss:$16 sps:$4 sm:$0xff]   ;;  %v9346_v26 = vld [vmem:[#allocation8 + $0x12c] ss:$16 sps:$4 sm:$0xff]  }
 0x296   : > { %4028 = vmatprep.subr.bf16.mxu0 %v8546_v27  ;;  %4110 = vmatprep.subr.bf16.mxu1 %v8548_v28  ;;  %v9341_v27 = vld [vmem:[#allocation8 + $0x120] ss:$16 sps:$4 sm:$0xff]   ;;  %v9344_v28 = vld [vmem:[#allocation8 + $0x128] ss:$16 sps:$4 sm:$0xff]  }
 0x299   : > { %4029 = vmatpush1.bf16.msra.mxu0 %v8545_v34  ;;  %4111 = vmatpush1.bf16.msra.mxu1 %v8547_v37  ;;  %v9358_v34 = vld [vmem:[#allocation8 + $0x16c] ss:$16 sps:$4 sm:$0xff]   ;;  %v9353_v37 = vld [vmem:[#allocation8 + $0x160] ss:$16 sps:$4 sm:$0xff]  }
 0x29a   : > { %4030 = vmatprep.subr.bf16.mxu0 %v8562_v57  ;;  %4112 = vmatprep.subr.bf16.mxu1 %v8564_v38  ;;  %v9356_v57 = vld [vmem:[#allocation8 + $0x168] ss:$16 sps:$4 sm:$0xff]   ;;  %v9361_v38 = vld [vmem:[#allocation8 + $0x184] ss:$16 sps:$4 sm:$0xff]  }
 0x29d   : > { %4031 = vmatpush1.bf16.msra.mxu0 %v8561_v41  ;;  %4113 = vmatpush1.bf16.msra.mxu1 %v8563_v12  ;;  %v9359_v41 = vld [vmem:[#allocation8 + $0x180] ss:$16 sps:$4 sm:$0xff]   ;;  %v10626_v12 = vsub.s32 0, %v10613_v6 }
 0x29e   : > { %7249 = vmatprep.subr.bf16.mxu0 %v9289_v42  ;;  %7577 = vmatprep.subr.bf16.mxu1 %v9292_v43  ;;  %v9362_v42 = vld [vmem:[#allocation8 + $0x188] ss:$16 sps:$4 sm:$0xff]   ;;  %v9367_v43 = vld [vmem:[#allocation8 + $0x1a4] ss:$16 sps:$4 sm:$0xff]  }
 0x2a0   : > { %4033 = vmatmul.mubr.bf16.vlgmr.msra.gmra.mrb[12].mxu0 %v10571_v24  ;;  %4115 = vmatmul.mubr.bf16.vlgmr.msra.gmra.mrb[12].mxu1 %v10571_v24  ;;  %v9305_v24 = vld [vmem:[#allocation8 + $0x60] ss:$16 sps:$4 sm:$0xff]  }
 0x2a1   : > { %7250 = vmatpush1.bf16.msra.mxu0 %v9287_v45  ;;  %7281 = vmatprep.mubr.bf16.mxu0 %v4140_v48  ;;  %v10629_v45 = vsub.s32 3, %v10613_v6 }
 0x2a2   : > { %7578 = vmatpush1.bf16.msra.mxu1 %v9290_v46  ;;  %7609 = vmatprep.mubr.bf16.mxu1 %v4140_v48  ;;  %v9365_v46 = vld [vmem:[#allocation8 + $0x1a0] ss:$16 sps:$4 sm:$0xff]   ;;  %v9368_v48 = vld [vmem:[#allocation8 + $0x1a8] ss:$16 sps:$4 sm:$0xff]  }
 0x2a3   : > { %7251 = vmatprep.subr.bf16.mxu0 %v9295_v47  ;;  %7579 = vmatprep.subr.bf16.mxu1 %v9298_v36  ;;  %v816_v47 = vrot.slane %v10618_v23, %v10626_v12  ;;  %v9373_v36 = vld [vmem:[#allocation8 + $0x1c4] ss:$16 sps:$4 sm:$0xff]  }
 0x2a5   : > { %7252 = vmatpush1.bf16.msra.mxu0 %v9293_v49  ;;  %v9376_v49 = vld [vmem:[#allocation8 + $0x1cc] ss:$16 sps:$4 sm:$0xff]  }
 0x2a6   : > { %7580 = vmatpush1.bf16.msra.mxu1 %v9296_v50  ;;  %7253 = vmatprep.subr.bf16.mxu0 %v9301_v53  ;;  %v828_v50 = vrot.slane %v10618_v23, %v10629_v45  ;;  %v9371_v53 = vld [vmem:[#allocation8 + $0x1c0] ss:$16 sps:$4 sm:$0xff]  }
 0x2a7   : > { %7581 = vmatprep.subr.bf16.mxu1 %v9304_v51  ;;  %v9084_v51 = vadd.f32 %v10589_v32, %v816_v47  ;;  %v9383_v32 = vld [vmem:[#allocation8 + $0x200] ss:$16 sps:$4 sm:$0xff]   ;;  %v9430_v47 = vld [vmem:[#allocation8 + $0x2ec] ss:$16 sps:$4 sm:$0xff]  }
 0x2a9   : > { %7254 = vmatpush1.bf16.msra.mxu0 %v9299_v52  ;;  %v9374_v52 = vld [vmem:[#allocation8 + $0x1c8] ss:$16 sps:$4 sm:$0xff]  }
 0x2aa   : > { %7582 = vmatpush1.bf16.msra.mxu1 %v9302_v54  ;;  %7255 = vmatprep.subr.bf16.mxu0 %v9307_v55  ;;  %v9379_v54 = vld [vmem:[#allocation8 + $0x1e4] ss:$16 sps:$4 sm:$0xff]   ;;  %v9382_v55 = vld [vmem:[#allocation8 + $0x1ec] ss:$16 sps:$4 sm:$0xff]  }
 0x2ab   : > { %7583 = vmatprep.subr.bf16.mxu1 %v9310_v56  ;;  %v9087_v56 = vadd.f32 %v10595_v39, %v828_v50  ;;  %v9394_v39 = vld [vmem:[#allocation8 + $0x22c] ss:$16 sps:$4 sm:$0xff]  }
 0x2ac   : > { %v9436_v50 = vld [vmem:[#allocation8 + $0x30c] ss:$16 sps:$4 sm:$0xff]  }
 0x2ad   : > { %7256 = vmatpush1.bf16.msra.mxu0 %v9305_v24  ;;  %v9377_v24 = vld [vmem:[#allocation8 + $0x1e0] ss:$16 sps:$4 sm:$0xff]  }
 0x2ae   : > { %7584 = vmatpush1.bf16.msra.mxu1 %v9308_v58  ;;  %7257 = vmatprep.subr.bf16.mxu0 %v9313_v59  ;;  %v4123_v58 = vmax.f32 %v9084_v51, 0.0  ;;  %v9380_v59 = vld [vmem:[#allocation8 + $0x1e8] ss:$16 sps:$4 sm:$0xff]  }
 0x2af   : > { %7585 = vmatprep.subr.bf16.mxu1 %v9316_v60  ;;  %v9385_v60 = vld [vmem:[#allocation8 + $0x204] ss:$16 sps:$4 sm:$0xff]   ;;  %v9434_v51 = vld [vmem:[#allocation8 + $0x308] ss:$16 sps:$4 sm:$0xff]  }
 0x2b1   : > { %7258 = vmatpush1.bf16.msra.mxu0 %v9311_v61  ;;  %v9388_v61 = vld [vmem:[#allocation8 + $0x20c] ss:$16 sps:$4 sm:$0xff]  }
 0x2b2   : > { %7586 = vmatpush1.bf16.msra.mxu1 %v9314_v62  ;;  %7259 = vmatprep.subr.bf16.mxu0 %v9319_v63  ;;  %v4126_v62 = vmax.f32 %v9087_v56, 0.0  ;;  %v4139_v63 = vpack.c.bf16 %v4123_v58, %v4123_v58  ;;  %v9440_v56 = vld [vmem:[#allocation8 + $0x328] ss:$16 sps:$4 sm:$0xff]   ;;  %v9448_v58 = vld [vmem:[#allocation8 + $0x34c] ss:$16 sps:$4 sm:$0xff]  }
 0x2b3   : > { %7587 = vmatprep.subr.bf16.mxu1 %v9322_v0  ;;  %v9386_v0 = vld [vmem:[#allocation8 + $0x208] ss:$16 sps:$4 sm:$0xff]  }
 0x2b5   : > { %7260 = vmatpush1.bf16.msra.mxu0 %v9317_v1  ;;  %v9391_v1 = vld [vmem:[#allocation8 + $0x224] ss:$16 sps:$4 sm:$0xff]  }
 0x2b6   : > { %7588 = vmatpush1.bf16.msra.mxu1 %v9320_v2  ;;  %7261 = vmatprep.subr.bf16.mxu0 %v9325_v3  ;;  %v4142_v2 = vpack.c.bf16 %v4126_v62, %v4126_v62  ;;  %v9389_v3 = vld [vmem:[#allocation8 + $0x220] ss:$16 sps:$4 sm:$0xff]   ;;  %v9454_v62 = vld [vmem:[#allocation8 + $0x36c] ss:$16 sps:$4 sm:$0xff]  }
 0x2b7   : > { %7589 = vmatprep.subr.bf16.mxu1 %v9328_v5  ;;  %v9392_v5 = vld [vmem:[#allocation8 + $0x228] ss:$16 sps:$4 sm:$0xff]  }
 0x2b9   : > { %7262 = vmatpush1.bf16.msra.mxu0 %v9323_v7  ;;  %v9397_v7 = vld [vmem:[#allocation8 + $0x244] ss:$16 sps:$4 sm:$0xff]  }
 0x2ba   : > { %7590 = vmatpush1.bf16.msra.mxu1 %v9326_v10  ;;  %7263 = vmatprep.subr.bf16.mxu0 %v9331_v11  ;;  %v9400_v10 = vld [vmem:[#allocation8 + $0x24c] ss:$16 sps:$4 sm:$0xff]   ;;  %v9395_v11 = vld [vmem:[#allocation8 + $0x240] ss:$16 sps:$4 sm:$0xff]  }
 0x2bb   : > { %7591 = vmatprep.subr.bf16.mxu1 %v9334_v14  ;;  %v9398_v14 = vld [vmem:[#allocation8 + $0x248] ss:$16 sps:$4 sm:$0xff]  }
 0x2bd   : > { %7264 = vmatpush1.bf16.msra.mxu0 %v9329_v16  ;;  %v9403_v16 = vld [vmem:[#allocation8 + $0x264] ss:$16 sps:$4 sm:$0xff]  }
 0x2be   : > { %7592 = vmatpush1.bf16.msra.mxu1 %v9332_v17  ;;  %7265 = vmatprep.subr.bf16.mxu0 %v9337_v18  ;;  %v9406_v17 = vld [vmem:[#allocation8 + $0x26c] ss:$16 sps:$4 sm:$0xff]   ;;  %v9401_v18 = vld [vmem:[#allocation8 + $0x260] ss:$16 sps:$4 sm:$0xff]  }
 0x2bf   : > { %7593 = vmatprep.subr.bf16.mxu1 %v9340_v19  ;;  %v9404_v19 = vld [vmem:[#allocation8 + $0x268] ss:$16 sps:$4 sm:$0xff]  }
 0x2c1   : > { %7266 = vmatpush1.bf16.msra.mxu0 %v9335_v21  ;;  %v9409_v21 = vld [vmem:[#allocation8 + $0x284] ss:$16 sps:$4 sm:$0xff]  }
 0x2c2   : > { %7594 = vmatpush1.bf16.msra.mxu1 %v9338_v22  ;;  %7267 = vmatprep.subr.bf16.mxu0 %v9343_v25  ;;  %v9412_v22 = vld [vmem:[#allocation8 + $0x28c] ss:$16 sps:$4 sm:$0xff]   ;;  %v9407_v25 = vld [vmem:[#allocation8 + $0x280] ss:$16 sps:$4 sm:$0xff]  }
 0x2c3   : > { %7595 = vmatprep.subr.bf16.mxu1 %v9346_v26  ;;  %v9410_v26 = vld [vmem:[#allocation8 + $0x288] ss:$16 sps:$4 sm:$0xff]  }
 0x2c5   : > { %7268 = vmatpush1.bf16.msra.mxu0 %v9341_v27  ;;  %v9415_v27 = vld [vmem:[#allocation8 + $0x2a4] ss:$16 sps:$4 sm:$0xff]  }
 0x2c6   : > { %7596 = vmatpush1.bf16.msra.mxu1 %v9344_v28  ;;  %7269 = vmatprep.subr.bf16.mxu0 %v9349_v29  ;;  %v9418_v28 = vld [vmem:[#allocation8 + $0x2ac] ss:$16 sps:$4 sm:$0xff]   ;;  %v9413_v29 = vld [vmem:[#allocation8 + $0x2a0] ss:$16 sps:$4 sm:$0xff]  }
 0x2c7   : > { %7597 = vmatprep.subr.bf16.mxu1 %v9352_v30  ;;  %v9416_v30 = vld [vmem:[#allocation8 + $0x2a8] ss:$16 sps:$4 sm:$0xff]  }
 0x2c9   : > { %7270 = vmatpush1.bf16.msra.mxu0 %v9347_v31  ;;  %v9421_v31 = vld [vmem:[#allocation8 + $0x2c4] ss:$16 sps:$4 sm:$0xff]  }
 0x2ca   : > { %7598 = vmatpush1.bf16.msra.mxu1 %v9350_v33  ;;  %7271 = vmatprep.subr.bf16.mxu0 %v9355_v15  ;;  %v9424_v15 = vld [vmem:[#allocation8 + $0x2cc] ss:$16 sps:$4 sm:$0xff]  }
 0x2cb   : > { %7599 = vmatprep.subr.bf16.mxu1 %v9358_v34 }
 0x2cd   : > { %7272 = vmatpush1.bf16.msra.mxu0 %v9353_v37 }
 0x2ce   : > { %7600 = vmatpush1.bf16.msra.mxu1 %v9356_v57  ;;  %7273 = vmatprep.subr.bf16.mxu0 %v9361_v38 }
 0x2cf   : > { %7601 = vmatprep.subr.bf16.mxu1 %v9364_v40  ;;  %v9419_v40 = vld [vmem:[#allocation8 + $0x2c0] ss:$16 sps:$4 sm:$0xff]  }
 0x2d1   : > { %7274 = vmatpush1.bf16.msra.mxu0 %v9359_v41 }
 0x2d2   : > { %7602 = vmatpush1.bf16.msra.mxu1 %v9362_v42  ;;  %7275 = vmatprep.subr.bf16.mxu0 %v9367_v43  ;;  %v9422_v43 = vld [vmem:[#allocation8 + $0x2c8] ss:$16 sps:$4 sm:$0xff]  }
 0x2d3   : > { %7603 = vmatprep.subr.bf16.mxu1 %v9370_v44  ;;  %v9427_v44 = vld [vmem:[#allocation8 + $0x2e4] ss:$16 sps:$4 sm:$0xff]  }
 0x2d5   : > { %7276 = vmatpush1.bf16.msra.mxu0 %v9365_v46 }
 0x2d6   : > { %7604 = vmatpush1.bf16.msra.mxu1 %v9368_v48  ;;  %7277 = vmatprep.subr.bf16.mxu0 %v9373_v36  ;;  %v9425_v48 = vld [vmem:[#allocation8 + $0x2e0] ss:$16 sps:$4 sm:$0xff]   ;;  %v9428_v36 = vld [vmem:[#allocation8 + $0x2e8] ss:$16 sps:$4 sm:$0xff]  }
 0x2d7   : > { %7605 = vmatprep.subr.bf16.mxu1 %v9376_v49  ;;  %v9433_v49 = vld [vmem:[#allocation8 + $0x304] ss:$16 sps:$4 sm:$0xff]  }
 0x2d9   : > { %7278 = vmatpush1.bf16.msra.mxu0 %v9371_v53  ;;  %v9431_v53 = vld [vmem:[#allocation8 + $0x300] ss:$16 sps:$4 sm:$0xff]  }
 0x2da   : > { %7606 = vmatpush1.bf16.msra.mxu1 %v9374_v52  ;;  %7279 = vmatprep.subr.bf16.mxu0 %v9379_v54  ;;  %v9439_v52 = vld [vmem:[#allocation8 + $0x324] ss:$16 sps:$4 sm:$0xff]   ;;  %v9442_v54 = vld [vmem:[#allocation8 + $0x32c] ss:$16 sps:$4 sm:$0xff]  }
 0x2db   : > { %7607 = vmatprep.subr.bf16.mxu1 %v9382_v55  ;;  %v9437_v55 = vld [vmem:[#allocation8 + $0x320] ss:$16 sps:$4 sm:$0xff]  }
 0x2dd   : > { %7280 = vmatpush1.bf16.msra.mxu0 %v9377_v24  ;;  %v9445_v24 = vld [vmem:[#allocation8 + $0x344] ss:$16 sps:$4 sm:$0xff]  }
 0x2de   : > { %7608 = vmatpush1.bf16.msra.mxu1 %v9380_v59  ;;  %7290 = vmatprep.subr.bf16.mxu0 %v9385_v60  ;;  %v9443_v59 = vld [vmem:[#allocation8 + $0x340] ss:$16 sps:$4 sm:$0xff]   ;;  %v9446_v60 = vld [vmem:[#allocation8 + $0x348] ss:$16 sps:$4 sm:$0xff]  }
 0x2df   : > { %7618 = vmatprep.subr.bf16.mxu1 %v9388_v61  ;;  %v9451_v61 = vld [vmem:[#allocation8 + $0x364] ss:$16 sps:$4 sm:$0xff]  }
 0x2e0   : > { %7282 = vmatmul.mubr.bf16.vlgmr.msra.gmra.mrb[16].mxu0 %v4139_v63 }
 0x2e1   : > { %7610 = vmatmul.mubr.bf16.vlgmr.msra.gmra.mrb[16].mxu1 %v4139_v63  ;;  %7291 = vmatpush1.bf16.msra.mxu0 %v9383_v32  ;;  %v9449_v32 = vld [vmem:[#allocation8 + $0x360] ss:$16 sps:$4 sm:$0xff]   ;;  %v9452_v63 = vld [vmem:[#allocation8 + $0x368] ss:$16 sps:$4 sm:$0xff]  }
 0x2e2   : > { %7322 = vmatprep.mubr.bf16.mxu0 %v4142_v2  ;;  %7619 = vmatpush1.bf16.msra.mxu1 %v9386_v0  ;;  %v9457_v0 = vld [vmem:[#allocation8 + $0x384] ss:$16 sps:$4 sm:$0xff]  }
 0x2e3   : > { %7650 = vmatprep.mubr.bf16.mxu1 %v4142_v2  ;;  %7292 = vmatprep.subr.bf16.mxu0 %v9391_v1  ;;  %v9460_v1 = vld [vmem:[#allocation8 + $0x38c] ss:$16 sps:$4 sm:$0xff]   ;;  %v9455_v2 = vld [vmem:[#allocation8 + $0x380] ss:$16 sps:$4 sm:$0xff]  }
 0x2e4   : > { %7620 = vmatprep.subr.bf16.mxu1 %v9394_v39  ;;  %v10646_v39 = vsub.s32 2, %v10613_v6 }
 0x2e5   : > { %7293 = vmatpush1.bf16.msra.mxu0 %v9389_v3  ;;  %v9458_v3 = vld [vmem:[#allocation8 + $0x388] ss:$16 sps:$4 sm:$0xff]  }
 0x2e6   : > { %7621 = vmatpush1.bf16.msra.mxu1 %v9392_v5  ;;  %7294 = vmatprep.subr.bf16.mxu0 %v9397_v7  ;;  %v9463_v5 = vld [vmem:[#allocation8 + $0x3a4] ss:$16 sps:$4 sm:$0xff]   ;;  %v9466_v7 = vld [vmem:[#allocation8 + $0x3ac] ss:$16 sps:$4 sm:$0xff]  }
 0x2e7   : > { %7622 = vmatprep.subr.bf16.mxu1 %v9400_v10  ;;  %v835_v10 = vsub.s32 5, %v10613_v6 }
 0x2e9   : > { %7295 = vmatpush1.bf16.msra.mxu0 %v9395_v11  ;;  %v9461_v11 = vld [vmem:[#allocation8 + $0x3a0] ss:$16 sps:$4 sm:$0xff]  }
 0x2ea   : > { %7623 = vmatpush1.bf16.msra.mxu1 %v9398_v14  ;;  %7296 = vmatprep.subr.bf16.mxu0 %v9403_v16  ;;  %v824_v14 = vrot.slane %v10618_v23, %v10646_v39  ;;  %v9464_v16 = vld [vmem:[#allocation8 + $0x3a8] ss:$16 sps:$4 sm:$0xff]  }
 0x2eb   : > { %7624 = vmatprep.subr.bf16.mxu1 %v9406_v17  ;;  %v9469_v17 = vld [vmem:[#allocation8 + $0x3c4] ss:$16 sps:$4 sm:$0xff]  }
 0x2ed   : > { %7297 = vmatpush1.bf16.msra.mxu0 %v9401_v18  ;;  %v9472_v18 = vld [vmem:[#allocation8 + $0x3cc] ss:$16 sps:$4 sm:$0xff]  }
 0x2ee   : > { %7625 = vmatpush1.bf16.msra.mxu1 %v9404_v19  ;;  %7298 = vmatprep.subr.bf16.mxu0 %v9409_v21  ;;  %v836_v19 = vrot.slane %v10618_v23, %v835_v10  ;;  %v9467_v21 = vld [vmem:[#allocation8 + $0x3c0] ss:$16 sps:$4 sm:$0xff]  }
 0x2ef   : > { %7626 = vmatprep.subr.bf16.mxu1 %v9412_v22  ;;  %v9086_v22 = vadd.f32 %v10591_v35, %v824_v14  ;;  %v9479_v35 = vld [vmem:[#allocation8 + $0x400] ss:$16 sps:$4 sm:$0xff]   ;;  %v9532_v14 = vld [vmem:[#allocation8 + $0x50c] ss:$16 sps:$4 sm:$0xff]  }
 0x2f1   : > { %7299 = vmatpush1.bf16.msra.mxu0 %v9407_v25  ;;  %v9470_v25 = vld [vmem:[#allocation8 + $0x3c8] ss:$16 sps:$4 sm:$0xff]  }
 0x2f2   : > { %7627 = vmatpush1.bf16.msra.mxu1 %v9410_v26  ;;  %7300 = vmatprep.subr.bf16.mxu0 %v9415_v27  ;;  %v9475_v26 = vld [vmem:[#allocation8 + $0x3e4] ss:$16 sps:$4 sm:$0xff]   ;;  %v9478_v27 = vld [vmem:[#allocation8 + $0x3ec] ss:$16 sps:$4 sm:$0xff]  }
 0x2f3   : > { %v10637_v33 = vpop.f32.mrb[8].mxu0  ;;  %7628 = vmatprep.subr.bf16.mxu1 %v9418_v28  ;;  %v10639_v34 = vpop.f32.mrb[8].mxu1  ;;  %v9089_v28 = vadd.f32 %v10609_v9, %v836_v19  ;;  %v9490_v9 = vld [vmem:[#allocation8 + $0x42c] ss:$16 sps:$4 sm:$0xff]  }
 0x2f4   : > { %v10641_v37 = vpop.f32.mrb[9].mxu0  ;;  %v10643_v57 = vpop.f32.mrb[9].mxu1  ;;  %v9538_v19 = vld [vmem:[#allocation8 + $0x52c] ss:$16 sps:$4 sm:$0xff]  }
 0x2f5   : > { %v3874_v38 = vpop.f32.mrb[10].mxu0  ;;  %7301 = vmatpush1.bf16.msra.mxu0 %v9413_v29  ;;  %v3956_v41 = vpop.f32.mrb[10].mxu1  ;;  %v9473_v29 = vld [vmem:[#allocation8 + $0x3e0] ss:$16 sps:$4 sm:$0xff]  }
 0x2f6   : > { %7629 = vmatpush1.bf16.msra.mxu1 %v9416_v30  ;;  %v3875_v42 = vpop.f32.mrb[11].mxu0  ;;  %7302 = vmatprep.subr.bf16.mxu0 %v9421_v31  ;;  %v3957_v46 = vpop.f32.mrb[11].mxu1  ;;  %v4125_v30 = vmax.f32 %v9086_v22, 0.0  ;;  %v9476_v31 = vld [vmem:[#allocation8 + $0x3e8] ss:$16 sps:$4 sm:$0xff]  }
 0x2f7   : > { %7630 = vmatprep.subr.bf16.mxu1 %v9424_v15  ;;  %v9481_v15 = vld [vmem:[#allocation8 + $0x404] ss:$16 sps:$4 sm:$0xff]   ;;  %v9484_v38 = vld [vmem:[#allocation8 + $0x40c] ss:$16 sps:$4 sm:$0xff]   ;;  %v9482_v42 = vld [vmem:[#allocation8 + $0x408] ss:$16 sps:$4 sm:$0xff]  }
 0x2f8   : > { %v4141_v41 = vpack.c.bf16 %v4125_v30, %v4125_v30  ;;  %v9485_v46 = vld [vmem:[#allocation8 + $0x420] ss:$16 sps:$4 sm:$0xff]   ;;  %v9536_v22 = vld [vmem:[#allocation8 + $0x528] ss:$16 sps:$4 sm:$0xff]   ;;  %v9550_v30 = vld [vmem:[#allocation8 + $0x56c] ss:$16 sps:$4 sm:$0xff]  }
 0x2f9   : > { %7303 = vmatpush1.bf16.msra.mxu0 %v9419_v40  ;;  %v4128_v40 = vmax.f32 %v9089_v28, 0.0  ;;  %v9542_v28 = vld [vmem:[#allocation8 + $0x548] ss:$16 sps:$4 sm:$0xff]  }
 0x2fa   : > { %7631 = vmatpush1.bf16.msra.mxu1 %v9422_v43  ;;  %7304 = vmatprep.subr.bf16.mxu0 %v9427_v44  ;;  %v9487_v43 = vld [vmem:[#allocation8 + $0x424] ss:$16 sps:$4 sm:$0xff]  }
 0x2fb   : > { %7632 = vmatprep.subr.bf16.mxu1 %v9430_v47  ;;  %v4144_v44 = vpack.c.bf16 %v4128_v40, %v4128_v40  ;;  %v9488_v47 = vld [vmem:[#allocation8 + $0x428] ss:$16 sps:$4 sm:$0xff]   ;;  %v9556_v40 = vld [vmem:[#allocation8 + $0x58c] ss:$16 sps:$4 sm:$0xff]  }
 0x2fd   : > { %7305 = vmatpush1.bf16.msra.mxu0 %v9425_v48  ;;  %v9493_v48 = vld [vmem:[#allocation8 + $0x444] ss:$16 sps:$4 sm:$0xff]  }
 0x2fe   : > { %7633 = vmatpush1.bf16.msra.mxu1 %v9428_v36  ;;  %7306 = vmatprep.subr.bf16.mxu0 %v9433_v49  ;;  %v9496_v36 = vld [vmem:[#allocation8 + $0x44c] ss:$16 sps:$4 sm:$0xff]   ;;  %v9491_v49 = vld [vmem:[#allocation8 + $0x440] ss:$16 sps:$4 sm:$0xff]  }
 0x2ff   : > { %7634 = vmatprep.subr.bf16.mxu1 %v9436_v50  ;;  %v9494_v50 = vld [vmem:[#allocation8 + $0x448] ss:$16 sps:$4 sm:$0xff]  }
 0x301   : > { %7307 = vmatpush1.bf16.msra.mxu0 %v9431_v53  ;;  %v9499_v53 = vld [vmem:[#allocation8 + $0x464] ss:$16 sps:$4 sm:$0xff]  }
 0x302   : > { %7635 = vmatpush1.bf16.msra.mxu1 %v9434_v51  ;;  %7308 = vmatprep.subr.bf16.mxu0 %v9439_v52  ;;  %v9502_v51 = vld [vmem:[#allocation8 + $0x46c] ss:$16 sps:$4 sm:$0xff]   ;;  %v9497_v52 = vld [vmem:[#allocation8 + $0x460] ss:$16 sps:$4 sm:$0xff]  }
 0x303   : > { %7636 = vmatprep.subr.bf16.mxu1 %v9442_v54  ;;  %v9500_v54 = vld [vmem:[#allocation8 + $0x468] ss:$16 sps:$4 sm:$0xff]  }
 0x305   : > { %7309 = vmatpush1.bf16.msra.mxu0 %v9437_v55  ;;  %v9505_v55 = vld [vmem:[#allocation8 + $0x484] ss:$16 sps:$4 sm:$0xff]  }
 0x306   : > { %7637 = vmatpush1.bf16.msra.mxu1 %v9440_v56  ;;  %7310 = vmatprep.subr.bf16.mxu0 %v9445_v24  ;;  %v9508_v56 = vld [vmem:[#allocation8 + $0x48c] ss:$16 sps:$4 sm:$0xff]   ;;  %v9503_v24 = vld [vmem:[#allocation8 + $0x480] ss:$16 sps:$4 sm:$0xff]  }
 0x307   : > { %7638 = vmatprep.subr.bf16.mxu1 %v9448_v58  ;;  %v9506_v58 = vld [vmem:[#allocation8 + $0x488] ss:$16 sps:$4 sm:$0xff]  }
 0x309   : > { %7311 = vmatpush1.bf16.msra.mxu0 %v9443_v59  ;;  %v9511_v59 = vld [vmem:[#allocation8 + $0x4a4] ss:$16 sps:$4 sm:$0xff]  }
 0x30a   : > { %7639 = vmatpush1.bf16.msra.mxu1 %v9446_v60  ;;  %7312 = vmatprep.subr.bf16.mxu0 %v9451_v61  ;;  %v9514_v60 = vld [vmem:[#allocation8 + $0x4ac] ss:$16 sps:$4 sm:$0xff]   ;;  %v9509_v61 = vld [vmem:[#allocation8 + $0x4a0] ss:$16 sps:$4 sm:$0xff]  }
 0x30b   : > { %7640 = vmatprep.subr.bf16.mxu1 %v9454_v62  ;;  %v9512_v62 = vld [vmem:[#allocation8 + $0x4a8] ss:$16 sps:$4 sm:$0xff]  }
 0x30d   : > { %7313 = vmatpush1.bf16.msra.mxu0 %v9449_v32  ;;  %v9517_v32 = vld [vmem:[#allocation8 + $0x4c4] ss:$16 sps:$4 sm:$0xff]  }
 0x30e   : > { %7641 = vmatpush1.bf16.msra.mxu1 %v9452_v63  ;;  %7314 = vmatprep.subr.bf16.mxu0 %v9457_v0  ;;  %v9520_v63 = vld [vmem:[#allocation8 + $0x4cc] ss:$16 sps:$4 sm:$0xff]   ;;  %v9515_v0 = vld [vmem:[#allocation8 + $0x4c0] ss:$16 sps:$4 sm:$0xff]  }
 0x30f   : > { %7642 = vmatprep.subr.bf16.mxu1 %v9460_v1  ;;  %v9518_v1 = vld [vmem:[#allocation8 + $0x4c8] ss:$16 sps:$4 sm:$0xff]  }
 0x311   : > { %7315 = vmatpush1.bf16.msra.mxu0 %v9455_v2  ;;  %v9523_v2 = vld [vmem:[#allocation8 + $0x4e4] ss:$16 sps:$4 sm:$0xff]  }
 0x312   : > { %7643 = vmatpush1.bf16.msra.mxu1 %v9458_v3  ;;  %7316 = vmatprep.subr.bf16.mxu0 %v9463_v5  ;;  %v9526_v3 = vld [vmem:[#allocation8 + $0x4ec] ss:$16 sps:$4 sm:$0xff]   ;;  %v9521_v5 = vld [vmem:[#allocation8 + $0x4e0] ss:$16 sps:$4 sm:$0xff]  }
 0x313   : > { %7644 = vmatprep.subr.bf16.mxu1 %v9466_v7  ;;  %v9524_v7 = vld [vmem:[#allocation8 + $0x4e8] ss:$16 sps:$4 sm:$0xff]  }
 0x315   : > { %7317 = vmatpush1.bf16.msra.mxu0 %v9461_v11  ;;  %v9529_v11 = vld [vmem:[#allocation8 + $0x504] ss:$16 sps:$4 sm:$0xff]  }
 0x316   : > { %7645 = vmatpush1.bf16.msra.mxu1 %v9464_v16  ;;  %7318 = vmatprep.subr.bf16.mxu0 %v9469_v17  ;;  %v9527_v16 = vld [vmem:[#allocation8 + $0x500] ss:$16 sps:$4 sm:$0xff]   ;;  %v9530_v17 = vld [vmem:[#allocation8 + $0x508] ss:$16 sps:$4 sm:$0xff]  }
 0x317   : > { %7646 = vmatprep.subr.bf16.mxu1 %v9472_v18  ;;  %v9535_v18 = vld [vmem:[#allocation8 + $0x524] ss:$16 sps:$4 sm:$0xff]  }
 0x319   : > { %7319 = vmatpush1.bf16.msra.mxu0 %v9467_v21  ;;  %v9533_v21 = vld [vmem:[#allocation8 + $0x520] ss:$16 sps:$4 sm:$0xff]  }
 0x31a   : > { %7647 = vmatpush1.bf16.msra.mxu1 %v9470_v25  ;;  %7320 = vmatprep.subr.bf16.mxu0 %v9475_v26  ;;  %v9541_v25 = vld [vmem:[#allocation8 + $0x544] ss:$16 sps:$4 sm:$0xff]   ;;  %v9544_v26 = vld [vmem:[#allocation8 + $0x54c] ss:$16 sps:$4 sm:$0xff]  }
 0x31b   : > { %7648 = vmatprep.subr.bf16.mxu1 %v9478_v27  ;;  %v9539_v27 = vld [vmem:[#allocation8 + $0x540] ss:$16 sps:$4 sm:$0xff]  }
 0x31d   : > { %7321 = vmatpush1.bf16.msra.mxu0 %v9473_v29  ;;  %v9547_v29 = vld [vmem:[#allocation8 + $0x564] ss:$16 sps:$4 sm:$0xff]  }
 0x31e   : > { %7649 = vmatpush1.bf16.msra.mxu1 %v9476_v31  ;;  %7331 = vmatprep.subr.bf16.mxu0 %v9481_v15  ;;  %v9545_v31 = vld [vmem:[#allocation8 + $0x560] ss:$16 sps:$4 sm:$0xff]   ;;  %v9548_v15 = vld [vmem:[#allocation8 + $0x568] ss:$16 sps:$4 sm:$0xff]  }
 0x31f   : > { %7659 = vmatprep.subr.bf16.mxu1 %v9484_v38  ;;  %v9553_v38 = vld [vmem:[#allocation8 + $0x584] ss:$16 sps:$4 sm:$0xff]  }
 0x320   : > { %7323 = vmatmul.mubr.bf16.vlgmr.msra.gmra.mrb[16].mxu0 %v4141_v41 }
 0x321   : > { %7651 = vmatmul.mubr.bf16.vlgmr.msra.gmra.mrb[16].mxu1 %v4141_v41  ;;  %7332 = vmatpush1.bf16.msra.mxu0 %v9479_v35  ;;  %v9551_v35 = vld [vmem:[#allocation8 + $0x580] ss:$16 sps:$4 sm:$0xff]   ;;  %v831_v41 = vsub.s32 4, %v10613_v6 }
 0x322   : > { %7363 = vmatprep.mubr.bf16.mxu0 %v4144_v44  ;;  %7660 = vmatpush1.bf16.msra.mxu1 %v9482_v42  ;;  %v9554_v42 = vld [vmem:[#allocation8 + $0x588] ss:$16 sps:$4 sm:$0xff]  }
 0x323   : > { %7691 = vmatprep.mubr.bf16.mxu1 %v4144_v44  ;;  %7333 = vmatprep.subr.bf16.mxu0 %v9487_v43  ;;  %v9559_v43 = vld [vmem:[#allocation8 + $0x5a4] ss:$16 sps:$4 sm:$0xff]   ;;  %v9562_v44 = vld [vmem:[#allocation8 + $0x5ac] ss:$16 sps:$4 sm:$0xff]  }
 0x324   : > { %7661 = vmatprep.subr.bf16.mxu1 %v9490_v9  ;;  %v843_v9 = vsub.s32 7, %v10613_v6 }
 0x325   : > { %7334 = vmatpush1.bf16.msra.mxu0 %v9485_v46  ;;  %v9557_v46 = vld [vmem:[#allocation8 + $0x5a0] ss:$16 sps:$4 sm:$0xff]  }
 0x326   : > { %7662 = vmatpush1.bf16.msra.mxu1 %v9488_v47  ;;  %7335 = vmatprep.subr.bf16.mxu0 %v9493_v48  ;;  %v832_v47 = vrot.slane %v10618_v23, %v831_v41  ;;  %v9560_v48 = vld [vmem:[#allocation8 + $0x5a8] ss:$16 sps:$4 sm:$0xff]  }
 0x327   : > { %7663 = vmatprep.subr.bf16.mxu1 %v9496_v36  ;;  %v9565_v36 = vld [vmem:[#allocation8 + $0x5c4] ss:$16 sps:$4 sm:$0xff]  }
 0x329   : > { %7336 = vmatpush1.bf16.msra.mxu0 %v9491_v49  ;;  %v9568_v49 = vld [vmem:[#allocation8 + $0x5cc] ss:$16 sps:$4 sm:$0xff]  }
 0x32a   : > { %7664 = vmatpush1.bf16.msra.mxu1 %v9494_v50  ;;  %7337 = vmatprep.subr.bf16.mxu0 %v9499_v53  ;;  %v844_v50 = vrot.slane %v10618_v23, %v843_v9  ;;  %v9563_v53 = vld [vmem:[#allocation8 + $0x5c0] ss:$16 sps:$4 sm:$0xff]   ;;  %v9580_v23 = vld [vmem:[#allocation8 + $0x60c] ss:$16 sps:$4 sm:$0xff]  }
 0x32b   : > { %7665 = vmatprep.subr.bf16.mxu1 %v9502_v51  ;;  %v9088_v51 = vadd.f32 %v10605_v4, %v832_v47  ;;  %v9575_v4 = vld [vmem:[#allocation8 + $0x600] ss:$16 sps:$4 sm:$0xff]   ;;  %v9614_v47 = vld [vmem:[#allocation8 + $0x6c8] ss:$16 sps:$4 sm:$0xff]  }
 0x32d   : > { %7338 = vmatpush1.bf16.msra.mxu0 %v9497_v52  ;;  %v9566_v52 = vld [vmem:[#allocation8 + $0x5c8] ss:$16 sps:$4 sm:$0xff]  }
 0x32e   : > { %7666 = vmatpush1.bf16.msra.mxu1 %v9500_v54  ;;  %7339 = vmatprep.subr.bf16.mxu0 %v9505_v55  ;;  %v9571_v54 = vld [vmem:[#allocation8 + $0x5e4] ss:$16 sps:$4 sm:$0xff]   ;;  %v9574_v55 = vld [vmem:[#allocation8 + $0x5ec] ss:$16 sps:$4 sm:$0xff]  }
 0x32f   : > { %7667 = vmatprep.subr.bf16.mxu1 %v9508_v56  ;;  %v9091_v56 = vadd.f32 %v10611_v13, %v844_v50  ;;  %v9586_v13 = vld [vmem:[#allocation8 + $0x62c] ss:$16 sps:$4 sm:$0xff]   ;;  %v9617_v50 = vld [vmem:[#allocation8 + $0x6e0] ss:$16 sps:$4 sm:$0xff]  }
 0x331   : > { %7340 = vmatpush1.bf16.msra.mxu0 %v9503_v24  ;;  %v9569_v24 = vld [vmem:[#allocation8 + $0x5e0] ss:$16 sps:$4 sm:$0xff]  }
 0x332   : > { %7668 = vmatpush1.bf16.msra.mxu1 %v9506_v58  ;;  %7341 = vmatprep.subr.bf16.mxu0 %v9511_v59  ;;  %v4127_v58 = vmax.f32 %v9088_v51, 0.0  ;;  %v9572_v59 = vld [vmem:[#allocation8 + $0x5e8] ss:$16 sps:$4 sm:$0xff]   ;;  %v9625_v51 = vld [vmem:[#allocation8 + $0x704] ss:$16 sps:$4 sm:$0xff]  }
 0x333   : > { %7669 = vmatprep.subr.bf16.mxu1 %v9514_v60  ;;  %v9577_v60 = vld [vmem:[#allocation8 + $0x604] ss:$16 sps:$4 sm:$0xff]  }
 0x335   : > { %7342 = vmatpush1.bf16.msra.mxu0 %v9509_v61  ;;  %v4130_v61 = vmax.f32 %v9091_v56, 0.0  ;;  %v9631_v56 = vld [vmem:[#allocation8 + $0x724] ss:$16 sps:$4 sm:$0xff]  }
 0x336   : > { %7670 = vmatpush1.bf16.msra.mxu1 %v9512_v62  ;;  %7343 = vmatprep.subr.bf16.mxu0 %v9517_v32  ;;  %v4143_v62 = vpack.c.bf16 %v4127_v58, %v4127_v58  ;;  %v9578_v32 = vld [vmem:[#allocation8 + $0x608] ss:$16 sps:$4 sm:$0xff]   ;;  %v9629_v58 = vld [vmem:[#allocation8 + $0x720] ss:$16 sps:$4 sm:$0xff]  }
 0x337   : > { %7671 = vmatprep.subr.bf16.mxu1 %v9520_v63  ;;  %v9583_v63 = vld [vmem:[#allocation8 + $0x624] ss:$16 sps:$4 sm:$0xff]  }
 0x339   : > { %7344 = vmatpush1.bf16.msra.mxu0 %v9515_v0  ;;  %v4146_v0 = vpack.c.bf16 %v4130_v61, %v4130_v61  ;;  %v9635_v61 = vld [vmem:[#allocation8 + $0x740] ss:$16 sps:$4 sm:$0xff]  }
 0x33a   : > { %7672 = vmatpush1.bf16.msra.mxu1 %v9518_v1  ;;  %7345 = vmatprep.subr.bf16.mxu0 %v9523_v2  ;;  %v9581_v1 = vld [vmem:[#allocation8 + $0x620] ss:$16 sps:$4 sm:$0xff]   ;;  %v9584_v2 = vld [vmem:[#allocation8 + $0x628] ss:$16 sps:$4 sm:$0xff]  }
 0x33b   : > { %7673 = vmatprep.subr.bf16.mxu1 %v9526_v3  ;;  %v9589_v3 = vld [vmem:[#allocation8 + $0x644] ss:$16 sps:$4 sm:$0xff]  }
 0x33d   : > { %7346 = vmatpush1.bf16.msra.mxu0 %v9521_v5  ;;  %v9592_v5 = vld [vmem:[#allocation8 + $0x64c] ss:$16 sps:$4 sm:$0xff]  }
 0x33e   : > { %7674 = vmatpush1.bf16.msra.mxu1 %v9524_v7  ;;  %7347 = vmatprep.subr.bf16.mxu0 %v9529_v11  ;;  %v9587_v7 = vld [vmem:[#allocation8 + $0x640] ss:$16 sps:$4 sm:$0xff]   ;;  %v9590_v11 = vld [vmem:[#allocation8 + $0x648] ss:$16 sps:$4 sm:$0xff]  }
 0x33f   : > { %7675 = vmatprep.subr.bf16.mxu1 %v9532_v14  ;;  %v9595_v14 = vld [vmem:[#allocation8 + $0x664] ss:$16 sps:$4 sm:$0xff]  }
 0x341   : > { %7348 = vmatpush1.bf16.msra.mxu0 %v9527_v16  ;;  %v9598_v16 = vld [vmem:[#allocation8 + $0x66c] ss:$16 sps:$4 sm:$0xff]  }
 0x342   : > { %7676 = vmatpush1.bf16.msra.mxu1 %v9530_v17  ;;  %7349 = vmatprep.subr.bf16.mxu0 %v9535_v18  ;;  %v9593_v17 = vld [vmem:[#allocation8 + $0x660] ss:$16 sps:$4 sm:$0xff]   ;;  %v9596_v18 = vld [vmem:[#allocation8 + $0x668] ss:$16 sps:$4 sm:$0xff]  }
 0x343   : > { %7677 = vmatprep.subr.bf16.mxu1 %v9538_v19  ;;  %v9601_v19 = vld [vmem:[#allocation8 + $0x684] ss:$16 sps:$4 sm:$0xff]  }
 0x345   : > { %7350 = vmatpush1.bf16.msra.mxu0 %v9533_v21  ;;  %v9604_v21 = vld [vmem:[#allocation8 + $0x68c] ss:$16 sps:$4 sm:$0xff]  }
 0x346   : > { %7678 = vmatpush1.bf16.msra.mxu1 %v9536_v22  ;;  %7351 = vmatprep.subr.bf16.mxu0 %v9541_v25  ;;  %v9599_v22 = vld [vmem:[#allocation8 + $0x680] ss:$16 sps:$4 sm:$0xff]   ;;  %v9602_v25 = vld [vmem:[#allocation8 + $0x688] ss:$16 sps:$4 sm:$0xff]  }
 0x347   : > { %7679 = vmatprep.subr.bf16.mxu1 %v9544_v26  ;;  %v9607_v26 = vld [vmem:[#allocation8 + $0x6a4] ss:$16 sps:$4 sm:$0xff]  }
 0x349   : > { %7352 = vmatpush1.bf16.msra.mxu0 %v9539_v27  ;;  %v9610_v27 = vld [vmem:[#allocation8 + $0x6ac] ss:$16 sps:$4 sm:$0xff]  }
 0x34a   : > { %7680 = vmatpush1.bf16.msra.mxu1 %v9542_v28  ;;  %7353 = vmatprep.subr.bf16.mxu0 %v9547_v29  ;;  %v9605_v28 = vld [vmem:[#allocation8 + $0x6a0] ss:$16 sps:$4 sm:$0xff]   ;;  %v9608_v29 = vld [vmem:[#allocation8 + $0x6a8] ss:$16 sps:$4 sm:$0xff]  }
 0x34b   : > { %7681 = vmatprep.subr.bf16.mxu1 %v9550_v30  ;;  %v9613_v30 = vld [vmem:[#allocation8 + $0x6c4] ss:$16 sps:$4 sm:$0xff]  }
 0x34d   : > { %7354 = vmatpush1.bf16.msra.mxu0 %v9545_v31 }
 0x34e   : > { %7682 = vmatpush1.bf16.msra.mxu1 %v9548_v15  ;;  %7355 = vmatprep.subr.bf16.mxu0 %v9553_v38  ;;  %v9616_v15 = vld [vmem:[#allocation8 + $0x6cc] ss:$16 sps:$4 sm:$0xff]  }
 0x34f   : > { %7683 = vmatprep.subr.bf16.mxu1 %v9556_v40 }
 0x351   : > { %7356 = vmatpush1.bf16.msra.mxu0 %v9551_v35 }
 0x352   : > { %7684 = vmatpush1.bf16.msra.mxu1 %v9554_v42  ;;  %7357 = vmatprep.subr.bf16.mxu0 %v9559_v43  ;;  %v9611_v43 = vld [vmem:[#allocation8 + $0x6c0] ss:$16 sps:$4 sm:$0xff]  }
 0x353   : > { %7685 = vmatprep.subr.bf16.mxu1 %v9562_v44 }
 0x355   : > { %7358 = vmatpush1.bf16.msra.mxu0 %v9557_v46 }
 0x356   : > { %7686 = vmatpush1.bf16.msra.mxu1 %v9560_v48  ;;  %7359 = vmatprep.subr.bf16.mxu0 %v9565_v36  ;;  %v9619_v48 = vld [vmem:[#allocation8 + $0x6e4] ss:$16 sps:$4 sm:$0xff]  }
 0x357   : > { %7687 = vmatprep.subr.bf16.mxu1 %v9568_v49  ;;  %v9622_v49 = vld [vmem:[#allocation8 + $0x6ec] ss:$16 sps:$4 sm:$0xff]  }
 0x359   : > { %7360 = vmatpush1.bf16.msra.mxu0 %v9563_v53  ;;  %v9620_v53 = vld [vmem:[#allocation8 + $0x6e8] ss:$16 sps:$4 sm:$0xff]  }
 0x35a   : > { %7688 = vmatpush1.bf16.msra.mxu1 %v9566_v52  ;;  %7361 = vmatprep.subr.bf16.mxu0 %v9571_v54  ;;  %v9628_v52 = vld [vmem:[#allocation8 + $0x70c] ss:$16 sps:$4 sm:$0xff]   ;;  %v9623_v54 = vld [vmem:[#allocation8 + $0x700] ss:$16 sps:$4 sm:$0xff]  }
 0x35b   : > { %7689 = vmatprep.subr.bf16.mxu1 %v9574_v55  ;;  %v9626_v55 = vld [vmem:[#allocation8 + $0x708] ss:$16 sps:$4 sm:$0xff]  }
 0x35d   : > { %7362 = vmatpush1.bf16.msra.mxu0 %v9569_v24  ;;  %v9634_v24 = vld [vmem:[#allocation8 + $0x72c] ss:$16 sps:$4 sm:$0xff]  }
 0x35e   : > { %7690 = vmatpush1.bf16.msra.mxu1 %v9572_v59  ;;  %7372 = vmatprep.subr.bf16.mxu0 %v9577_v60  ;;  %v9632_v59 = vld [vmem:[#allocation8 + $0x728] ss:$16 sps:$4 sm:$0xff]   ;;  %v9637_v60 = vld [vmem:[#allocation8 + $0x744] ss:$16 sps:$4 sm:$0xff]  }
 0x35f   : > { %7700 = vmatprep.subr.bf16.mxu1 %v9580_v23  ;;  %v9640_v23 = vld [vmem:[#allocation8 + $0x74c] ss:$16 sps:$4 sm:$0xff]  }
 0x360   : > { %7364 = vmatmul.mubr.bf16.vlgmr.msra.gmra.mrb[16].mxu0 %v4143_v62 }
 0x361   : > { %7692 = vmatmul.mubr.bf16.vlgmr.msra.gmra.mrb[16].mxu1 %v4143_v62  ;;  %7373 = vmatpush1.bf16.msra.mxu0 %v9575_v4  ;;  %v9638_v4 = vld [vmem:[#allocation8 + $0x748] ss:$16 sps:$4 sm:$0xff]   ;;  %v9643_v62 = vld [vmem:[#allocation8 + $0x764] ss:$16 sps:$4 sm:$0xff]  }
 0x362   : > { %7404 = vmatprep.mubr.bf16.mxu0 %v4146_v0  ;;  %7701 = vmatpush1.bf16.msra.mxu1 %v9578_v32  ;;  %v9646_v32 = vld [vmem:[#allocation8 + $0x76c] ss:$16 sps:$4 sm:$0xff]  }
 0x363   : > { %7732 = vmatprep.mubr.bf16.mxu1 %v4146_v0  ;;  %7374 = vmatprep.subr.bf16.mxu0 %v9583_v63  ;;  %v9641_v63 = vld [vmem:[#allocation8 + $0x760] ss:$16 sps:$4 sm:$0xff]   ;;  %v9644_v0 = vld [vmem:[#allocation8 + $0x768] ss:$16 sps:$4 sm:$0xff]  }
 0x364   : > { %7702 = vmatprep.subr.bf16.mxu1 %v9586_v13  ;;  %v9649_v13 = vld [vmem:[#allocation8 + $0x784] ss:$16 sps:$4 sm:$0xff]  }
 0x365   : > { %7375 = vmatpush1.bf16.msra.mxu0 %v9581_v1  ;;  %v9652_v1 = vld [vmem:[#allocation8 + $0x78c] ss:$16 sps:$4 sm:$0xff]  }
 0x366   : > { %7703 = vmatpush1.bf16.msra.mxu1 %v9584_v2  ;;  %7376 = vmatprep.subr.bf16.mxu0 %v9589_v3  ;;  %v9647_v2 = vld [vmem:[#allocation8 + $0x780] ss:$16 sps:$4 sm:$0xff]   ;;  %v839_v3 = vsub.s32 6, %v10613_v6 }
 0x367   : > { %7704 = vmatprep.subr.bf16.mxu1 %v9592_v5  ;;  %v9650_v5 = vld [vmem:[#allocation8 + $0x788] ss:$16 sps:$4 sm:$0xff]   ;;  %v10049_v6 = vld [vmem:[#allocation8 + $0xfe0] ss:$16 sps:$4 sm:$0xff]  }
 0x369   : > { %7377 = vmatpush1.bf16.msra.mxu0 %v9587_v7  ;;  %v9655_v7 = vld [vmem:[#allocation8 + $0x7a4] ss:$16 sps:$4 sm:$0xff]  }
 0x36a   : > { %7705 = vmatpush1.bf16.msra.mxu1 %v9590_v11  ;;  %7378 = vmatprep.subr.bf16.mxu0 %v9595_v14  ;;  %v9658_v11 = vld [vmem:[#allocation8 + $0x7ac] ss:$16 sps:$4 sm:$0xff]  }
 0x36b   : > { %7706 = vmatprep.subr.bf16.mxu1 %v9598_v16  ;;  %v10675_v14 = vld [vmem:[#allocation7 + $0x8] sm:$0xff]  ;;  %v9653_v16 = vld [vmem:[#allocation8 + $0x7a0] ss:$16 sps:$4 sm:$0xff]  }
 0x36d   : > { %7379 = vmatpush1.bf16.msra.mxu0 %v9593_v17  ;;  %v10055_v17 = vld [vmem:[#allocation7] sm:$0xff] }
 0x36e   : > { %7707 = vmatpush1.bf16.msra.mxu1 %v9596_v18  ;;  %7380 = vmatprep.subr.bf16.mxu0 %v9601_v19  ;;  %v840_v18 = vrot.slane %v10055_v17, %v839_v3  ;;  %v9656_v19 = vld [vmem:[#allocation8 + $0x7a8] ss:$16 sps:$4 sm:$0xff]   ;;  %v9718_v17 = vld [vmem:[#allocation8 + $0x8ec] ss:$16 sps:$4 sm:$0xff]  }
 0x36f   : > { %7708 = vmatprep.subr.bf16.mxu1 %v9604_v21  ;;  %v9661_v21 = vld [vmem:[#allocation8 + $0x7c4] ss:$16 sps:$4 sm:$0xff]  }
 0x371   : > { %7381 = vmatpush1.bf16.msra.mxu0 %v9599_v22  ;;  %v9664_v22 = vld [vmem:[#allocation8 + $0x7cc] ss:$16 sps:$4 sm:$0xff]  }
 0x372   : > { %7709 = vmatpush1.bf16.msra.mxu1 %v9602_v25  ;;  %7382 = vmatprep.subr.bf16.mxu0 %v9607_v26  ;;  %v852_v25 = vrot.slane %v10675_v14, %v10616_v20  ;;  %v9659_v26 = vld [vmem:[#allocation8 + $0x7c0] ss:$16 sps:$4 sm:$0xff]  }
 0x373   : > { %v10666_v31 = vpop.f32.mrb[12].mxu0  ;;  %7710 = vmatprep.subr.bf16.mxu1 %v9610_v27  ;;  %v10668_v38 = vpop.f32.mrb[12].mxu1  ;;  %v9090_v27 = vadd.f32 %v10607_v8, %v840_v18  ;;  %v9671_v8 = vld [vmem:[#allocation8 + $0x800] ss:$16 sps:$4 sm:$0xff]  }
 0x374   : > { %v10670_v40 = vpop.f32.mrb[13].mxu0  ;;  %v10672_v35 = vpop.f32.mrb[13].mxu1  ;;  %v9713_v18 = vld [vmem:[#allocation8 + $0x8e0] ss:$16 sps:$4 sm:$0xff]  }
 0x375   : > { %v4038_v42 = vpop.f32.mrb[14].mxu0  ;;  %7383 = vmatpush1.bf16.msra.mxu0 %v9605_v28  ;;  %v4120_v44 = vpop.f32.mrb[14].mxu1  ;;  %v9662_v28 = vld [vmem:[#allocation8 + $0x7c8] ss:$16 sps:$4 sm:$0xff]  }
 0x376   : > { %7711 = vmatpush1.bf16.msra.mxu1 %v9608_v29  ;;  %v4039_v46 = vpop.f32.mrb[15].mxu0  ;;  %7384 = vmatprep.subr.bf16.mxu0 %v9613_v30  ;;  %v4121_v36 = vpop.f32.mrb[15].mxu1  ;;  %v9667_v29 = vld [vmem:[#allocation8 + $0x7e4] ss:$16 sps:$4 sm:$0xff]   ;;  %v9670_v30 = vld [vmem:[#allocation8 + $0x7ec] ss:$16 sps:$4 sm:$0xff]  }
 0x377   : > { %7712 = vmatprep.subr.bf16.mxu1 %v9616_v15  ;;  %v9093_v15 = vadd.f32 %v10641_v37, %v852_v25  ;;  %v9665_v42 = vld [vmem:[#allocation8 + $0x7e0] ss:$16 sps:$4 sm:$0xff]   ;;  %v9668_v44 = vld [vmem:[#allocation8 + $0x7e8] ss:$16 sps:$4 sm:$0xff]   ;;  %v9673_v46 = vld [vmem:[#allocation8 + $0x804] ss:$16 sps:$4 sm:$0xff]  }
 0x378   : > { %v9682_v37 = vld [vmem:[#allocation8 + $0x82c] ss:$16 sps:$4 sm:$0xff]   ;;  %v9719_v25 = vld [vmem:[#allocation8 + $0x900] ss:$16 sps:$4 sm:$0xff]  }
 0x379   : > { %7385 = vmatpush1.bf16.msra.mxu0 %v9611_v43  ;;  %v4129_v43 = vmax.f32 %v9090_v27, 0.0  ;;  %v9727_v27 = vld [vmem:[#allocation8 + $0x924] ss:$16 sps:$4 sm:$0xff]  }
 0x37a   : > { %7713 = vmatpush1.bf16.msra.mxu1 %v9614_v47  ;;  %7386 = vmatprep.subr.bf16.mxu0 %v9619_v48  ;;  %v9676_v47 = vld [vmem:[#allocation8 + $0x80c] ss:$16 sps:$4 sm:$0xff]   ;;  %v4132_v48 = vmax.f32 %v9093_v15, 0.0  ;;  %v9733_v15 = vld [vmem:[#allocation8 + $0x944] ss:$16 sps:$4 sm:$0xff]  }
 0x37b   : > { %7714 = vmatprep.subr.bf16.mxu1 %v9622_v49  ;;  %v4145_v36 = vpack.c.bf16 %v4129_v43, %v4129_v43  ;;  %v9674_v49 = vld [vmem:[#allocation8 + $0x808] ss:$16 sps:$4 sm:$0xff]   ;;  %v9731_v43 = vld [vmem:[#allocation8 + $0x940] ss:$16 sps:$4 sm:$0xff]  }
 0x37d   : > { %7387 = vmatpush1.bf16.msra.mxu0 %v9617_v50  ;;  %v9679_v50 = vld [vmem:[#allocation8 + $0x824] ss:$16 sps:$4 sm:$0xff]  }
 0x37e   : > { %7715 = vmatpush1.bf16.msra.mxu1 %v9620_v53  ;;  %7388 = vmatprep.subr.bf16.mxu0 %v9625_v51  ;;  %v4148_v53 = vpack.c.bf16 %v4132_v48, %v4132_v48  ;;  %v9677_v51 = vld [vmem:[#allocation8 + $0x820] ss:$16 sps:$4 sm:$0xff]  }
 0x37f   : > { %7716 = vmatprep.subr.bf16.mxu1 %v9628_v52  ;;  %v9680_v52 = vld [vmem:[#allocation8 + $0x828] ss:$16 sps:$4 sm:$0xff]   ;;  %v9737_v48 = vld [vmem:[#allocation8 + $0x960] ss:$16 sps:$4 sm:$0xff]  }
 0x381   : > { %7389 = vmatpush1.bf16.msra.mxu0 %v9623_v54  ;;  %v9685_v54 = vld [vmem:[#allocation8 + $0x844] ss:$16 sps:$4 sm:$0xff]  }
 0x382   : > { %7717 = vmatpush1.bf16.msra.mxu1 %v9626_v55  ;;  %7390 = vmatprep.subr.bf16.mxu0 %v9631_v56  ;;  %v9688_v55 = vld [vmem:[#allocation8 + $0x84c] ss:$16 sps:$4 sm:$0xff]   ;;  %v9683_v56 = vld [vmem:[#allocation8 + $0x840] ss:$16 sps:$4 sm:$0xff]  }
 0x383   : > { %7718 = vmatprep.subr.bf16.mxu1 %v9634_v24  ;;  %v9686_v24 = vld [vmem:[#allocation8 + $0x848] ss:$16 sps:$4 sm:$0xff]  }
 0x385   : > { %7391 = vmatpush1.bf16.msra.mxu0 %v9629_v58  ;;  %v9691_v58 = vld [vmem:[#allocation8 + $0x864] ss:$16 sps:$4 sm:$0xff]  }
 0x386   : > { %7719 = vmatpush1.bf16.msra.mxu1 %v9632_v59  ;;  %7392 = vmatprep.subr.bf16.mxu0 %v9637_v60  ;;  %v9694_v59 = vld [vmem:[#allocation8 + $0x86c] ss:$16 sps:$4 sm:$0xff]   ;;  %v9689_v60 = vld [vmem:[#allocation8 + $0x860] ss:$16 sps:$4 sm:$0xff]  }
 0x387   : > { %7720 = vmatprep.subr.bf16.mxu1 %v9640_v23  ;;  %v9692_v23 = vld [vmem:[#allocation8 + $0x868] ss:$16 sps:$4 sm:$0xff]  }
 0x389   : > { %7393 = vmatpush1.bf16.msra.mxu0 %v9635_v61  ;;  %v9697_v61 = vld [vmem:[#allocation8 + $0x884] ss:$16 sps:$4 sm:$0xff]  }
 0x38a   : > { %7721 = vmatpush1.bf16.msra.mxu1 %v9638_v4  ;;  %7394 = vmatprep.subr.bf16.mxu0 %v9643_v62  ;;  %v9700_v4 = vld [vmem:[#allocation8 + $0x88c] ss:$16 sps:$4 sm:$0xff]   ;;  %v9695_v62 = vld [vmem:[#allocation8 + $0x880] ss:$16 sps:$4 sm:$0xff]  }
 0x38b   : > { %7722 = vmatprep.subr.bf16.mxu1 %v9646_v32  ;;  %v9698_v32 = vld [vmem:[#allocation8 + $0x888] ss:$16 sps:$4 sm:$0xff]  }
 0x38d   : > { %7395 = vmatpush1.bf16.msra.mxu0 %v9641_v63  ;;  %v9703_v63 = vld [vmem:[#allocation8 + $0x8a4] ss:$16 sps:$4 sm:$0xff]  }
 0x38e   : > { %7723 = vmatpush1.bf16.msra.mxu1 %v9644_v0  ;;  %7396 = vmatprep.subr.bf16.mxu0 %v9649_v13  ;;  %v9706_v0 = vld [vmem:[#allocation8 + $0x8ac] ss:$16 sps:$4 sm:$0xff]   ;;  %v9701_v13 = vld [vmem:[#allocation8 + $0x8a0] ss:$16 sps:$4 sm:$0xff]  }
 0x38f   : > { %7724 = vmatprep.subr.bf16.mxu1 %v9652_v1  ;;  %v9704_v1 = vld [vmem:[#allocation8 + $0x8a8] ss:$16 sps:$4 sm:$0xff]  }
 0x391   : > { %7397 = vmatpush1.bf16.msra.mxu0 %v9647_v2  ;;  %v9709_v2 = vld [vmem:[#allocation8 + $0x8c4] ss:$16 sps:$4 sm:$0xff]  }
 0x392   : > { %7725 = vmatpush1.bf16.msra.mxu1 %v9650_v5  ;;  %7398 = vmatprep.subr.bf16.mxu0 %v9655_v7  ;;  %v9712_v5 = vld [vmem:[#allocation8 + $0x8cc] ss:$16 sps:$4 sm:$0xff]   ;;  %v9707_v7 = vld [vmem:[#allocation8 + $0x8c0] ss:$16 sps:$4 sm:$0xff]  }
 0x393   : > { %7726 = vmatprep.subr.bf16.mxu1 %v9658_v11  ;;  %v9710_v11 = vld [vmem:[#allocation8 + $0x8c8] ss:$16 sps:$4 sm:$0xff]  }
 0x395   : > { %7399 = vmatpush1.bf16.msra.mxu0 %v9653_v16  ;;  %v9715_v16 = vld [vmem:[#allocation8 + $0x8e4] ss:$16 sps:$4 sm:$0xff]  }
 0x396   : > { %7727 = vmatpush1.bf16.msra.mxu1 %v9656_v19  ;;  %7400 = vmatprep.subr.bf16.mxu0 %v9661_v21  ;;  %v9716_v19 = vld [vmem:[#allocation8 + $0x8e8] ss:$16 sps:$4 sm:$0xff]   ;;  %v9721_v21 = vld [vmem:[#allocation8 + $0x904] ss:$16 sps:$4 sm:$0xff]  }
 0x397   : > { %7728 = vmatprep.subr.bf16.mxu1 %v9664_v22  ;;  %v9724_v22 = vld [vmem:[#allocation8 + $0x90c] ss:$16 sps:$4 sm:$0xff]  }
 0x399   : > { %7401 = vmatpush1.bf16.msra.mxu0 %v9659_v26  ;;  %v9722_v26 = vld [vmem:[#allocation8 + $0x908] ss:$16 sps:$4 sm:$0xff]  }
 0x39a   : > { %7729 = vmatpush1.bf16.msra.mxu1 %v9662_v28  ;;  %7402 = vmatprep.subr.bf16.mxu0 %v9667_v29  ;;  %v9730_v28 = vld [vmem:[#allocation8 + $0x92c] ss:$16 sps:$4 sm:$0xff]   ;;  %v9725_v29 = vld [vmem:[#allocation8 + $0x920] ss:$16 sps:$4 sm:$0xff]  }
 0x39b   : > { %7730 = vmatprep.subr.bf16.mxu1 %v9670_v30  ;;  %v9728_v30 = vld [vmem:[#allocation8 + $0x928] ss:$16 sps:$4 sm:$0xff]  }
 0x39d   : > { %7403 = vmatpush1.bf16.msra.mxu0 %v9665_v42  ;;  %v9736_v42 = vld [vmem:[#allocation8 + $0x94c] ss:$16 sps:$4 sm:$0xff]  }
 0x39e   : > { %7731 = vmatpush1.bf16.msra.mxu1 %v9668_v44  ;;  %7413 = vmatprep.subr.bf16.mxu0 %v9673_v46  ;;  %v9734_v44 = vld [vmem:[#allocation8 + $0x948] ss:$16 sps:$4 sm:$0xff]   ;;  %v9739_v46 = vld [vmem:[#allocation8 + $0x964] ss:$16 sps:$4 sm:$0xff]  }
 0x39f   : > { %7741 = vmatprep.subr.bf16.mxu1 %v9676_v47  ;;  %v9742_v47 = vld [vmem:[#allocation8 + $0x96c] ss:$16 sps:$4 sm:$0xff]  }
 0x3a0   : > { %7405 = vmatmul.mubr.bf16.vlgmr.msra.gmra.mrb[16].mxu0 %v4145_v36 }
 0x3a1   : > { %7733 = vmatmul.mubr.bf16.vlgmr.msra.gmra.mrb[16].mxu1 %v4145_v36  ;;  %7414 = vmatpush1.bf16.msra.mxu0 %v9671_v8  ;;  %v9740_v8 = vld [vmem:[#allocation8 + $0x968] ss:$16 sps:$4 sm:$0xff]   ;;  %v9745_v36 = vld [vmem:[#allocation8 + $0x984] ss:$16 sps:$4 sm:$0xff]  }
 0x3a2   : > { %7445 = vmatprep.mubr.bf16.mxu0 %v4148_v53  ;;  %7742 = vmatpush1.bf16.msra.mxu1 %v9674_v49  ;;  %v9748_v49 = vld [vmem:[#allocation8 + $0x98c] ss:$16 sps:$4 sm:$0xff]  }
 0x3a3   : > { %7773 = vmatprep.mubr.bf16.mxu1 %v4148_v53  ;;  %7415 = vmatprep.subr.bf16.mxu0 %v9679_v50  ;;  %v9743_v50 = vld [vmem:[#allocation8 + $0x980] ss:$16 sps:$4 sm:$0xff]   ;;  %v9746_v53 = vld [vmem:[#allocation8 + $0x988] ss:$16 sps:$4 sm:$0xff]  }
 0x3a4   : > { %7743 = vmatprep.subr.bf16.mxu1 %v9682_v37  ;;  %v9751_v37 = vld [vmem:[#allocation8 + $0x9a4] ss:$16 sps:$4 sm:$0xff]  }
 0x3a5   : > { %7416 = vmatpush1.bf16.msra.mxu0 %v9677_v51  ;;  %v9754_v51 = vld [vmem:[#allocation8 + $0x9ac] ss:$16 sps:$4 sm:$0xff]  }
 0x3a6   : > { %7744 = vmatpush1.bf16.msra.mxu1 %v9680_v52  ;;  %7417 = vmatprep.subr.bf16.mxu0 %v9685_v54  ;;  %v9749_v52 = vld [vmem:[#allocation8 + $0x9a0] ss:$16 sps:$4 sm:$0xff]   ;;  %v848_v54 = vrot.slane %v10675_v14, %v10626_v12 }
 0x3a7   : > { %7745 = vmatprep.subr.bf16.mxu1 %v9688_v55  ;;  %v9752_v55 = vld [vmem:[#allocation8 + $0x9a8] ss:$16 sps:$4 sm:$0xff]  }
 0x3a9   : > { %7418 = vmatpush1.bf16.msra.mxu0 %v9683_v56  ;;  %v9757_v56 = vld [vmem:[#allocation8 + $0x9c4] ss:$16 sps:$4 sm:$0xff]  }
 0x3aa   : > { %7746 = vmatpush1.bf16.msra.mxu1 %v9686_v24  ;;  %7419 = vmatprep.subr.bf16.mxu0 %v9691_v58  ;;  %v9760_v24 = vld [vmem:[#allocation8 + $0x9cc] ss:$16 sps:$4 sm:$0xff]   ;;  %v860_v58 = vrot.slane %v10675_v14, %v10629_v45 }
 0x3ab   : > { %7747 = vmatprep.subr.bf16.mxu1 %v9694_v59  ;;  %v9755_v59 = vld [vmem:[#allocation8 + $0x9c0] ss:$16 sps:$4 sm:$0xff]  }
 0x3ad   : > { %7420 = vmatpush1.bf16.msra.mxu0 %v9689_v60  ;;  %v9092_v60 = vadd.f32 %v10637_v33, %v848_v54  ;;  %v9767_v33 = vld [vmem:[#allocation8 + $0xa00] ss:$16 sps:$4 sm:$0xff]   ;;  %v9817_v54 = vld [vmem:[#allocation8 + $0xb04] ss:$16 sps:$4 sm:$0xff]  }
 0x3ae   : > { %7748 = vmatpush1.bf16.msra.mxu1 %v9692_v23  ;;  %7421 = vmatprep.subr.bf16.mxu0 %v9697_v61  ;;  %v9758_v23 = vld [vmem:[#allocation8 + $0x9c8] ss:$16 sps:$4 sm:$0xff]   ;;  %v9763_v61 = vld [vmem:[#allocation8 + $0x9e4] ss:$16 sps:$4 sm:$0xff]  }
 0x3af   : > { %7749 = vmatprep.subr.bf16.mxu1 %v9700_v4  ;;  %v9766_v4 = vld [vmem:[#allocation8 + $0x9ec] ss:$16 sps:$4 sm:$0xff]  }
 0x3b1   : > { %7422 = vmatpush1.bf16.msra.mxu0 %v9695_v62  ;;  %v9095_v62 = vadd.f32 %v10643_v57, %v860_v58  ;;  %v9778_v57 = vld [vmem:[#allocation8 + $0xa2c] ss:$16 sps:$4 sm:$0xff]   ;;  %v9823_v58 = vld [vmem:[#allocation8 + $0xb24] ss:$16 sps:$4 sm:$0xff]  }
 0x3b2   : > { %7750 = vmatpush1.bf16.msra.mxu1 %v9698_v32  ;;  %7423 = vmatprep.subr.bf16.mxu0 %v9703_v63  ;;  %v9761_v32 = vld [vmem:[#allocation8 + $0x9e0] ss:$16 sps:$4 sm:$0xff]   ;;  %v4131_v63 = vmax.f32 %v9092_v60, 0.0 }
 0x3b3   : > { %7751 = vmatprep.subr.bf16.mxu1 %v9706_v0  ;;  %v9764_v0 = vld [vmem:[#allocation8 + $0x9e8] ss:$16 sps:$4 sm:$0xff]   ;;  %v9821_v60 = vld [vmem:[#allocation8 + $0xb20] ss:$16 sps:$4 sm:$0xff]  }
 0x3b5   : > { %7424 = vmatpush1.bf16.msra.mxu0 %v9701_v13  ;;  %v9769_v13 = vld [vmem:[#allocation8 + $0xa04] ss:$16 sps:$4 sm:$0xff]  }
 0x3b6   : > { %7752 = vmatpush1.bf16.msra.mxu1 %v9704_v1  ;;  %7425 = vmatprep.subr.bf16.mxu0 %v9709_v2  ;;  %v9772_v1 = vld [vmem:[#allocation8 + $0xa0c] ss:$16 sps:$4 sm:$0xff]   ;;  %v4134_v2 = vmax.f32 %v9095_v62, 0.0  ;;  %v9827_v62 = vld [vmem:[#allocation8 + $0xb40] ss:$16 sps:$4 sm:$0xff]  }
 0x3b7   : > { %7753 = vmatprep.subr.bf16.mxu1 %v9712_v5  ;;  %v4147_v5 = vpack.c.bf16 %v4131_v63, %v4131_v63  ;;  %v9835_v63 = vld [vmem:[#allocation8 + $0xb64] ss:$16 sps:$4 sm:$0xff]  }
 0x3b9   : > { %7426 = vmatpush1.bf16.msra.mxu0 %v9707_v7  ;;  %v9770_v7 = vld [vmem:[#allocation8 + $0xa08] ss:$16 sps:$4 sm:$0xff]  }
 0x3ba   : > { %7754 = vmatpush1.bf16.msra.mxu1 %v9710_v11  ;;  %7427 = vmatprep.subr.bf16.mxu0 %v9715_v16  ;;  %v9775_v11 = vld [vmem:[#allocation8 + $0xa24] ss:$16 sps:$4 sm:$0xff]   ;;  %v4150_v16 = vpack.c.bf16 %v4134_v2, %v4134_v2 }
 0x3bb   : > { %7755 = vmatprep.subr.bf16.mxu1 %v9718_v17  ;;  %v9773_v17 = vld [vmem:[#allocation8 + $0xa20] ss:$16 sps:$4 sm:$0xff]   ;;  %v9841_v2 = vld [vmem:[#allocation8 + $0xb84] ss:$16 sps:$4 sm:$0xff]  }
 0x3bd   : > { %7428 = vmatpush1.bf16.msra.mxu0 %v9713_v18  ;;  %v9776_v18 = vld [vmem:[#allocation8 + $0xa28] ss:$16 sps:$4 sm:$0xff]  }
 0x3be   : > { %7756 = vmatpush1.bf16.msra.mxu1 %v9716_v19  ;;  %7429 = vmatprep.subr.bf16.mxu0 %v9721_v21  ;;  %v9781_v19 = vld [vmem:[#allocation8 + $0xa44] ss:$16 sps:$4 sm:$0xff]   ;;  %v9784_v21 = vld [vmem:[#allocation8 + $0xa4c] ss:$16 sps:$4 sm:$0xff]  }
 0x3bf   : > { %7757 = vmatprep.subr.bf16.mxu1 %v9724_v22  ;;  %v9779_v22 = vld [vmem:[#allocation8 + $0xa40] ss:$16 sps:$4 sm:$0xff]  }
 0x3c1   : > { %7430 = vmatpush1.bf16.msra.mxu0 %v9719_v25  ;;  %v9782_v25 = vld [vmem:[#allocation8 + $0xa48] ss:$16 sps:$4 sm:$0xff]  }
 0x3c2   : > { %7758 = vmatpush1.bf16.msra.mxu1 %v9722_v26  ;;  %7431 = vmatprep.subr.bf16.mxu0 %v9727_v27  ;;  %v9787_v26 = vld [vmem:[#allocation8 + $0xa64] ss:$16 sps:$4 sm:$0xff]   ;;  %v9790_v27 = vld [vmem:[#allocation8 + $0xa6c] ss:$16 sps:$4 sm:$0xff]  }
 0x3c3   : > { %7759 = vmatprep.subr.bf16.mxu1 %v9730_v28  ;;  %v9785_v28 = vld [vmem:[#allocation8 + $0xa60] ss:$16 sps:$4 sm:$0xff]  }
 0x3c5   : > { %7432 = vmatpush1.bf16.msra.mxu0 %v9725_v29  ;;  %v9788_v29 = vld [vmem:[#allocation8 + $0xa68] ss:$16 sps:$4 sm:$0xff]  }
 0x3c6   : > { %7760 = vmatpush1.bf16.msra.mxu1 %v9728_v30  ;;  %7433 = vmatprep.subr.bf16.mxu0 %v9733_v15  ;;  %v9793_v30 = vld [vmem:[#allocation8 + $0xa84] ss:$16 sps:$4 sm:$0xff]   ;;  %v9796_v15 = vld [vmem:[#allocation8 + $0xa8c] ss:$16 sps:$4 sm:$0xff]  }
 0x3c7   : > { %7761 = vmatprep.subr.bf16.mxu1 %v9736_v42  ;;  %v9791_v42 = vld [vmem:[#allocation8 + $0xa80] ss:$16 sps:$4 sm:$0xff]  }
 0x3c9   : > { %7434 = vmatpush1.bf16.msra.mxu0 %v9731_v43  ;;  %v9794_v43 = vld [vmem:[#allocation8 + $0xa88] ss:$16 sps:$4 sm:$0xff]  }
 0x3ca   : > { %7762 = vmatpush1.bf16.msra.mxu1 %v9734_v44  ;;  %7435 = vmatprep.subr.bf16.mxu0 %v9739_v46  ;;  %v9799_v44 = vld [vmem:[#allocation8 + $0xaa4] ss:$16 sps:$4 sm:$0xff]   ;;  %v9802_v46 = vld [vmem:[#allocation8 + $0xaac] ss:$16 sps:$4 sm:$0xff]  }
 0x3cb   : > { %7763 = vmatprep.subr.bf16.mxu1 %v9742_v47  ;;  %v9797_v47 = vld [vmem:[#allocation8 + $0xaa0] ss:$16 sps:$4 sm:$0xff]  }
 0x3cd   : > { %7436 = vmatpush1.bf16.msra.mxu0 %v9737_v48  ;;  %v9800_v48 = vld [vmem:[#allocation8 + $0xaa8] ss:$16 sps:$4 sm:$0xff]  }
 0x3ce   : > { %7764 = vmatpush1.bf16.msra.mxu1 %v9740_v8  ;;  %7437 = vmatprep.subr.bf16.mxu0 %v9745_v36  ;;  %v9805_v8 = vld [vmem:[#allocation8 + $0xac4] ss:$16 sps:$4 sm:$0xff]   ;;  %v9808_v36 = vld [vmem:[#allocation8 + $0xacc] ss:$16 sps:$4 sm:$0xff]  }
 0x3cf   : > { %7765 = vmatprep.subr.bf16.mxu1 %v9748_v49  ;;  %v9803_v49 = vld [vmem:[#allocation8 + $0xac0] ss:$16 sps:$4 sm:$0xff]  }
 0x3d1   : > { %7438 = vmatpush1.bf16.msra.mxu0 %v9743_v50  ;;  %v9806_v50 = vld [vmem:[#allocation8 + $0xac8] ss:$16 sps:$4 sm:$0xff]  }
 0x3d2   : > { %7766 = vmatpush1.bf16.msra.mxu1 %v9746_v53  ;;  %7439 = vmatprep.subr.bf16.mxu0 %v9751_v37  ;;  %v9811_v53 = vld [vmem:[#allocation8 + $0xae4] ss:$16 sps:$4 sm:$0xff]   ;;  %v9814_v37 = vld [vmem:[#allocation8 + $0xaec] ss:$16 sps:$4 sm:$0xff]  }
 0x3d3   : > { %7767 = vmatprep.subr.bf16.mxu1 %v9754_v51  ;;  %v9809_v51 = vld [vmem:[#allocation8 + $0xae0] ss:$16 sps:$4 sm:$0xff]  }
 0x3d5   : > { %7440 = vmatpush1.bf16.msra.mxu0 %v9749_v52  ;;  %v9812_v52 = vld [vmem:[#allocation8 + $0xae8] ss:$16 sps:$4 sm:$0xff]  }
 0x3d6   : > { %7768 = vmatpush1.bf16.msra.mxu1 %v9752_v55  ;;  %7441 = vmatprep.subr.bf16.mxu0 %v9757_v56  ;;  %v9820_v55 = vld [vmem:[#allocation8 + $0xb0c] ss:$16 sps:$4 sm:$0xff]   ;;  %v9815_v56 = vld [vmem:[#allocation8 + $0xb00] ss:$16 sps:$4 sm:$0xff]  }
 0x3d7   : > { %7769 = vmatprep.subr.bf16.mxu1 %v9760_v24  ;;  %v9818_v24 = vld [vmem:[#allocation8 + $0xb08] ss:$16 sps:$4 sm:$0xff]  }
 0x3d9   : > { %7442 = vmatpush1.bf16.msra.mxu0 %v9755_v59  ;;  %v9826_v59 = vld [vmem:[#allocation8 + $0xb2c] ss:$16 sps:$4 sm:$0xff]  }
 0x3da   : > { %7770 = vmatpush1.bf16.msra.mxu1 %v9758_v23  ;;  %7443 = vmatprep.subr.bf16.mxu0 %v9763_v61  ;;  %v9824_v23 = vld [vmem:[#allocation8 + $0xb28] ss:$16 sps:$4 sm:$0xff]   ;;  %v9829_v61 = vld [vmem:[#allocation8 + $0xb44] ss:$16 sps:$4 sm:$0xff]  }
 0x3db   : > { %7771 = vmatprep.subr.bf16.mxu1 %v9766_v4  ;;  %v9832_v4 = vld [vmem:[#allocation8 + $0xb4c] ss:$16 sps:$4 sm:$0xff]  }
 0x3dd   : > { %7444 = vmatpush1.bf16.msra.mxu0 %v9761_v32  ;;  %v9830_v32 = vld [vmem:[#allocation8 + $0xb48] ss:$16 sps:$4 sm:$0xff]  }
 0x3de   : > { %7772 = vmatpush1.bf16.msra.mxu1 %v9764_v0  ;;  %7454 = vmatprep.subr.bf16.mxu0 %v9769_v13  ;;  %v9838_v0 = vld [vmem:[#allocation8 + $0xb6c] ss:$16 sps:$4 sm:$0xff]   ;;  %v9833_v13 = vld [vmem:[#allocation8 + $0xb60] ss:$16 sps:$4 sm:$0xff]  }
 0x3df   : > { %7782 = vmatprep.subr.bf16.mxu1 %v9772_v1  ;;  %v9836_v1 = vld [vmem:[#allocation8 + $0xb68] ss:$16 sps:$4 sm:$0xff]  }
 0x3e0   : > { %7446 = vmatmul.mubr.bf16.vlgmr.msra.gmra.mrb[16].mxu0 %v4147_v5 }
 0x3e1   : > { %7774 = vmatmul.mubr.bf16.vlgmr.msra.gmra.mrb[16].mxu1 %v4147_v5  ;;  %7455 = vmatpush1.bf16.msra.mxu0 %v9767_v33  ;;  %v9844_v33 = vld [vmem:[#allocation8 + $0xb8c] ss:$16 sps:$4 sm:$0xff]   ;;  %v9839_v5 = vld [vmem:[#allocation8 + $0xb80] ss:$16 sps:$4 sm:$0xff]  }
 0x3e2   : > { %7486 = vmatprep.mubr.bf16.mxu0 %v4150_v16  ;;  %7783 = vmatpush1.bf16.msra.mxu1 %v9770_v7  ;;  %v9842_v7 = vld [vmem:[#allocation8 + $0xb88] ss:$16 sps:$4 sm:$0xff]  }
 0x3e3   : > { %7814 = vmatprep.mubr.bf16.mxu1 %v4150_v16  ;;  %7456 = vmatprep.subr.bf16.mxu0 %v9775_v11  ;;  %v9847_v11 = vld [vmem:[#allocation8 + $0xba4] ss:$16 sps:$4 sm:$0xff]   ;;  %v9850_v16 = vld [vmem:[#allocation8 + $0xbac] ss:$16 sps:$4 sm:$0xff]  }
 0x3e4   : > { %7784 = vmatprep.subr.bf16.mxu1 %v9778_v57  ;;  %v9845_v57 = vld [vmem:[#allocation8 + $0xba0] ss:$16 sps:$4 sm:$0xff]  }
 0x3e5   : > { %7457 = vmatpush1.bf16.msra.mxu0 %v9773_v17  ;;  %v856_v17 = vrot.slane %v10675_v14, %v10646_v39 }
 0x3e6   : > { %7785 = vmatpush1.bf16.msra.mxu1 %v9776_v18  ;;  %7458 = vmatprep.subr.bf16.mxu0 %v9781_v19  ;;  %v9848_v18 = vld [vmem:[#allocation8 + $0xba8] ss:$16 sps:$4 sm:$0xff]   ;;  %v9853_v19 = vld [vmem:[#allocation8 + $0xbc4] ss:$16 sps:$4 sm:$0xff]  }
 0x3e7   : > { %7786 = vmatprep.subr.bf16.mxu1 %v9784_v21  ;;  %v9856_v21 = vld [vmem:[#allocation8 + $0xbcc] ss:$16 sps:$4 sm:$0xff]  }
 0x3e9   : > { %7459 = vmatpush1.bf16.msra.mxu0 %v9779_v22  ;;  %v868_v22 = vrot.slane %v10675_v14, %v835_v10  ;;  %v9868_v10 = vld [vmem:[#allocation8 + $0xc0c] ss:$16 sps:$4 sm:$0xff]  }
 0x3ea   : > { %7787 = vmatpush1.bf16.msra.mxu1 %v9782_v25  ;;  %7460 = vmatprep.subr.bf16.mxu0 %v9787_v26  ;;  %v9851_v25 = vld [vmem:[#allocation8 + $0xbc0] ss:$16 sps:$4 sm:$0xff]   ;;  %v9094_v26 = vadd.f32 %v10639_v34, %v856_v17  ;;  %v9914_v17 = vld [vmem:[#allocation8 + $0xd08] ss:$16 sps:$4 sm:$0xff]  }
 0x3eb   : > { %7788 = vmatprep.subr.bf16.mxu1 %v9790_v27  ;;  %v9854_v27 = vld [vmem:[#allocation8 + $0xbc8] ss:$16 sps:$4 sm:$0xff]   ;;  %v9863_v34 = vld [vmem:[#allocation8 + $0xc00] ss:$16 sps:$4 sm:$0xff]  }
 0x3ed   : > { %7461 = vmatpush1.bf16.msra.mxu0 %v9785_v28  ;;  %v9859_v28 = vld [vmem:[#allocation8 + $0xbe4] ss:$16 sps:$4 sm:$0xff]  }
 0x3ee   : > { %7789 = vmatpush1.bf16.msra.mxu1 %v9788_v29  ;;  %7462 = vmatprep.subr.bf16.mxu0 %v9793_v30  ;;  %v9862_v29 = vld [vmem:[#allocation8 + $0xbec] ss:$16 sps:$4 sm:$0xff]   ;;  %v9097_v30 = vadd.f32 %v10670_v40, %v868_v22  ;;  %v9920_v22 = vld [vmem:[#allocation8 + $0xd28] ss:$16 sps:$4 sm:$0xff]  }
 0x3ef   : > { %7790 = vmatprep.subr.bf16.mxu1 %v9796_v15  ;;  %v9857_v15 = vld [vmem:[#allocation8 + $0xbe0] ss:$16 sps:$4 sm:$0xff]   ;;  %v9874_v40 = vld [vmem:[#allocation8 + $0xc2c] ss:$16 sps:$4 sm:$0xff]  }
 0x3f1   : > { %7463 = vmatpush1.bf16.msra.mxu0 %v9791_v42  ;;  %v4133_v42 = vmax.f32 %v9094_v26, 0.0  ;;  %v9928_v26 = vld [vmem:[#allocation8 + $0xd4c] ss:$16 sps:$4 sm:$0xff]  }
 0x3f2   : > { %7791 = vmatpush1.bf16.msra.mxu1 %v9794_v43  ;;  %7464 = vmatprep.subr.bf16.mxu0 %v9799_v44  ;;  %v9860_v43 = vld [vmem:[#allocation8 + $0xbe8] ss:$16 sps:$4 sm:$0xff]   ;;  %v9865_v44 = vld [vmem:[#allocation8 + $0xc04] ss:$16 sps:$4 sm:$0xff]  }
 0x3f3   : > { %7792 = vmatprep.subr.bf16.mxu1 %v9802_v46  ;;  %v4136_v46 = vmax.f32 %v9097_v30, 0.0  ;;  %v9934_v30 = vld [vmem:[#allocation8 + $0xd6c] ss:$16 sps:$4 sm:$0xff]  }
 0x3f5   : > { %7465 = vmatpush1.bf16.msra.mxu0 %v9797_v47  ;;  %v4149_v47 = vpack.c.bf16 %v4133_v42, %v4133_v42  ;;  %v9932_v42 = vld [vmem:[#allocation8 + $0xd68] ss:$16 sps:$4 sm:$0xff]  }
 0x3f6   : > { %7793 = vmatpush1.bf16.msra.mxu1 %v9800_v48  ;;  %7466 = vmatprep.subr.bf16.mxu0 %v9805_v8  ;;  %v9866_v48 = vld [vmem:[#allocation8 + $0xc08] ss:$16 sps:$4 sm:$0xff]   ;;  %v9871_v8 = vld [vmem:[#allocation8 + $0xc24] ss:$16 sps:$4 sm:$0xff]  }
 0x3f7   : > { %7794 = vmatprep.subr.bf16.mxu1 %v9808_v36  ;;  %v4152_v36 = vpack.c.bf16 %v4136_v46, %v4136_v46  ;;  %v9938_v46 = vld [vmem:[#allocation8 + $0xd88] ss:$16 sps:$4 sm:$0xff]  }
 0x3f9   : > { %7467 = vmatpush1.bf16.msra.mxu0 %v9803_v49  ;;  %v9869_v49 = vld [vmem:[#allocation8 + $0xc20] ss:$16 sps:$4 sm:$0xff]  }
 0x3fa   : > { %7795 = vmatpush1.bf16.msra.mxu1 %v9806_v50  ;;  %7468 = vmatprep.subr.bf16.mxu0 %v9811_v53  ;;  %v9872_v50 = vld [vmem:[#allocation8 + $0xc28] ss:$16 sps:$4 sm:$0xff]   ;;  %v9877_v53 = vld [vmem:[#allocation8 + $0xc44] ss:$16 sps:$4 sm:$0xff]  }
 0x3fb   : > { %7796 = vmatprep.subr.bf16.mxu1 %v9814_v37  ;;  %v9880_v37 = vld [vmem:[#allocation8 + $0xc4c] ss:$16 sps:$4 sm:$0xff]  }
 0x3fd   : > { %7469 = vmatpush1.bf16.msra.mxu0 %v9809_v51  ;;  %v9875_v51 = vld [vmem:[#allocation8 + $0xc40] ss:$16 sps:$4 sm:$0xff]  }
 0x3fe   : > { %7797 = vmatpush1.bf16.msra.mxu1 %v9812_v52  ;;  %7470 = vmatprep.subr.bf16.mxu0 %v9817_v54  ;;  %v9878_v52 = vld [vmem:[#allocation8 + $0xc48] ss:$16 sps:$4 sm:$0xff]   ;;  %v9883_v54 = vld [vmem:[#allocation8 + $0xc64] ss:$16 sps:$4 sm:$0xff]  }
 0x3ff   : > { %7798 = vmatprep.subr.bf16.mxu1 %v9820_v55  ;;  %v9886_v55 = vld [vmem:[#allocation8 + $0xc6c] ss:$16 sps:$4 sm:$0xff]  }
 0x401   : > { %7471 = vmatpush1.bf16.msra.mxu0 %v9815_v56  ;;  %v9881_v56 = vld [vmem:[#allocation8 + $0xc60] ss:$16 sps:$4 sm:$0xff]  }
 0x402   : > { %7799 = vmatpush1.bf16.msra.mxu1 %v9818_v24  ;;  %7472 = vmatprep.subr.bf16.mxu0 %v9823_v58  ;;  %v9884_v24 = vld [vmem:[#allocation8 + $0xc68] ss:$16 sps:$4 sm:$0xff]   ;;  %v9889_v58 = vld [vmem:[#allocation8 + $0xc84] ss:$16 sps:$4 sm:$0xff]  }
 0x403   : > { %7800 = vmatprep.subr.bf16.mxu1 %v9826_v59  ;;  %v9892_v59 = vld [vmem:[#allocation8 + $0xc8c] ss:$16 sps:$4 sm:$0xff]  }
 0x405   : > { %7473 = vmatpush1.bf16.msra.mxu0 %v9821_v60  ;;  %v9887_v60 = vld [vmem:[#allocation8 + $0xc80] ss:$16 sps:$4 sm:$0xff]  }
 0x406   : > { %7801 = vmatpush1.bf16.msra.mxu1 %v9824_v23  ;;  %7474 = vmatprep.subr.bf16.mxu0 %v9829_v61  ;;  %v9890_v23 = vld [vmem:[#allocation8 + $0xc88] ss:$16 sps:$4 sm:$0xff]   ;;  %v9895_v61 = vld [vmem:[#allocation8 + $0xca4] ss:$16 sps:$4 sm:$0xff]  }
 0x407   : > { %7802 = vmatprep.subr.bf16.mxu1 %v9832_v4  ;;  %v9898_v4 = vld [vmem:[#allocation8 + $0xcac] ss:$16 sps:$4 sm:$0xff]  }
 0x409   : > { %7475 = vmatpush1.bf16.msra.mxu0 %v9827_v62  ;;  %v9893_v62 = vld [vmem:[#allocation8 + $0xca0] ss:$16 sps:$4 sm:$0xff]  }
 0x40a   : > { %7803 = vmatpush1.bf16.msra.mxu1 %v9830_v32  ;;  %7476 = vmatprep.subr.bf16.mxu0 %v9835_v63  ;;  %v9896_v32 = vld [vmem:[#allocation8 + $0xca8] ss:$16 sps:$4 sm:$0xff]   ;;  %v9901_v63 = vld [vmem:[#allocation8 + $0xcc4] ss:$16 sps:$4 sm:$0xff]  }
 0x40b   : > { %7804 = vmatprep.subr.bf16.mxu1 %v9838_v0  ;;  %v9904_v0 = vld [vmem:[#allocation8 + $0xccc] ss:$16 sps:$4 sm:$0xff]  }
 0x40d   : > { %7477 = vmatpush1.bf16.msra.mxu0 %v9833_v13  ;;  %v9899_v13 = vld [vmem:[#allocation8 + $0xcc0] ss:$16 sps:$4 sm:$0xff]  }
 0x40e   : > { %7805 = vmatpush1.bf16.msra.mxu1 %v9836_v1  ;;  %7478 = vmatprep.subr.bf16.mxu0 %v9841_v2  ;;  %v9902_v1 = vld [vmem:[#allocation8 + $0xcc8] ss:$16 sps:$4 sm:$0xff]   ;;  %v9907_v2 = vld [vmem:[#allocation8 + $0xce4] ss:$16 sps:$4 sm:$0xff]  }
 0x40f   : > { %7806 = vmatprep.subr.bf16.mxu1 %v9844_v33  ;;  %v9910_v33 = vld [vmem:[#allocation8 + $0xcec] ss:$16 sps:$4 sm:$0xff]  }
 0x411   : > { %7479 = vmatpush1.bf16.msra.mxu0 %v9839_v5  ;;  %v9905_v5 = vld [vmem:[#allocation8 + $0xce0] ss:$16 sps:$4 sm:$0xff]  }
 0x412   : > { %7807 = vmatpush1.bf16.msra.mxu1 %v9842_v7  ;;  %7480 = vmatprep.subr.bf16.mxu0 %v9847_v11  ;;  %v9908_v7 = vld [vmem:[#allocation8 + $0xce8] ss:$16 sps:$4 sm:$0xff]   ;;  %v9913_v11 = vld [vmem:[#allocation8 + $0xd04] ss:$16 sps:$4 sm:$0xff]  }
 0x413   : > { %7808 = vmatprep.subr.bf16.mxu1 %v9850_v16  ;;  %v9916_v16 = vld [vmem:[#allocation8 + $0xd0c] ss:$16 sps:$4 sm:$0xff]  }
 0x415   : > { %7481 = vmatpush1.bf16.msra.mxu0 %v9845_v57  ;;  %v9911_v57 = vld [vmem:[#allocation8 + $0xd00] ss:$16 sps:$4 sm:$0xff]  }
 0x416   : > { %7809 = vmatpush1.bf16.msra.mxu1 %v9848_v18  ;;  %7482 = vmatprep.subr.bf16.mxu0 %v9853_v19  ;;  %v9919_v18 = vld [vmem:[#allocation8 + $0xd24] ss:$16 sps:$4 sm:$0xff]   ;;  %v9922_v19 = vld [vmem:[#allocation8 + $0xd2c] ss:$16 sps:$4 sm:$0xff]  }
 0x417   : > { %7810 = vmatprep.subr.bf16.mxu1 %v9856_v21  ;;  %v9917_v21 = vld [vmem:[#allocation8 + $0xd20] ss:$16 sps:$4 sm:$0xff]  }
 0x419   : > { %7483 = vmatpush1.bf16.msra.mxu0 %v9851_v25  ;;  %v9925_v25 = vld [vmem:[#allocation8 + $0xd44] ss:$16 sps:$4 sm:$0xff]  }
 0x41a   : > { %7811 = vmatpush1.bf16.msra.mxu1 %v9854_v27  ;;  %7484 = vmatprep.subr.bf16.mxu0 %v9859_v28  ;;  %v9923_v27 = vld [vmem:[#allocation8 + $0xd40] ss:$16 sps:$4 sm:$0xff]   ;;  %v9926_v28 = vld [vmem:[#allocation8 + $0xd48] ss:$16 sps:$4 sm:$0xff]  }
 0x41b   : > { %7812 = vmatprep.subr.bf16.mxu1 %v9862_v29  ;;  %v9931_v29 = vld [vmem:[#allocation8 + $0xd64] ss:$16 sps:$4 sm:$0xff]  }
 0x41d   : > { %7485 = vmatpush1.bf16.msra.mxu0 %v9857_v15  ;;  %v9929_v15 = vld [vmem:[#allocation8 + $0xd60] ss:$16 sps:$4 sm:$0xff]  }
 0x41e   : > { %7813 = vmatpush1.bf16.msra.mxu1 %v9860_v43  ;;  %7495 = vmatprep.subr.bf16.mxu0 %v9865_v44  ;;  %v9937_v43 = vld [vmem:[#allocation8 + $0xd84] ss:$16 sps:$4 sm:$0xff]   ;;  %v9940_v44 = vld [vmem:[#allocation8 + $0xd8c] ss:$16 sps:$4 sm:$0xff]  }
 0x41f   : > { %7823 = vmatprep.subr.bf16.mxu1 %v9868_v10  ;;  %v9935_v10 = vld [vmem:[#allocation8 + $0xd80] ss:$16 sps:$4 sm:$0xff]  }
 0x420   : > { %7487 = vmatmul.mubr.bf16.vlgmr.msra.gmra.mrb[16].mxu0 %v4149_v47 }
 0x421   : > { %7815 = vmatmul.mubr.bf16.vlgmr.msra.gmra.mrb[16].mxu1 %v4149_v47  ;;  %7496 = vmatpush1.bf16.msra.mxu0 %v9863_v34  ;;  %v9943_v34 = vld [vmem:[#allocation8 + $0xda4] ss:$16 sps:$4 sm:$0xff]   ;;  %v9946_v47 = vld [vmem:[#allocation8 + $0xdac] ss:$16 sps:$4 sm:$0xff]  }
 0x422   : > { %7527 = vmatprep.mubr.bf16.mxu0 %v4152_v36  ;;  %7824 = vmatpush1.bf16.msra.mxu1 %v9866_v48  ;;  %v9941_v48 = vld [vmem:[#allocation8 + $0xda0] ss:$16 sps:$4 sm:$0xff]  }
 0x423   : > { %7855 = vmatprep.mubr.bf16.mxu1 %v4152_v36  ;;  %7497 = vmatprep.subr.bf16.mxu0 %v9871_v8  ;;  %v864_v8 = vrot.slane %v10675_v14, %v831_v41  ;;  %v9944_v36 = vld [vmem:[#allocation8 + $0xda8] ss:$16 sps:$4 sm:$0xff]   ;;  %v9958_v41 = vld [vmem:[#allocation8 + $0xdec] ss:$16 sps:$4 sm:$0xff]  }
 0x424   : > { %7825 = vmatprep.subr.bf16.mxu1 %v9874_v40  ;;  %v9949_v40 = vld [vmem:[#allocation8 + $0xdc4] ss:$16 sps:$4 sm:$0xff]  }
 0x425   : > { %7498 = vmatpush1.bf16.msra.mxu0 %v9869_v49  ;;  %v9952_v49 = vld [vmem:[#allocation8 + $0xdcc] ss:$16 sps:$4 sm:$0xff]  }
 0x426   : > { %7826 = vmatpush1.bf16.msra.mxu1 %v9872_v50  ;;  %7499 = vmatprep.subr.bf16.mxu0 %v9877_v53  ;;  %v876_v50 = vrot.slane %v10675_v14, %v843_v9  ;;  %v9947_v53 = vld [vmem:[#allocation8 + $0xdc0] ss:$16 sps:$4 sm:$0xff]   ;;  %v9964_v9 = vld [vmem:[#allocation8 + $0xe0c] ss:$16 sps:$4 sm:$0xff]  }
 0x427   : > { %7827 = vmatprep.subr.bf16.mxu1 %v9880_v37  ;;  %v9096_v37 = vadd.f32 %v10666_v31, %v864_v8  ;;  %v9959_v31 = vld [vmem:[#allocation8 + $0xe00] ss:$16 sps:$4 sm:$0xff]   ;;  %v10021_v8 = vld [vmem:[#allocation8 + $0xf44] ss:$16 sps:$4 sm:$0xff]  }
 0x429   : > { %7500 = vmatpush1.bf16.msra.mxu0 %v9875_v51  ;;  %v9950_v51 = vld [vmem:[#allocation8 + $0xdc8] ss:$16 sps:$4 sm:$0xff]  }
 0x42a   : > { %7828 = vmatpush1.bf16.msra.mxu1 %v9878_v52  ;;  %7501 = vmatprep.subr.bf16.mxu0 %v9883_v54  ;;  %v9955_v52 = vld [vmem:[#allocation8 + $0xde4] ss:$16 sps:$4 sm:$0xff]   ;;  %v9099_v54 = vadd.f32 %v10672_v35, %v876_v50  ;;  %v9970_v35 = vld [vmem:[#allocation8 + $0xe2c] ss:$16 sps:$4 sm:$0xff]  }
 0x42b   : > { %7829 = vmatprep.subr.bf16.mxu1 %v9886_v55  ;;  %v9953_v55 = vld [vmem:[#allocation8 + $0xde0] ss:$16 sps:$4 sm:$0xff]   ;;  %v10027_v50 = vld [vmem:[#allocation8 + $0xf64] ss:$16 sps:$4 sm:$0xff]  }
 0x42c   : > { %v4138_v14 = vmax.f32 %v9099_v54, 0.0  ;;  %v10031_v54 = vld [vmem:[#allocation8 + $0xf80] ss:$16 sps:$4 sm:$0xff]  }
 0x42d   : > { %7502 = vmatpush1.bf16.msra.mxu0 %v9881_v56  ;;  %v4135_v56 = vmax.f32 %v9096_v37, 0.0  ;;  %v10025_v37 = vld [vmem:[#allocation8 + $0xf60] ss:$16 sps:$4 sm:$0xff]  }
 0x42e   : > { %7830 = vmatpush1.bf16.msra.mxu1 %v9884_v24  ;;  %7503 = vmatprep.subr.bf16.mxu0 %v9889_v58  ;;  %v9956_v24 = vld [vmem:[#allocation8 + $0xde8] ss:$16 sps:$4 sm:$0xff]   ;;  %v9961_v58 = vld [vmem:[#allocation8 + $0xe04] ss:$16 sps:$4 sm:$0xff]  }
 0x42f   : > { %7831 = vmatprep.subr.bf16.mxu1 %v9892_v59  ;;  %v4151_v59 = vpack.c.bf16 %v4135_v56, %v4135_v56  ;;  %v10039_v56 = vld [vmem:[#allocation8 + $0xfa4] ss:$16 sps:$4 sm:$0xff]  }
 0x431   : > { %7504 = vmatpush1.bf16.msra.mxu0 %v9887_v60  ;;  %v9962_v60 = vld [vmem:[#allocation8 + $0xe08] ss:$16 sps:$4 sm:$0xff]  }
 0x432   : > { %7832 = vmatpush1.bf16.msra.mxu1 %v9890_v23  ;;  %7505 = vmatprep.subr.bf16.mxu0 %v9895_v61  ;;  %v9967_v23 = vld [vmem:[#allocation8 + $0xe24] ss:$16 sps:$4 sm:$0xff]   ;;  %v4154_v61 = vpack.c.bf16 %v4138_v14, %v4138_v14 }
 0x433   : > { %7833 = vmatprep.subr.bf16.mxu1 %v9898_v4  ;;  %v9965_v4 = vld [vmem:[#allocation8 + $0xe20] ss:$16 sps:$4 sm:$0xff]  }
 0x435   : > { %7506 = vmatpush1.bf16.msra.mxu0 %v9893_v62  ;;  %v9968_v62 = vld [vmem:[#allocation8 + $0xe28] ss:$16 sps:$4 sm:$0xff]  }
 0x436   : > { %7834 = vmatpush1.bf16.msra.mxu1 %v9896_v32  ;;  %7507 = vmatprep.subr.bf16.mxu0 %v9901_v63  ;;  %v9973_v32 = vld [vmem:[#allocation8 + $0xe44] ss:$16 sps:$4 sm:$0xff]   ;;  %v9976_v63 = vld [vmem:[#allocation8 + $0xe4c] ss:$16 sps:$4 sm:$0xff]  }
 0x437   : > { %7835 = vmatprep.subr.bf16.mxu1 %v9904_v0  ;;  %v9971_v0 = vld [vmem:[#allocation8 + $0xe40] ss:$16 sps:$4 sm:$0xff]  }
 0x439   : > { %7508 = vmatpush1.bf16.msra.mxu0 %v9899_v13  ;;  %v9974_v13 = vld [vmem:[#allocation8 + $0xe48] ss:$16 sps:$4 sm:$0xff]  }
 0x43a   : > { %7836 = vmatpush1.bf16.msra.mxu1 %v9902_v1  ;;  %7509 = vmatprep.subr.bf16.mxu0 %v9907_v2  ;;  %v9979_v1 = vld [vmem:[#allocation8 + $0xe64] ss:$16 sps:$4 sm:$0xff]   ;;  %v9982_v2 = vld [vmem:[#allocation8 + $0xe6c] ss:$16 sps:$4 sm:$0xff]  }
 0x43b   : > { %7837 = vmatprep.subr.bf16.mxu1 %v9910_v33  ;;  %v9977_v33 = vld [vmem:[#allocation8 + $0xe60] ss:$16 sps:$4 sm:$0xff]  }
 0x43d   : > { %7510 = vmatpush1.bf16.msra.mxu0 %v9905_v5  ;;  %v9980_v5 = vld [vmem:[#allocation8 + $0xe68] ss:$16 sps:$4 sm:$0xff]  }
 0x43e   : > { %7838 = vmatpush1.bf16.msra.mxu1 %v9908_v7  ;;  %7511 = vmatprep.subr.bf16.mxu0 %v9913_v11  ;;  %v9985_v7 = vld [vmem:[#allocation8 + $0xe84] ss:$16 sps:$4 sm:$0xff]   ;;  %v9988_v11 = vld [vmem:[#allocation8 + $0xe8c] ss:$16 sps:$4 sm:$0xff]  }
 0x43f   : > { %7839 = vmatprep.subr.bf16.mxu1 %v9916_v16  ;;  %v9983_v16 = vld [vmem:[#allocation8 + $0xe80] ss:$16 sps:$4 sm:$0xff]  }
 0x441   : > { %7512 = vmatpush1.bf16.msra.mxu0 %v9911_v57  ;;  %v9986_v57 = vld [vmem:[#allocation8 + $0xe88] ss:$16 sps:$4 sm:$0xff]  }
 0x442   : > { %7840 = vmatpush1.bf16.msra.mxu1 %v9914_v17  ;;  %7513 = vmatprep.subr.bf16.mxu0 %v9919_v18  ;;  %v9991_v17 = vld [vmem:[#allocation8 + $0xea4] ss:$16 sps:$4 sm:$0xff]   ;;  %v9994_v18 = vld [vmem:[#allocation8 + $0xeac] ss:$16 sps:$4 sm:$0xff]  }
 0x443   : > { %7841 = vmatprep.subr.bf16.mxu1 %v9922_v19  ;;  %v9989_v19 = vld [vmem:[#allocation8 + $0xea0] ss:$16 sps:$4 sm:$0xff]  }
 0x445   : > { %7514 = vmatpush1.bf16.msra.mxu0 %v9917_v21  ;;  %v9992_v21 = vld [vmem:[#allocation8 + $0xea8] ss:$16 sps:$4 sm:$0xff]  }
 0x446   : > { %7842 = vmatpush1.bf16.msra.mxu1 %v9920_v22  ;;  %7515 = vmatprep.subr.bf16.mxu0 %v9925_v25  ;;  %v9997_v22 = vld [vmem:[#allocation8 + $0xec4] ss:$16 sps:$4 sm:$0xff]   ;;  %v10000_v25 = vld [vmem:[#allocation8 + $0xecc] ss:$16 sps:$4 sm:$0xff]  }
 0x447   : > { %7843 = vmatprep.subr.bf16.mxu1 %v9928_v26  ;;  %v9995_v26 = vld [vmem:[#allocation8 + $0xec0] ss:$16 sps:$4 sm:$0xff]  }
 0x449   : > { %7516 = vmatpush1.bf16.msra.mxu0 %v9923_v27  ;;  %v9998_v27 = vld [vmem:[#allocation8 + $0xec8] ss:$16 sps:$4 sm:$0xff]  }
 0x44a   : > { %7844 = vmatpush1.bf16.msra.mxu1 %v9926_v28  ;;  %7517 = vmatprep.subr.bf16.mxu0 %v9931_v29  ;;  %v10003_v28 = vld [vmem:[#allocation8 + $0xee4] ss:$16 sps:$4 sm:$0xff]   ;;  %v10006_v29 = vld [vmem:[#allocation8 + $0xeec] ss:$16 sps:$4 sm:$0xff]  }
 0x44b   : > { %7845 = vmatprep.subr.bf16.mxu1 %v9934_v30  ;;  %v10001_v30 = vld [vmem:[#allocation8 + $0xee0] ss:$16 sps:$4 sm:$0xff]  }
 0x44d   : > { %7518 = vmatpush1.bf16.msra.mxu0 %v9929_v15  ;;  %v10004_v15 = vld [vmem:[#allocation8 + $0xee8] ss:$16 sps:$4 sm:$0xff]  }
 0x44e   : > { %7846 = vmatpush1.bf16.msra.mxu1 %v9932_v42  ;;  %7519 = vmatprep.subr.bf16.mxu0 %v9937_v43  ;;  %v10009_v42 = vld [vmem:[#allocation8 + $0xf04] ss:$16 sps:$4 sm:$0xff]   ;;  %v10012_v43 = vld [vmem:[#allocation8 + $0xf0c] ss:$16 sps:$4 sm:$0xff]  }
 0x44f   : > { %7847 = vmatprep.subr.bf16.mxu1 %v9940_v44  ;;  %v10007_v44 = vld [vmem:[#allocation8 + $0xf00] ss:$16 sps:$4 sm:$0xff]  }
 0x451   : > { %7520 = vmatpush1.bf16.msra.mxu0 %v9935_v10  ;;  %v10010_v10 = vld [vmem:[#allocation8 + $0xf08] ss:$16 sps:$4 sm:$0xff]  }
 0x452   : > { %7848 = vmatpush1.bf16.msra.mxu1 %v9938_v46  ;;  %7521 = vmatprep.subr.bf16.mxu0 %v9943_v34  ;;  %v10015_v46 = vld [vmem:[#allocation8 + $0xf24] ss:$16 sps:$4 sm:$0xff]   ;;  %v10018_v34 = vld [vmem:[#allocation8 + $0xf2c] ss:$16 sps:$4 sm:$0xff]  }
 0x453   : > { %7849 = vmatprep.subr.bf16.mxu1 %v9946_v47  ;;  %v10013_v47 = vld [vmem:[#allocation8 + $0xf20] ss:$16 sps:$4 sm:$0xff]  }
 0x455   : > { %7522 = vmatpush1.bf16.msra.mxu0 %v9941_v48  ;;  %v10016_v48 = vld [vmem:[#allocation8 + $0xf28] ss:$16 sps:$4 sm:$0xff]  }
 0x456   : > { %7850 = vmatpush1.bf16.msra.mxu1 %v9944_v36  ;;  %7523 = vmatprep.subr.bf16.mxu0 %v9949_v40  ;;  %v10024_v36 = vld [vmem:[#allocation8 + $0xf4c] ss:$16 sps:$4 sm:$0xff]   ;;  %v10019_v40 = vld [vmem:[#allocation8 + $0xf40] ss:$16 sps:$4 sm:$0xff]  }
 0x457   : > { %7851 = vmatprep.subr.bf16.mxu1 %v9952_v49  ;;  %v10022_v49 = vld [vmem:[#allocation8 + $0xf48] ss:$16 sps:$4 sm:$0xff]  }
 0x459   : > { %7524 = vmatpush1.bf16.msra.mxu0 %v9947_v53  ;;  %v10030_v53 = vld [vmem:[#allocation8 + $0xf6c] ss:$16 sps:$4 sm:$0xff]  }
 0x45a   : > { %7852 = vmatpush1.bf16.msra.mxu1 %v9950_v51  ;;  %7525 = vmatprep.subr.bf16.mxu0 %v9955_v52  ;;  %v10028_v51 = vld [vmem:[#allocation8 + $0xf68] ss:$16 sps:$4 sm:$0xff]   ;;  %v10033_v52 = vld [vmem:[#allocation8 + $0xf84] ss:$16 sps:$4 sm:$0xff]  }
 0x45b   : > { %7853 = vmatprep.subr.bf16.mxu1 %v9958_v41  ;;  %v10036_v41 = vld [vmem:[#allocation8 + $0xf8c] ss:$16 sps:$4 sm:$0xff]  }
 0x45d   : > { %7526 = vmatpush1.bf16.msra.mxu0 %v9953_v55  ;;  %v10034_v55 = vld [vmem:[#allocation8 + $0xf88] ss:$16 sps:$4 sm:$0xff]  }
 0x45e   : > { %7854 = vmatpush1.bf16.msra.mxu1 %v9956_v24  ;;  %7536 = vmatprep.subr.bf16.mxu0 %v9961_v58  ;;  %v10042_v24 = vld [vmem:[#allocation8 + $0xfac] ss:$16 sps:$4 sm:$0xff]   ;;  %v10037_v58 = vld [vmem:[#allocation8 + $0xfa0] ss:$16 sps:$4 sm:$0xff]  }
 0x45f   : > { %7864 = vmatprep.subr.bf16.mxu1 %v9964_v9  ;;  %v10056_v9 = vld [vmem:[#allocation7 + $0x8] sm:$0xff] }
 0x460   : > { %7528 = vmatmul.mubr.bf16.vlgmr.msra.gmra.mrb[16].mxu0 %v4151_v59  ;;  %v872_v14 = vrot.slane %v10056_v9, %v839_v3 }
 0x461   : > { %7856 = vmatmul.mubr.bf16.vlgmr.msra.gmra.mrb[16].mxu1 %v4151_v59  ;;  %7537 = vmatpush1.bf16.msra.mxu0 %v9959_v31  ;;  %v10040_v31 = vld [vmem:[#allocation8 + $0xfa8] ss:$16 sps:$4 sm:$0xff]   ;;  %v10045_v59 = vld [vmem:[#allocation8 + $0xfc4] ss:$16 sps:$4 sm:$0xff]  }
 0x462   : > { %7568 = vmatprep.mubr.bf16.mxu0 %v4154_v61  ;;  %7865 = vmatpush1.bf16.msra.mxu1 %v9962_v60  ;;  %v10048_v60 = vld [vmem:[#allocation8 + $0xfcc] ss:$16 sps:$4 sm:$0xff]  }
 0x463   : > { %7896 = vmatprep.mubr.bf16.mxu1 %v4154_v61  ;;  %7538 = vmatprep.subr.bf16.mxu0 %v9967_v23  ;;  %v10043_v23 = vld [vmem:[#allocation8 + $0xfc0] ss:$16 sps:$4 sm:$0xff]   ;;  %v9098_v61 = vadd.f32 %v10668_v38, %v872_v14 }
 0x464   : > { %7866 = vmatprep.subr.bf16.mxu1 %v9970_v35  ;;  %v10046_v35 = vld [vmem:[#allocation8 + $0xfc8] ss:$16 sps:$4 sm:$0xff]   ;;  %v4667_v38 = vld [vmem:[#allocation10] sm:$0xf] }
 0x465   : > { %7539 = vmatpush1.bf16.msra.mxu0 %v9965_v4  ;;  %v10051_v4 = vld [vmem:[#allocation8 + $0xfe4] ss:$16 sps:$4 sm:$0xff]   ;;  %v4137_v3 = vmax.f32 %v9098_v61, 0.0 }
 0x466   : > { %7867 = vmatpush1.bf16.msra.mxu1 %v9968_v62  ;;  %7540 = vmatprep.subr.bf16.mxu0 %v9973_v32  ;;  %v10054_v62 = vld [vmem:[#allocation8 + $0xfec] ss:$16 sps:$4 sm:$0xff]   ;;  %v10052_v32 = vld [vmem:[#allocation8 + $0xfe8] ss:$16 sps:$4 sm:$0xff]  }
 0x467   : > { %7868 = vmatprep.subr.bf16.mxu1 %v9976_v63  ;;  %v4153_v63 = vpack.c.bf16 %v4137_v3, %v4137_v3 }
 0x469   : > { %7541 = vmatpush1.bf16.msra.mxu0 %v9971_v0  ;;  %v4672_v0 = vrot.slane %v4667_v38, %v10626_v12 }
 0x46a   : > { %7869 = vmatpush1.bf16.msra.mxu1 %v9974_v13  ;;  %7542 = vmatprep.subr.bf16.mxu0 %v9979_v1  ;;  %v4680_v13 = vrot.slane %v4667_v38, %v10646_v39  ;;  %v4676_v1 = vrot.slane %v4667_v38, %v10616_v20 }
 0x46b   : > { %7870 = vmatprep.subr.bf16.mxu1 %v9982_v2  ;;  %v4684_v2 = vrot.slane %v4667_v38, %v10629_v45 }
 0x46d   : > { %7543 = vmatpush1.bf16.msra.mxu0 %v9977_v33 }
 0x46e   : > { %7871 = vmatpush1.bf16.msra.mxu1 %v9980_v5  ;;  %7544 = vmatprep.subr.bf16.mxu0 %v9985_v7 }
 0x46f   : > { %7872 = vmatprep.subr.bf16.mxu1 %v9988_v11 }
 0x471   : > { %7545 = vmatpush1.bf16.msra.mxu0 %v9983_v16 }
 0x472   : > { %7873 = vmatpush1.bf16.msra.mxu1 %v9986_v57  ;;  %7546 = vmatprep.subr.bf16.mxu0 %v9991_v17 }
 0x473   : > { %7874 = vmatprep.subr.bf16.mxu1 %v9994_v18 }
 0x475   : > { %7547 = vmatpush1.bf16.msra.mxu0 %v9989_v19 }
 0x476   : > { %7875 = vmatpush1.bf16.msra.mxu1 %v9992_v21  ;;  %7548 = vmatprep.subr.bf16.mxu0 %v9997_v22 }
 0x477   : > { %7876 = vmatprep.subr.bf16.mxu1 %v10000_v25 }
 0x479   : > { %7549 = vmatpush1.bf16.msra.mxu0 %v9995_v26 }
 0x47a   : > { %7877 = vmatpush1.bf16.msra.mxu1 %v9998_v27  ;;  %7550 = vmatprep.subr.bf16.mxu0 %v10003_v28 }
 0x47b   : > { %7878 = vmatprep.subr.bf16.mxu1 %v10006_v29 }
 0x47d   : > { %7551 = vmatpush1.bf16.msra.mxu0 %v10001_v30 }
 0x47e   : > { %7879 = vmatpush1.bf16.msra.mxu1 %v10004_v15  ;;  %7552 = vmatprep.subr.bf16.mxu0 %v10009_v42 }
 0x47f   : > { %7880 = vmatprep.subr.bf16.mxu1 %v10012_v43 }
 0x481   : > { %7553 = vmatpush1.bf16.msra.mxu0 %v10007_v44 }
 0x482   : > { %7881 = vmatpush1.bf16.msra.mxu1 %v10010_v10  ;;  %7554 = vmatprep.subr.bf16.mxu0 %v10015_v46 }
 0x483   : > { %7882 = vmatprep.subr.bf16.mxu1 %v10018_v34 }
 0x485   : > { %7555 = vmatpush1.bf16.msra.mxu0 %v10013_v47 }
 0x486   : > { %7883 = vmatpush1.bf16.msra.mxu1 %v10016_v48  ;;  %7556 = vmatprep.subr.bf16.mxu0 %v10021_v8 }
 0x487   : > { %7884 = vmatprep.subr.bf16.mxu1 %v10024_v36 }
 0x489   : > { %7557 = vmatpush1.bf16.msra.mxu0 %v10019_v40 }
 0x48a   : > { %7885 = vmatpush1.bf16.msra.mxu1 %v10022_v49  ;;  %7558 = vmatprep.subr.bf16.mxu0 %v10027_v50 }
 0x48b   : > { %7886 = vmatprep.subr.bf16.mxu1 %v10030_v53 }
 0x48d   : > { %7559 = vmatpush1.bf16.msra.mxu0 %v10025_v37 }
 0x48e   : > { %7887 = vmatpush1.bf16.msra.mxu1 %v10028_v51  ;;  %7560 = vmatprep.subr.bf16.mxu0 %v10033_v52 }
 0x48f   : > { %7888 = vmatprep.subr.bf16.mxu1 %v10036_v41 }
 0x491   : > { %7561 = vmatpush1.bf16.msra.mxu0 %v10031_v54 }
 0x492   : > { %7889 = vmatpush1.bf16.msra.mxu1 %v10034_v55  ;;  %7562 = vmatprep.subr.bf16.mxu0 %v10039_v56 }
 0x493   : > { %7890 = vmatprep.subr.bf16.mxu1 %v10042_v24 }
 0x495   : > { %7563 = vmatpush1.bf16.msra.mxu0 %v10037_v58 }
 0x496   : > { %7891 = vmatpush1.bf16.msra.mxu1 %v10040_v31  ;;  %7564 = vmatprep.subr.bf16.mxu0 %v10045_v59 }
 0x497   : > { %7892 = vmatprep.subr.bf16.mxu1 %v10048_v60 }
 0x499   : > { %7565 = vmatpush1.bf16.msra.mxu0 %v10043_v23 }
 0x49a   : > { %7893 = vmatpush1.bf16.msra.mxu1 %v10046_v35  ;;  %7566 = vmatprep.subr.bf16.mxu0 %v10051_v4 }
 0x49b   : > { %7894 = vmatprep.subr.bf16.mxu1 %v10054_v62 }
 0x49d   : > { %7567 = vmatpush1.bf16.msra.mxu0 %v10049_v6 }
 0x49e   : > { %7895 = vmatpush1.bf16.msra.mxu1 %v10052_v32 }
 0x4a0   : > { %7569 = vmatmul.mubr.bf16.vlgmr.msra.gmra.mrb[16].mxu0 %v4153_v63 }
 0x4a1   : > { %7897 = vmatmul.mubr.bf16.vlgmr.msra.gmra.mrb[16].mxu1 %v4153_v63 }
 0x573   : > { %v7570_v33 = vpop.f32.mrb[16].mxu0 }
 0x574   : > { %v9100_v5 = vadd.f32 %v7570_v33, %v4672_v0  ;;  %v7898_v7 = vpop.f32.mrb[16].mxu1  ;;  %v7572_v11 = vpop.f32.mrb[17].mxu0 }
 0x575   : > { %v9102_v16 = vadd.f32 %v7898_v7, %v4680_v13  ;;  %v9101_v57 = vadd.f32 %v7572_v11, %v4676_v1  ;;  %v7900_v17 = vpop.f32.mrb[17].mxu1  ;;  %v7574_v18 = vpop.f32.mrb[18].mxu0 }
 0x576   : > { %7905 = vst [vmem:[%s294_s17] sm:$0xff] %v9100_v5  ;;  %v9103_v12 = vadd.f32 %v7900_v17, %v4684_v2  ;;  %v7902_v39 = vpop.f32.mrb[18].mxu1  ;;  %v7575_v19 = vpop.f32.mrb[19].mxu0 }
 0x577   : > { %7907 = vst [vmem:[%s294_s17 + $0x10] sm:$0xff] %v9102_v16  ;;  %7906 = vst [vmem:[%s294_s17 + $0x8] sm:$0xff] %v9101_v57  ;;  %v7903_v20 = vpop.f32.mrb[19].mxu1 }
 0x578   : > { %7908 = vst [vmem:[%s294_s17 + $0x18] sm:$0xff] %v9103_v12 }
 0x579   : > { %10212 = shalt.err (!%p10209_p12)
}
 0x57a   : > { %s10213_s22 = scalar_lea.hbm %s10716_s27, 512  ;;  %s10217_s7 = scalar_lea.hbm %s10765_s5, 1024 }
 0x57b   : > { %p10214_p13 = scmp.ne.s32.totalorder %s10716_s27, %s10213_s22  ;;  %p10218_p9 = scmp.lt.u32.totalorder %s10716_s27, %s10765_s5 }
 0x57c   : > { %p10219_p4 = scmp.lt.u32.totalorder %s10217_s7, %s10213_s22  ;;  %p10221_p6 = scmp.lt.u32.totalorder %s10213_s22, %s10716_s27 }
 0x57d   : > { %p10215_p1 = pnand %p10214_p13, %p10783_p0 }
 0x57e   : > { %p10220_p8 = por %p10219_p4, %p10218_p9 }
 0x57f   : > { %p10216_p7 = pneg %p10215_p1 }
 0x580   : > { %p10222_p2 = por %p10221_p6, %p10220_p8 }
 0x582   : > { %p10223_p5 = pnand %p10222_p2, %p10216_p7 }
 0x584   : > { %10226 = shalt.err (!%p10223_p5)
}
 0x585   : > { %9210 = dma.vmem_to_hbm [thread:$0]  (%p10783_p0), %s10718_s30, 512, %s10716_s27, %s7910_s24  }
 0x586 PF: > { %s7936_s9 = sand.u32 1, %s10261_s18   ;;  %p10784_p10 = scmp.ne.s32.totalorder %s10776_s12, 0 }
 0x587   : > { %p10785_p11 = scmp.ge.s32.totalorder %s10273_s21, 2  ;;  %s7937_s17 = scalar_lea.sflag [#allocation4], %s7936_s9 }
 0x589   : > { %p9230_p3 = pnand %p10785_p11, %p10784_p10 }
 0x58b   : > { %10256 = dma.done.wait (!%p9230_p3), %s7937_s17, 512  }
 0x58c   : > { %10258 = vsyncadd (!%p9230_p3), %s7937_s17, 4294966784  ;;  %p20_p12 = scmp.ge.s32.totalorder %s10451_s28, 4   ;;  %s10786_s18 = smov %s10265_s19 }
 0x58d   : > { %s10787_s19 = smov %s10269_s20  ;;  %s10788_s20 = smov %s10462_s8 }
 0x58e   : > { %s10789_s21 = smov %s10451_s28  ;;  %22 = sbr.rel (!%p20_p12) target bundleno = 7 (0x7), region = 101 }
 0x595   :  { %7942 = vsyncpa [#allocation3], 1 }
 0x596   :  { %7944 = vsyncpa [#allocation3 + $0x1], 1 }
 0x597   :  { %7945 = vsyncpa [#allocation6], 1 }
 0x598   :  { %7946 = vsyncpa [#allocation9], 1 }
 0x599   :  { %7947 = vsyncpa [#allocation4], 1 }
 0x59a   :  { %7949 = vsyncpa [#allocation4 + $0x1], 1 }

// kernel: tpu_custom_call.1
= control target key start
LH: loop header
LB: loop body
LE: loop exit
PB: predicated region body
PF: predicated region fallthrough
CT: control target
= control target key end

     0   :  { %10 = vsyncpa [#allocation3], 0  ;;  %s10760_s0 = inlined_call_operand.hbm [shape: bf16[16,512], index: 0, kind: input, shape index: {}]   ;;  %s10761_s1 = inlined_call_operand.hbm [shape: bf16[512,2048], index: 1, kind: input, shape index: {}]   ;;  %s10762_s2 = inlined_call_operand.hbm [shape: f32[1,2048], index: 2, kind: input, shape index: {}]   ;;  %s10763_s3 = inlined_call_operand.hbm [shape: bf16[2048,512], index: 3, kind: input, shape index: {}]   ;;  %s10764_s4 = inlined_call_operand.hbm [shape: f32[1,512], index: 4, kind: input, shape index: {}]   ;;  %s10765_s5 = inlined_call_operand.hbm [shape: f32[16,512], index: 5, kind: output, shape index: {}]  }
   0x1   :  { %12 = vsyncpa [#allocation3 + $0x1], 0 }
   0x2   :  { %13 = vsyncpa [#allocation6], 0 }
   0x3   :  { %14 = vsyncpa [#allocation9], 0 }
   0x4   :  { %15 = vsyncpa [#allocation4], 0 }
   0x5   :  { %17 = vsyncpa [#allocation4 + $0x1], 0  ;;  %s10315_s18 = smov 0   ;;  %s10317_s19 = smov 0  }
   0x6   :  { %s10319_s20 = smov 0   ;;  %s10321_s21 = smov 0  }
   0x7 LB: > { %s10275_s22 = smov [#allocation5]   ;;  %s10336_s24 = sadd.s32 4294967295, %s10273_s21   ;;  %s10273_s21 = sphi %s10321_s21, %s10789_s21   ;;  %s10269_s20 = sphi %s10319_s20, %s10788_s20   ;;  %s10265_s19 = sphi %s10317_s19, %s10787_s19   ;;  %s10261_s18 = sphi %s10315_s18, %s10786_s18  }
   0x8   : > { %s176_s23 = sshll.u32 %s10275_s22, 4  ;;  %p8033_p0 = scmp.ge.s32.totalorder %s10273_s21, 1  ;;  %s10341_s23 = int_to_ptr.vmem [resolvable:$true] %s176_s23 }
   0x9   : > { %p10766_p1 = scmp.eq.s32.totalorder %s10336_s24, 0  ;;  %p164_p2 = scmp.lt.s32.totalorder %s10273_s21, 3 }
   0xa   : > { %s10276_s26 = smov [#allocation8]   ;;  %s10277_s29 = smov [#allocation7]  }
   0xb   : > { %p10343_p3 = pnand %p8033_p0, %p164_p2  ;;  %s200_s27 = sshll.u32 %s10276_s26, 4  ;;  %s10356_s27 = int_to_ptr.vmem [resolvable:$true] %s200_s27 }
   0xc   : > { %s10358_s30 = sshll.u32 %s10277_s29, 4  ;;  %s10057_s8 = scalar_lea.hbm %s10761_s1, 65536  ;;  %s191_s30 = int_to_ptr.vmem [resolvable:$true] %s10358_s30 }
   0xd   : > { %s10769_s25 = scalar_select %p10343_p3, 1, 0 }
   0xe   : > { %p9212_p5 = pneg %p10343_p3  ;;  %p10058_p7 = scmp.ne.s32.totalorder %s10761_s1, %s10057_s8 }
   0xf   : > { %p10064_p11 = scmp.lt.u32.totalorder %s10057_s8, %s10761_s1 }
  0x10   : > { %p10352_p6 = pnand %p9212_p5, %p10766_p1 }
  0x12   : > { %p10368_p8 = pneg %p10352_p6 }
  0x14   : > { %p10060_p9 = pnand %p10368_p8, %p10058_p7 }
  0x16   : > { %p10061_p10 = pneg %p10060_p9 }
  0x18   : > { %p10066_p12 = pnand %p10064_p11, %p10061_p10 }
  0x1a   : > { %10069 = shalt.err (!%p10066_p12)
}
  0x1b   : > { %s10070_s14 = scalar_lea.vmem %s10341_s23, 65536  ;;  %p10078_p5 = scmp.lt.s32.totalorder %s10341_s23, %s10341_s23 }
  0x1c   : > { %p10071_p13 = scmp.ne.s32.totalorder %s10341_s23, %s10070_s14  ;;  %p10079_p4 = scmp.lt.s32.totalorder %s10070_s14, %s10070_s14 }
  0x1e   : > { %p10073_p0 = pnand %p10071_p13, %p10368_p8  ;;  %p10080_p7 = por %p10079_p4, %p10078_p5 }
  0x20   : > { %p10074_p2 = pneg %p10073_p0 }
  0x22   : > { %p10081_p9 = pnand %p10080_p7, %p10074_p2 }
  0x24   : > { %10084 = shalt.err (!%p10081_p9)
}
  0x25   : > { %s10278_s15 = smov 1024   ;;  %s10279_s16 = smov 64  }
  0x26   : > { %9215 = dma.hbm_to_vmem [thread:$0]  (!%p10352_p6), %s10761_s1, 65536, %s10341_s23, [#allocation6], %s10278_s15, %s10278_s15, %s10279_s16  }
  0x27   : > { %s10085_s6 = scalar_lea.hbm %s10763_s3, 65536 }
  0x28   : > { %p10086_p4 = scmp.ne.s32.totalorder %s10763_s3, %s10085_s6  ;;  %p10092_p12 = scmp.lt.u32.totalorder %s10085_s6, %s10763_s3 }
  0x2a   : > { %p10088_p10 = pnand %p10086_p4, %p10368_p8 }
  0x2c   : > { %p10089_p11 = pneg %p10088_p10 }
  0x2e   : > { %p10094_p13 = pnand %p10092_p12, %p10089_p11 }
  0x30   : > { %10097 = shalt.err (!%p10094_p13)
}
  0x31   : > { %s10098_s23 = scalar_lea.vmem %s10356_s27, 65536  ;;  %p10106_p7 = scmp.lt.s32.totalorder %s10356_s27, %s10356_s27 }
  0x32   : > { %p10099_p0 = scmp.ne.s32.totalorder %s10356_s27, %s10098_s23  ;;  %p10107_p9 = scmp.lt.s32.totalorder %s10098_s23, %s10098_s23 }
  0x34   : > { %p10101_p2 = pnand %p10099_p0, %p10368_p8  ;;  %p10108_p4 = por %p10107_p9, %p10106_p7 }
  0x36   : > { %p10102_p5 = pneg %p10101_p2 }
  0x38   : > { %p10109_p10 = pnand %p10108_p4, %p10102_p5 }
  0x3a   : > { %10112 = shalt.err (!%p10109_p10)
}
  0x3b   : > { %s10280_s12 = smov 256   ;;  %s10281_s13 = smov 16  }
  0x3c   : > { %9221 = dma.hbm_to_vmem [thread:$0]  (!%p10352_p6), %s10763_s3, 65536, %s10356_s27, [#allocation9], %s10280_s12, %s10280_s12, %s10281_s13  }
  0x3d   : > { %s10113_s22 = scalar_lea.hbm %s10762_s2, 256 }
  0x3e   : > { %p10114_p11 = scmp.ne.s32.totalorder %s10762_s2, %s10113_s22  ;;  %p10120_p0 = scmp.lt.u32.totalorder %s10113_s22, %s10762_s2 }
  0x40   : > { %p10116_p12 = pnand %p10114_p11, %p10368_p8 }
  0x42   : > { %p10117_p13 = pneg %p10116_p12 }
  0x44   : > { %p10122_p2 = pnand %p10120_p0, %p10117_p13 }
  0x46   : > { %10125 = shalt.err (!%p10122_p2)
}
  0x47   : > { %s10126_s8 = scalar_lea.vmem %s191_s30, 256  ;;  %p10134_p4 = scmp.lt.s32.totalorder %s191_s30, %s191_s30 }
  0x48   : > { %p10127_p5 = scmp.ne.s32.totalorder %s191_s30, %s10126_s8  ;;  %p10135_p10 = scmp.lt.s32.totalorder %s10126_s8, %s10126_s8 }
  0x4a   : > { %p10129_p7 = pnand %p10127_p5, %p10368_p8  ;;  %p10136_p1 = por %p10135_p10, %p10134_p4 }
  0x4c   : > { %p10130_p9 = pneg %p10129_p7 }
  0x4e   : > { %p10137_p3 = pnand %p10136_p1, %p10130_p9 }
  0x50   : > { %10140 = shalt.err (!%p10137_p3)
}
  0x51   : > { %9218 = dma.hbm_to_vmem [thread:$0]  (!%p10352_p6), %s10762_s2, 256, %s191_s30, [#allocation6]  }
  0x52   : > { %s10282_s10 = smov [#allocation10]   ;;  %s10141_s14 = scalar_lea.hbm %s10764_s4, 64 }
  0x53   : > { %s214_s23 = sshll.u32 %s10282_s10, 4  ;;  %p10142_p11 = scmp.ne.s32.totalorder %s10764_s4, %s10141_s14  ;;  %s215_s23 = int_to_ptr.vmem [resolvable:$true] %s214_s23 }
  0x54   : > { %p10148_p12 = scmp.lt.u32.totalorder %s10141_s14, %s10764_s4 }
  0x55   : > { %p10144_p1 = pnand %p10142_p11, %p10368_p8 }
  0x57   : > { %p10145_p3 = pneg %p10144_p1 }
  0x59   : > { %p10150_p13 = pnand %p10148_p12, %p10145_p3 }
  0x5b   : > { %10153 = shalt.err (!%p10150_p13)
}
  0x5c   : > { %s10154_s30 = scalar_lea.vmem %s215_s23, 64  ;;  %p10162_p7 = scmp.lt.s32.totalorder %s215_s23, %s215_s23 }
  0x5d   : > { %p10155_p0 = scmp.ne.s32.totalorder %s215_s23, %s10154_s30  ;;  %p10163_p9 = scmp.lt.s32.totalorder %s10154_s30, %s10154_s30 }
  0x5f   : > { %p10157_p2 = pnand %p10155_p0, %p10368_p8  ;;  %p10164_p4 = por %p10163_p9, %p10162_p7 }
  0x61   : > { %p10158_p5 = pneg %p10157_p2 }
  0x63   : > { %p10165_p10 = pnand %p10164_p4, %p10158_p5 }
  0x65   : > { %10168 = shalt.err (!%p10165_p10)
}
  0x66   : > { %9224 = dma.hbm_to_vmem [thread:$0]  (!%p10352_p6), %s10764_s4, 64, %s215_s23, [#allocation9]  }
  0x67   : > { %s8032_s11 = sadd.s32 4294967294, %s10273_s21   ;;  %s10451_s28 = sadd.s32 1, %s10273_s21  }
  0x68   : > { %s27_s6 = ssub.s32 %s10273_s21, %s10451_s28  ;;  %s30_s7 = sadd.s32 1, %s10269_s20 }
  0x69   : > { %p28_p8 = scmp.eq.s32.totalorder %s27_s6, 0  ;;  %p37_p11 = scmp.ne.s32.totalorder %s10269_s20, %s10265_s19 }
  0x6a   : > { %p38_p1 = scmp.eq.s32.totalorder %s10273_s21, 0  ;;  %p43_p3 = scmp.ne.s32.totalorder %s10265_s19, %s10261_s18 }
  0x6b   : > { %s10462_s8 = scalar_select %p28_p8, %s10269_s20, %s30_s7  }
  0x6c   : > { %p10464_p12 = por %p38_p1, %p37_p11  ;;  %p10773_p13 = scmp.eq.s32.totalorder %s10336_s24, 0 }
  0x6d   : > { %p151_p0 = scmp.eq.s32.totalorder %s10336_s24, 1  ;;  %p157_p2 = scmp.eq.s32.totalorder %s8032_s11, 1 }
  0x6e   : > { %p10470_p6 = por %p10773_p13, %p43_p3  ;;  %p9237_p5 = scmp.lt.s32.totalorder %s10273_s21, 2 }
  0x6f   : > { %s225_s10 = sand.u32 1, %s10269_s20   ;;  %p10477_p7 = por %p151_p0, %p37_p11 }
  0x70   : > { %p10481_p9 = por %p157_p2, %p43_p3  ;;  %s8039_s13 = sshll.u32 %s225_s10, 4 }
  0x71   : > { %s10775_s23 = scalar_select %p10477_p7, 1, 0 }
  0x72   : > { %s10776_s12 = scalar_select %p10481_p9, 1, 0 }
  0x73   : > { %s9082_s14 = sshll.u32 %s10273_s21, 8  ;;  %s229_s22 = scalar_lea.vmem [#allocation2], %s8039_s13 }
  0x74   : > { %s10489_s17 = scalar_lea.hbm %s10760_s0, %s9082_s14  ;;  %s237_s30 = sshll.u32 %s229_s22, 4  ;;  %s10491_s30 = int_to_ptr.vmem [resolvable:$true] %s237_s30 }
  0x75   : > { %p10495_p4 = pnand %p9237_p5, %p10464_p12  ;;  %s226_s29 = scalar_lea.sflag [#allocation3], %s225_s10 }
  0x76   : > { %s10169_s11 = scalar_lea.hbm %s10489_s17, 256  ;;  %s10174_s13 = scalar_lea.hbm %s10760_s0, 512 }
  0x77   : > { %p10170_p10 = scmp.ne.s32.totalorder %s10489_s17, %s10169_s11  ;;  %p10171_p8 = pneg %p10495_p4 }
  0x78   : > { %p10175_p3 = scmp.lt.u32.totalorder %s10489_s17, %s10760_s0  ;;  %p10176_p12 = scmp.lt.u32.totalorder %s10174_s13, %s10169_s11 }
  0x79   : > { %p10172_p11 = pnand %p10171_p8, %p10170_p10  ;;  %p10178_p0 = scmp.lt.u32.totalorder %s10169_s11, %s10489_s17 }
  0x7a   : > { %p10177_p13 = por %p10176_p12, %p10175_p3 }
  0x7b   : > { %p10173_p1 = pneg %p10172_p11 }
  0x7c   : > { %p10179_p2 = por %p10178_p0, %p10177_p13 }
  0x7e   : > { %p10180_p5 = pnand %p10179_p2, %p10173_p1 }
  0x80   : > { %10183 = shalt.err (!%p10180_p5)
}
  0x81   : > { %s10184_s10 = scalar_lea.vmem %s10491_s30, 256  ;;  %s10283_s15 = smov [#allocation2]  }
  0x82   : > { %p10185_p10 = scmp.ne.s32.totalorder %s10491_s30, %s10184_s10  ;;  %s10189_s16 = sshll.u32 %s10283_s15, 4  ;;  %s10190_s16 = int_to_ptr.vmem [resolvable:$false] %s10189_s16 }
  0x83   : > { %s10191_s22 = scalar_lea.vmem %s10190_s16, 512  ;;  %p10192_p7 = scmp.lt.s32.totalorder %s10491_s30, %s10190_s16 }
  0x84   : > { %p10187_p11 = pnand %p10185_p10, %p10171_p8  ;;  %p10193_p3 = scmp.lt.s32.totalorder %s10191_s22, %s10184_s10 }
  0x86   : > { %p10188_p9 = pneg %p10187_p11  ;;  %p10194_p12 = por %p10193_p3, %p10192_p7 }
  0x88   : > { %p10195_p13 = pnand %p10194_p12, %p10188_p9 }
  0x8a   : > { %10198 = shalt.err (!%p10195_p13)
}
  0x8b   : > { %9228 = dma.hbm_to_vmem [thread:$0]  (!%p10495_p4), %s10489_s17, 256, %s10491_s30, %s226_s29  }
  0x8c   : > { %p10778_p1 = scmp.ne.s32.totalorder %s10769_s25, 0 }
  0x8d   : > { %s10527_s11 = sand.u32 (!%p10778_p1), 1, %s10265_s19  }
  0x8e   : > { %246 = sbr.rel (%p10778_p1) target bundleno = 1414 (0x586), region = 40  ;;  %s8043_s6 = sshll.u32 (!%p10778_p1), %s10527_s11, 4 }
  0x8f   : > { %s249_s7 = scalar_lea.sflag (!%p10778_p1), [#allocation3], %s10527_s11  ;;  %s10531_s13 = scalar_lea.vmem (!%p10778_p1), [#allocation2], %s8043_s6 }
  0x95   : > { %10244 = dma.done.wait (%p10470_p6), %s249_s7, 256  }
  0x96   : > { %10246 = vsyncadd (%p10470_p6), %s249_s7, 4294967040  ;;  %p10779_p7 = scmp.eq.s32.totalorder %s10336_s24, 0 }
  0x98   : > { %10248 = dma.done.wait (%p10779_p7), [#allocation6], 65792   ;;  %p10780_p9 = pmov %p10779_p7 }
  0x99   : > { %p10781_p4 = pmov %p10779_p7 }
  0x9a   : > { %10250 = vsyncadd (%p10780_p9), [#allocation6], 4294901504 }
  0x9b   : > { %10252 = dma.done.wait (%p10781_p4), [#allocation9], 65600   ;;  %p10782_p8 = pmov %p10781_p4 }
  0x9c   : > { %v297_v0 = vld [vmem:[#allocation5] sm:$0xff]  ;;  %v298_v2 = vld [vmem:[#allocation5 + $0x8] sm:$0xff]  ;;  %s8048_s25 = sshll.u32 %s10527_s11, 5  ;;  %s9083_s9 = sshll.u32 %s10336_s24, 9 }
  0x9d   : > { %10254 = vsyncadd (%p10782_p8), [#allocation9], 4294901696  ;;  %v305_v1 = vld [vmem:[#allocation5 + $0x40] sm:$0xff]  ;;  %v306_v4 = vld [vmem:[#allocation5 + $0x48] sm:$0xff]  ;;  %s294_s17 = scalar_lea.vmem [#allocation11], %s8048_s25  ;;  %s10716_s27 = scalar_lea.hbm %s10765_s5, %s9083_s9 }
  0x9e   : > { %v8054_v3 = vcombine.high %v297_v0, %v305_v1  ;;  %v8053_v5 = vcombine.low %v297_v0, %v305_v1  ;;  %v313_v6 = vld [vmem:[#allocation5 + $0x80] sm:$0xff]  ;;  %v8056_v8 = vcombine.high %v298_v2, %v306_v4  ;;  %v8055_v9 = vcombine.low %v298_v2, %v306_v4  ;;  %v314_v11 = vld [vmem:[#allocation5 + $0x88] sm:$0xff]  ;;  %s7924_s30 = sshll.u32 %s294_s17, 4  ;;  %s7910_s24 = scalar_lea.sflag [#allocation4], %s10527_s11  ;;  %s10718_s30 = int_to_ptr.vmem [resolvable:$true] %s7924_s30 }
  0x9f   : > { %v321_v7 = vld [vmem:[#allocation5 + $0xc0] sm:$0xff]  ;;  %v322_v12 = vld [vmem:[#allocation5 + $0xc8] sm:$0xff]  ;;  %s10199_s14 = scalar_lea.vmem %s10718_s30, 512  ;;  %p10783_p0 = scmp.ne.s32.totalorder %s10775_s23, 0 }
  0xa0   : > { %v8070_v10 = vcombine.high %v313_v6, %v321_v7  ;;  %v329_v13 = vld [vmem:[#allocation5 + $0x100] sm:$0xff]  ;;  %3467 = vmatprep.subr.bf16.mxu0 %v8054_v3  ;;  %v8072_v14 = vcombine.high %v314_v11, %v322_v12  ;;  %v330_v16 = vld [vmem:[#allocation5 + $0x108] sm:$0xff]  ;;  %3549 = vmatprep.subr.bf16.mxu1 %v8056_v8  ;;  %v8069_v18 = vcombine.low %v313_v6, %v321_v7  ;;  %p10200_p6 = scmp.ne.s32.totalorder %s10718_s30, %s10199_s14  ;;  %s10284_s10 = smov [#allocation11]  }
  0xa1   : > { %v337_v15 = vld [vmem:[#allocation5 + $0x140] sm:$0xff]  ;;  %v338_v17 = vld [vmem:[#allocation5 + $0x148] sm:$0xff]  ;;  %3468 = vmatpush1.bf16.msra.mxu0 %v8053_v5  ;;  %3550 = vmatpush1.bf16.msra.mxu1 %v8055_v9  ;;  %v8071_v19 = vcombine.low %v314_v11, %v322_v12  ;;  %s10203_s15 = sshll.u32 %s10284_s10, 4  ;;  %s10204_s15 = int_to_ptr.vmem [resolvable:$false] %s10203_s15 }
  0xa2   : > { %3469 = vmatprep.subr.bf16.mxu0 %v8070_v10  ;;  %v8086_v20 = vcombine.high %v329_v13, %v337_v15  ;;  %3551 = vmatprep.subr.bf16.mxu1 %v8072_v14  ;;  %v8088_v21 = vcombine.high %v330_v16, %v338_v17  ;;  %v345_v22 = vld [vmem:[#allocation5 + $0x180] sm:$0xff]  ;;  %v346_v24 = vld [vmem:[#allocation5 + $0x188] sm:$0xff]  ;;  %v8085_v26 = vcombine.low %v329_v13, %v337_v15  ;;  %p10201_p2 = pnand %p10200_p6, %p10783_p0  ;;  %s10205_s16 = scalar_lea.vmem %s10204_s15, 1024 }
  0xa3   : > { %v353_v23 = vld [vmem:[#allocation5 + $0x1c0] sm:$0xff]  ;;  %v354_v25 = vld [vmem:[#allocation5 + $0x1c8] sm:$0xff]  ;;  %v8087_v27 = vcombine.low %v330_v16, %v338_v17  ;;  %p10206_p10 = scmp.lt.s32.totalorder %s10718_s30, %s10204_s15  ;;  %p10207_p11 = scmp.lt.s32.totalorder %s10205_s16, %s10199_s14 }
  0xa4   : > { %v8102_v28 = vcombine.high %v345_v22, %v353_v23  ;;  %v8104_v29 = vcombine.high %v346_v24, %v354_v25  ;;  %v361_v30 = vld [vmem:[#allocation5 + $0x200] sm:$0xff]  ;;  %v362_v32 = vld [vmem:[#allocation5 + $0x208] sm:$0xff]  ;;  %v8101_v34 = vcombine.low %v345_v22, %v353_v23  ;;  %v8103_v35 = vcombine.low %v346_v24, %v354_v25  ;;  %p10202_p5 = pneg %p10201_p2 }
  0xa5   : > { %3470 = vmatpush1.bf16.msra.mxu0 %v8069_v18  ;;  %3552 = vmatpush1.bf16.msra.mxu1 %v8071_v19  ;;  %v369_v31 = vld [vmem:[#allocation5 + $0x240] sm:$0xff]  ;;  %v370_v33 = vld [vmem:[#allocation5 + $0x248] sm:$0xff]  ;;  %p10208_p3 = por %p10207_p11, %p10206_p10 }
  0xa6   : > { %3471 = vmatprep.subr.bf16.mxu0 %v8086_v20  ;;  %3553 = vmatprep.subr.bf16.mxu1 %v8088_v21  ;;  %v8118_v36 = vcombine.high %v361_v30, %v369_v31  ;;  %v8120_v37 = vcombine.high %v362_v32, %v370_v33  ;;  %v377_v38 = vld [vmem:[#allocation5 + $0x280] sm:$0xff]  ;;  %v378_v40 = vld [vmem:[#allocation5 + $0x288] sm:$0xff]  ;;  %v8117_v42 = vcombine.low %v361_v30, %v369_v31 }
  0xa7   : > { %v385_v39 = vld [vmem:[#allocation5 + $0x2c0] sm:$0xff]  ;;  %v386_v41 = vld [vmem:[#allocation5 + $0x2c8] sm:$0xff]  ;;  %v8119_v43 = vcombine.low %v362_v32, %v370_v33  ;;  %p10209_p12 = pnand %p10208_p3, %p10202_p5 }
  0xa8   : > { %v8134_v44 = vcombine.high %v377_v38, %v385_v39  ;;  %v8136_v45 = vcombine.high %v378_v40, %v386_v41  ;;  %v393_v46 = vld [vmem:[#allocation5 + $0x300] sm:$0xff]  ;;  %v394_v48 = vld [vmem:[#allocation5 + $0x308] sm:$0xff]  ;;  %v8133_v50 = vcombine.low %v377_v38, %v385_v39  ;;  %v8135_v51 = vcombine.low %v378_v40, %v386_v41 }
  0xa9   : > { %3472 = vmatpush1.bf16.msra.mxu0 %v8085_v26  ;;  %3554 = vmatpush1.bf16.msra.mxu1 %v8087_v27  ;;  %v401_v47 = vld [vmem:[#allocation5 + $0x340] sm:$0xff]  ;;  %v402_v49 = vld [vmem:[#allocation5 + $0x348] sm:$0xff] }
  0xaa   : > { %3473 = vmatprep.subr.bf16.mxu0 %v8102_v28  ;;  %3555 = vmatprep.subr.bf16.mxu1 %v8104_v29  ;;  %v8150_v52 = vcombine.high %v393_v46, %v401_v47  ;;  %v10546_v53 = vld [vmem:[%s10531_s13] sm:$0xff]  ;;  %v8152_v54 = vcombine.high %v394_v48, %v402_v49  ;;  %v410_v58 = vld [vmem:[#allocation5 + $0x388] sm:$0xff]  ;;  %v8149_v60 = vcombine.low %v393_v46, %v401_v47 }
  0xab   : > { %v409_v55 = vld [vmem:[#allocation5 + $0x380] sm:$0xff]  ;;  %v10550_v57 = vcombine.high %v10546_v53, %v10546_v53  ;;  %v418_v59 = vld [vmem:[#allocation5 + $0x3c8] sm:$0xff]  ;;  %v8151_v61 = vcombine.low %v394_v48, %v402_v49 }
  0xac   : > { %v417_v56 = vld [vmem:[#allocation5 + $0x3c0] sm:$0xff]  ;;  %v8168_v63 = vcombine.high %v410_v58, %v418_v59  ;;  %v426_v2 = vld [vmem:[#allocation5 + $0x408] sm:$0xff]  ;;  %v8167_v5 = vcombine.low %v410_v58, %v418_v59 }
  0xad   : > { %3474 = vmatpush1.bf16.msra.mxu0 %v8101_v34  ;;  %3556 = vmatpush1.bf16.msra.mxu1 %v8103_v35  ;;  %v8166_v62 = vcombine.high %v409_v55, %v417_v56  ;;  %v425_v0 = vld [vmem:[#allocation5 + $0x400] sm:$0xff]  ;;  %v434_v3 = vld [vmem:[#allocation5 + $0x448] sm:$0xff]  ;;  %v8165_v4 = vcombine.low %v409_v55, %v417_v56 }
  0xae   : > { %3475 = vmatprep.subr.bf16.mxu0 %v8118_v36  ;;  %3557 = vmatprep.subr.bf16.mxu1 %v8120_v37  ;;  %v433_v1 = vld [vmem:[#allocation5 + $0x440] sm:$0xff]  ;;  %v8184_v7 = vcombine.high %v426_v2, %v434_v3  ;;  %v442_v10 = vld [vmem:[#allocation5 + $0x488] sm:$0xff]  ;;  %v8183_v13 = vcombine.low %v426_v2, %v434_v3 }
  0xaf   : > { %3499 = vmatprep.mubr.bf16.mxu0 %v10550_v57  ;;  %3581 = vmatprep.mubr.bf16.mxu1 %v10550_v57  ;;  %v8182_v6 = vcombine.high %v425_v0, %v433_v1  ;;  %v441_v8 = vld [vmem:[#allocation5 + $0x480] sm:$0xff]  ;;  %v450_v11 = vld [vmem:[#allocation5 + $0x4c8] sm:$0xff]  ;;  %v8181_v12 = vcombine.low %v425_v0, %v433_v1 }
  0xb0   : > { %v449_v9 = vld [vmem:[#allocation5 + $0x4c0] sm:$0xff]  ;;  %v8200_v15 = vcombine.high %v442_v10, %v450_v11  ;;  %v458_v18 = vld [vmem:[#allocation5 + $0x508] sm:$0xff]  ;;  %v8199_v21 = vcombine.low %v442_v10, %v450_v11 }
  0xb1   : > { %3476 = vmatpush1.bf16.msra.mxu0 %v8117_v42  ;;  %3558 = vmatpush1.bf16.msra.mxu1 %v8119_v43  ;;  %v8198_v14 = vcombine.high %v441_v8, %v449_v9  ;;  %v457_v16 = vld [vmem:[#allocation5 + $0x500] sm:$0xff]  ;;  %v466_v19 = vld [vmem:[#allocation5 + $0x548] sm:$0xff]  ;;  %v8197_v20 = vcombine.low %v441_v8, %v449_v9 }
  0xb2   : > { %3477 = vmatprep.subr.bf16.mxu0 %v8134_v44  ;;  %3559 = vmatprep.subr.bf16.mxu1 %v8136_v45  ;;  %v465_v17 = vld [vmem:[#allocation5 + $0x540] sm:$0xff]  ;;  %v8216_v23 = vcombine.high %v458_v18, %v466_v19  ;;  %v474_v26 = vld [vmem:[#allocation5 + $0x588] sm:$0xff]  ;;  %v8215_v29 = vcombine.low %v458_v18, %v466_v19 }
  0xb3   : > { %v8214_v22 = vcombine.high %v457_v16, %v465_v17  ;;  %v473_v24 = vld [vmem:[#allocation5 + $0x580] sm:$0xff]  ;;  %v482_v27 = vld [vmem:[#allocation5 + $0x5c8] sm:$0xff]  ;;  %v8213_v28 = vcombine.low %v457_v16, %v465_v17 }
  0xb4   : > { %v481_v25 = vld [vmem:[#allocation5 + $0x5c0] sm:$0xff]  ;;  %v8232_v31 = vcombine.high %v474_v26, %v482_v27  ;;  %v490_v34 = vld [vmem:[#allocation5 + $0x608] sm:$0xff]  ;;  %v8231_v37 = vcombine.low %v474_v26, %v482_v27 }
  0xb5   : > { %3478 = vmatpush1.bf16.msra.mxu0 %v8133_v50  ;;  %3560 = vmatpush1.bf16.msra.mxu1 %v8135_v51  ;;  %v8230_v30 = vcombine.high %v473_v24, %v481_v25  ;;  %v489_v32 = vld [vmem:[#allocation5 + $0x600] sm:$0xff]  ;;  %v498_v35 = vld [vmem:[#allocation5 + $0x648] sm:$0xff]  ;;  %v8229_v36 = vcombine.low %v473_v24, %v481_v25 }
  0xb6   : > { %3479 = vmatprep.subr.bf16.mxu0 %v8150_v52  ;;  %3561 = vmatprep.subr.bf16.mxu1 %v8152_v54  ;;  %v497_v33 = vld [vmem:[#allocation5 + $0x640] sm:$0xff]  ;;  %v8248_v39 = vcombine.high %v490_v34, %v498_v35  ;;  %v506_v42 = vld [vmem:[#allocation5 + $0x688] sm:$0xff]  ;;  %v8247_v45 = vcombine.low %v490_v34, %v498_v35 }
  0xb7   : > { %v8246_v38 = vcombine.high %v489_v32, %v497_v33  ;;  %v505_v40 = vld [vmem:[#allocation5 + $0x680] sm:$0xff]  ;;  %v514_v43 = vld [vmem:[#allocation5 + $0x6c8] sm:$0xff]  ;;  %v8245_v44 = vcombine.low %v489_v32, %v497_v33 }
  0xb8   : > { %v513_v41 = vld [vmem:[#allocation5 + $0x6c0] sm:$0xff]  ;;  %v8264_v47 = vcombine.high %v506_v42, %v514_v43  ;;  %v522_v50 = vld [vmem:[#allocation5 + $0x708] sm:$0xff]  ;;  %v8263_v54 = vcombine.low %v506_v42, %v514_v43 }
  0xb9   : > { %3480 = vmatpush1.bf16.msra.mxu0 %v8149_v60  ;;  %3562 = vmatpush1.bf16.msra.mxu1 %v8151_v61  ;;  %v8262_v46 = vcombine.high %v505_v40, %v513_v41  ;;  %v521_v48 = vld [vmem:[#allocation5 + $0x700] sm:$0xff]  ;;  %v530_v51 = vld [vmem:[#allocation5 + $0x748] sm:$0xff]  ;;  %v8261_v52 = vcombine.low %v505_v40, %v513_v41 }
  0xba   : > { %3481 = vmatprep.subr.bf16.mxu0 %v8166_v62  ;;  %3563 = vmatprep.subr.bf16.mxu1 %v8168_v63  ;;  %v529_v49 = vld [vmem:[#allocation5 + $0x740] sm:$0xff]  ;;  %v8280_v56 = vcombine.high %v522_v50, %v530_v51  ;;  %v538_v60 = vld [vmem:[#allocation5 + $0x788] sm:$0xff]  ;;  %v8279_v63 = vcombine.low %v522_v50, %v530_v51 }
  0xbb   : > { %v8278_v55 = vcombine.high %v521_v48, %v529_v49  ;;  %v537_v58 = vld [vmem:[#allocation5 + $0x780] sm:$0xff]  ;;  %v546_v61 = vld [vmem:[#allocation5 + $0x7c8] sm:$0xff]  ;;  %v8277_v62 = vcombine.low %v521_v48, %v529_v49 }
  0xbc   : > { %v545_v59 = vld [vmem:[#allocation5 + $0x7c0] sm:$0xff]  ;;  %v8296_v1 = vcombine.high %v538_v60, %v546_v61 }
  0xbd   : > { %3482 = vmatpush1.bf16.msra.mxu0 %v8165_v4  ;;  %3564 = vmatpush1.bf16.msra.mxu1 %v8167_v5  ;;  %v8294_v0 = vcombine.high %v537_v58, %v545_v59  ;;  %v553_v2 = vld [vmem:[#allocation5 + $0x800] sm:$0xff]  ;;  %v554_v4 = vld [vmem:[#allocation5 + $0x808] sm:$0xff] }
  0xbe   : > { %3483 = vmatprep.subr.bf16.mxu0 %v8182_v6  ;;  %3565 = vmatprep.subr.bf16.mxu1 %v8184_v7  ;;  %v561_v3 = vld [vmem:[#allocation5 + $0x840] sm:$0xff]  ;;  %v562_v5 = vld [vmem:[#allocation5 + $0x848] sm:$0xff]  ;;  %v8293_v6 = vcombine.low %v537_v58, %v545_v59  ;;  %v8295_v7 = vcombine.low %v538_v60, %v546_v61 }
  0xbf   : > { %v8310_v8 = vcombine.high %v553_v2, %v561_v3  ;;  %v8312_v9 = vcombine.high %v554_v4, %v562_v5  ;;  %v569_v10 = vld [vmem:[#allocation5 + $0x880] sm:$0xff]  ;;  %v8309_v16 = vcombine.low %v553_v2, %v561_v3  ;;  %v8311_v17 = vcombine.low %v554_v4, %v562_v5 }
  0xc0   : > { %v577_v11 = vld [vmem:[#allocation5 + $0x8c0] sm:$0xff] }
  0xc1   : > { %3484 = vmatpush1.bf16.msra.mxu0 %v8181_v12  ;;  %3566 = vmatpush1.bf16.msra.mxu1 %v8183_v13  ;;  %v10556_v12 = vcombine.low %v10546_v53, %v10546_v53  ;;  %v570_v13 = vld [vmem:[#allocation5 + $0x888] sm:$0xff]  ;;  %v8326_v18 = vcombine.high %v569_v10, %v577_v11  ;;  %v585_v19 = vld [vmem:[#allocation5 + $0x900] sm:$0xff]  ;;  %v8325_v24 = vcombine.low %v569_v10, %v577_v11 }
  0xc2   : > { %3485 = vmatprep.subr.bf16.mxu0 %v8198_v14  ;;  %3567 = vmatprep.subr.bf16.mxu1 %v8200_v15  ;;  %v578_v14 = vld [vmem:[#allocation5 + $0x8c8] sm:$0xff]  ;;  %v601_v27 = vld [vmem:[#allocation5 + $0x980] sm:$0xff] }
  0xc3   : > { %v10559_v15 = vld [vmem:[%s10531_s13 + $0x8] sm:$0xff]  ;;  %v8327_v25 = vcombine.low %v570_v13, %v578_v14  ;;  %v617_v35 = vld [vmem:[#allocation5 + $0xa00] sm:$0xff] }
  0xc4   : > { %v10563_v53 = vcombine.high %v10559_v15, %v10559_v15  ;;  %v633_v43 = vld [vmem:[#allocation5 + $0xa80] sm:$0xff] }
  0xc5   : > { %3486 = vmatpush1.bf16.msra.mxu0 %v8197_v20  ;;  %3568 = vmatpush1.bf16.msra.mxu1 %v8199_v21  ;;  %v593_v20 = vld [vmem:[#allocation5 + $0x940] sm:$0xff]  ;;  %v586_v21 = vld [vmem:[#allocation5 + $0x908] sm:$0xff] }
  0xc6   : > { %3487 = vmatprep.subr.bf16.mxu0 %v8214_v22  ;;  %3569 = vmatprep.subr.bf16.mxu1 %v8216_v23  ;;  %v8328_v22 = vcombine.high %v570_v13, %v578_v14  ;;  %v594_v23 = vld [vmem:[#allocation5 + $0x948] sm:$0xff]  ;;  %v8342_v26 = vcombine.high %v585_v19, %v593_v20  ;;  %v8341_v32 = vcombine.low %v585_v19, %v593_v20  ;;  %v649_v51 = vld [vmem:[#allocation5 + $0xb00] sm:$0xff] }
  0xc7   : > { %v8343_v33 = vcombine.low %v586_v21, %v594_v23  ;;  %v665_v61 = vld [vmem:[#allocation5 + $0xb80] sm:$0xff]  ;;  %v706_v19 = vld [vmem:[#allocation5 + $0xcc8] sm:$0xff] }
  0xc8   : > { %v681_v5 = vld [vmem:[#allocation5 + $0xc00] sm:$0xff] }
  0xc9   : > { %3488 = vmatpush1.bf16.msra.mxu0 %v8213_v28  ;;  %3570 = vmatpush1.bf16.msra.mxu1 %v8215_v29  ;;  %v609_v28 = vld [vmem:[#allocation5 + $0x9c0] sm:$0xff]  ;;  %v602_v29 = vld [vmem:[#allocation5 + $0x988] sm:$0xff] }
  0xca   : > { %3489 = vmatprep.subr.bf16.mxu0 %v8230_v30  ;;  %3571 = vmatprep.subr.bf16.mxu1 %v8232_v31  ;;  %v8344_v30 = vcombine.high %v586_v21, %v594_v23  ;;  %v610_v31 = vld [vmem:[#allocation5 + $0x9c8] sm:$0xff]  ;;  %v8358_v34 = vcombine.high %v601_v27, %v609_v28  ;;  %v8357_v40 = vcombine.low %v601_v27, %v609_v28  ;;  %v697_v14 = vld [vmem:[#allocation5 + $0xc80] sm:$0xff] }
  0xcb   : > { %v8359_v41 = vcombine.low %v602_v29, %v610_v31  ;;  %v713_v23 = vld [vmem:[#allocation5 + $0xd00] sm:$0xff]  ;;  %v722_v27 = vld [vmem:[#allocation5 + $0xd48] sm:$0xff] }
  0xcd   : > { %3490 = vmatpush1.bf16.msra.mxu0 %v8229_v36  ;;  %3572 = vmatpush1.bf16.msra.mxu1 %v8231_v37  ;;  %v625_v36 = vld [vmem:[#allocation5 + $0xa40] sm:$0xff]  ;;  %v618_v37 = vld [vmem:[#allocation5 + $0xa08] sm:$0xff] }
  0xce   : > { %3491 = vmatprep.subr.bf16.mxu0 %v8246_v38  ;;  %3573 = vmatprep.subr.bf16.mxu1 %v8248_v39  ;;  %v8360_v38 = vcombine.high %v602_v29, %v610_v31  ;;  %v626_v39 = vld [vmem:[#allocation5 + $0xa48] sm:$0xff]  ;;  %v8374_v42 = vcombine.high %v617_v35, %v625_v36  ;;  %v8373_v48 = vcombine.low %v617_v35, %v625_v36  ;;  %v729_v31 = vld [vmem:[#allocation5 + $0xd80] sm:$0xff] }
  0xcf   : > { %v8375_v49 = vcombine.low %v618_v37, %v626_v39  ;;  %v738_v35 = vld [vmem:[#allocation5 + $0xdc8] sm:$0xff] }
  0xd1   : > { %3492 = vmatpush1.bf16.msra.mxu0 %v8245_v44  ;;  %3574 = vmatpush1.bf16.msra.mxu1 %v8247_v45  ;;  %v641_v44 = vld [vmem:[#allocation5 + $0xac0] sm:$0xff]  ;;  %v634_v45 = vld [vmem:[#allocation5 + $0xa88] sm:$0xff] }
  0xd2   : > { %3493 = vmatprep.subr.bf16.mxu0 %v8262_v46  ;;  %3575 = vmatprep.subr.bf16.mxu1 %v8264_v47  ;;  %v8376_v46 = vcombine.high %v618_v37, %v626_v39  ;;  %v642_v47 = vld [vmem:[#allocation5 + $0xac8] sm:$0xff]  ;;  %v8390_v50 = vcombine.high %v633_v43, %v641_v44  ;;  %v8389_v58 = vcombine.low %v633_v43, %v641_v44  ;;  %v745_v39 = vld [vmem:[#allocation5 + $0xe00] sm:$0xff] }
  0xd3   : > { %v8391_v59 = vcombine.low %v634_v45, %v642_v47  ;;  %v754_v43 = vld [vmem:[#allocation5 + $0xe48] sm:$0xff] }
  0xd5   : > { %3494 = vmatpush1.bf16.msra.mxu0 %v8261_v52  ;;  %3576 = vmatpush1.bf16.msra.mxu1 %v8263_v54  ;;  %v657_v52 = vld [vmem:[#allocation5 + $0xb40] sm:$0xff]  ;;  %v650_v54 = vld [vmem:[#allocation5 + $0xb08] sm:$0xff] }
  0xd6   : > { %3495 = vmatprep.subr.bf16.mxu0 %v8278_v55  ;;  %3577 = vmatprep.subr.bf16.mxu1 %v8280_v56  ;;  %v8392_v55 = vcombine.high %v634_v45, %v642_v47  ;;  %v658_v56 = vld [vmem:[#allocation5 + $0xb48] sm:$0xff]  ;;  %v8406_v60 = vcombine.high %v649_v51, %v657_v52  ;;  %v8405_v2 = vcombine.low %v649_v51, %v657_v52  ;;  %v761_v47 = vld [vmem:[#allocation5 + $0xe80] sm:$0xff] }
  0xd7   : > { %v8407_v3 = vcombine.low %v650_v54, %v658_v56  ;;  %v770_v51 = vld [vmem:[#allocation5 + $0xec8] sm:$0xff] }
  0xd9   : > { %3496 = vmatpush1.bf16.msra.mxu0 %v8277_v62  ;;  %3578 = vmatpush1.bf16.msra.mxu1 %v8279_v63  ;;  %v673_v62 = vld [vmem:[#allocation5 + $0xbc0] sm:$0xff]  ;;  %v666_v63 = vld [vmem:[#allocation5 + $0xb88] sm:$0xff] }
  0xda   : > { %3497 = vmatprep.subr.bf16.mxu0 %v8294_v0  ;;  %3579 = vmatprep.subr.bf16.mxu1 %v8296_v1  ;;  %v8408_v0 = vcombine.high %v650_v54, %v658_v56  ;;  %v674_v1 = vld [vmem:[#allocation5 + $0xbc8] sm:$0xff]  ;;  %v8422_v4 = vcombine.high %v665_v61, %v673_v62  ;;  %v8421_v10 = vcombine.low %v665_v61, %v673_v62  ;;  %v777_v56 = vld [vmem:[#allocation5 + $0xf00] sm:$0xff] }
  0xdb   : > { %v8423_v11 = vcombine.low %v666_v63, %v674_v1  ;;  %v786_v61 = vld [vmem:[#allocation5 + $0xf48] sm:$0xff] }
  0xdd   : > { %3498 = vmatpush1.bf16.msra.mxu0 %v8293_v6  ;;  %3580 = vmatpush1.bf16.msra.mxu1 %v8295_v7  ;;  %v689_v6 = vld [vmem:[#allocation5 + $0xc40] sm:$0xff]  ;;  %v682_v7 = vld [vmem:[#allocation5 + $0xc08] sm:$0xff] }
  0xde   : > { %3508 = vmatprep.subr.bf16.mxu0 %v8310_v8  ;;  %3590 = vmatprep.subr.bf16.mxu1 %v8312_v9  ;;  %v8424_v8 = vcombine.high %v666_v63, %v674_v1  ;;  %v690_v9 = vld [vmem:[#allocation5 + $0xc48] sm:$0xff]  ;;  %v8438_v13 = vcombine.high %v681_v5, %v689_v6  ;;  %v8437_v20 = vcombine.low %v681_v5, %v689_v6  ;;  %v793_v1 = vld [vmem:[#allocation5 + $0xf80] sm:$0xff] }
  0xdf   : > { %v8439_v21 = vcombine.low %v682_v7, %v690_v9  ;;  %v802_v5 = vld [vmem:[#allocation5 + $0xfc8] sm:$0xff] }
  0xe0   : > { %3500 = vmatmul.mubr.bf16.vlgmr.msra.gmra.mrb[0].mxu0 %v10556_v12  ;;  %3582 = vmatmul.mubr.bf16.vlgmr.msra.gmra.mrb[0].mxu1 %v10556_v12 }
  0xe1   : > { %3509 = vmatpush1.bf16.msra.mxu0 %v8309_v16  ;;  %3591 = vmatpush1.bf16.msra.mxu1 %v8311_v17  ;;  %v705_v16 = vld [vmem:[#allocation5 + $0xcc0] sm:$0xff]  ;;  %v698_v17 = vld [vmem:[#allocation5 + $0xc88] sm:$0xff] }
  0xe2   : > { %3510 = vmatprep.subr.bf16.mxu0 %v8326_v18  ;;  %3592 = vmatprep.subr.bf16.mxu1 %v8328_v22  ;;  %v8440_v18 = vcombine.high %v682_v7, %v690_v9  ;;  %v8454_v22 = vcombine.high %v697_v14, %v705_v16  ;;  %v8453_v28 = vcombine.low %v697_v14, %v705_v16  ;;  %v299_v9 = vld [vmem:[#allocation5 + $0x10] sm:$0xff]  ;;  %v308_v14 = vld [vmem:[#allocation5 + $0x58] sm:$0xff] }
  0xe3   : > { %3540 = vmatprep.mubr.bf16.mxu0 %v10563_v53  ;;  %3622 = vmatprep.mubr.bf16.mxu1 %v10563_v53  ;;  %v8455_v29 = vcombine.low %v698_v17, %v706_v19 }
  0xe5   : > { %3511 = vmatpush1.bf16.msra.mxu0 %v8325_v24  ;;  %3593 = vmatpush1.bf16.msra.mxu1 %v8327_v25  ;;  %v721_v24 = vld [vmem:[#allocation5 + $0xd40] sm:$0xff]  ;;  %v714_v25 = vld [vmem:[#allocation5 + $0xd08] sm:$0xff] }
  0xe6   : > { %3512 = vmatprep.subr.bf16.mxu0 %v8342_v26  ;;  %3594 = vmatprep.subr.bf16.mxu1 %v8344_v30  ;;  %v8456_v26 = vcombine.high %v698_v17, %v706_v19  ;;  %v8470_v30 = vcombine.high %v713_v23, %v721_v24  ;;  %v8469_v36 = vcombine.low %v713_v23, %v721_v24  ;;  %v315_v19 = vld [vmem:[#allocation5 + $0x90] sm:$0xff]  ;;  %v324_v23 = vld [vmem:[#allocation5 + $0xd8] sm:$0xff] }
  0xe7   : > { %v8471_v37 = vcombine.low %v714_v25, %v722_v27  ;;  %v10571_v24 = vcombine.low %v10559_v15, %v10559_v15 }
  0xe9   : > { %3513 = vmatpush1.bf16.msra.mxu0 %v8341_v32  ;;  %3595 = vmatpush1.bf16.msra.mxu1 %v8343_v33  ;;  %v737_v32 = vld [vmem:[#allocation5 + $0xdc0] sm:$0xff]  ;;  %v730_v33 = vld [vmem:[#allocation5 + $0xd88] sm:$0xff] }
  0xea   : > { %3514 = vmatprep.subr.bf16.mxu0 %v8358_v34  ;;  %3596 = vmatprep.subr.bf16.mxu1 %v8360_v38  ;;  %v8472_v34 = vcombine.high %v714_v25, %v722_v27  ;;  %v8486_v38 = vcombine.high %v729_v31, %v737_v32  ;;  %v8485_v44 = vcombine.low %v729_v31, %v737_v32  ;;  %v340_v32 = vld [vmem:[#allocation5 + $0x158] sm:$0xff] }
  0xeb   : > { %v8487_v45 = vcombine.low %v730_v33, %v738_v35 }
  0xed   : > { %3515 = vmatpush1.bf16.msra.mxu0 %v8357_v40  ;;  %3597 = vmatpush1.bf16.msra.mxu1 %v8359_v41  ;;  %v753_v40 = vld [vmem:[#allocation5 + $0xe40] sm:$0xff]  ;;  %v746_v41 = vld [vmem:[#allocation5 + $0xe08] sm:$0xff] }
  0xee   : > { %3516 = vmatprep.subr.bf16.mxu0 %v8374_v42  ;;  %3598 = vmatprep.subr.bf16.mxu1 %v8376_v46  ;;  %v8488_v42 = vcombine.high %v730_v33, %v738_v35  ;;  %v8502_v46 = vcombine.high %v745_v39, %v753_v40  ;;  %v8501_v52 = vcombine.low %v745_v39, %v753_v40  ;;  %v347_v35 = vld [vmem:[#allocation5 + $0x190] sm:$0xff]  ;;  %v356_v39 = vld [vmem:[#allocation5 + $0x1d8] sm:$0xff] }
  0xef   : > { %v8503_v54 = vcombine.low %v746_v41, %v754_v43 }
  0xf1   : > { %3517 = vmatpush1.bf16.msra.mxu0 %v8373_v48  ;;  %3599 = vmatpush1.bf16.msra.mxu1 %v8375_v49  ;;  %v769_v48 = vld [vmem:[#allocation5 + $0xec0] sm:$0xff]  ;;  %v762_v49 = vld [vmem:[#allocation5 + $0xe88] sm:$0xff] }
  0xf2   : > { %3518 = vmatprep.subr.bf16.mxu0 %v8390_v50  ;;  %3600 = vmatprep.subr.bf16.mxu1 %v8392_v55  ;;  %v8504_v50 = vcombine.high %v746_v41, %v754_v43  ;;  %v8518_v55 = vcombine.high %v761_v47, %v769_v48  ;;  %v8517_v62 = vcombine.low %v761_v47, %v769_v48  ;;  %v363_v43 = vld [vmem:[#allocation5 + $0x210] sm:$0xff]  ;;  %v372_v47 = vld [vmem:[#allocation5 + $0x258] sm:$0xff] }
  0xf3   : > { %v8519_v63 = vcombine.low %v762_v49, %v770_v51 }
  0xf5   : > { %3519 = vmatpush1.bf16.msra.mxu0 %v8389_v58  ;;  %3601 = vmatpush1.bf16.msra.mxu1 %v8391_v59  ;;  %v785_v58 = vld [vmem:[#allocation5 + $0xf40] sm:$0xff]  ;;  %v778_v59 = vld [vmem:[#allocation5 + $0xf08] sm:$0xff] }
  0xf6   : > { %3520 = vmatprep.subr.bf16.mxu0 %v8406_v60  ;;  %3602 = vmatprep.subr.bf16.mxu1 %v8408_v0  ;;  %v8520_v60 = vcombine.high %v762_v49, %v770_v51  ;;  %v8534_v0 = vcombine.high %v777_v56, %v785_v58  ;;  %v8533_v6 = vcombine.low %v777_v56, %v785_v58  ;;  %v379_v51 = vld [vmem:[#allocation5 + $0x290] sm:$0xff]  ;;  %v388_v56 = vld [vmem:[#allocation5 + $0x2d8] sm:$0xff] }
  0xf7   : > { %v8535_v7 = vcombine.low %v778_v59, %v786_v61 }
  0xf9   : > { %3521 = vmatpush1.bf16.msra.mxu0 %v8405_v2  ;;  %3603 = vmatpush1.bf16.msra.mxu1 %v8407_v3  ;;  %v801_v2 = vld [vmem:[#allocation5 + $0xfc0] sm:$0xff]  ;;  %v794_v3 = vld [vmem:[#allocation5 + $0xf88] sm:$0xff] }
  0xfa   : > { %3522 = vmatprep.subr.bf16.mxu0 %v8422_v4  ;;  %3604 = vmatprep.subr.bf16.mxu1 %v8424_v8  ;;  %v8536_v4 = vcombine.high %v778_v59, %v786_v61  ;;  %v8550_v8 = vcombine.high %v793_v1, %v801_v2  ;;  %v8549_v16 = vcombine.low %v793_v1, %v801_v2  ;;  %v395_v61 = vld [vmem:[#allocation5 + $0x310] sm:$0xff]  ;;  %v404_v1 = vld [vmem:[#allocation5 + $0x358] sm:$0xff] }
  0xfb   : > { %v8551_v17 = vcombine.low %v794_v3, %v802_v5 }
  0xfd   : > { %3523 = vmatpush1.bf16.msra.mxu0 %v8421_v10  ;;  %3605 = vmatpush1.bf16.msra.mxu1 %v8423_v11  ;;  %v307_v10 = vld [vmem:[#allocation5 + $0x50] sm:$0xff]  ;;  %v300_v11 = vld [vmem:[#allocation5 + $0x18] sm:$0xff] }
  0xfe   : > { %3524 = vmatprep.subr.bf16.mxu0 %v8438_v13  ;;  %3606 = vmatprep.subr.bf16.mxu1 %v8440_v18  ;;  %v8552_v13 = vcombine.high %v794_v3, %v802_v5  ;;  %v8058_v18 = vcombine.high %v299_v9, %v307_v10  ;;  %v8057_v25 = vcombine.low %v299_v9, %v307_v10  ;;  %v411_v5 = vld [vmem:[#allocation5 + $0x390] sm:$0xff]  ;;  %v420_v9 = vld [vmem:[#allocation5 + $0x3d8] sm:$0xff] }
 0x101   : > { %3525 = vmatpush1.bf16.msra.mxu0 %v8437_v20  ;;  %3607 = vmatpush1.bf16.msra.mxu1 %v8439_v21  ;;  %v323_v20 = vld [vmem:[#allocation5 + $0xd0] sm:$0xff]  ;;  %v316_v21 = vld [vmem:[#allocation5 + $0x98] sm:$0xff] }
 0x102   : > { %3526 = vmatprep.subr.bf16.mxu0 %v8454_v22  ;;  %3608 = vmatprep.subr.bf16.mxu1 %v8456_v26  ;;  %v8060_v22 = vcombine.high %v300_v11, %v308_v14  ;;  %v8059_v26 = vcombine.low %v300_v11, %v308_v14  ;;  %v8074_v27 = vcombine.high %v315_v19, %v323_v20  ;;  %v427_v14 = vld [vmem:[#allocation5 + $0x410] sm:$0xff] }
 0x103   : > { %v8076_v31 = vcombine.high %v316_v21, %v324_v23  ;;  %v8073_v33 = vcombine.low %v315_v19, %v323_v20  ;;  %v8075_v15 = vcombine.low %v316_v21, %v324_v23  ;;  %v436_v19 = vld [vmem:[#allocation5 + $0x458] sm:$0xff]  ;;  %v443_v23 = vld [vmem:[#allocation5 + $0x490] sm:$0xff] }
 0x105   : > { %3527 = vmatpush1.bf16.msra.mxu0 %v8453_v28  ;;  %3609 = vmatpush1.bf16.msra.mxu1 %v8455_v29  ;;  %v331_v28 = vld [vmem:[#allocation5 + $0x110] sm:$0xff] }
 0x106   : > { %3528 = vmatprep.subr.bf16.mxu0 %v8470_v30  ;;  %3610 = vmatprep.subr.bf16.mxu1 %v8472_v34  ;;  %v339_v29 = vld [vmem:[#allocation5 + $0x150] sm:$0xff]  ;;  %v332_v30 = vld [vmem:[#allocation5 + $0x118] sm:$0xff] }
 0x107   : > { %v8090_v34 = vcombine.high %v331_v28, %v339_v29  ;;  %v8089_v40 = vcombine.low %v331_v28, %v339_v29  ;;  %v8091_v41 = vcombine.low %v332_v30, %v340_v32  ;;  %v452_v28 = vld [vmem:[#allocation5 + $0x4d8] sm:$0xff] }
 0x109   : > { %3529 = vmatpush1.bf16.msra.mxu0 %v8469_v36  ;;  %3611 = vmatpush1.bf16.msra.mxu1 %v8471_v37  ;;  %v355_v36 = vld [vmem:[#allocation5 + $0x1d0] sm:$0xff]  ;;  %v348_v37 = vld [vmem:[#allocation5 + $0x198] sm:$0xff] }
 0x10a   : > { %3530 = vmatprep.subr.bf16.mxu0 %v8486_v38  ;;  %3612 = vmatprep.subr.bf16.mxu1 %v8488_v42  ;;  %v8092_v38 = vcombine.high %v332_v30, %v340_v32  ;;  %v8106_v42 = vcombine.high %v347_v35, %v355_v36  ;;  %v8105_v48 = vcombine.low %v347_v35, %v355_v36  ;;  %v459_v32 = vld [vmem:[#allocation5 + $0x510] sm:$0xff]  ;;  %v468_v35 = vld [vmem:[#allocation5 + $0x558] sm:$0xff] }
 0x10b   : > { %v8107_v49 = vcombine.low %v348_v37, %v356_v39 }
 0x10d   : > { %3531 = vmatpush1.bf16.msra.mxu0 %v8485_v44  ;;  %3613 = vmatpush1.bf16.msra.mxu1 %v8487_v45  ;;  %v371_v44 = vld [vmem:[#allocation5 + $0x250] sm:$0xff]  ;;  %v364_v45 = vld [vmem:[#allocation5 + $0x218] sm:$0xff] }
 0x10e   : > { %3532 = vmatprep.subr.bf16.mxu0 %v8502_v46  ;;  %3614 = vmatprep.subr.bf16.mxu1 %v8504_v50  ;;  %v8108_v46 = vcombine.high %v348_v37, %v356_v39  ;;  %v8122_v50 = vcombine.high %v363_v43, %v371_v44  ;;  %v8121_v58 = vcombine.low %v363_v43, %v371_v44  ;;  %v475_v39 = vld [vmem:[#allocation5 + $0x590] sm:$0xff]  ;;  %v484_v43 = vld [vmem:[#allocation5 + $0x5d8] sm:$0xff] }
 0x10f   : > { %v8123_v59 = vcombine.low %v364_v45, %v372_v47 }
 0x111   : > { %3533 = vmatpush1.bf16.msra.mxu0 %v8501_v52  ;;  %3615 = vmatpush1.bf16.msra.mxu1 %v8503_v54  ;;  %v387_v52 = vld [vmem:[#allocation5 + $0x2d0] sm:$0xff]  ;;  %v380_v54 = vld [vmem:[#allocation5 + $0x298] sm:$0xff] }
 0x112   : > { %3534 = vmatprep.subr.bf16.mxu0 %v8518_v55  ;;  %3616 = vmatprep.subr.bf16.mxu1 %v8520_v60  ;;  %v8124_v55 = vcombine.high %v364_v45, %v372_v47  ;;  %v8138_v60 = vcombine.high %v379_v51, %v387_v52  ;;  %v8137_v2 = vcombine.low %v379_v51, %v387_v52  ;;  %v491_v47 = vld [vmem:[#allocation5 + $0x610] sm:$0xff]  ;;  %v500_v51 = vld [vmem:[#allocation5 + $0x658] sm:$0xff] }
 0x113   : > { %v8139_v3 = vcombine.low %v380_v54, %v388_v56 }
 0x115   : > { %3535 = vmatpush1.bf16.msra.mxu0 %v8517_v62  ;;  %3617 = vmatpush1.bf16.msra.mxu1 %v8519_v63  ;;  %v403_v62 = vld [vmem:[#allocation5 + $0x350] sm:$0xff]  ;;  %v396_v63 = vld [vmem:[#allocation5 + $0x318] sm:$0xff] }
 0x116   : > { %3536 = vmatprep.subr.bf16.mxu0 %v8534_v0  ;;  %3618 = vmatprep.subr.bf16.mxu1 %v8536_v4  ;;  %v8140_v0 = vcombine.high %v380_v54, %v388_v56  ;;  %v8154_v4 = vcombine.high %v395_v61, %v403_v62  ;;  %v8153_v10 = vcombine.low %v395_v61, %v403_v62  ;;  %v507_v56 = vld [vmem:[#allocation5 + $0x690] sm:$0xff]  ;;  %v516_v61 = vld [vmem:[#allocation5 + $0x6d8] sm:$0xff] }
 0x117   : > { %v8155_v11 = vcombine.low %v396_v63, %v404_v1 }
 0x119   : > { %3537 = vmatpush1.bf16.msra.mxu0 %v8533_v6  ;;  %3619 = vmatpush1.bf16.msra.mxu1 %v8535_v7  ;;  %v419_v6 = vld [vmem:[#allocation5 + $0x3d0] sm:$0xff]  ;;  %v412_v7 = vld [vmem:[#allocation5 + $0x398] sm:$0xff] }
 0x11a   : > { %3538 = vmatprep.subr.bf16.mxu0 %v8550_v8  ;;  %3620 = vmatprep.subr.bf16.mxu1 %v8552_v13  ;;  %v8156_v8 = vcombine.high %v396_v63, %v404_v1  ;;  %v8170_v13 = vcombine.high %v411_v5, %v419_v6  ;;  %v8169_v20 = vcombine.low %v411_v5, %v419_v6  ;;  %v523_v1 = vld [vmem:[#allocation5 + $0x710] sm:$0xff]  ;;  %v532_v5 = vld [vmem:[#allocation5 + $0x758] sm:$0xff] }
 0x11b   : > { %v8171_v21 = vcombine.low %v412_v7, %v420_v9 }
 0x11d   : > { %3539 = vmatpush1.bf16.msra.mxu0 %v8549_v16  ;;  %3621 = vmatpush1.bf16.msra.mxu1 %v8551_v17  ;;  %v435_v16 = vld [vmem:[#allocation5 + $0x450] sm:$0xff]  ;;  %v428_v17 = vld [vmem:[#allocation5 + $0x418] sm:$0xff] }
 0x11e   : > { %3631 = vmatprep.subr.bf16.mxu0 %v8058_v18  ;;  %3713 = vmatprep.subr.bf16.mxu1 %v8060_v22  ;;  %v8172_v18 = vcombine.high %v412_v7, %v420_v9  ;;  %v8186_v22 = vcombine.high %v427_v14, %v435_v16  ;;  %v8185_v29 = vcombine.low %v427_v14, %v435_v16  ;;  %v539_v9 = vld [vmem:[#allocation5 + $0x790] sm:$0xff]  ;;  %v548_v14 = vld [vmem:[#allocation5 + $0x7d8] sm:$0xff] }
 0x11f   : > { %v8187_v30 = vcombine.low %v428_v17, %v436_v19 }
 0x120   : > { %3541 = vmatmul.mubr.bf16.vlgmr.msra.gmra.mrb[0].mxu0 %v10571_v24  ;;  %3623 = vmatmul.mubr.bf16.vlgmr.msra.gmra.mrb[0].mxu1 %v10571_v24 }
 0x121   : > { %3632 = vmatpush1.bf16.msra.mxu0 %v8057_v25  ;;  %3714 = vmatpush1.bf16.msra.mxu1 %v8059_v26  ;;  %v451_v25 = vld [vmem:[#allocation5 + $0x4d0] sm:$0xff]  ;;  %v444_v26 = vld [vmem:[#allocation5 + $0x498] sm:$0xff] }
 0x122   : > { %3633 = vmatprep.subr.bf16.mxu0 %v8074_v27  ;;  %3715 = vmatprep.subr.bf16.mxu1 %v8076_v31  ;;  %v8188_v27 = vcombine.high %v428_v17, %v436_v19  ;;  %v8202_v31 = vcombine.high %v443_v23, %v451_v25  ;;  %v8201_v36 = vcombine.low %v443_v23, %v451_v25  ;;  %v555_v19 = vld [vmem:[#allocation5 + $0x810] sm:$0xff]  ;;  %v564_v23 = vld [vmem:[#allocation5 + $0x858] sm:$0xff] }
 0x123   : > { %3663 = vmatprep.mubr.bf16.mxu0 %v10550_v57  ;;  %3745 = vmatprep.mubr.bf16.mxu1 %v10550_v57  ;;  %v8203_v37 = vcombine.low %v444_v26, %v452_v28 }
 0x125   : > { %3634 = vmatpush1.bf16.msra.mxu0 %v8073_v33  ;;  %3716 = vmatpush1.bf16.msra.mxu1 %v8075_v15  ;;  %v467_v33 = vld [vmem:[#allocation5 + $0x550] sm:$0xff]  ;;  %v460_v15 = vld [vmem:[#allocation5 + $0x518] sm:$0xff] }
 0x126   : > { %3635 = vmatprep.subr.bf16.mxu0 %v8090_v34  ;;  %3717 = vmatprep.subr.bf16.mxu1 %v8092_v38  ;;  %v8204_v34 = vcombine.high %v444_v26, %v452_v28  ;;  %v8218_v38 = vcombine.high %v459_v32, %v467_v33  ;;  %v8217_v44 = vcombine.low %v459_v32, %v467_v33  ;;  %v571_v28 = vld [vmem:[#allocation5 + $0x890] sm:$0xff]  ;;  %v580_v32 = vld [vmem:[#allocation5 + $0x8d8] sm:$0xff] }
 0x127   : > { %v8219_v45 = vcombine.low %v460_v15, %v468_v35 }
 0x129   : > { %3636 = vmatpush1.bf16.msra.mxu0 %v8089_v40  ;;  %3718 = vmatpush1.bf16.msra.mxu1 %v8091_v41  ;;  %v483_v40 = vld [vmem:[#allocation5 + $0x5d0] sm:$0xff]  ;;  %v476_v41 = vld [vmem:[#allocation5 + $0x598] sm:$0xff] }
 0x12a   : > { %3637 = vmatprep.subr.bf16.mxu0 %v8106_v42  ;;  %3719 = vmatprep.subr.bf16.mxu1 %v8108_v46  ;;  %v8220_v42 = vcombine.high %v460_v15, %v468_v35  ;;  %v8234_v46 = vcombine.high %v475_v39, %v483_v40  ;;  %v8233_v52 = vcombine.low %v475_v39, %v483_v40  ;;  %v587_v35 = vld [vmem:[#allocation5 + $0x910] sm:$0xff]  ;;  %v596_v39 = vld [vmem:[#allocation5 + $0x958] sm:$0xff] }
 0x12b   : > { %v8235_v54 = vcombine.low %v476_v41, %v484_v43 }
 0x12d   : > { %3638 = vmatpush1.bf16.msra.mxu0 %v8105_v48  ;;  %3720 = vmatpush1.bf16.msra.mxu1 %v8107_v49  ;;  %v499_v48 = vld [vmem:[#allocation5 + $0x650] sm:$0xff]  ;;  %v492_v49 = vld [vmem:[#allocation5 + $0x618] sm:$0xff] }
 0x12e   : > { %3639 = vmatprep.subr.bf16.mxu0 %v8122_v50  ;;  %3721 = vmatprep.subr.bf16.mxu1 %v8124_v55  ;;  %v8236_v50 = vcombine.high %v476_v41, %v484_v43  ;;  %v8250_v55 = vcombine.high %v491_v47, %v499_v48  ;;  %v8249_v62 = vcombine.low %v491_v47, %v499_v48  ;;  %v603_v43 = vld [vmem:[#allocation5 + $0x990] sm:$0xff]  ;;  %v612_v47 = vld [vmem:[#allocation5 + $0x9d8] sm:$0xff] }
 0x12f   : > { %v8251_v63 = vcombine.low %v492_v49, %v500_v51 }
 0x131   : > { %3640 = vmatpush1.bf16.msra.mxu0 %v8121_v58  ;;  %3722 = vmatpush1.bf16.msra.mxu1 %v8123_v59  ;;  %v515_v58 = vld [vmem:[#allocation5 + $0x6d0] sm:$0xff]  ;;  %v508_v59 = vld [vmem:[#allocation5 + $0x698] sm:$0xff] }
 0x132   : > { %3641 = vmatprep.subr.bf16.mxu0 %v8138_v60  ;;  %3723 = vmatprep.subr.bf16.mxu1 %v8140_v0  ;;  %v8252_v60 = vcombine.high %v492_v49, %v500_v51  ;;  %v8266_v0 = vcombine.high %v507_v56, %v515_v58  ;;  %v8265_v6 = vcombine.low %v507_v56, %v515_v58  ;;  %v619_v51 = vld [vmem:[#allocation5 + $0xa10] sm:$0xff]  ;;  %v628_v56 = vld [vmem:[#allocation5 + $0xa58] sm:$0xff] }
 0x133   : > { %v8267_v7 = vcombine.low %v508_v59, %v516_v61 }
 0x135   : > { %3642 = vmatpush1.bf16.msra.mxu0 %v8137_v2  ;;  %3724 = vmatpush1.bf16.msra.mxu1 %v8139_v3  ;;  %v531_v2 = vld [vmem:[#allocation5 + $0x750] sm:$0xff]  ;;  %v524_v3 = vld [vmem:[#allocation5 + $0x718] sm:$0xff] }
 0x136   : > { %3643 = vmatprep.subr.bf16.mxu0 %v8154_v4  ;;  %3725 = vmatprep.subr.bf16.mxu1 %v8156_v8  ;;  %v8268_v4 = vcombine.high %v508_v59, %v516_v61  ;;  %v8282_v8 = vcombine.high %v523_v1, %v531_v2  ;;  %v8281_v16 = vcombine.low %v523_v1, %v531_v2  ;;  %v635_v61 = vld [vmem:[#allocation5 + $0xa90] sm:$0xff]  ;;  %v644_v1 = vld [vmem:[#allocation5 + $0xad8] sm:$0xff] }
 0x137   : > { %v8283_v17 = vcombine.low %v524_v3, %v532_v5 }
 0x139   : > { %3644 = vmatpush1.bf16.msra.mxu0 %v8153_v10  ;;  %3726 = vmatpush1.bf16.msra.mxu1 %v8155_v11  ;;  %v547_v10 = vld [vmem:[#allocation5 + $0x7d0] sm:$0xff]  ;;  %v540_v11 = vld [vmem:[#allocation5 + $0x798] sm:$0xff] }
 0x13a   : > { %3645 = vmatprep.subr.bf16.mxu0 %v8170_v13  ;;  %3727 = vmatprep.subr.bf16.mxu1 %v8172_v18  ;;  %v8284_v13 = vcombine.high %v524_v3, %v532_v5  ;;  %v8298_v18 = vcombine.high %v539_v9, %v547_v10  ;;  %v8297_v25 = vcombine.low %v539_v9, %v547_v10  ;;  %v651_v5 = vld [vmem:[#allocation5 + $0xb10] sm:$0xff]  ;;  %v660_v9 = vld [vmem:[#allocation5 + $0xb58] sm:$0xff] }
 0x13b   : > { %v8299_v26 = vcombine.low %v540_v11, %v548_v14 }
 0x13d   : > { %3646 = vmatpush1.bf16.msra.mxu0 %v8169_v20  ;;  %3728 = vmatpush1.bf16.msra.mxu1 %v8171_v21  ;;  %v563_v20 = vld [vmem:[#allocation5 + $0x850] sm:$0xff]  ;;  %v556_v21 = vld [vmem:[#allocation5 + $0x818] sm:$0xff] }
 0x13e   : > { %3647 = vmatprep.subr.bf16.mxu0 %v8186_v22  ;;  %3729 = vmatprep.subr.bf16.mxu1 %v8188_v27  ;;  %v8300_v22 = vcombine.high %v540_v11, %v548_v14  ;;  %v8314_v27 = vcombine.high %v555_v19, %v563_v20  ;;  %v8313_v33 = vcombine.low %v555_v19, %v563_v20  ;;  %v667_v14 = vld [vmem:[#allocation5 + $0xb90] sm:$0xff]  ;;  %v676_v19 = vld [vmem:[#allocation5 + $0xbd8] sm:$0xff] }
 0x13f   : > { %v8315_v15 = vcombine.low %v556_v21, %v564_v23 }
 0x141   : > { %3648 = vmatpush1.bf16.msra.mxu0 %v8185_v29  ;;  %3730 = vmatpush1.bf16.msra.mxu1 %v8187_v30  ;;  %v579_v29 = vld [vmem:[#allocation5 + $0x8d0] sm:$0xff]  ;;  %v572_v30 = vld [vmem:[#allocation5 + $0x898] sm:$0xff] }
 0x142   : > { %3649 = vmatprep.subr.bf16.mxu0 %v8202_v31  ;;  %3731 = vmatprep.subr.bf16.mxu1 %v8204_v34  ;;  %v8316_v31 = vcombine.high %v556_v21, %v564_v23  ;;  %v8330_v34 = vcombine.high %v571_v28, %v579_v29  ;;  %v8329_v40 = vcombine.low %v571_v28, %v579_v29  ;;  %v683_v23 = vld [vmem:[#allocation5 + $0xc10] sm:$0xff]  ;;  %v692_v28 = vld [vmem:[#allocation5 + $0xc58] sm:$0xff] }
 0x143   : > { %v8331_v41 = vcombine.low %v572_v30, %v580_v32 }
 0x145   : > { %3650 = vmatpush1.bf16.msra.mxu0 %v8201_v36  ;;  %3732 = vmatpush1.bf16.msra.mxu1 %v8203_v37  ;;  %v595_v36 = vld [vmem:[#allocation5 + $0x950] sm:$0xff]  ;;  %v588_v37 = vld [vmem:[#allocation5 + $0x918] sm:$0xff] }
 0x146   : > { %3651 = vmatprep.subr.bf16.mxu0 %v8218_v38  ;;  %3733 = vmatprep.subr.bf16.mxu1 %v8220_v42  ;;  %v8332_v38 = vcombine.high %v572_v30, %v580_v32  ;;  %v8346_v42 = vcombine.high %v587_v35, %v595_v36  ;;  %v8345_v48 = vcombine.low %v587_v35, %v595_v36  ;;  %v699_v32 = vld [vmem:[#allocation5 + $0xc90] sm:$0xff]  ;;  %v708_v35 = vld [vmem:[#allocation5 + $0xcd8] sm:$0xff] }
 0x147   : > { %v8347_v49 = vcombine.low %v588_v37, %v596_v39 }
 0x149   : > { %3652 = vmatpush1.bf16.msra.mxu0 %v8217_v44  ;;  %3734 = vmatpush1.bf16.msra.mxu1 %v8219_v45  ;;  %v611_v44 = vld [vmem:[#allocation5 + $0x9d0] sm:$0xff]  ;;  %v604_v45 = vld [vmem:[#allocation5 + $0x998] sm:$0xff] }
 0x14a   : > { %3653 = vmatprep.subr.bf16.mxu0 %v8234_v46  ;;  %3735 = vmatprep.subr.bf16.mxu1 %v8236_v50  ;;  %v8348_v46 = vcombine.high %v588_v37, %v596_v39  ;;  %v8362_v50 = vcombine.high %v603_v43, %v611_v44  ;;  %v8361_v58 = vcombine.low %v603_v43, %v611_v44  ;;  %v715_v39 = vld [vmem:[#allocation5 + $0xd10] sm:$0xff]  ;;  %v724_v43 = vld [vmem:[#allocation5 + $0xd58] sm:$0xff] }
 0x14b   : > { %v8363_v59 = vcombine.low %v604_v45, %v612_v47 }
 0x14d   : > { %3654 = vmatpush1.bf16.msra.mxu0 %v8233_v52  ;;  %3736 = vmatpush1.bf16.msra.mxu1 %v8235_v54  ;;  %v627_v52 = vld [vmem:[#allocation5 + $0xa50] sm:$0xff]  ;;  %v620_v54 = vld [vmem:[#allocation5 + $0xa18] sm:$0xff] }
 0x14e   : > { %3655 = vmatprep.subr.bf16.mxu0 %v8250_v55  ;;  %3737 = vmatprep.subr.bf16.mxu1 %v8252_v60  ;;  %v8364_v55 = vcombine.high %v604_v45, %v612_v47  ;;  %v8378_v60 = vcombine.high %v619_v51, %v627_v52  ;;  %v8377_v2 = vcombine.low %v619_v51, %v627_v52  ;;  %v731_v47 = vld [vmem:[#allocation5 + $0xd90] sm:$0xff]  ;;  %v740_v51 = vld [vmem:[#allocation5 + $0xdd8] sm:$0xff] }
 0x14f   : > { %v8379_v3 = vcombine.low %v620_v54, %v628_v56 }
 0x151   : > { %3656 = vmatpush1.bf16.msra.mxu0 %v8249_v62  ;;  %3738 = vmatpush1.bf16.msra.mxu1 %v8251_v63  ;;  %v643_v62 = vld [vmem:[#allocation5 + $0xad0] sm:$0xff]  ;;  %v636_v63 = vld [vmem:[#allocation5 + $0xa98] sm:$0xff] }
 0x152   : > { %3657 = vmatprep.subr.bf16.mxu0 %v8266_v0  ;;  %3739 = vmatprep.subr.bf16.mxu1 %v8268_v4  ;;  %v8380_v0 = vcombine.high %v620_v54, %v628_v56  ;;  %v8394_v4 = vcombine.high %v635_v61, %v643_v62  ;;  %v8393_v10 = vcombine.low %v635_v61, %v643_v62  ;;  %v747_v56 = vld [vmem:[#allocation5 + $0xe10] sm:$0xff]  ;;  %v756_v61 = vld [vmem:[#allocation5 + $0xe58] sm:$0xff] }
 0x153   : > { %v8395_v11 = vcombine.low %v636_v63, %v644_v1 }
 0x155   : > { %3658 = vmatpush1.bf16.msra.mxu0 %v8265_v6  ;;  %3740 = vmatpush1.bf16.msra.mxu1 %v8267_v7  ;;  %v659_v6 = vld [vmem:[#allocation5 + $0xb50] sm:$0xff]  ;;  %v652_v7 = vld [vmem:[#allocation5 + $0xb18] sm:$0xff] }
 0x156   : > { %3659 = vmatprep.subr.bf16.mxu0 %v8282_v8  ;;  %3741 = vmatprep.subr.bf16.mxu1 %v8284_v13  ;;  %v8396_v8 = vcombine.high %v636_v63, %v644_v1  ;;  %v8410_v13 = vcombine.high %v651_v5, %v659_v6  ;;  %v8409_v20 = vcombine.low %v651_v5, %v659_v6  ;;  %v763_v1 = vld [vmem:[#allocation5 + $0xe90] sm:$0xff]  ;;  %v772_v5 = vld [vmem:[#allocation5 + $0xed8] sm:$0xff] }
 0x157   : > { %v8411_v21 = vcombine.low %v652_v7, %v660_v9 }
 0x159   : > { %3660 = vmatpush1.bf16.msra.mxu0 %v8281_v16  ;;  %3742 = vmatpush1.bf16.msra.mxu1 %v8283_v17  ;;  %v675_v16 = vld [vmem:[#allocation5 + $0xbd0] sm:$0xff]  ;;  %v8412_v17 = vcombine.high %v652_v7, %v660_v9 }
 0x15a   : > { %3661 = vmatprep.subr.bf16.mxu0 %v8298_v18  ;;  %3743 = vmatprep.subr.bf16.mxu1 %v8300_v22  ;;  %v668_v18 = vld [vmem:[#allocation5 + $0xb98] sm:$0xff]  ;;  %v8426_v22 = vcombine.high %v667_v14, %v675_v16  ;;  %v8425_v29 = vcombine.low %v667_v14, %v675_v16  ;;  %v779_v9 = vld [vmem:[#allocation5 + $0xf10] sm:$0xff] }
 0x15b   : > { %v8427_v30 = vcombine.low %v668_v18, %v676_v19  ;;  %v788_v14 = vld [vmem:[#allocation5 + $0xf58] sm:$0xff] }
 0x15d   : > { %3662 = vmatpush1.bf16.msra.mxu0 %v8297_v25  ;;  %3744 = vmatpush1.bf16.msra.mxu1 %v8299_v26  ;;  %v691_v25 = vld [vmem:[#allocation5 + $0xc50] sm:$0xff]  ;;  %v684_v26 = vld [vmem:[#allocation5 + $0xc18] sm:$0xff] }
 0x15e   : > { %3672 = vmatprep.subr.bf16.mxu0 %v8314_v27  ;;  %3754 = vmatprep.subr.bf16.mxu1 %v8316_v31  ;;  %v8428_v27 = vcombine.high %v668_v18, %v676_v19  ;;  %v8442_v31 = vcombine.high %v683_v23, %v691_v25  ;;  %v8441_v36 = vcombine.low %v683_v23, %v691_v25  ;;  %v795_v19 = vld [vmem:[#allocation5 + $0xf90] sm:$0xff]  ;;  %v804_v23 = vld [vmem:[#allocation5 + $0xfd8] sm:$0xff] }
 0x15f   : > { %v8443_v37 = vcombine.low %v684_v26, %v692_v28 }
 0x160   : > { %3664 = vmatmul.mubr.bf16.vlgmr.msra.gmra.mrb[4].mxu0 %v10556_v12  ;;  %3746 = vmatmul.mubr.bf16.vlgmr.msra.gmra.mrb[4].mxu1 %v10556_v12 }
 0x161   : > { %3673 = vmatpush1.bf16.msra.mxu0 %v8313_v33  ;;  %3755 = vmatpush1.bf16.msra.mxu1 %v8315_v15  ;;  %v707_v33 = vld [vmem:[#allocation5 + $0xcd0] sm:$0xff]  ;;  %v700_v15 = vld [vmem:[#allocation5 + $0xc98] sm:$0xff] }
 0x162   : > { %3674 = vmatprep.subr.bf16.mxu0 %v8330_v34  ;;  %3756 = vmatprep.subr.bf16.mxu1 %v8332_v38  ;;  %v8444_v34 = vcombine.high %v684_v26, %v692_v28  ;;  %v8458_v38 = vcombine.high %v699_v32, %v707_v33  ;;  %v8457_v44 = vcombine.low %v699_v32, %v707_v33  ;;  %v301_v28 = vld [vmem:[#allocation5 + $0x20] sm:$0xff]  ;;  %v310_v32 = vld [vmem:[#allocation5 + $0x68] sm:$0xff] }
 0x163   : > { %3704 = vmatprep.mubr.bf16.mxu0 %v10563_v53  ;;  %3786 = vmatprep.mubr.bf16.mxu1 %v10563_v53  ;;  %v8459_v45 = vcombine.low %v700_v15, %v708_v35 }
 0x165   : > { %3675 = vmatpush1.bf16.msra.mxu0 %v8329_v40  ;;  %3757 = vmatpush1.bf16.msra.mxu1 %v8331_v41  ;;  %v723_v40 = vld [vmem:[#allocation5 + $0xd50] sm:$0xff]  ;;  %v716_v41 = vld [vmem:[#allocation5 + $0xd18] sm:$0xff] }
 0x166   : > { %3676 = vmatprep.subr.bf16.mxu0 %v8346_v42  ;;  %3758 = vmatprep.subr.bf16.mxu1 %v8348_v46  ;;  %v8460_v42 = vcombine.high %v700_v15, %v708_v35  ;;  %v8474_v46 = vcombine.high %v715_v39, %v723_v40  ;;  %v8473_v52 = vcombine.low %v715_v39, %v723_v40  ;;  %v317_v35 = vld [vmem:[#allocation5 + $0xa0] sm:$0xff]  ;;  %v326_v39 = vld [vmem:[#allocation5 + $0xe8] sm:$0xff] }
 0x167   : > { %v8475_v54 = vcombine.low %v716_v41, %v724_v43 }
 0x169   : > { %3677 = vmatpush1.bf16.msra.mxu0 %v8345_v48  ;;  %3759 = vmatpush1.bf16.msra.mxu1 %v8347_v49  ;;  %v739_v48 = vld [vmem:[#allocation5 + $0xdd0] sm:$0xff]  ;;  %v732_v49 = vld [vmem:[#allocation5 + $0xd98] sm:$0xff] }
 0x16a   : > { %3678 = vmatprep.subr.bf16.mxu0 %v8362_v50  ;;  %3760 = vmatprep.subr.bf16.mxu1 %v8364_v55  ;;  %v8476_v50 = vcombine.high %v716_v41, %v724_v43  ;;  %v8490_v55 = vcombine.high %v731_v47, %v739_v48  ;;  %v8489_v62 = vcombine.low %v731_v47, %v739_v48  ;;  %v333_v43 = vld [vmem:[#allocation5 + $0x120] sm:$0xff]  ;;  %v342_v47 = vld [vmem:[#allocation5 + $0x168] sm:$0xff] }
 0x16b   : > { %v8491_v63 = vcombine.low %v732_v49, %v740_v51 }
 0x16d   : > { %3679 = vmatpush1.bf16.msra.mxu0 %v8361_v58  ;;  %3761 = vmatpush1.bf16.msra.mxu1 %v8363_v59  ;;  %v755_v58 = vld [vmem:[#allocation5 + $0xe50] sm:$0xff]  ;;  %v748_v59 = vld [vmem:[#allocation5 + $0xe18] sm:$0xff] }
 0x16e   : > { %3680 = vmatprep.subr.bf16.mxu0 %v8378_v60  ;;  %3762 = vmatprep.subr.bf16.mxu1 %v8380_v0  ;;  %v8492_v60 = vcombine.high %v732_v49, %v740_v51  ;;  %v8506_v0 = vcombine.high %v747_v56, %v755_v58  ;;  %v8505_v6 = vcombine.low %v747_v56, %v755_v58  ;;  %v349_v51 = vld [vmem:[#allocation5 + $0x1a0] sm:$0xff]  ;;  %v358_v56 = vld [vmem:[#allocation5 + $0x1e8] sm:$0xff] }
 0x16f   : > { %v8507_v7 = vcombine.low %v748_v59, %v756_v61 }
 0x171   : > { %3681 = vmatpush1.bf16.msra.mxu0 %v8377_v2  ;;  %3763 = vmatpush1.bf16.msra.mxu1 %v8379_v3  ;;  %v771_v2 = vld [vmem:[#allocation5 + $0xed0] sm:$0xff]  ;;  %v764_v3 = vld [vmem:[#allocation5 + $0xe98] sm:$0xff] }
 0x172   : > { %3682 = vmatprep.subr.bf16.mxu0 %v8394_v4  ;;  %3764 = vmatprep.subr.bf16.mxu1 %v8396_v8  ;;  %v8508_v4 = vcombine.high %v748_v59, %v756_v61  ;;  %v8522_v8 = vcombine.high %v763_v1, %v771_v2  ;;  %v8521_v16 = vcombine.low %v763_v1, %v771_v2  ;;  %v365_v61 = vld [vmem:[#allocation5 + $0x220] sm:$0xff]  ;;  %v374_v1 = vld [vmem:[#allocation5 + $0x268] sm:$0xff] }
 0x175   : > { %3683 = vmatpush1.bf16.msra.mxu0 %v8393_v10  ;;  %3765 = vmatpush1.bf16.msra.mxu1 %v8395_v11  ;;  %v787_v10 = vld [vmem:[#allocation5 + $0xf50] sm:$0xff]  ;;  %v780_v11 = vld [vmem:[#allocation5 + $0xf18] sm:$0xff] }
 0x176   : > { %3684 = vmatprep.subr.bf16.mxu0 %v8410_v13  ;;  %3766 = vmatprep.subr.bf16.mxu1 %v8412_v17  ;;  %v8524_v13 = vcombine.high %v764_v3, %v772_v5  ;;  %v8523_v17 = vcombine.low %v764_v3, %v772_v5  ;;  %v8538_v18 = vcombine.high %v779_v9, %v787_v10  ;;  %v381_v5 = vld [vmem:[#allocation5 + $0x2a0] sm:$0xff] }
 0x177   : > { %v8537_v25 = vcombine.low %v779_v9, %v787_v10  ;;  %v8539_v26 = vcombine.low %v780_v11, %v788_v14  ;;  %v390_v9 = vld [vmem:[#allocation5 + $0x2e8] sm:$0xff] }
 0x179   : > { %3685 = vmatpush1.bf16.msra.mxu0 %v8409_v20  ;;  %3767 = vmatpush1.bf16.msra.mxu1 %v8411_v21  ;;  %v803_v20 = vld [vmem:[#allocation5 + $0xfd0] sm:$0xff]  ;;  %v796_v21 = vld [vmem:[#allocation5 + $0xf98] sm:$0xff] }
 0x17a   : > { %3686 = vmatprep.subr.bf16.mxu0 %v8426_v22  ;;  %3768 = vmatprep.subr.bf16.mxu1 %v8428_v27  ;;  %v8540_v22 = vcombine.high %v780_v11, %v788_v14  ;;  %v8554_v27 = vcombine.high %v795_v19, %v803_v20  ;;  %v8553_v33 = vcombine.low %v795_v19, %v803_v20  ;;  %v397_v14 = vld [vmem:[#allocation5 + $0x320] sm:$0xff]  ;;  %v406_v19 = vld [vmem:[#allocation5 + $0x368] sm:$0xff] }
 0x17b   : > { %v8555_v15 = vcombine.low %v796_v21, %v804_v23 }
 0x17d   : > { %3687 = vmatpush1.bf16.msra.mxu0 %v8425_v29  ;;  %3769 = vmatpush1.bf16.msra.mxu1 %v8427_v30  ;;  %v309_v29 = vld [vmem:[#allocation5 + $0x60] sm:$0xff]  ;;  %v302_v30 = vld [vmem:[#allocation5 + $0x28] sm:$0xff] }
 0x17e   : > { %3688 = vmatprep.subr.bf16.mxu0 %v8442_v31  ;;  %3770 = vmatprep.subr.bf16.mxu1 %v8444_v34  ;;  %v8556_v31 = vcombine.high %v796_v21, %v804_v23  ;;  %v8062_v34 = vcombine.high %v301_v28, %v309_v29  ;;  %v8061_v40 = vcombine.low %v301_v28, %v309_v29  ;;  %v413_v23 = vld [vmem:[#allocation5 + $0x3a0] sm:$0xff]  ;;  %v422_v28 = vld [vmem:[#allocation5 + $0x3e8] sm:$0xff] }
 0x17f   : > { %v8063_v41 = vcombine.low %v302_v30, %v310_v32 }
 0x181   : > { %3689 = vmatpush1.bf16.msra.mxu0 %v8441_v36  ;;  %3771 = vmatpush1.bf16.msra.mxu1 %v8443_v37  ;;  %v325_v36 = vld [vmem:[#allocation5 + $0xe0] sm:$0xff]  ;;  %v318_v37 = vld [vmem:[#allocation5 + $0xa8] sm:$0xff] }
 0x182   : > { %3690 = vmatprep.subr.bf16.mxu0 %v8458_v38  ;;  %3772 = vmatprep.subr.bf16.mxu1 %v8460_v42  ;;  %v8064_v38 = vcombine.high %v302_v30, %v310_v32  ;;  %v8078_v42 = vcombine.high %v317_v35, %v325_v36  ;;  %v8077_v48 = vcombine.low %v317_v35, %v325_v36  ;;  %v429_v32 = vld [vmem:[#allocation5 + $0x420] sm:$0xff]  ;;  %v438_v35 = vld [vmem:[#allocation5 + $0x468] sm:$0xff] }
 0x183   : > { %v8079_v49 = vcombine.low %v318_v37, %v326_v39 }
 0x185   : > { %3691 = vmatpush1.bf16.msra.mxu0 %v8457_v44  ;;  %3773 = vmatpush1.bf16.msra.mxu1 %v8459_v45  ;;  %v341_v44 = vld [vmem:[#allocation5 + $0x160] sm:$0xff]  ;;  %v334_v45 = vld [vmem:[#allocation5 + $0x128] sm:$0xff] }
 0x186   : > { %3692 = vmatprep.subr.bf16.mxu0 %v8474_v46  ;;  %3774 = vmatprep.subr.bf16.mxu1 %v8476_v50  ;;  %v8080_v46 = vcombine.high %v318_v37, %v326_v39  ;;  %v8094_v50 = vcombine.high %v333_v43, %v341_v44  ;;  %v8093_v58 = vcombine.low %v333_v43, %v341_v44  ;;  %v445_v39 = vld [vmem:[#allocation5 + $0x4a0] sm:$0xff]  ;;  %v454_v43 = vld [vmem:[#allocation5 + $0x4e8] sm:$0xff] }
 0x187   : > { %v8095_v59 = vcombine.low %v334_v45, %v342_v47 }
 0x189   : > { %3693 = vmatpush1.bf16.msra.mxu0 %v8473_v52  ;;  %3775 = vmatpush1.bf16.msra.mxu1 %v8475_v54  ;;  %v357_v52 = vld [vmem:[#allocation5 + $0x1e0] sm:$0xff]  ;;  %v350_v54 = vld [vmem:[#allocation5 + $0x1a8] sm:$0xff] }
 0x18a   : > { %3694 = vmatprep.subr.bf16.mxu0 %v8490_v55  ;;  %3776 = vmatprep.subr.bf16.mxu1 %v8492_v60  ;;  %v8096_v55 = vcombine.high %v334_v45, %v342_v47  ;;  %v8110_v60 = vcombine.high %v349_v51, %v357_v52  ;;  %v8109_v2 = vcombine.low %v349_v51, %v357_v52  ;;  %v461_v47 = vld [vmem:[#allocation5 + $0x520] sm:$0xff]  ;;  %v470_v51 = vld [vmem:[#allocation5 + $0x568] sm:$0xff] }
 0x18b   : > { %v8111_v3 = vcombine.low %v350_v54, %v358_v56 }
 0x18d   : > { %3695 = vmatpush1.bf16.msra.mxu0 %v8489_v62  ;;  %3777 = vmatpush1.bf16.msra.mxu1 %v8491_v63  ;;  %v373_v62 = vld [vmem:[#allocation5 + $0x260] sm:$0xff]  ;;  %v366_v63 = vld [vmem:[#allocation5 + $0x228] sm:$0xff] }
 0x18e   : > { %3696 = vmatprep.subr.bf16.mxu0 %v8506_v0  ;;  %3778 = vmatprep.subr.bf16.mxu1 %v8508_v4  ;;  %v8112_v0 = vcombine.high %v350_v54, %v358_v56  ;;  %v8126_v4 = vcombine.high %v365_v61, %v373_v62  ;;  %v8125_v10 = vcombine.low %v365_v61, %v373_v62  ;;  %v477_v56 = vld [vmem:[#allocation5 + $0x5a0] sm:$0xff]  ;;  %v486_v61 = vld [vmem:[#allocation5 + $0x5e8] sm:$0xff] }
 0x18f   : > { %v8127_v11 = vcombine.low %v366_v63, %v374_v1 }
 0x191   : > { %3697 = vmatpush1.bf16.msra.mxu0 %v8505_v6  ;;  %3779 = vmatpush1.bf16.msra.mxu1 %v8507_v7  ;;  %v389_v6 = vld [vmem:[#allocation5 + $0x2e0] sm:$0xff]  ;;  %v382_v7 = vld [vmem:[#allocation5 + $0x2a8] sm:$0xff] }
 0x192   : > { %3698 = vmatprep.subr.bf16.mxu0 %v8522_v8  ;;  %3780 = vmatprep.subr.bf16.mxu1 %v8524_v13  ;;  %v8128_v8 = vcombine.high %v366_v63, %v374_v1  ;;  %v8142_v13 = vcombine.high %v381_v5, %v389_v6  ;;  %v8141_v20 = vcombine.low %v381_v5, %v389_v6  ;;  %v493_v1 = vld [vmem:[#allocation5 + $0x620] sm:$0xff]  ;;  %v502_v5 = vld [vmem:[#allocation5 + $0x668] sm:$0xff] }
 0x193   : > { %v8143_v21 = vcombine.low %v382_v7, %v390_v9 }
 0x195   : > { %3699 = vmatpush1.bf16.msra.mxu0 %v8521_v16  ;;  %3781 = vmatpush1.bf16.msra.mxu1 %v8523_v17  ;;  %v405_v16 = vld [vmem:[#allocation5 + $0x360] sm:$0xff]  ;;  %v398_v17 = vld [vmem:[#allocation5 + $0x328] sm:$0xff] }
 0x196   : > { %3700 = vmatprep.subr.bf16.mxu0 %v8538_v18  ;;  %3782 = vmatprep.subr.bf16.mxu1 %v8540_v22  ;;  %v8144_v18 = vcombine.high %v382_v7, %v390_v9  ;;  %v8158_v22 = vcombine.high %v397_v14, %v405_v16  ;;  %v8157_v29 = vcombine.low %v397_v14, %v405_v16  ;;  %v509_v9 = vld [vmem:[#allocation5 + $0x6a0] sm:$0xff]  ;;  %v518_v14 = vld [vmem:[#allocation5 + $0x6e8] sm:$0xff] }
 0x197   : > { %v8159_v30 = vcombine.low %v398_v17, %v406_v19 }
 0x199   : > { %3701 = vmatpush1.bf16.msra.mxu0 %v8537_v25  ;;  %3783 = vmatpush1.bf16.msra.mxu1 %v8539_v26  ;;  %v421_v25 = vld [vmem:[#allocation5 + $0x3e0] sm:$0xff]  ;;  %v414_v26 = vld [vmem:[#allocation5 + $0x3a8] sm:$0xff] }
 0x19a   : > { %3702 = vmatprep.subr.bf16.mxu0 %v8554_v27  ;;  %3784 = vmatprep.subr.bf16.mxu1 %v8556_v31  ;;  %v8160_v27 = vcombine.high %v398_v17, %v406_v19  ;;  %v8174_v31 = vcombine.high %v413_v23, %v421_v25  ;;  %v8173_v36 = vcombine.low %v413_v23, %v421_v25  ;;  %v525_v19 = vld [vmem:[#allocation5 + $0x720] sm:$0xff]  ;;  %v534_v23 = vld [vmem:[#allocation5 + $0x768] sm:$0xff] }
 0x19b   : > { %v8175_v37 = vcombine.low %v414_v26, %v422_v28 }
 0x19d   : > { %3703 = vmatpush1.bf16.msra.mxu0 %v8553_v33  ;;  %3785 = vmatpush1.bf16.msra.mxu1 %v8555_v15  ;;  %v437_v33 = vld [vmem:[#allocation5 + $0x460] sm:$0xff]  ;;  %v430_v15 = vld [vmem:[#allocation5 + $0x428] sm:$0xff] }
 0x19e   : > { %3795 = vmatprep.subr.bf16.mxu0 %v8062_v34  ;;  %3877 = vmatprep.subr.bf16.mxu1 %v8064_v38  ;;  %v8176_v34 = vcombine.high %v414_v26, %v422_v28  ;;  %v8190_v38 = vcombine.high %v429_v32, %v437_v33  ;;  %v8189_v44 = vcombine.low %v429_v32, %v437_v33  ;;  %v541_v28 = vld [vmem:[#allocation5 + $0x7a0] sm:$0xff]  ;;  %v550_v32 = vld [vmem:[#allocation5 + $0x7e8] sm:$0xff] }
 0x19f   : > { %v8191_v45 = vcombine.low %v430_v15, %v438_v35 }
 0x1a0   : > { %3705 = vmatmul.mubr.bf16.vlgmr.msra.gmra.mrb[4].mxu0 %v10571_v24  ;;  %3787 = vmatmul.mubr.bf16.vlgmr.msra.gmra.mrb[4].mxu1 %v10571_v24 }
 0x1a1   : > { %3796 = vmatpush1.bf16.msra.mxu0 %v8061_v40  ;;  %3878 = vmatpush1.bf16.msra.mxu1 %v8063_v41  ;;  %v453_v40 = vld [vmem:[#allocation5 + $0x4e0] sm:$0xff]  ;;  %v446_v41 = vld [vmem:[#allocation5 + $0x4a8] sm:$0xff] }
 0x1a2   : > { %3797 = vmatprep.subr.bf16.mxu0 %v8078_v42  ;;  %3879 = vmatprep.subr.bf16.mxu1 %v8080_v46  ;;  %v8192_v42 = vcombine.high %v430_v15, %v438_v35  ;;  %v8206_v46 = vcombine.high %v445_v39, %v453_v40  ;;  %v8205_v52 = vcombine.low %v445_v39, %v453_v40  ;;  %v557_v35 = vld [vmem:[#allocation5 + $0x820] sm:$0xff]  ;;  %v566_v39 = vld [vmem:[#allocation5 + $0x868] sm:$0xff] }
 0x1a3   : > { %3827 = vmatprep.mubr.bf16.mxu0 %v10550_v57  ;;  %3909 = vmatprep.mubr.bf16.mxu1 %v10550_v57  ;;  %v8207_v54 = vcombine.low %v446_v41, %v454_v43 }
 0x1a5   : > { %3798 = vmatpush1.bf16.msra.mxu0 %v8077_v48  ;;  %3880 = vmatpush1.bf16.msra.mxu1 %v8079_v49  ;;  %v469_v48 = vld [vmem:[#allocation5 + $0x560] sm:$0xff]  ;;  %v462_v49 = vld [vmem:[#allocation5 + $0x528] sm:$0xff] }
 0x1a6   : > { %3799 = vmatprep.subr.bf16.mxu0 %v8094_v50  ;;  %3881 = vmatprep.subr.bf16.mxu1 %v8096_v55  ;;  %v8208_v50 = vcombine.high %v446_v41, %v454_v43  ;;  %v8222_v55 = vcombine.high %v461_v47, %v469_v48  ;;  %v8221_v62 = vcombine.low %v461_v47, %v469_v48  ;;  %v573_v43 = vld [vmem:[#allocation5 + $0x8a0] sm:$0xff]  ;;  %v582_v47 = vld [vmem:[#allocation5 + $0x8e8] sm:$0xff] }
 0x1a7   : > { %v8223_v63 = vcombine.low %v462_v49, %v470_v51 }
 0x1a9   : > { %3800 = vmatpush1.bf16.msra.mxu0 %v8093_v58  ;;  %3882 = vmatpush1.bf16.msra.mxu1 %v8095_v59  ;;  %v485_v58 = vld [vmem:[#allocation5 + $0x5e0] sm:$0xff]  ;;  %v478_v59 = vld [vmem:[#allocation5 + $0x5a8] sm:$0xff] }
 0x1aa   : > { %3801 = vmatprep.subr.bf16.mxu0 %v8110_v60  ;;  %3883 = vmatprep.subr.bf16.mxu1 %v8112_v0  ;;  %v8224_v60 = vcombine.high %v462_v49, %v470_v51  ;;  %v8238_v0 = vcombine.high %v477_v56, %v485_v58  ;;  %v8237_v6 = vcombine.low %v477_v56, %v485_v58  ;;  %v598_v56 = vld [vmem:[#allocation5 + $0x968] sm:$0xff] }
 0x1ab   : > { %v8239_v7 = vcombine.low %v478_v59, %v486_v61 }
 0x1ad   : > { %3802 = vmatpush1.bf16.msra.mxu0 %v8109_v2  ;;  %3884 = vmatpush1.bf16.msra.mxu1 %v8111_v3  ;;  %v501_v2 = vld [vmem:[#allocation5 + $0x660] sm:$0xff]  ;;  %v494_v3 = vld [vmem:[#allocation5 + $0x628] sm:$0xff] }
 0x1ae   : > { %3803 = vmatprep.subr.bf16.mxu0 %v8126_v4  ;;  %3885 = vmatprep.subr.bf16.mxu1 %v8128_v8  ;;  %v8240_v4 = vcombine.high %v478_v59, %v486_v61  ;;  %v8254_v8 = vcombine.high %v493_v1, %v501_v2  ;;  %v8253_v16 = vcombine.low %v493_v1, %v501_v2  ;;  %v614_v1 = vld [vmem:[#allocation5 + $0x9e8] sm:$0xff] }
 0x1af   : > { %v8255_v17 = vcombine.low %v494_v3, %v502_v5 }
 0x1b1   : > { %3804 = vmatpush1.bf16.msra.mxu0 %v8125_v10  ;;  %3886 = vmatpush1.bf16.msra.mxu1 %v8127_v11  ;;  %v517_v10 = vld [vmem:[#allocation5 + $0x6e0] sm:$0xff]  ;;  %v510_v11 = vld [vmem:[#allocation5 + $0x6a8] sm:$0xff] }
 0x1b2   : > { %3805 = vmatprep.subr.bf16.mxu0 %v8142_v13  ;;  %3887 = vmatprep.subr.bf16.mxu1 %v8144_v18  ;;  %v8256_v13 = vcombine.high %v494_v3, %v502_v5  ;;  %v8270_v18 = vcombine.high %v509_v9, %v517_v10  ;;  %v8269_v25 = vcombine.low %v509_v9, %v517_v10  ;;  %v630_v9 = vld [vmem:[#allocation5 + $0xa68] sm:$0xff] }
 0x1b3   : > { %v8271_v26 = vcombine.low %v510_v11, %v518_v14 }
 0x1b5   : > { %3806 = vmatpush1.bf16.msra.mxu0 %v8141_v20  ;;  %3888 = vmatpush1.bf16.msra.mxu1 %v8143_v21  ;;  %v533_v20 = vld [vmem:[#allocation5 + $0x760] sm:$0xff]  ;;  %v526_v21 = vld [vmem:[#allocation5 + $0x728] sm:$0xff] }
 0x1b6   : > { %3807 = vmatprep.subr.bf16.mxu0 %v8158_v22  ;;  %3889 = vmatprep.subr.bf16.mxu1 %v8160_v27  ;;  %v8272_v22 = vcombine.high %v510_v11, %v518_v14  ;;  %v8286_v27 = vcombine.high %v525_v19, %v533_v20  ;;  %v8285_v33 = vcombine.low %v525_v19, %v533_v20  ;;  %v646_v19 = vld [vmem:[#allocation5 + $0xae8] sm:$0xff] }
 0x1b7   : > { %v8287_v15 = vcombine.low %v526_v21, %v534_v23 }
 0x1b9   : > { %3808 = vmatpush1.bf16.msra.mxu0 %v8157_v29  ;;  %3890 = vmatpush1.bf16.msra.mxu1 %v8159_v30  ;;  %v549_v29 = vld [vmem:[#allocation5 + $0x7e0] sm:$0xff]  ;;  %v542_v30 = vld [vmem:[#allocation5 + $0x7a8] sm:$0xff] }
 0x1ba   : > { %3809 = vmatprep.subr.bf16.mxu0 %v8174_v31  ;;  %3891 = vmatprep.subr.bf16.mxu1 %v8176_v34  ;;  %v8288_v31 = vcombine.high %v526_v21, %v534_v23  ;;  %v8302_v34 = vcombine.high %v541_v28, %v549_v29  ;;  %v8301_v40 = vcombine.low %v541_v28, %v549_v29  ;;  %v662_v28 = vld [vmem:[#allocation5 + $0xb68] sm:$0xff] }
 0x1bb   : > { %v8303_v41 = vcombine.low %v542_v30, %v550_v32 }
 0x1bd   : > { %3810 = vmatpush1.bf16.msra.mxu0 %v8173_v36  ;;  %3892 = vmatpush1.bf16.msra.mxu1 %v8175_v37  ;;  %v565_v36 = vld [vmem:[#allocation5 + $0x860] sm:$0xff]  ;;  %v558_v37 = vld [vmem:[#allocation5 + $0x828] sm:$0xff] }
 0x1be   : > { %3811 = vmatprep.subr.bf16.mxu0 %v8190_v38  ;;  %3893 = vmatprep.subr.bf16.mxu1 %v8192_v42  ;;  %v8304_v38 = vcombine.high %v542_v30, %v550_v32  ;;  %v8318_v42 = vcombine.high %v557_v35, %v565_v36  ;;  %v8317_v48 = vcombine.low %v557_v35, %v565_v36 }
 0x1bf   : > { %v8319_v49 = vcombine.low %v558_v37, %v566_v39 }
 0x1c1   : > { %3812 = vmatpush1.bf16.msra.mxu0 %v8189_v44  ;;  %3894 = vmatpush1.bf16.msra.mxu1 %v8191_v45  ;;  %v581_v44 = vld [vmem:[#allocation5 + $0x8e0] sm:$0xff]  ;;  %v574_v45 = vld [vmem:[#allocation5 + $0x8a8] sm:$0xff] }
 0x1c2   : > { %3813 = vmatprep.subr.bf16.mxu0 %v8206_v46  ;;  %3895 = vmatprep.subr.bf16.mxu1 %v8208_v50  ;;  %v8320_v46 = vcombine.high %v558_v37, %v566_v39  ;;  %v8334_v50 = vcombine.high %v573_v43, %v581_v44  ;;  %v8336_v51 = vcombine.high %v574_v45, %v582_v47  ;;  %v670_v37 = vld [vmem:[#allocation5 + $0xba8] sm:$0xff] }
 0x1c3   : > { %v8333_v58 = vcombine.low %v573_v43, %v581_v44  ;;  %v8335_v59 = vcombine.low %v574_v45, %v582_v47 }
 0x1c5   : > { %3814 = vmatpush1.bf16.msra.mxu0 %v8205_v52  ;;  %3896 = vmatpush1.bf16.msra.mxu1 %v8207_v54  ;;  %v589_v52 = vld [vmem:[#allocation5 + $0x920] sm:$0xff] }
 0x1c6   : > { %3815 = vmatprep.subr.bf16.mxu0 %v8222_v55  ;;  %3897 = vmatprep.subr.bf16.mxu1 %v8224_v60  ;;  %v597_v54 = vld [vmem:[#allocation5 + $0x960] sm:$0xff]  ;;  %v590_v55 = vld [vmem:[#allocation5 + $0x928] sm:$0xff] }
 0x1c7   : > { %v8350_v60 = vcombine.high %v589_v52, %v597_v54  ;;  %v8352_v61 = vcombine.high %v590_v55, %v598_v56  ;;  %v8349_v2 = vcombine.low %v589_v52, %v597_v54  ;;  %v8351_v3 = vcombine.low %v590_v55, %v598_v56 }
 0x1c9   : > { %3816 = vmatpush1.bf16.msra.mxu0 %v8221_v62  ;;  %3898 = vmatpush1.bf16.msra.mxu1 %v8223_v63  ;;  %v605_v62 = vld [vmem:[#allocation5 + $0x9a0] sm:$0xff] }
 0x1ca   : > { %3817 = vmatprep.subr.bf16.mxu0 %v8238_v0  ;;  %3899 = vmatprep.subr.bf16.mxu1 %v8240_v4  ;;  %v613_v63 = vld [vmem:[#allocation5 + $0x9e0] sm:$0xff]  ;;  %v606_v0 = vld [vmem:[#allocation5 + $0x9a8] sm:$0xff] }
 0x1cb   : > { %v8366_v4 = vcombine.high %v605_v62, %v613_v63  ;;  %v8368_v5 = vcombine.high %v606_v0, %v614_v1  ;;  %v8365_v10 = vcombine.low %v605_v62, %v613_v63  ;;  %v8367_v11 = vcombine.low %v606_v0, %v614_v1 }
 0x1cd   : > { %3818 = vmatpush1.bf16.msra.mxu0 %v8237_v6  ;;  %3900 = vmatpush1.bf16.msra.mxu1 %v8239_v7  ;;  %v621_v6 = vld [vmem:[#allocation5 + $0xa20] sm:$0xff] }
 0x1ce   : > { %3819 = vmatprep.subr.bf16.mxu0 %v8254_v8  ;;  %3901 = vmatprep.subr.bf16.mxu1 %v8256_v13  ;;  %v629_v7 = vld [vmem:[#allocation5 + $0xa60] sm:$0xff]  ;;  %v622_v8 = vld [vmem:[#allocation5 + $0xa28] sm:$0xff] }
 0x1cf   : > { %v8382_v13 = vcombine.high %v621_v6, %v629_v7  ;;  %v8384_v14 = vcombine.high %v622_v8, %v630_v9  ;;  %v8381_v20 = vcombine.low %v621_v6, %v629_v7  ;;  %v8383_v21 = vcombine.low %v622_v8, %v630_v9 }
 0x1d1   : > { %3820 = vmatpush1.bf16.msra.mxu0 %v8253_v16  ;;  %3902 = vmatpush1.bf16.msra.mxu1 %v8255_v17  ;;  %v637_v16 = vld [vmem:[#allocation5 + $0xaa0] sm:$0xff] }
 0x1d2   : > { %3821 = vmatprep.subr.bf16.mxu0 %v8270_v18  ;;  %3903 = vmatprep.subr.bf16.mxu1 %v8272_v22  ;;  %v645_v17 = vld [vmem:[#allocation5 + $0xae0] sm:$0xff]  ;;  %v638_v18 = vld [vmem:[#allocation5 + $0xaa8] sm:$0xff] }
 0x1d3   : > { %v8398_v22 = vcombine.high %v637_v16, %v645_v17  ;;  %v8400_v23 = vcombine.high %v638_v18, %v646_v19  ;;  %v8397_v29 = vcombine.low %v637_v16, %v645_v17  ;;  %v8399_v30 = vcombine.low %v638_v18, %v646_v19 }
 0x1d5   : > { %3822 = vmatpush1.bf16.msra.mxu0 %v8269_v25  ;;  %3904 = vmatpush1.bf16.msra.mxu1 %v8271_v26  ;;  %v653_v25 = vld [vmem:[#allocation5 + $0xb20] sm:$0xff] }
 0x1d6   : > { %3823 = vmatprep.subr.bf16.mxu0 %v8286_v27  ;;  %3905 = vmatprep.subr.bf16.mxu1 %v8288_v31  ;;  %v661_v26 = vld [vmem:[#allocation5 + $0xb60] sm:$0xff]  ;;  %v654_v27 = vld [vmem:[#allocation5 + $0xb28] sm:$0xff] }
 0x1d7   : > { %v8414_v31 = vcombine.high %v653_v25, %v661_v26  ;;  %v8415_v44 = vcombine.low %v654_v27, %v662_v28 }
 0x1d9   : > { %3824 = vmatpush1.bf16.msra.mxu0 %v8285_v33  ;;  %3906 = vmatpush1.bf16.msra.mxu1 %v8287_v15  ;;  %v8416_v33 = vcombine.high %v654_v27, %v662_v28  ;;  %v669_v15 = vld [vmem:[#allocation5 + $0xba0] sm:$0xff] }
 0x1da   : > { %3825 = vmatprep.subr.bf16.mxu0 %v8302_v34  ;;  %3907 = vmatprep.subr.bf16.mxu1 %v8304_v38  ;;  %v677_v34 = vld [vmem:[#allocation5 + $0xbe0] sm:$0xff]  ;;  %v678_v38 = vld [vmem:[#allocation5 + $0xbe8] sm:$0xff] }
 0x1db   : > { %v8430_v45 = vcombine.high %v669_v15, %v677_v34  ;;  %v8432_v47 = vcombine.high %v670_v37, %v678_v38  ;;  %v8429_v52 = vcombine.low %v669_v15, %v677_v34  ;;  %v8431_v54 = vcombine.low %v670_v37, %v678_v38 }
 0x1dd   : > { %3826 = vmatpush1.bf16.msra.mxu0 %v8301_v40  ;;  %3908 = vmatpush1.bf16.msra.mxu1 %v8303_v41  ;;  %v8413_v41 = vcombine.low %v653_v25, %v661_v26 }
 0x1de   : > { %3836 = vmatprep.subr.bf16.mxu0 %v8318_v42  ;;  %3918 = vmatprep.subr.bf16.mxu1 %v8320_v46 }
 0x1e0   : > { %3828 = vmatmul.mubr.bf16.vlgmr.msra.gmra.mrb[8].mxu0 %v10556_v12  ;;  %3910 = vmatmul.mubr.bf16.vlgmr.msra.gmra.mrb[8].mxu1 %v10556_v12 }
 0x1e1   : > { %3837 = vmatpush1.bf16.msra.mxu0 %v8317_v48  ;;  %3919 = vmatpush1.bf16.msra.mxu1 %v8319_v49  ;;  %v685_v48 = vld [vmem:[#allocation5 + $0xc20] sm:$0xff] }
 0x1e2   : > { %3838 = vmatprep.subr.bf16.mxu0 %v8334_v50  ;;  %3920 = vmatprep.subr.bf16.mxu1 %v8336_v51  ;;  %v693_v49 = vld [vmem:[#allocation5 + $0xc60] sm:$0xff]  ;;  %v686_v50 = vld [vmem:[#allocation5 + $0xc28] sm:$0xff] }
 0x1e3   : > { %3868 = vmatprep.mubr.bf16.mxu0 %v10563_v53  ;;  %3950 = vmatprep.mubr.bf16.mxu1 %v10563_v53  ;;  %v694_v51 = vld [vmem:[#allocation5 + $0xc68] sm:$0xff]  ;;  %v8446_v55 = vcombine.high %v685_v48, %v693_v49  ;;  %v8445_v62 = vcombine.low %v685_v48, %v693_v49  ;;  %v797_v48 = vld [vmem:[#allocation5 + $0xfa0] sm:$0xff] }
 0x1e4   : > { %v8448_v56 = vcombine.high %v686_v50, %v694_v51  ;;  %v8447_v63 = vcombine.low %v686_v50, %v694_v51  ;;  %v805_v49 = vld [vmem:[#allocation5 + $0xfe0] sm:$0xff]  ;;  %v798_v50 = vld [vmem:[#allocation5 + $0xfa8] sm:$0xff] }
 0x1e5   : > { %3839 = vmatpush1.bf16.msra.mxu0 %v8333_v58  ;;  %3921 = vmatpush1.bf16.msra.mxu1 %v8335_v59  ;;  %v701_v58 = vld [vmem:[#allocation5 + $0xca0] sm:$0xff]  ;;  %v806_v51 = vld [vmem:[#allocation5 + $0xfe8] sm:$0xff] }
 0x1e6   : > { %3840 = vmatprep.subr.bf16.mxu0 %v8350_v60  ;;  %3922 = vmatprep.subr.bf16.mxu1 %v8352_v61  ;;  %v709_v59 = vld [vmem:[#allocation5 + $0xce0] sm:$0xff]  ;;  %v702_v60 = vld [vmem:[#allocation5 + $0xca8] sm:$0xff] }
 0x1e7   : > { %v710_v61 = vld [vmem:[#allocation5 + $0xce8] sm:$0xff]  ;;  %v8462_v0 = vcombine.high %v701_v58, %v709_v59  ;;  %v8461_v6 = vcombine.low %v701_v58, %v709_v59  ;;  %v303_v58 = vld [vmem:[#allocation5 + $0x30] sm:$0xff] }
 0x1e8   : > { %v8464_v1 = vcombine.high %v702_v60, %v710_v61  ;;  %v8463_v7 = vcombine.low %v702_v60, %v710_v61  ;;  %v311_v59 = vld [vmem:[#allocation5 + $0x70] sm:$0xff]  ;;  %v304_v60 = vld [vmem:[#allocation5 + $0x38] sm:$0xff] }
 0x1e9   : > { %3841 = vmatpush1.bf16.msra.mxu0 %v8349_v2  ;;  %3923 = vmatpush1.bf16.msra.mxu1 %v8351_v3  ;;  %v717_v2 = vld [vmem:[#allocation5 + $0xd20] sm:$0xff]  ;;  %v312_v61 = vld [vmem:[#allocation5 + $0x78] sm:$0xff] }
 0x1ea   : > { %3842 = vmatprep.subr.bf16.mxu0 %v8366_v4  ;;  %3924 = vmatprep.subr.bf16.mxu1 %v8368_v5  ;;  %v725_v3 = vld [vmem:[#allocation5 + $0xd60] sm:$0xff]  ;;  %v718_v4 = vld [vmem:[#allocation5 + $0xd28] sm:$0xff] }
 0x1eb   : > { %v726_v5 = vld [vmem:[#allocation5 + $0xd68] sm:$0xff]  ;;  %v8478_v8 = vcombine.high %v717_v2, %v725_v3  ;;  %v8477_v16 = vcombine.low %v717_v2, %v725_v3  ;;  %v319_v2 = vld [vmem:[#allocation5 + $0xb0] sm:$0xff] }
 0x1ec   : > { %v8480_v9 = vcombine.high %v718_v4, %v726_v5  ;;  %v8479_v17 = vcombine.low %v718_v4, %v726_v5  ;;  %v327_v3 = vld [vmem:[#allocation5 + $0xf0] sm:$0xff]  ;;  %v320_v4 = vld [vmem:[#allocation5 + $0xb8] sm:$0xff] }
 0x1ed   : > { %3843 = vmatpush1.bf16.msra.mxu0 %v8365_v10  ;;  %3925 = vmatpush1.bf16.msra.mxu1 %v8367_v11  ;;  %v733_v10 = vld [vmem:[#allocation5 + $0xda0] sm:$0xff]  ;;  %v328_v5 = vld [vmem:[#allocation5 + $0xf8] sm:$0xff] }
 0x1ee   : > { %3844 = vmatprep.subr.bf16.mxu0 %v8382_v13  ;;  %3926 = vmatprep.subr.bf16.mxu1 %v8384_v14  ;;  %v741_v11 = vld [vmem:[#allocation5 + $0xde0] sm:$0xff]  ;;  %v734_v13 = vld [vmem:[#allocation5 + $0xda8] sm:$0xff] }
 0x1ef   : > { %v742_v14 = vld [vmem:[#allocation5 + $0xde8] sm:$0xff]  ;;  %v8494_v18 = vcombine.high %v733_v10, %v741_v11  ;;  %v8493_v25 = vcombine.low %v733_v10, %v741_v11  ;;  %v335_v10 = vld [vmem:[#allocation5 + $0x130] sm:$0xff] }
 0x1f0   : > { %v8496_v19 = vcombine.high %v734_v13, %v742_v14  ;;  %v8495_v26 = vcombine.low %v734_v13, %v742_v14  ;;  %v343_v11 = vld [vmem:[#allocation5 + $0x170] sm:$0xff]  ;;  %v336_v13 = vld [vmem:[#allocation5 + $0x138] sm:$0xff] }
 0x1f1   : > { %3845 = vmatpush1.bf16.msra.mxu0 %v8381_v20  ;;  %3927 = vmatpush1.bf16.msra.mxu1 %v8383_v21  ;;  %v749_v20 = vld [vmem:[#allocation5 + $0xe20] sm:$0xff]  ;;  %v344_v14 = vld [vmem:[#allocation5 + $0x178] sm:$0xff] }
 0x1f2   : > { %3846 = vmatprep.subr.bf16.mxu0 %v8398_v22  ;;  %3928 = vmatprep.subr.bf16.mxu1 %v8400_v23  ;;  %v757_v21 = vld [vmem:[#allocation5 + $0xe60] sm:$0xff]  ;;  %v750_v22 = vld [vmem:[#allocation5 + $0xe28] sm:$0xff] }
 0x1f3   : > { %v10589_v32 = vpop.f32.mrb[0].mxu0  ;;  %v10591_v35 = vpop.f32.mrb[0].mxu1  ;;  %v758_v23 = vld [vmem:[#allocation5 + $0xe68] sm:$0xff]  ;;  %v8510_v27 = vcombine.high %v749_v20, %v757_v21  ;;  %v8509_v15 = vcombine.low %v749_v20, %v757_v21  ;;  %v351_v20 = vld [vmem:[#allocation5 + $0x1b0] sm:$0xff] }
 0x1f4   : > { %v10593_v36 = vpop.f32.mrb[1].mxu0  ;;  %v10595_v39 = vpop.f32.mrb[1].mxu1  ;;  %v8512_v28 = vcombine.high %v750_v22, %v758_v23  ;;  %v8511_v34 = vcombine.low %v750_v22, %v758_v23  ;;  %v359_v21 = vld [vmem:[#allocation5 + $0x1f0] sm:$0xff]  ;;  %v352_v22 = vld [vmem:[#allocation5 + $0x1b8] sm:$0xff] }
 0x1f5   : > { %v3546_v40 = vpop.f32.mrb[2].mxu0  ;;  %3847 = vmatpush1.bf16.msra.mxu0 %v8397_v29  ;;  %v3628_v42 = vpop.f32.mrb[2].mxu1  ;;  %3929 = vmatpush1.bf16.msra.mxu1 %v8399_v30  ;;  %v765_v29 = vld [vmem:[#allocation5 + $0xea0] sm:$0xff]  ;;  %v360_v23 = vld [vmem:[#allocation5 + $0x1f8] sm:$0xff] }
 0x1f6   : > { %v3547_v43 = vpop.f32.mrb[3].mxu0  ;;  %3848 = vmatprep.subr.bf16.mxu0 %v8414_v31  ;;  %v3629_v46 = vpop.f32.mrb[3].mxu1  ;;  %3930 = vmatprep.subr.bf16.mxu1 %v8416_v33  ;;  %v773_v30 = vld [vmem:[#allocation5 + $0xee0] sm:$0xff]  ;;  %v766_v31 = vld [vmem:[#allocation5 + $0xea8] sm:$0xff] }
 0x1f7   : > { %v774_v33 = vld [vmem:[#allocation5 + $0xee8] sm:$0xff]  ;;  %v8526_v37 = vcombine.high %v765_v29, %v773_v30  ;;  %v781_v40 = vld [vmem:[#allocation5 + $0xf20] sm:$0xff] }
 0x1f8   : > { %v8528_v38 = vcombine.high %v766_v31, %v774_v33  ;;  %v782_v42 = vld [vmem:[#allocation5 + $0xf28] sm:$0xff] }
 0x1f9   : > { %3849 = vmatpush1.bf16.msra.mxu0 %v8413_v41  ;;  %3931 = vmatpush1.bf16.msra.mxu1 %v8415_v44  ;;  %v789_v41 = vld [vmem:[#allocation5 + $0xf60] sm:$0xff]  ;;  %v790_v43 = vld [vmem:[#allocation5 + $0xf68] sm:$0xff]  ;;  %v8525_v44 = vcombine.low %v765_v29, %v773_v30  ;;  %v367_v29 = vld [vmem:[#allocation5 + $0x230] sm:$0xff] }
 0x1fa   : > { %3850 = vmatprep.subr.bf16.mxu0 %v8430_v45  ;;  %3932 = vmatprep.subr.bf16.mxu1 %v8432_v47  ;;  %v8527_v45 = vcombine.low %v766_v31, %v774_v33  ;;  %v8542_v46 = vcombine.high %v781_v40, %v789_v41  ;;  %v8544_v47 = vcombine.high %v782_v42, %v790_v43  ;;  %v375_v30 = vld [vmem:[#allocation5 + $0x270] sm:$0xff]  ;;  %v368_v31 = vld [vmem:[#allocation5 + $0x238] sm:$0xff] }
 0x1fb   : > { %v376_v33 = vld [vmem:[#allocation5 + $0x278] sm:$0xff] }
 0x1fd   : > { %3851 = vmatpush1.bf16.msra.mxu0 %v8429_v52  ;;  %3933 = vmatpush1.bf16.msra.mxu1 %v8431_v54  ;;  %v8541_v52 = vcombine.low %v781_v40, %v789_v41  ;;  %v8543_v54 = vcombine.low %v782_v42, %v790_v43  ;;  %v391_v40 = vld [vmem:[#allocation5 + $0x2f0] sm:$0xff]  ;;  %v384_v41 = vld [vmem:[#allocation5 + $0x2b8] sm:$0xff]  ;;  %v8129_v43 = vcombine.low %v367_v29, %v375_v30 }
 0x1fe   : > { %3852 = vmatprep.subr.bf16.mxu0 %v8446_v55  ;;  %3934 = vmatprep.subr.bf16.mxu1 %v8448_v56  ;;  %v8558_v55 = vcombine.high %v797_v48, %v805_v49  ;;  %v8560_v56 = vcombine.high %v798_v50, %v806_v51  ;;  %v392_v42 = vld [vmem:[#allocation5 + $0x2f8] sm:$0xff] }
 0x201   : > { %3853 = vmatpush1.bf16.msra.mxu0 %v8445_v62  ;;  %3935 = vmatpush1.bf16.msra.mxu1 %v8447_v63  ;;  %v8557_v62 = vcombine.low %v797_v48, %v805_v49  ;;  %v8559_v63 = vcombine.low %v798_v50, %v806_v51  ;;  %v407_v48 = vld [vmem:[#allocation5 + $0x370] sm:$0xff]  ;;  %v400_v49 = vld [vmem:[#allocation5 + $0x338] sm:$0xff] }
 0x202   : > { %3854 = vmatprep.subr.bf16.mxu0 %v8462_v0  ;;  %3936 = vmatprep.subr.bf16.mxu1 %v8464_v1  ;;  %v8066_v0 = vcombine.high %v303_v58, %v311_v59  ;;  %v8068_v1 = vcombine.high %v304_v60, %v312_v61  ;;  %v408_v50 = vld [vmem:[#allocation5 + $0x378] sm:$0xff] }
 0x205   : > { %3855 = vmatpush1.bf16.msra.mxu0 %v8461_v6  ;;  %3937 = vmatpush1.bf16.msra.mxu1 %v8463_v7  ;;  %v8065_v6 = vcombine.low %v303_v58, %v311_v59  ;;  %v8067_v7 = vcombine.low %v304_v60, %v312_v61  ;;  %v423_v58 = vld [vmem:[#allocation5 + $0x3f0] sm:$0xff]  ;;  %v416_v59 = vld [vmem:[#allocation5 + $0x3b8] sm:$0xff] }
 0x206   : > { %3856 = vmatprep.subr.bf16.mxu0 %v8478_v8  ;;  %3938 = vmatprep.subr.bf16.mxu1 %v8480_v9  ;;  %v8082_v8 = vcombine.high %v319_v2, %v327_v3  ;;  %v8084_v9 = vcombine.high %v320_v4, %v328_v5  ;;  %v424_v60 = vld [vmem:[#allocation5 + $0x3f8] sm:$0xff] }
 0x209   : > { %3857 = vmatpush1.bf16.msra.mxu0 %v8477_v16  ;;  %3939 = vmatpush1.bf16.msra.mxu1 %v8479_v17  ;;  %v8081_v16 = vcombine.low %v319_v2, %v327_v3  ;;  %v8083_v17 = vcombine.low %v320_v4, %v328_v5  ;;  %v439_v2 = vld [vmem:[#allocation5 + $0x470] sm:$0xff]  ;;  %v432_v3 = vld [vmem:[#allocation5 + $0x438] sm:$0xff] }
 0x20a   : > { %3858 = vmatprep.subr.bf16.mxu0 %v8494_v18  ;;  %3940 = vmatprep.subr.bf16.mxu1 %v8496_v19  ;;  %v8098_v18 = vcombine.high %v335_v10, %v343_v11  ;;  %v8100_v19 = vcombine.high %v336_v13, %v344_v14  ;;  %v440_v4 = vld [vmem:[#allocation5 + $0x478] sm:$0xff] }
 0x20d   : > { %3859 = vmatpush1.bf16.msra.mxu0 %v8493_v25  ;;  %3941 = vmatpush1.bf16.msra.mxu1 %v8495_v26  ;;  %v8097_v25 = vcombine.low %v335_v10, %v343_v11  ;;  %v8099_v26 = vcombine.low %v336_v13, %v344_v14  ;;  %v455_v10 = vld [vmem:[#allocation5 + $0x4f0] sm:$0xff]  ;;  %v448_v11 = vld [vmem:[#allocation5 + $0x4b8] sm:$0xff] }
 0x20e   : > { %3860 = vmatprep.subr.bf16.mxu0 %v8510_v27  ;;  %3942 = vmatprep.subr.bf16.mxu1 %v8512_v28  ;;  %v8114_v27 = vcombine.high %v351_v20, %v359_v21  ;;  %v8116_v28 = vcombine.high %v352_v22, %v360_v23  ;;  %v456_v13 = vld [vmem:[#allocation5 + $0x4f8] sm:$0xff] }
 0x211   : > { %3861 = vmatpush1.bf16.msra.mxu0 %v8509_v15  ;;  %3943 = vmatpush1.bf16.msra.mxu1 %v8511_v34  ;;  %v8113_v15 = vcombine.low %v351_v20, %v359_v21  ;;  %v8115_v34 = vcombine.low %v352_v22, %v360_v23  ;;  %v471_v20 = vld [vmem:[#allocation5 + $0x570] sm:$0xff]  ;;  %v464_v21 = vld [vmem:[#allocation5 + $0x538] sm:$0xff] }
 0x212   : > { %3862 = vmatprep.subr.bf16.mxu0 %v8526_v37  ;;  %3944 = vmatprep.subr.bf16.mxu1 %v8528_v38  ;;  %v8130_v37 = vcombine.high %v367_v29, %v375_v30  ;;  %v383_v38 = vld [vmem:[#allocation5 + $0x2b0] sm:$0xff]  ;;  %v472_v22 = vld [vmem:[#allocation5 + $0x578] sm:$0xff] }
 0x213   : > { %v8145_v51 = vcombine.low %v383_v38, %v391_v40  ;;  %v487_v29 = vld [vmem:[#allocation5 + $0x5f0] sm:$0xff]  ;;  %v480_v30 = vld [vmem:[#allocation5 + $0x5b8] sm:$0xff] }
 0x215   : > { %3863 = vmatpush1.bf16.msra.mxu0 %v8525_v44  ;;  %3945 = vmatpush1.bf16.msra.mxu1 %v8527_v45  ;;  %v8131_v44 = vcombine.low %v368_v31, %v376_v33  ;;  %v8146_v45 = vcombine.high %v383_v38, %v391_v40  ;;  %v503_v38 = vld [vmem:[#allocation5 + $0x670] sm:$0xff]  ;;  %v496_v40 = vld [vmem:[#allocation5 + $0x638] sm:$0xff] }
 0x216   : > { %3864 = vmatprep.subr.bf16.mxu0 %v8542_v46  ;;  %3946 = vmatprep.subr.bf16.mxu1 %v8544_v47  ;;  %v8148_v46 = vcombine.high %v384_v41, %v392_v42  ;;  %v399_v47 = vld [vmem:[#allocation5 + $0x330] sm:$0xff] }
 0x217   : > { %v8161_v61 = vcombine.low %v399_v47, %v407_v48 }
 0x219   : > { %3865 = vmatpush1.bf16.msra.mxu0 %v8541_v52  ;;  %3947 = vmatpush1.bf16.msra.mxu1 %v8543_v54  ;;  %v8147_v52 = vcombine.low %v384_v41, %v392_v42  ;;  %v8162_v54 = vcombine.high %v399_v47, %v407_v48  ;;  %v504_v41 = vld [vmem:[#allocation5 + $0x678] sm:$0xff]  ;;  %v519_v47 = vld [vmem:[#allocation5 + $0x6f0] sm:$0xff] }
 0x21a   : > { %3866 = vmatprep.subr.bf16.mxu0 %v8558_v55  ;;  %3948 = vmatprep.subr.bf16.mxu1 %v8560_v56  ;;  %v8164_v55 = vcombine.high %v400_v49, %v408_v50  ;;  %v415_v56 = vld [vmem:[#allocation5 + $0x3b0] sm:$0xff]  ;;  %v512_v48 = vld [vmem:[#allocation5 + $0x6b8] sm:$0xff] }
 0x21b   : > { %v8177_v5 = vcombine.low %v415_v56, %v423_v58 }
 0x21d   : > { %3867 = vmatpush1.bf16.msra.mxu0 %v8557_v62  ;;  %3949 = vmatpush1.bf16.msra.mxu1 %v8559_v63  ;;  %v8163_v62 = vcombine.low %v400_v49, %v408_v50  ;;  %v8178_v63 = vcombine.high %v415_v56, %v423_v58  ;;  %v520_v49 = vld [vmem:[#allocation5 + $0x6f8] sm:$0xff]  ;;  %v535_v56 = vld [vmem:[#allocation5 + $0x770] sm:$0xff] }
 0x21e   : > { %3959 = vmatprep.subr.bf16.mxu0 %v8066_v0  ;;  %4041 = vmatprep.subr.bf16.mxu1 %v8068_v1  ;;  %v8180_v0 = vcombine.high %v416_v59, %v424_v60  ;;  %v431_v1 = vld [vmem:[#allocation5 + $0x430] sm:$0xff]  ;;  %v528_v58 = vld [vmem:[#allocation5 + $0x738] sm:$0xff] }
 0x21f   : > { %v8193_v14 = vcombine.low %v431_v1, %v439_v2 }
 0x220   : > { %3869 = vmatmul.mubr.bf16.vlgmr.msra.gmra.mrb[8].mxu0 %v10571_v24  ;;  %3951 = vmatmul.mubr.bf16.vlgmr.msra.gmra.mrb[8].mxu1 %v10571_v24 }
 0x221   : > { %3960 = vmatpush1.bf16.msra.mxu0 %v8065_v6  ;;  %4042 = vmatpush1.bf16.msra.mxu1 %v8067_v7  ;;  %v8179_v6 = vcombine.low %v416_v59, %v424_v60  ;;  %v8194_v7 = vcombine.high %v431_v1, %v439_v2  ;;  %v536_v59 = vld [vmem:[#allocation5 + $0x778] sm:$0xff]  ;;  %v551_v1 = vld [vmem:[#allocation5 + $0x7f0] sm:$0xff] }
 0x222   : > { %3961 = vmatprep.subr.bf16.mxu0 %v8082_v8  ;;  %4043 = vmatprep.subr.bf16.mxu1 %v8084_v9  ;;  %v8196_v8 = vcombine.high %v432_v3, %v440_v4  ;;  %v447_v9 = vld [vmem:[#allocation5 + $0x4b0] sm:$0xff]  ;;  %v544_v2 = vld [vmem:[#allocation5 + $0x7b8] sm:$0xff] }
 0x223   : > { %3991 = vmatprep.mubr.bf16.mxu0 %v10550_v57  ;;  %4073 = vmatprep.mubr.bf16.mxu1 %v10550_v57  ;;  %v8132_v57 = vcombine.high %v368_v31, %v376_v33  ;;  %v8209_v23 = vcombine.low %v447_v9, %v455_v10  ;;  %v488_v31 = vld [vmem:[#allocation5 + $0x5f8] sm:$0xff] }
 0x225   : > { %3962 = vmatpush1.bf16.msra.mxu0 %v8081_v16  ;;  %4044 = vmatpush1.bf16.msra.mxu1 %v8083_v17  ;;  %v8195_v16 = vcombine.low %v432_v3, %v440_v4  ;;  %v8210_v17 = vcombine.high %v447_v9, %v455_v10  ;;  %v552_v3 = vld [vmem:[#allocation5 + $0x7f8] sm:$0xff]  ;;  %v567_v9 = vld [vmem:[#allocation5 + $0x870] sm:$0xff] }
 0x226   : > { %3963 = vmatprep.subr.bf16.mxu0 %v8098_v18  ;;  %4045 = vmatprep.subr.bf16.mxu1 %v8100_v19  ;;  %v8212_v18 = vcombine.high %v448_v11, %v456_v13  ;;  %v463_v19 = vld [vmem:[#allocation5 + $0x530] sm:$0xff]  ;;  %v560_v10 = vld [vmem:[#allocation5 + $0x838] sm:$0xff] }
 0x227   : > { %v8225_v33 = vcombine.low %v463_v19, %v471_v20 }
 0x229   : > { %3964 = vmatpush1.bf16.msra.mxu0 %v8097_v25  ;;  %4046 = vmatpush1.bf16.msra.mxu1 %v8099_v26  ;;  %v8211_v25 = vcombine.low %v448_v11, %v456_v13  ;;  %v8226_v26 = vcombine.high %v463_v19, %v471_v20  ;;  %v568_v11 = vld [vmem:[#allocation5 + $0x878] sm:$0xff]  ;;  %v583_v19 = vld [vmem:[#allocation5 + $0x8f0] sm:$0xff] }
 0x22a   : > { %3965 = vmatprep.subr.bf16.mxu0 %v8114_v27  ;;  %4047 = vmatprep.subr.bf16.mxu1 %v8116_v28  ;;  %v8228_v27 = vcombine.high %v464_v21, %v472_v22  ;;  %v479_v28 = vld [vmem:[#allocation5 + $0x5b0] sm:$0xff]  ;;  %v576_v20 = vld [vmem:[#allocation5 + $0x8b8] sm:$0xff] }
 0x22b   : > { %v8241_v42 = vcombine.low %v479_v28, %v487_v29 }
 0x22d   : > { %3966 = vmatpush1.bf16.msra.mxu0 %v8113_v15  ;;  %4048 = vmatpush1.bf16.msra.mxu1 %v8115_v34  ;;  %v8227_v15 = vcombine.low %v464_v21, %v472_v22  ;;  %v8242_v34 = vcombine.high %v479_v28, %v487_v29  ;;  %v584_v21 = vld [vmem:[#allocation5 + $0x8f8] sm:$0xff]  ;;  %v599_v28 = vld [vmem:[#allocation5 + $0x970] sm:$0xff] }
 0x22e   : > { %3967 = vmatprep.subr.bf16.mxu0 %v8130_v37  ;;  %4049 = vmatprep.subr.bf16.mxu1 %v8132_v57  ;;  %v8244_v37 = vcombine.high %v480_v30, %v488_v31  ;;  %v495_v57 = vld [vmem:[#allocation5 + $0x630] sm:$0xff]  ;;  %v592_v29 = vld [vmem:[#allocation5 + $0x938] sm:$0xff] }
 0x22f   : > { %v8257_v50 = vcombine.low %v495_v57, %v503_v38 }
 0x231   : > { %3968 = vmatpush1.bf16.msra.mxu0 %v8129_v43  ;;  %4050 = vmatpush1.bf16.msra.mxu1 %v8131_v44  ;;  %v8243_v43 = vcombine.low %v480_v30, %v488_v31  ;;  %v8258_v44 = vcombine.high %v495_v57, %v503_v38  ;;  %v600_v30 = vld [vmem:[#allocation5 + $0x978] sm:$0xff]  ;;  %v615_v57 = vld [vmem:[#allocation5 + $0x9f0] sm:$0xff] }
 0x232   : > { %3969 = vmatprep.subr.bf16.mxu0 %v8146_v45  ;;  %4051 = vmatprep.subr.bf16.mxu1 %v8148_v46  ;;  %v8260_v45 = vcombine.high %v496_v40, %v504_v41  ;;  %v511_v46 = vld [vmem:[#allocation5 + $0x6b0] sm:$0xff]  ;;  %v608_v38 = vld [vmem:[#allocation5 + $0x9b8] sm:$0xff] }
 0x233   : > { %v8273_v60 = vcombine.low %v511_v46, %v519_v47 }
 0x235   : > { %3970 = vmatpush1.bf16.msra.mxu0 %v8145_v51  ;;  %4052 = vmatpush1.bf16.msra.mxu1 %v8147_v52  ;;  %v8259_v51 = vcombine.low %v496_v40, %v504_v41  ;;  %v8274_v52 = vcombine.high %v511_v46, %v519_v47  ;;  %v616_v40 = vld [vmem:[#allocation5 + $0x9f8] sm:$0xff] }
 0x236   : > { %3971 = vmatprep.subr.bf16.mxu0 %v8162_v54  ;;  %4053 = vmatprep.subr.bf16.mxu1 %v8164_v55  ;;  %v8276_v54 = vcombine.high %v512_v48, %v520_v49  ;;  %v527_v55 = vld [vmem:[#allocation5 + $0x730] sm:$0xff]  ;;  %v624_v46 = vld [vmem:[#allocation5 + $0xa38] sm:$0xff] }
 0x237   : > { %v8289_v4 = vcombine.low %v527_v55, %v535_v56  ;;  %v632_v47 = vld [vmem:[#allocation5 + $0xa78] sm:$0xff] }
 0x239   : > { %3972 = vmatpush1.bf16.msra.mxu0 %v8161_v61  ;;  %4054 = vmatpush1.bf16.msra.mxu1 %v8163_v62  ;;  %v8275_v61 = vcombine.low %v512_v48, %v520_v49  ;;  %v8290_v62 = vcombine.high %v527_v55, %v535_v56  ;;  %v8371_v49 = vcombine.low %v608_v38, %v616_v40  ;;  %v648_v55 = vld [vmem:[#allocation5 + $0xaf8] sm:$0xff] }
 0x23a   : > { %3973 = vmatprep.subr.bf16.mxu0 %v8178_v63  ;;  %4055 = vmatprep.subr.bf16.mxu1 %v8180_v0  ;;  %v8292_v63 = vcombine.high %v528_v58, %v536_v59  ;;  %v543_v0 = vld [vmem:[#allocation5 + $0x7b0] sm:$0xff] }
 0x23b   : > { %v8305_v13 = vcombine.low %v543_v0, %v551_v1 }
 0x23d   : > { %3974 = vmatpush1.bf16.msra.mxu0 %v8177_v5  ;;  %4056 = vmatpush1.bf16.msra.mxu1 %v8179_v6  ;;  %v8291_v5 = vcombine.low %v528_v58, %v536_v59  ;;  %v8306_v6 = vcombine.high %v543_v0, %v551_v1  ;;  %v8387_v58 = vcombine.low %v624_v46, %v632_v47  ;;  %v664_v0 = vld [vmem:[#allocation5 + $0xb78] sm:$0xff] }
 0x23e   : > { %3975 = vmatprep.subr.bf16.mxu0 %v8194_v7  ;;  %4057 = vmatprep.subr.bf16.mxu1 %v8196_v8  ;;  %v8308_v7 = vcombine.high %v544_v2, %v552_v3  ;;  %v559_v8 = vld [vmem:[#allocation5 + $0x830] sm:$0xff] }
 0x23f   : > { %v8321_v22 = vcombine.low %v559_v8, %v567_v9 }
 0x241   : > { %3976 = vmatpush1.bf16.msra.mxu0 %v8193_v14  ;;  %4058 = vmatpush1.bf16.msra.mxu1 %v8195_v16  ;;  %v8307_v14 = vcombine.low %v544_v2, %v552_v3  ;;  %v8322_v16 = vcombine.high %v559_v8, %v567_v9 }
 0x242   : > { %3977 = vmatprep.subr.bf16.mxu0 %v8210_v17  ;;  %4059 = vmatprep.subr.bf16.mxu1 %v8212_v18  ;;  %v8324_v17 = vcombine.high %v560_v10, %v568_v11  ;;  %v575_v18 = vld [vmem:[#allocation5 + $0x8b0] sm:$0xff] }
 0x243   : > { %v8337_v31 = vcombine.low %v575_v18, %v583_v19 }
 0x245   : > { %3978 = vmatpush1.bf16.msra.mxu0 %v8209_v23  ;;  %4060 = vmatpush1.bf16.msra.mxu1 %v8211_v25  ;;  %v8323_v23 = vcombine.low %v560_v10, %v568_v11  ;;  %v8338_v25 = vcombine.high %v575_v18, %v583_v19  ;;  %v672_v10 = vld [vmem:[#allocation5 + $0xbb8] sm:$0xff] }
 0x246   : > { %3979 = vmatprep.subr.bf16.mxu0 %v8226_v26  ;;  %4061 = vmatprep.subr.bf16.mxu1 %v8228_v27  ;;  %v8340_v26 = vcombine.high %v576_v20, %v584_v21  ;;  %v591_v27 = vld [vmem:[#allocation5 + $0x930] sm:$0xff]  ;;  %v680_v11 = vld [vmem:[#allocation5 + $0xbf8] sm:$0xff] }
 0x247   : > { %v8353_v41 = vcombine.low %v591_v27, %v599_v28 }
 0x249   : > { %3980 = vmatpush1.bf16.msra.mxu0 %v8225_v33  ;;  %4062 = vmatpush1.bf16.msra.mxu1 %v8227_v15  ;;  %v8339_v33 = vcombine.low %v576_v20, %v584_v21  ;;  %v8354_v15 = vcombine.high %v591_v27, %v599_v28  ;;  %v696_v27 = vld [vmem:[#allocation5 + $0xc78] sm:$0xff] }
 0x24a   : > { %3981 = vmatprep.subr.bf16.mxu0 %v8242_v34  ;;  %4063 = vmatprep.subr.bf16.mxu1 %v8244_v37  ;;  %v8356_v34 = vcombine.high %v592_v29, %v600_v30  ;;  %v607_v37 = vld [vmem:[#allocation5 + $0x9b0] sm:$0xff] }
 0x24b   : > { %v8369_v48 = vcombine.low %v607_v37, %v615_v57 }
 0x24d   : > { %3982 = vmatpush1.bf16.msra.mxu0 %v8241_v42  ;;  %4064 = vmatpush1.bf16.msra.mxu1 %v8243_v43  ;;  %v8370_v42 = vcombine.high %v607_v37, %v615_v57  ;;  %v8372_v43 = vcombine.high %v608_v38, %v616_v40  ;;  %v712_v37 = vld [vmem:[#allocation5 + $0xcf8] sm:$0xff] }
 0x24e   : > { %3983 = vmatprep.subr.bf16.mxu0 %v8258_v44  ;;  %4065 = vmatprep.subr.bf16.mxu1 %v8260_v45  ;;  %v623_v44 = vld [vmem:[#allocation5 + $0xa30] sm:$0xff] }
 0x24f   : > { %v631_v45 = vld [vmem:[#allocation5 + $0xa70] sm:$0xff] }
 0x250   : > { %v8385_v56 = vcombine.low %v623_v44, %v631_v45 }
 0x251   : > { %3984 = vmatpush1.bf16.msra.mxu0 %v8257_v50  ;;  %4066 = vmatpush1.bf16.msra.mxu1 %v8259_v51  ;;  %v8386_v50 = vcombine.high %v623_v44, %v631_v45  ;;  %v639_v51 = vld [vmem:[#allocation5 + $0xab0] sm:$0xff]  ;;  %v728_v44 = vld [vmem:[#allocation5 + $0xd78] sm:$0xff] }
 0x252   : > { %3985 = vmatprep.subr.bf16.mxu0 %v8274_v52  ;;  %4067 = vmatprep.subr.bf16.mxu1 %v8276_v54  ;;  %v647_v52 = vld [vmem:[#allocation5 + $0xaf0] sm:$0xff]  ;;  %v640_v54 = vld [vmem:[#allocation5 + $0xab8] sm:$0xff] }
 0x253   : > { %v8402_v59 = vcombine.high %v639_v51, %v647_v52  ;;  %v8401_v1 = vcombine.low %v639_v51, %v647_v52  ;;  %v8403_v2 = vcombine.low %v640_v54, %v648_v55  ;;  %v744_v51 = vld [vmem:[#allocation5 + $0xdf8] sm:$0xff] }
 0x255   : > { %3986 = vmatpush1.bf16.msra.mxu0 %v8273_v60  ;;  %4068 = vmatpush1.bf16.msra.mxu1 %v8275_v61  ;;  %v8404_v60 = vcombine.high %v640_v54, %v648_v55  ;;  %v655_v61 = vld [vmem:[#allocation5 + $0xb30] sm:$0xff] }
 0x256   : > { %3987 = vmatprep.subr.bf16.mxu0 %v8290_v62  ;;  %4069 = vmatprep.subr.bf16.mxu1 %v8292_v63  ;;  %v663_v62 = vld [vmem:[#allocation5 + $0xb70] sm:$0xff]  ;;  %v656_v63 = vld [vmem:[#allocation5 + $0xb38] sm:$0xff] }
 0x257   : > { %v8418_v3 = vcombine.high %v655_v61, %v663_v62  ;;  %v8419_v19 = vcombine.low %v656_v63, %v664_v0 }
 0x259   : > { %3988 = vmatpush1.bf16.msra.mxu0 %v8289_v4  ;;  %4070 = vmatpush1.bf16.msra.mxu1 %v8291_v5  ;;  %v8420_v5 = vcombine.high %v656_v63, %v664_v0 }
 0x25a   : > { %3989 = vmatprep.subr.bf16.mxu0 %v8306_v6  ;;  %4071 = vmatprep.subr.bf16.mxu1 %v8308_v7  ;;  %v671_v6 = vld [vmem:[#allocation5 + $0xbb0] sm:$0xff] }
 0x25b   : > { %v679_v7 = vld [vmem:[#allocation5 + $0xbf0] sm:$0xff] }
 0x25c   : > { %v8434_v20 = vcombine.high %v671_v6, %v679_v7  ;;  %v8433_v28 = vcombine.low %v671_v6, %v679_v7  ;;  %v768_v7 = vld [vmem:[#allocation5 + $0xeb8] sm:$0xff] }
 0x25d   : > { %3990 = vmatpush1.bf16.msra.mxu0 %v8305_v13  ;;  %4072 = vmatpush1.bf16.msra.mxu1 %v8307_v14 }
 0x25e   : > { %4000 = vmatprep.subr.bf16.mxu0 %v8322_v16  ;;  %4082 = vmatprep.subr.bf16.mxu1 %v8324_v17  ;;  %v8417_v16 = vcombine.low %v655_v61, %v663_v62  ;;  %v752_v61 = vld [vmem:[#allocation5 + $0xe38] sm:$0xff] }
 0x25f   : > { %v760_v62 = vld [vmem:[#allocation5 + $0xe78] sm:$0xff] }
 0x260   : > { %3992 = vmatmul.mubr.bf16.vlgmr.msra.gmra.mrb[12].mxu0 %v10556_v12  ;;  %4074 = vmatmul.mubr.bf16.vlgmr.msra.gmra.mrb[12].mxu1 %v10556_v12  ;;  %v8355_v12 = vcombine.low %v592_v29, %v600_v30  ;;  %v8435_v29 = vcombine.low %v672_v10, %v680_v11 }
 0x261   : > { %4001 = vmatpush1.bf16.msra.mxu0 %v8321_v22  ;;  %4083 = vmatpush1.bf16.msra.mxu1 %v8323_v23  ;;  %v8436_v22 = vcombine.high %v672_v10, %v680_v11  ;;  %v687_v23 = vld [vmem:[#allocation5 + $0xc30] sm:$0xff]  ;;  %v776_v10 = vld [vmem:[#allocation5 + $0xef8] sm:$0xff] }
 0x262   : > { %4002 = vmatprep.subr.bf16.mxu0 %v8338_v25  ;;  %4084 = vmatprep.subr.bf16.mxu1 %v8340_v26  ;;  %v695_v25 = vld [vmem:[#allocation5 + $0xc70] sm:$0xff]  ;;  %v688_v26 = vld [vmem:[#allocation5 + $0xc38] sm:$0xff] }
 0x263   : > { %4032 = vmatprep.mubr.bf16.mxu0 %v10563_v53  ;;  %4114 = vmatprep.mubr.bf16.mxu1 %v10563_v53  ;;  %v8388_v53 = vcombine.high %v624_v46, %v632_v47  ;;  %v8450_v30 = vcombine.high %v687_v23, %v695_v25  ;;  %v8449_v57 = vcombine.low %v687_v23, %v695_v25  ;;  %v10618_v23 = vld [vmem:[#allocation7] sm:$0xff] }
 0x264   : > { %v8451_v38 = vcombine.low %v688_v26, %v696_v27 }
 0x265   : > { %4003 = vmatpush1.bf16.msra.mxu0 %v8337_v31  ;;  %4085 = vmatpush1.bf16.msra.mxu1 %v8339_v33  ;;  %v8452_v31 = vcombine.high %v688_v26, %v696_v27  ;;  %v703_v33 = vld [vmem:[#allocation5 + $0xcb0] sm:$0xff]  ;;  %v8531_v26 = vcombine.low %v768_v7, %v776_v10 }
 0x266   : > { %4004 = vmatprep.subr.bf16.mxu0 %v8354_v15  ;;  %4086 = vmatprep.subr.bf16.mxu1 %v8356_v34  ;;  %v711_v15 = vld [vmem:[#allocation5 + $0xcf0] sm:$0xff]  ;;  %v704_v34 = vld [vmem:[#allocation5 + $0xcb8] sm:$0xff] }
 0x267   : > { %v8466_v40 = vcombine.high %v703_v33, %v711_v15  ;;  %v8465_v45 = vcombine.low %v703_v33, %v711_v15  ;;  %v8467_v46 = vcombine.low %v704_v34, %v712_v37  ;;  %v800_v33 = vld [vmem:[#allocation5 + $0xfb8] sm:$0xff] }
 0x268   : > { %v808_v15 = vld [vmem:[#allocation5 + $0xff8] sm:$0xff] }
 0x269   : > { %4005 = vmatpush1.bf16.msra.mxu0 %v8353_v41  ;;  %4087 = vmatpush1.bf16.msra.mxu1 %v8355_v12  ;;  %v8468_v41 = vcombine.high %v704_v34, %v712_v37  ;;  %v719_v12 = vld [vmem:[#allocation5 + $0xd30] sm:$0xff] }
 0x26a   : > { %4006 = vmatprep.subr.bf16.mxu0 %v8370_v42  ;;  %4088 = vmatprep.subr.bf16.mxu1 %v8372_v43  ;;  %v727_v42 = vld [vmem:[#allocation5 + $0xd70] sm:$0xff]  ;;  %v720_v43 = vld [vmem:[#allocation5 + $0xd38] sm:$0xff] }
 0x26b   : > { %v8482_v47 = vcombine.high %v719_v12, %v727_v42  ;;  %v8481_v52 = vcombine.low %v719_v12, %v727_v42  ;;  %v8483_v54 = vcombine.low %v720_v43, %v728_v44  ;;  %v8563_v12 = vcombine.low %v800_v33, %v808_v15  ;;  %v9289_v42 = vld [vmem:[#allocation8 + $0x4] ss:$16 sps:$4 sm:$0xff]  }
 0x26d   : > { %4007 = vmatpush1.bf16.msra.mxu0 %v8369_v48  ;;  %4089 = vmatpush1.bf16.msra.mxu1 %v8371_v49  ;;  %v8484_v48 = vcombine.high %v720_v43, %v728_v44  ;;  %v735_v49 = vld [vmem:[#allocation5 + $0xdb0] sm:$0xff]  ;;  %v9292_v43 = vld [vmem:[#allocation8 + $0xc] ss:$16 sps:$4 sm:$0xff]  }
 0x26e   : > { %4008 = vmatprep.subr.bf16.mxu0 %v8386_v50  ;;  %4090 = vmatprep.subr.bf16.mxu1 %v8388_v53  ;;  %v743_v50 = vld [vmem:[#allocation5 + $0xdf0] sm:$0xff]  ;;  %v736_v53 = vld [vmem:[#allocation5 + $0xdb8] sm:$0xff] }
 0x26f   : > { %v8498_v55 = vcombine.high %v735_v49, %v743_v50  ;;  %v8497_v63 = vcombine.low %v735_v49, %v743_v50  ;;  %v8499_v0 = vcombine.low %v736_v53, %v744_v51  ;;  %v9293_v49 = vld [vmem:[#allocation8 + $0x20] ss:$16 sps:$4 sm:$0xff]   ;;  %v9296_v50 = vld [vmem:[#allocation8 + $0x28] ss:$16 sps:$4 sm:$0xff]  }
 0x271   : > { %4009 = vmatpush1.bf16.msra.mxu0 %v8385_v56  ;;  %4091 = vmatpush1.bf16.msra.mxu1 %v8387_v58  ;;  %v8500_v56 = vcombine.high %v736_v53, %v744_v51  ;;  %v751_v58 = vld [vmem:[#allocation5 + $0xe30] sm:$0xff]  ;;  %v9304_v51 = vld [vmem:[#allocation8 + $0x4c] ss:$16 sps:$4 sm:$0xff]  }
 0x272   : > { %4010 = vmatprep.subr.bf16.mxu0 %v8402_v59  ;;  %4092 = vmatprep.subr.bf16.mxu1 %v8404_v60  ;;  %v759_v59 = vld [vmem:[#allocation5 + $0xe70] sm:$0xff]  ;;  %v813_v60 = vlaneseq }
 0x273   : > { %v10605_v4 = vpop.f32.mrb[4].mxu0  ;;  %v10607_v8 = vpop.f32.mrb[4].mxu1  ;;  %v8513_v11 = vcombine.low %v751_v58, %v759_v59  ;;  %v9301_v53 = vld [vmem:[#allocation8 + $0x44] ss:$16 sps:$4 sm:$0xff]  }
 0x274   : > { %v10609_v9 = vpop.f32.mrb[5].mxu0  ;;  %v10611_v13 = vpop.f32.mrb[5].mxu1  ;;  %v10613_v6 = vshrl.u32 %v813_v60, 7  ;;  %v9316_v60 = vld [vmem:[#allocation8 + $0x8c] ss:$16 sps:$4 sm:$0xff]  }
 0x275   : > { %v3710_v14 = vpop.f32.mrb[6].mxu0  ;;  %4011 = vmatpush1.bf16.msra.mxu0 %v8401_v1  ;;  %v3792_v17 = vpop.f32.mrb[6].mxu1  ;;  %4093 = vmatpush1.bf16.msra.mxu1 %v8403_v2  ;;  %v8514_v1 = vcombine.high %v751_v58, %v759_v59  ;;  %v8516_v2 = vcombine.high %v752_v61, %v760_v62  ;;  %v9308_v58 = vld [vmem:[#allocation8 + $0x68] ss:$16 sps:$4 sm:$0xff]   ;;  %v9313_v59 = vld [vmem:[#allocation8 + $0x84] ss:$16 sps:$4 sm:$0xff]  }
 0x276   : > { %v3711_v18 = vpop.f32.mrb[7].mxu0  ;;  %4012 = vmatprep.subr.bf16.mxu0 %v8418_v3  ;;  %v3793_v21 = vpop.f32.mrb[7].mxu1  ;;  %4094 = vmatprep.subr.bf16.mxu1 %v8420_v5  ;;  %v767_v3 = vld [vmem:[#allocation5 + $0xeb0] sm:$0xff]  ;;  %v8515_v14 = vcombine.low %v752_v61, %v760_v62  ;;  %v8532_v17 = vcombine.high %v768_v7, %v776_v10  ;;  %v9314_v62 = vld [vmem:[#allocation8 + $0x88] ss:$16 sps:$4 sm:$0xff]  }
 0x277   : > { %v775_v5 = vld [vmem:[#allocation5 + $0xef0] sm:$0xff]  ;;  %v784_v21 = vld [vmem:[#allocation5 + $0xf38] sm:$0xff] }
 0x278   : > { %v783_v18 = vld [vmem:[#allocation5 + $0xf30] sm:$0xff]  ;;  %v8529_v25 = vcombine.low %v767_v3, %v775_v5  ;;  %v9326_v10 = vld [vmem:[#allocation8 + $0xc8] ss:$16 sps:$4 sm:$0xff]  }
 0x279   : > { %4013 = vmatpush1.bf16.msra.mxu0 %v8417_v16  ;;  %4095 = vmatpush1.bf16.msra.mxu1 %v8419_v19  ;;  %v8530_v16 = vcombine.high %v767_v3, %v775_v5  ;;  %v791_v19 = vld [vmem:[#allocation5 + $0xf70] sm:$0xff]  ;;  %v9328_v5 = vld [vmem:[#allocation8 + $0xcc] ss:$16 sps:$4 sm:$0xff]  }
 0x27a   : > { %4014 = vmatprep.subr.bf16.mxu0 %v8434_v20  ;;  %4096 = vmatprep.subr.bf16.mxu1 %v8436_v22  ;;  %v10616_v20 = vsub.s32 1, %v10613_v6  ;;  %v792_v22 = vld [vmem:[#allocation5 + $0xf78] sm:$0xff]  ;;  %v8546_v27 = vcombine.high %v783_v18, %v791_v19  ;;  %v8545_v34 = vcombine.low %v783_v18, %v791_v19  ;;  %v9311_v61 = vld [vmem:[#allocation8 + $0x80] ss:$16 sps:$4 sm:$0xff]   ;;  %v9325_v3 = vld [vmem:[#allocation8 + $0xc4] ss:$16 sps:$4 sm:$0xff]  }
 0x27b   : > { %v8547_v37 = vcombine.low %v784_v21, %v792_v22  ;;  %v9323_v7 = vld [vmem:[#allocation8 + $0xc0] ss:$16 sps:$4 sm:$0xff]   ;;  %v9337_v18 = vld [vmem:[#allocation8 + $0x104] ss:$16 sps:$4 sm:$0xff]   ;;  %v9340_v19 = vld [vmem:[#allocation8 + $0x10c] ss:$16 sps:$4 sm:$0xff]  }
 0x27d   : > { %4015 = vmatpush1.bf16.msra.mxu0 %v8433_v28  ;;  %4097 = vmatpush1.bf16.msra.mxu1 %v8435_v29  ;;  %v8548_v28 = vcombine.high %v784_v21, %v792_v22  ;;  %v799_v29 = vld [vmem:[#allocation5 + $0xfb0] sm:$0xff]  ;;  %v9338_v22 = vld [vmem:[#allocation8 + $0x108] ss:$16 sps:$4 sm:$0xff]  }
 0x27e   : > { %4016 = vmatprep.subr.bf16.mxu0 %v8450_v30  ;;  %4098 = vmatprep.subr.bf16.mxu1 %v8452_v31  ;;  %v807_v30 = vld [vmem:[#allocation5 + $0xff0] sm:$0xff]  ;;  %v820_v31 = vrot.slane %v10618_v23, %v10616_v20 }
 0x27f   : > { %v9335_v21 = vld [vmem:[#allocation8 + $0x100] ss:$16 sps:$4 sm:$0xff]  }
 0x281   : > { %4017 = vmatpush1.bf16.msra.mxu0 %v8449_v57  ;;  %4099 = vmatpush1.bf16.msra.mxu1 %v8451_v38  ;;  %v8562_v57 = vcombine.high %v799_v29, %v807_v30  ;;  %v8564_v38 = vcombine.high %v800_v33, %v808_v15  ;;  %v9350_v33 = vld [vmem:[#allocation8 + $0x148] ss:$16 sps:$4 sm:$0xff]   ;;  %v9355_v15 = vld [vmem:[#allocation8 + $0x164] ss:$16 sps:$4 sm:$0xff]  }
 0x282   : > { %4018 = vmatprep.subr.bf16.mxu0 %v8466_v40  ;;  %4100 = vmatprep.subr.bf16.mxu1 %v8468_v41  ;;  %v9085_v40 = vadd.f32 %v10593_v36, %v820_v31  ;;  %v8561_v41 = vcombine.low %v799_v29, %v807_v30  ;;  %v9298_v36 = vld [vmem:[#allocation8 + $0x2c] ss:$16 sps:$4 sm:$0xff]   ;;  %v9349_v29 = vld [vmem:[#allocation8 + $0x144] ss:$16 sps:$4 sm:$0xff]   ;;  %v9347_v31 = vld [vmem:[#allocation8 + $0x140] ss:$16 sps:$4 sm:$0xff]  }
 0x283   : > { %v9352_v30 = vld [vmem:[#allocation8 + $0x14c] ss:$16 sps:$4 sm:$0xff]  }
 0x284   : > { %v4124_v44 = vmax.f32 %v9085_v40, 0.0  ;;  %v9364_v40 = vld [vmem:[#allocation8 + $0x18c] ss:$16 sps:$4 sm:$0xff]  }
 0x285   : > { %4019 = vmatpush1.bf16.msra.mxu0 %v8465_v45  ;;  %4101 = vmatpush1.bf16.msra.mxu1 %v8467_v46  ;;  %v9287_v45 = vld [vmem:[#allocation8] ss:$16 sps:$4 sm:$0xff]   ;;  %v9290_v46 = vld [vmem:[#allocation8 + $0x8] ss:$16 sps:$4 sm:$0xff]  }
 0x286   : > { %4020 = vmatprep.subr.bf16.mxu0 %v8482_v47  ;;  %4102 = vmatprep.subr.bf16.mxu1 %v8484_v48  ;;  %v9295_v47 = vld [vmem:[#allocation8 + $0x24] ss:$16 sps:$4 sm:$0xff]   ;;  %v4140_v48 = vpack.c.bf16 %v4124_v44, %v4124_v44  ;;  %v9370_v44 = vld [vmem:[#allocation8 + $0x1ac] ss:$16 sps:$4 sm:$0xff]  }
 0x289   : > { %4021 = vmatpush1.bf16.msra.mxu0 %v8481_v52  ;;  %4103 = vmatpush1.bf16.msra.mxu1 %v8483_v54  ;;  %v9299_v52 = vld [vmem:[#allocation8 + $0x40] ss:$16 sps:$4 sm:$0xff]   ;;  %v9302_v54 = vld [vmem:[#allocation8 + $0x48] ss:$16 sps:$4 sm:$0xff]  }
 0x28a   : > { %4022 = vmatprep.subr.bf16.mxu0 %v8498_v55  ;;  %4104 = vmatprep.subr.bf16.mxu1 %v8500_v56  ;;  %v9307_v55 = vld [vmem:[#allocation8 + $0x64] ss:$16 sps:$4 sm:$0xff]   ;;  %v9310_v56 = vld [vmem:[#allocation8 + $0x6c] ss:$16 sps:$4 sm:$0xff]  }
 0x28d   : > { %4023 = vmatpush1.bf16.msra.mxu0 %v8497_v63  ;;  %4105 = vmatpush1.bf16.msra.mxu1 %v8499_v0  ;;  %v9319_v63 = vld [vmem:[#allocation8 + $0xa4] ss:$16 sps:$4 sm:$0xff]   ;;  %v9322_v0 = vld [vmem:[#allocation8 + $0xac] ss:$16 sps:$4 sm:$0xff]  }
 0x28e   : > { %4024 = vmatprep.subr.bf16.mxu0 %v8514_v1  ;;  %4106 = vmatprep.subr.bf16.mxu1 %v8516_v2  ;;  %v9317_v1 = vld [vmem:[#allocation8 + $0xa0] ss:$16 sps:$4 sm:$0xff]   ;;  %v9320_v2 = vld [vmem:[#allocation8 + $0xa8] ss:$16 sps:$4 sm:$0xff]  }
 0x291   : > { %4025 = vmatpush1.bf16.msra.mxu0 %v8513_v11  ;;  %4107 = vmatpush1.bf16.msra.mxu1 %v8515_v14  ;;  %v9331_v11 = vld [vmem:[#allocation8 + $0xe4] ss:$16 sps:$4 sm:$0xff]   ;;  %v9334_v14 = vld [vmem:[#allocation8 + $0xec] ss:$16 sps:$4 sm:$0xff]  }
 0x292   : > { %4026 = vmatprep.subr.bf16.mxu0 %v8530_v16  ;;  %4108 = vmatprep.subr.bf16.mxu1 %v8532_v17  ;;  %v9329_v16 = vld [vmem:[#allocation8 + $0xe0] ss:$16 sps:$4 sm:$0xff]   ;;  %v9332_v17 = vld [vmem:[#allocation8 + $0xe8] ss:$16 sps:$4 sm:$0xff]  }
 0x295   : > { %4027 = vmatpush1.bf16.msra.mxu0 %v8529_v25  ;;  %4109 = vmatpush1.bf16.msra.mxu1 %v8531_v26  ;;  %v9343_v25 = vld [vmem:[#allocation8 + $0x124] ss:$16 sps:$4 sm:$0xff]   ;;  %v9346_v26 = vld [vmem:[#allocation8 + $0x12c] ss:$16 sps:$4 sm:$0xff]  }
 0x296   : > { %4028 = vmatprep.subr.bf16.mxu0 %v8546_v27  ;;  %4110 = vmatprep.subr.bf16.mxu1 %v8548_v28  ;;  %v9341_v27 = vld [vmem:[#allocation8 + $0x120] ss:$16 sps:$4 sm:$0xff]   ;;  %v9344_v28 = vld [vmem:[#allocation8 + $0x128] ss:$16 sps:$4 sm:$0xff]  }
 0x299   : > { %4029 = vmatpush1.bf16.msra.mxu0 %v8545_v34  ;;  %4111 = vmatpush1.bf16.msra.mxu1 %v8547_v37  ;;  %v9358_v34 = vld [vmem:[#allocation8 + $0x16c] ss:$16 sps:$4 sm:$0xff]   ;;  %v9353_v37 = vld [vmem:[#allocation8 + $0x160] ss:$16 sps:$4 sm:$0xff]  }
 0x29a   : > { %4030 = vmatprep.subr.bf16.mxu0 %v8562_v57  ;;  %4112 = vmatprep.subr.bf16.mxu1 %v8564_v38  ;;  %v9356_v57 = vld [vmem:[#allocation8 + $0x168] ss:$16 sps:$4 sm:$0xff]   ;;  %v9361_v38 = vld [vmem:[#allocation8 + $0x184] ss:$16 sps:$4 sm:$0xff]  }
 0x29d   : > { %4031 = vmatpush1.bf16.msra.mxu0 %v8561_v41  ;;  %4113 = vmatpush1.bf16.msra.mxu1 %v8563_v12  ;;  %v9359_v41 = vld [vmem:[#allocation8 + $0x180] ss:$16 sps:$4 sm:$0xff]   ;;  %v10626_v12 = vsub.s32 0, %v10613_v6 }
 0x29e   : > { %7249 = vmatprep.subr.bf16.mxu0 %v9289_v42  ;;  %7577 = vmatprep.subr.bf16.mxu1 %v9292_v43  ;;  %v9362_v42 = vld [vmem:[#allocation8 + $0x188] ss:$16 sps:$4 sm:$0xff]   ;;  %v9367_v43 = vld [vmem:[#allocation8 + $0x1a4] ss:$16 sps:$4 sm:$0xff]  }
 0x2a0   : > { %4033 = vmatmul.mubr.bf16.vlgmr.msra.gmra.mrb[12].mxu0 %v10571_v24  ;;  %4115 = vmatmul.mubr.bf16.vlgmr.msra.gmra.mrb[12].mxu1 %v10571_v24  ;;  %v9305_v24 = vld [vmem:[#allocation8 + $0x60] ss:$16 sps:$4 sm:$0xff]  }
 0x2a1   : > { %7250 = vmatpush1.bf16.msra.mxu0 %v9287_v45  ;;  %7281 = vmatprep.mubr.bf16.mxu0 %v4140_v48  ;;  %v10629_v45 = vsub.s32 3, %v10613_v6 }
 0x2a2   : > { %7578 = vmatpush1.bf16.msra.mxu1 %v9290_v46  ;;  %7609 = vmatprep.mubr.bf16.mxu1 %v4140_v48  ;;  %v9365_v46 = vld [vmem:[#allocation8 + $0x1a0] ss:$16 sps:$4 sm:$0xff]   ;;  %v9368_v48 = vld [vmem:[#allocation8 + $0x1a8] ss:$16 sps:$4 sm:$0xff]  }
 0x2a3   : > { %7251 = vmatprep.subr.bf16.mxu0 %v9295_v47  ;;  %7579 = vmatprep.subr.bf16.mxu1 %v9298_v36  ;;  %v816_v47 = vrot.slane %v10618_v23, %v10626_v12  ;;  %v9373_v36 = vld [vmem:[#allocation8 + $0x1c4] ss:$16 sps:$4 sm:$0xff]  }
 0x2a5   : > { %7252 = vmatpush1.bf16.msra.mxu0 %v9293_v49  ;;  %v9376_v49 = vld [vmem:[#allocation8 + $0x1cc] ss:$16 sps:$4 sm:$0xff]  }
 0x2a6   : > { %7580 = vmatpush1.bf16.msra.mxu1 %v9296_v50  ;;  %7253 = vmatprep.subr.bf16.mxu0 %v9301_v53  ;;  %v828_v50 = vrot.slane %v10618_v23, %v10629_v45  ;;  %v9371_v53 = vld [vmem:[#allocation8 + $0x1c0] ss:$16 sps:$4 sm:$0xff]  }
 0x2a7   : > { %7581 = vmatprep.subr.bf16.mxu1 %v9304_v51  ;;  %v9084_v51 = vadd.f32 %v10589_v32, %v816_v47  ;;  %v9383_v32 = vld [vmem:[#allocation8 + $0x200] ss:$16 sps:$4 sm:$0xff]   ;;  %v9430_v47 = vld [vmem:[#allocation8 + $0x2ec] ss:$16 sps:$4 sm:$0xff]  }
 0x2a9   : > { %7254 = vmatpush1.bf16.msra.mxu0 %v9299_v52  ;;  %v9374_v52 = vld [vmem:[#allocation8 + $0x1c8] ss:$16 sps:$4 sm:$0xff]  }
 0x2aa   : > { %7582 = vmatpush1.bf16.msra.mxu1 %v9302_v54  ;;  %7255 = vmatprep.subr.bf16.mxu0 %v9307_v55  ;;  %v9379_v54 = vld [vmem:[#allocation8 + $0x1e4] ss:$16 sps:$4 sm:$0xff]   ;;  %v9382_v55 = vld [vmem:[#allocation8 + $0x1ec] ss:$16 sps:$4 sm:$0xff]  }
 0x2ab   : > { %7583 = vmatprep.subr.bf16.mxu1 %v9310_v56  ;;  %v9087_v56 = vadd.f32 %v10595_v39, %v828_v50  ;;  %v9394_v39 = vld [vmem:[#allocation8 + $0x22c] ss:$16 sps:$4 sm:$0xff]  }
 0x2ac   : > { %v9436_v50 = vld [vmem:[#allocation8 + $0x30c] ss:$16 sps:$4 sm:$0xff]  }
 0x2ad   : > { %7256 = vmatpush1.bf16.msra.mxu0 %v9305_v24  ;;  %v9377_v24 = vld [vmem:[#allocation8 + $0x1e0] ss:$16 sps:$4 sm:$0xff]  }
 0x2ae   : > { %7584 = vmatpush1.bf16.msra.mxu1 %v9308_v58  ;;  %7257 = vmatprep.subr.bf16.mxu0 %v9313_v59  ;;  %v4123_v58 = vmax.f32 %v9084_v51, 0.0  ;;  %v9380_v59 = vld [vmem:[#allocation8 + $0x1e8] ss:$16 sps:$4 sm:$0xff]  }
 0x2af   : > { %7585 = vmatprep.subr.bf16.mxu1 %v9316_v60  ;;  %v9385_v60 = vld [vmem:[#allocation8 + $0x204] ss:$16 sps:$4 sm:$0xff]   ;;  %v9434_v51 = vld [vmem:[#allocation8 + $0x308] ss:$16 sps:$4 sm:$0xff]  }
 0x2b1   : > { %7258 = vmatpush1.bf16.msra.mxu0 %v9311_v61  ;;  %v9388_v61 = vld [vmem:[#allocation8 + $0x20c] ss:$16 sps:$4 sm:$0xff]  }
 0x2b2   : > { %7586 = vmatpush1.bf16.msra.mxu1 %v9314_v62  ;;  %7259 = vmatprep.subr.bf16.mxu0 %v9319_v63  ;;  %v4126_v62 = vmax.f32 %v9087_v56, 0.0  ;;  %v4139_v63 = vpack.c.bf16 %v4123_v58, %v4123_v58  ;;  %v9440_v56 = vld [vmem:[#allocation8 + $0x328] ss:$16 sps:$4 sm:$0xff]   ;;  %v9448_v58 = vld [vmem:[#allocation8 + $0x34c] ss:$16 sps:$4 sm:$0xff]  }
 0x2b3   : > { %7587 = vmatprep.subr.bf16.mxu1 %v9322_v0  ;;  %v9386_v0 = vld [vmem:[#allocation8 + $0x208] ss:$16 sps:$4 sm:$0xff]  }
 0x2b5   : > { %7260 = vmatpush1.bf16.msra.mxu0 %v9317_v1  ;;  %v9391_v1 = vld [vmem:[#allocation8 + $0x224] ss:$16 sps:$4 sm:$0xff]  }
 0x2b6   : > { %7588 = vmatpush1.bf16.msra.mxu1 %v9320_v2  ;;  %7261 = vmatprep.subr.bf16.mxu0 %v9325_v3  ;;  %v4142_v2 = vpack.c.bf16 %v4126_v62, %v4126_v62  ;;  %v9389_v3 = vld [vmem:[#allocation8 + $0x220] ss:$16 sps:$4 sm:$0xff]   ;;  %v9454_v62 = vld [vmem:[#allocation8 + $0x36c] ss:$16 sps:$4 sm:$0xff]  }
 0x2b7   : > { %7589 = vmatprep.subr.bf16.mxu1 %v9328_v5  ;;  %v9392_v5 = vld [vmem:[#allocation8 + $0x228] ss:$16 sps:$4 sm:$0xff]  }
 0x2b9   : > { %7262 = vmatpush1.bf16.msra.mxu0 %v9323_v7  ;;  %v9397_v7 = vld [vmem:[#allocation8 + $0x244] ss:$16 sps:$4 sm:$0xff]  }
 0x2ba   : > { %7590 = vmatpush1.bf16.msra.mxu1 %v9326_v10  ;;  %7263 = vmatprep.subr.bf16.mxu0 %v9331_v11  ;;  %v9400_v10 = vld [vmem:[#allocation8 + $0x24c] ss:$16 sps:$4 sm:$0xff]   ;;  %v9395_v11 = vld [vmem:[#allocation8 + $0x240] ss:$16 sps:$4 sm:$0xff]  }
 0x2bb   : > { %7591 = vmatprep.subr.bf16.mxu1 %v9334_v14  ;;  %v9398_v14 = vld [vmem:[#allocation8 + $0x248] ss:$16 sps:$4 sm:$0xff]  }
 0x2bd   : > { %7264 = vmatpush1.bf16.msra.mxu0 %v9329_v16  ;;  %v9403_v16 = vld [vmem:[#allocation8 + $0x264] ss:$16 sps:$4 sm:$0xff]  }
 0x2be   : > { %7592 = vmatpush1.bf16.msra.mxu1 %v9332_v17  ;;  %7265 = vmatprep.subr.bf16.mxu0 %v9337_v18  ;;  %v9406_v17 = vld [vmem:[#allocation8 + $0x26c] ss:$16 sps:$4 sm:$0xff]   ;;  %v9401_v18 = vld [vmem:[#allocation8 + $0x260] ss:$16 sps:$4 sm:$0xff]  }
 0x2bf   : > { %7593 = vmatprep.subr.bf16.mxu1 %v9340_v19  ;;  %v9404_v19 = vld [vmem:[#allocation8 + $0x268] ss:$16 sps:$4 sm:$0xff]  }
 0x2c1   : > { %7266 = vmatpush1.bf16.msra.mxu0 %v9335_v21  ;;  %v9409_v21 = vld [vmem:[#allocation8 + $0x284] ss:$16 sps:$4 sm:$0xff]  }
 0x2c2   : > { %7594 = vmatpush1.bf16.msra.mxu1 %v9338_v22  ;;  %7267 = vmatprep.subr.bf16.mxu0 %v9343_v25  ;;  %v9412_v22 = vld [vmem:[#allocation8 + $0x28c] ss:$16 sps:$4 sm:$0xff]   ;;  %v9407_v25 = vld [vmem:[#allocation8 + $0x280] ss:$16 sps:$4 sm:$0xff]  }
 0x2c3   : > { %7595 = vmatprep.subr.bf16.mxu1 %v9346_v26  ;;  %v9410_v26 = vld [vmem:[#allocation8 + $0x288] ss:$16 sps:$4 sm:$0xff]  }
 0x2c5   : > { %7268 = vmatpush1.bf16.msra.mxu0 %v9341_v27  ;;  %v9415_v27 = vld [vmem:[#allocation8 + $0x2a4] ss:$16 sps:$4 sm:$0xff]  }
 0x2c6   : > { %7596 = vmatpush1.bf16.msra.mxu1 %v9344_v28  ;;  %7269 = vmatprep.subr.bf16.mxu0 %v9349_v29  ;;  %v9418_v28 = vld [vmem:[#allocation8 + $0x2ac] ss:$16 sps:$4 sm:$0xff]   ;;  %v9413_v29 = vld [vmem:[#allocation8 + $0x2a0] ss:$16 sps:$4 sm:$0xff]  }
 0x2c7   : > { %7597 = vmatprep.subr.bf16.mxu1 %v9352_v30  ;;  %v9416_v30 = vld [vmem:[#allocation8 + $0x2a8] ss:$16 sps:$4 sm:$0xff]  }
 0x2c9   : > { %7270 = vmatpush1.bf16.msra.mxu0 %v9347_v31  ;;  %v9421_v31 = vld [vmem:[#allocation8 + $0x2c4] ss:$16 sps:$4 sm:$0xff]  }
 0x2ca   : > { %7598 = vmatpush1.bf16.msra.mxu1 %v9350_v33  ;;  %7271 = vmatprep.subr.bf16.mxu0 %v9355_v15  ;;  %v9424_v15 = vld [vmem:[#allocation8 + $0x2cc] ss:$16 sps:$4 sm:$0xff]  }
 0x2cb   : > { %7599 = vmatprep.subr.bf16.mxu1 %v9358_v34 }
 0x2cd   : > { %7272 = vmatpush1.bf16.msra.mxu0 %v9353_v37 }
 0x2ce   : > { %7600 = vmatpush1.bf16.msra.mxu1 %v9356_v57  ;;  %7273 = vmatprep.subr.bf16.mxu0 %v9361_v38 }
 0x2cf   : > { %7601 = vmatprep.subr.bf16.mxu1 %v9364_v40  ;;  %v9419_v40 = vld [vmem:[#allocation8 + $0x2c0] ss:$16 sps:$4 sm:$0xff]  }
 0x2d1   : > { %7274 = vmatpush1.bf16.msra.mxu0 %v9359_v41 }
 0x2d2   : > { %7602 = vmatpush1.bf16.msra.mxu1 %v9362_v42  ;;  %7275 = vmatprep.subr.bf16.mxu0 %v9367_v43  ;;  %v9422_v43 = vld [vmem:[#allocation8 + $0x2c8] ss:$16 sps:$4 sm:$0xff]  }
 0x2d3   : > { %7603 = vmatprep.subr.bf16.mxu1 %v9370_v44  ;;  %v9427_v44 = vld [vmem:[#allocation8 + $0x2e4] ss:$16 sps:$4 sm:$0xff]  }
 0x2d5   : > { %7276 = vmatpush1.bf16.msra.mxu0 %v9365_v46 }
 0x2d6   : > { %7604 = vmatpush1.bf16.msra.mxu1 %v9368_v48  ;;  %7277 = vmatprep.subr.bf16.mxu0 %v9373_v36  ;;  %v9425_v48 = vld [vmem:[#allocation8 + $0x2e0] ss:$16 sps:$4 sm:$0xff]   ;;  %v9428_v36 = vld [vmem:[#allocation8 + $0x2e8] ss:$16 sps:$4 sm:$0xff]  }
 0x2d7   : > { %7605 = vmatprep.subr.bf16.mxu1 %v9376_v49  ;;  %v9433_v49 = vld [vmem:[#allocation8 + $0x304] ss:$16 sps:$4 sm:$0xff]  }
 0x2d9   : > { %7278 = vmatpush1.bf16.msra.mxu0 %v9371_v53  ;;  %v9431_v53 = vld [vmem:[#allocation8 + $0x300] ss:$16 sps:$4 sm:$0xff]  }
 0x2da   : > { %7606 = vmatpush1.bf16.msra.mxu1 %v9374_v52  ;;  %7279 = vmatprep.subr.bf16.mxu0 %v9379_v54  ;;  %v9439_v52 = vld [vmem:[#allocation8 + $0x324] ss:$16 sps:$4 sm:$0xff]   ;;  %v9442_v54 = vld [vmem:[#allocation8 + $0x32c] ss:$16 sps:$4 sm:$0xff]  }
 0x2db   : > { %7607 = vmatprep.subr.bf16.mxu1 %v9382_v55  ;;  %v9437_v55 = vld [vmem:[#allocation8 + $0x320] ss:$16 sps:$4 sm:$0xff]  }
 0x2dd   : > { %7280 = vmatpush1.bf16.msra.mxu0 %v9377_v24  ;;  %v9445_v24 = vld [vmem:[#allocation8 + $0x344] ss:$16 sps:$4 sm:$0xff]  }
 0x2de   : > { %7608 = vmatpush1.bf16.msra.mxu1 %v9380_v59  ;;  %7290 = vmatprep.subr.bf16.mxu0 %v9385_v60  ;;  %v9443_v59 = vld [vmem:[#allocation8 + $0x340] ss:$16 sps:$4 sm:$0xff]   ;;  %v9446_v60 = vld [vmem:[#allocation8 + $0x348] ss:$16 sps:$4 sm:$0xff]  }
 0x2df   : > { %7618 = vmatprep.subr.bf16.mxu1 %v9388_v61  ;;  %v9451_v61 = vld [vmem:[#allocation8 + $0x364] ss:$16 sps:$4 sm:$0xff]  }
 0x2e0   : > { %7282 = vmatmul.mubr.bf16.vlgmr.msra.gmra.mrb[16].mxu0 %v4139_v63 }
 0x2e1   : > { %7610 = vmatmul.mubr.bf16.vlgmr.msra.gmra.mrb[16].mxu1 %v4139_v63  ;;  %7291 = vmatpush1.bf16.msra.mxu0 %v9383_v32  ;;  %v9449_v32 = vld [vmem:[#allocation8 + $0x360] ss:$16 sps:$4 sm:$0xff]   ;;  %v9452_v63 = vld [vmem:[#allocation8 + $0x368] ss:$16 sps:$4 sm:$0xff]  }
 0x2e2   : > { %7322 = vmatprep.mubr.bf16.mxu0 %v4142_v2  ;;  %7619 = vmatpush1.bf16.msra.mxu1 %v9386_v0  ;;  %v9457_v0 = vld [vmem:[#allocation8 + $0x384] ss:$16 sps:$4 sm:$0xff]  }
 0x2e3   : > { %7650 = vmatprep.mubr.bf16.mxu1 %v4142_v2  ;;  %7292 = vmatprep.subr.bf16.mxu0 %v9391_v1  ;;  %v9460_v1 = vld [vmem:[#allocation8 + $0x38c] ss:$16 sps:$4 sm:$0xff]   ;;  %v9455_v2 = vld [vmem:[#allocation8 + $0x380] ss:$16 sps:$4 sm:$0xff]  }
 0x2e4   : > { %7620 = vmatprep.subr.bf16.mxu1 %v9394_v39  ;;  %v10646_v39 = vsub.s32 2, %v10613_v6 }
 0x2e5   : > { %7293 = vmatpush1.bf16.msra.mxu0 %v9389_v3  ;;  %v9458_v3 = vld [vmem:[#allocation8 + $0x388] ss:$16 sps:$4 sm:$0xff]  }
 0x2e6   : > { %7621 = vmatpush1.bf16.msra.mxu1 %v9392_v5  ;;  %7294 = vmatprep.subr.bf16.mxu0 %v9397_v7  ;;  %v9463_v5 = vld [vmem:[#allocation8 + $0x3a4] ss:$16 sps:$4 sm:$0xff]   ;;  %v9466_v7 = vld [vmem:[#allocation8 + $0x3ac] ss:$16 sps:$4 sm:$0xff]  }
 0x2e7   : > { %7622 = vmatprep.subr.bf16.mxu1 %v9400_v10  ;;  %v835_v10 = vsub.s32 5, %v10613_v6 }
 0x2e9   : > { %7295 = vmatpush1.bf16.msra.mxu0 %v9395_v11  ;;  %v9461_v11 = vld [vmem:[#allocation8 + $0x3a0] ss:$16 sps:$4 sm:$0xff]  }
 0x2ea   : > { %7623 = vmatpush1.bf16.msra.mxu1 %v9398_v14  ;;  %7296 = vmatprep.subr.bf16.mxu0 %v9403_v16  ;;  %v824_v14 = vrot.slane %v10618_v23, %v10646_v39  ;;  %v9464_v16 = vld [vmem:[#allocation8 + $0x3a8] ss:$16 sps:$4 sm:$0xff]  }
 0x2eb   : > { %7624 = vmatprep.subr.bf16.mxu1 %v9406_v17  ;;  %v9469_v17 = vld [vmem:[#allocation8 + $0x3c4] ss:$16 sps:$4 sm:$0xff]  }
 0x2ed   : > { %7297 = vmatpush1.bf16.msra.mxu0 %v9401_v18  ;;  %v9472_v18 = vld [vmem:[#allocation8 + $0x3cc] ss:$16 sps:$4 sm:$0xff]  }
 0x2ee   : > { %7625 = vmatpush1.bf16.msra.mxu1 %v9404_v19  ;;  %7298 = vmatprep.subr.bf16.mxu0 %v9409_v21  ;;  %v836_v19 = vrot.slane %v10618_v23, %v835_v10  ;;  %v9467_v21 = vld [vmem:[#allocation8 + $0x3c0] ss:$16 sps:$4 sm:$0xff]  }
 0x2ef   : > { %7626 = vmatprep.subr.bf16.mxu1 %v9412_v22  ;;  %v9086_v22 = vadd.f32 %v10591_v35, %v824_v14  ;;  %v9479_v35 = vld [vmem:[#allocation8 + $0x400] ss:$16 sps:$4 sm:$0xff]   ;;  %v9532_v14 = vld [vmem:[#allocation8 + $0x50c] ss:$16 sps:$4 sm:$0xff]  }
 0x2f1   : > { %7299 = vmatpush1.bf16.msra.mxu0 %v9407_v25  ;;  %v9470_v25 = vld [vmem:[#allocation8 + $0x3c8] ss:$16 sps:$4 sm:$0xff]  }
 0x2f2   : > { %7627 = vmatpush1.bf16.msra.mxu1 %v9410_v26  ;;  %7300 = vmatprep.subr.bf16.mxu0 %v9415_v27  ;;  %v9475_v26 = vld [vmem:[#allocation8 + $0x3e4] ss:$16 sps:$4 sm:$0xff]   ;;  %v9478_v27 = vld [vmem:[#allocation8 + $0x3ec] ss:$16 sps:$4 sm:$0xff]  }
 0x2f3   : > { %v10637_v33 = vpop.f32.mrb[8].mxu0  ;;  %7628 = vmatprep.subr.bf16.mxu1 %v9418_v28  ;;  %v10639_v34 = vpop.f32.mrb[8].mxu1  ;;  %v9089_v28 = vadd.f32 %v10609_v9, %v836_v19  ;;  %v9490_v9 = vld [vmem:[#allocation8 + $0x42c] ss:$16 sps:$4 sm:$0xff]  }
 0x2f4   : > { %v10641_v37 = vpop.f32.mrb[9].mxu0  ;;  %v10643_v57 = vpop.f32.mrb[9].mxu1  ;;  %v9538_v19 = vld [vmem:[#allocation8 + $0x52c] ss:$16 sps:$4 sm:$0xff]  }
 0x2f5   : > { %v3874_v38 = vpop.f32.mrb[10].mxu0  ;;  %7301 = vmatpush1.bf16.msra.mxu0 %v9413_v29  ;;  %v3956_v41 = vpop.f32.mrb[10].mxu1  ;;  %v9473_v29 = vld [vmem:[#allocation8 + $0x3e0] ss:$16 sps:$4 sm:$0xff]  }
 0x2f6   : > { %7629 = vmatpush1.bf16.msra.mxu1 %v9416_v30  ;;  %v3875_v42 = vpop.f32.mrb[11].mxu0  ;;  %7302 = vmatprep.subr.bf16.mxu0 %v9421_v31  ;;  %v3957_v46 = vpop.f32.mrb[11].mxu1  ;;  %v4125_v30 = vmax.f32 %v9086_v22, 0.0  ;;  %v9476_v31 = vld [vmem:[#allocation8 + $0x3e8] ss:$16 sps:$4 sm:$0xff]  }
 0x2f7   : > { %7630 = vmatprep.subr.bf16.mxu1 %v9424_v15  ;;  %v9481_v15 = vld [vmem:[#allocation8 + $0x404] ss:$16 sps:$4 sm:$0xff]   ;;  %v9484_v38 = vld [vmem:[#allocation8 + $0x40c] ss:$16 sps:$4 sm:$0xff]   ;;  %v9482_v42 = vld [vmem:[#allocation8 + $0x408] ss:$16 sps:$4 sm:$0xff]  }
 0x2f8   : > { %v4141_v41 = vpack.c.bf16 %v4125_v30, %v4125_v30  ;;  %v9485_v46 = vld [vmem:[#allocation8 + $0x420] ss:$16 sps:$4 sm:$0xff]   ;;  %v9536_v22 = vld [vmem:[#allocation8 + $0x528] ss:$16 sps:$4 sm:$0xff]   ;;  %v9550_v30 = vld [vmem:[#allocation8 + $0x56c] ss:$16 sps:$4 sm:$0xff]  }
 0x2f9   : > { %7303 = vmatpush1.bf16.msra.mxu0 %v9419_v40  ;;  %v4128_v40 = vmax.f32 %v9089_v28, 0.0  ;;  %v9542_v28 = vld [vmem:[#allocation8 + $0x548] ss:$16 sps:$4 sm:$0xff]  }
 0x2fa   : > { %7631 = vmatpush1.bf16.msra.mxu1 %v9422_v43  ;;  %7304 = vmatprep.subr.bf16.mxu0 %v9427_v44  ;;  %v9487_v43 = vld [vmem:[#allocation8 + $0x424] ss:$16 sps:$4 sm:$0xff]  }
 0x2fb   : > { %7632 = vmatprep.subr.bf16.mxu1 %v9430_v47  ;;  %v4144_v44 = vpack.c.bf16 %v4128_v40, %v4128_v40  ;;  %v9488_v47 = vld [vmem:[#allocation8 + $0x428] ss:$16 sps:$4 sm:$0xff]   ;;  %v9556_v40 = vld [vmem:[#allocation8 + $0x58c] ss:$16 sps:$4 sm:$0xff]  }
 0x2fd   : > { %7305 = vmatpush1.bf16.msra.mxu0 %v9425_v48  ;;  %v9493_v48 = vld [vmem:[#allocation8 + $0x444] ss:$16 sps:$4 sm:$0xff]  }
 0x2fe   : > { %7633 = vmatpush1.bf16.msra.mxu1 %v9428_v36  ;;  %7306 = vmatprep.subr.bf16.mxu0 %v9433_v49  ;;  %v9496_v36 = vld [vmem:[#allocation8 + $0x44c] ss:$16 sps:$4 sm:$0xff]   ;;  %v9491_v49 = vld [vmem:[#allocation8 + $0x440] ss:$16 sps:$4 sm:$0xff]  }
 0x2ff   : > { %7634 = vmatprep.subr.bf16.mxu1 %v9436_v50  ;;  %v9494_v50 = vld [vmem:[#allocation8 + $0x448] ss:$16 sps:$4 sm:$0xff]  }
 0x301   : > { %7307 = vmatpush1.bf16.msra.mxu0 %v9431_v53  ;;  %v9499_v53 = vld [vmem:[#allocation8 + $0x464] ss:$16 sps:$4 sm:$0xff]  }
 0x302   : > { %7635 = vmatpush1.bf16.msra.mxu1 %v9434_v51  ;;  %7308 = vmatprep.subr.bf16.mxu0 %v9439_v52  ;;  %v9502_v51 = vld [vmem:[#allocation8 + $0x46c] ss:$16 sps:$4 sm:$0xff]   ;;  %v9497_v52 = vld [vmem:[#allocation8 + $0x460] ss:$16 sps:$4 sm:$0xff]  }
 0x303   : > { %7636 = vmatprep.subr.bf16.mxu1 %v9442_v54  ;;  %v9500_v54 = vld [vmem:[#allocation8 + $0x468] ss:$16 sps:$4 sm:$0xff]  }
 0x305   : > { %7309 = vmatpush1.bf16.msra.mxu0 %v9437_v55  ;;  %v9505_v55 = vld [vmem:[#allocation8 + $0x484] ss:$16 sps:$4 sm:$0xff]  }
 0x306   : > { %7637 = vmatpush1.bf16.msra.mxu1 %v9440_v56  ;;  %7310 = vmatprep.subr.bf16.mxu0 %v9445_v24  ;;  %v9508_v56 = vld [vmem:[#allocation8 + $0x48c] ss:$16 sps:$4 sm:$0xff]   ;;  %v9503_v24 = vld [vmem:[#allocation8 + $0x480] ss:$16 sps:$4 sm:$0xff]  }
 0x307   : > { %7638 = vmatprep.subr.bf16.mxu1 %v9448_v58  ;;  %v9506_v58 = vld [vmem:[#allocation8 + $0x488] ss:$16 sps:$4 sm:$0xff]  }
 0x309   : > { %7311 = vmatpush1.bf16.msra.mxu0 %v9443_v59  ;;  %v9511_v59 = vld [vmem:[#allocation8 + $0x4a4] ss:$16 sps:$4 sm:$0xff]  }
 0x30a   : > { %7639 = vmatpush1.bf16.msra.mxu1 %v9446_v60  ;;  %7312 = vmatprep.subr.bf16.mxu0 %v9451_v61  ;;  %v9514_v60 = vld [vmem:[#allocation8 + $0x4ac] ss:$16 sps:$4 sm:$0xff]   ;;  %v9509_v61 = vld [vmem:[#allocation8 + $0x4a0] ss:$16 sps:$4 sm:$0xff]  }
 0x30b   : > { %7640 = vmatprep.subr.bf16.mxu1 %v9454_v62  ;;  %v9512_v62 = vld [vmem:[#allocation8 + $0x4a8] ss:$16 sps:$4 sm:$0xff]  }
 0x30d   : > { %7313 = vmatpush1.bf16.msra.mxu0 %v9449_v32  ;;  %v9517_v32 = vld [vmem:[#allocation8 + $0x4c4] ss:$16 sps:$4 sm:$0xff]  }
 0x30e   : > { %7641 = vmatpush1.bf16.msra.mxu1 %v9452_v63  ;;  %7314 = vmatprep.subr.bf16.mxu0 %v9457_v0  ;;  %v9520_v63 = vld [vmem:[#allocation8 + $0x4cc] ss:$16 sps:$4 sm:$0xff]   ;;  %v9515_v0 = vld [vmem:[#allocation8 + $0x4c0] ss:$16 sps:$4 sm:$0xff]  }
 0x30f   : > { %7642 = vmatprep.subr.bf16.mxu1 %v9460_v1  ;;  %v9518_v1 = vld [vmem:[#allocation8 + $0x4c8] ss:$16 sps:$4 sm:$0xff]  }
 0x311   : > { %7315 = vmatpush1.bf16.msra.mxu0 %v9455_v2  ;;  %v9523_v2 = vld [vmem:[#allocation8 + $0x4e4] ss:$16 sps:$4 sm:$0xff]  }
 0x312   : > { %7643 = vmatpush1.bf16.msra.mxu1 %v9458_v3  ;;  %7316 = vmatprep.subr.bf16.mxu0 %v9463_v5  ;;  %v9526_v3 = vld [vmem:[#allocation8 + $0x4ec] ss:$16 sps:$4 sm:$0xff]   ;;  %v9521_v5 = vld [vmem:[#allocation8 + $0x4e0] ss:$16 sps:$4 sm:$0xff]  }
 0x313   : > { %7644 = vmatprep.subr.bf16.mxu1 %v9466_v7  ;;  %v9524_v7 = vld [vmem:[#allocation8 + $0x4e8] ss:$16 sps:$4 sm:$0xff]  }
 0x315   : > { %7317 = vmatpush1.bf16.msra.mxu0 %v9461_v11  ;;  %v9529_v11 = vld [vmem:[#allocation8 + $0x504] ss:$16 sps:$4 sm:$0xff]  }
 0x316   : > { %7645 = vmatpush1.bf16.msra.mxu1 %v9464_v16  ;;  %7318 = vmatprep.subr.bf16.mxu0 %v9469_v17  ;;  %v9527_v16 = vld [vmem:[#allocation8 + $0x500] ss:$16 sps:$4 sm:$0xff]   ;;  %v9530_v17 = vld [vmem:[#allocation8 + $0x508] ss:$16 sps:$4 sm:$0xff]  }
 0x317   : > { %7646 = vmatprep.subr.bf16.mxu1 %v9472_v18  ;;  %v9535_v18 = vld [vmem:[#allocation8 + $0x524] ss:$16 sps:$4 sm:$0xff]  }
 0x319   : > { %7319 = vmatpush1.bf16.msra.mxu0 %v9467_v21  ;;  %v9533_v21 = vld [vmem:[#allocation8 + $0x520] ss:$16 sps:$4 sm:$0xff]  }
 0x31a   : > { %7647 = vmatpush1.bf16.msra.mxu1 %v9470_v25  ;;  %7320 = vmatprep.subr.bf16.mxu0 %v9475_v26  ;;  %v9541_v25 = vld [vmem:[#allocation8 + $0x544] ss:$16 sps:$4 sm:$0xff]   ;;  %v9544_v26 = vld [vmem:[#allocation8 + $0x54c] ss:$16 sps:$4 sm:$0xff]  }
 0x31b   : > { %7648 = vmatprep.subr.bf16.mxu1 %v9478_v27  ;;  %v9539_v27 = vld [vmem:[#allocation8 + $0x540] ss:$16 sps:$4 sm:$0xff]  }
 0x31d   : > { %7321 = vmatpush1.bf16.msra.mxu0 %v9473_v29  ;;  %v9547_v29 = vld [vmem:[#allocation8 + $0x564] ss:$16 sps:$4 sm:$0xff]  }
 0x31e   : > { %7649 = vmatpush1.bf16.msra.mxu1 %v9476_v31  ;;  %7331 = vmatprep.subr.bf16.mxu0 %v9481_v15  ;;  %v9545_v31 = vld [vmem:[#allocation8 + $0x560] ss:$16 sps:$4 sm:$0xff]   ;;  %v9548_v15 = vld [vmem:[#allocation8 + $0x568] ss:$16 sps:$4 sm:$0xff]  }
 0x31f   : > { %7659 = vmatprep.subr.bf16.mxu1 %v9484_v38  ;;  %v9553_v38 = vld [vmem:[#allocation8 + $0x584] ss:$16 sps:$4 sm:$0xff]  }
 0x320   : > { %7323 = vmatmul.mubr.bf16.vlgmr.msra.gmra.mrb[16].mxu0 %v4141_v41 }
 0x321   : > { %7651 = vmatmul.mubr.bf16.vlgmr.msra.gmra.mrb[16].mxu1 %v4141_v41  ;;  %7332 = vmatpush1.bf16.msra.mxu0 %v9479_v35  ;;  %v9551_v35 = vld [vmem:[#allocation8 + $0x580] ss:$16 sps:$4 sm:$0xff]   ;;  %v831_v41 = vsub.s32 4, %v10613_v6 }
 0x322   : > { %7363 = vmatprep.mubr.bf16.mxu0 %v4144_v44  ;;  %7660 = vmatpush1.bf16.msra.mxu1 %v9482_v42  ;;  %v9554_v42 = vld [vmem:[#allocation8 + $0x588] ss:$16 sps:$4 sm:$0xff]  }
 0x323   : > { %7691 = vmatprep.mubr.bf16.mxu1 %v4144_v44  ;;  %7333 = vmatprep.subr.bf16.mxu0 %v9487_v43  ;;  %v9559_v43 = vld [vmem:[#allocation8 + $0x5a4] ss:$16 sps:$4 sm:$0xff]   ;;  %v9562_v44 = vld [vmem:[#allocation8 + $0x5ac] ss:$16 sps:$4 sm:$0xff]  }
 0x324   : > { %7661 = vmatprep.subr.bf16.mxu1 %v9490_v9  ;;  %v843_v9 = vsub.s32 7, %v10613_v6 }
 0x325   : > { %7334 = vmatpush1.bf16.msra.mxu0 %v9485_v46  ;;  %v9557_v46 = vld [vmem:[#allocation8 + $0x5a0] ss:$16 sps:$4 sm:$0xff]  }
 0x326   : > { %7662 = vmatpush1.bf16.msra.mxu1 %v9488_v47  ;;  %7335 = vmatprep.subr.bf16.mxu0 %v9493_v48  ;;  %v832_v47 = vrot.slane %v10618_v23, %v831_v41  ;;  %v9560_v48 = vld [vmem:[#allocation8 + $0x5a8] ss:$16 sps:$4 sm:$0xff]  }
 0x327   : > { %7663 = vmatprep.subr.bf16.mxu1 %v9496_v36  ;;  %v9565_v36 = vld [vmem:[#allocation8 + $0x5c4] ss:$16 sps:$4 sm:$0xff]  }
 0x329   : > { %7336 = vmatpush1.bf16.msra.mxu0 %v9491_v49  ;;  %v9568_v49 = vld [vmem:[#allocation8 + $0x5cc] ss:$16 sps:$4 sm:$0xff]  }
 0x32a   : > { %7664 = vmatpush1.bf16.msra.mxu1 %v9494_v50  ;;  %7337 = vmatprep.subr.bf16.mxu0 %v9499_v53  ;;  %v844_v50 = vrot.slane %v10618_v23, %v843_v9  ;;  %v9563_v53 = vld [vmem:[#allocation8 + $0x5c0] ss:$16 sps:$4 sm:$0xff]   ;;  %v9580_v23 = vld [vmem:[#allocation8 + $0x60c] ss:$16 sps:$4 sm:$0xff]  }
 0x32b   : > { %7665 = vmatprep.subr.bf16.mxu1 %v9502_v51  ;;  %v9088_v51 = vadd.f32 %v10605_v4, %v832_v47  ;;  %v9575_v4 = vld [vmem:[#allocation8 + $0x600] ss:$16 sps:$4 sm:$0xff]   ;;  %v9614_v47 = vld [vmem:[#allocation8 + $0x6c8] ss:$16 sps:$4 sm:$0xff]  }
 0x32d   : > { %7338 = vmatpush1.bf16.msra.mxu0 %v9497_v52  ;;  %v9566_v52 = vld [vmem:[#allocation8 + $0x5c8] ss:$16 sps:$4 sm:$0xff]  }
 0x32e   : > { %7666 = vmatpush1.bf16.msra.mxu1 %v9500_v54  ;;  %7339 = vmatprep.subr.bf16.mxu0 %v9505_v55  ;;  %v9571_v54 = vld [vmem:[#allocation8 + $0x5e4] ss:$16 sps:$4 sm:$0xff]   ;;  %v9574_v55 = vld [vmem:[#allocation8 + $0x5ec] ss:$16 sps:$4 sm:$0xff]  }
 0x32f   : > { %7667 = vmatprep.subr.bf16.mxu1 %v9508_v56  ;;  %v9091_v56 = vadd.f32 %v10611_v13, %v844_v50  ;;  %v9586_v13 = vld [vmem:[#allocation8 + $0x62c] ss:$16 sps:$4 sm:$0xff]   ;;  %v9617_v50 = vld [vmem:[#allocation8 + $0x6e0] ss:$16 sps:$4 sm:$0xff]  }
 0x331   : > { %7340 = vmatpush1.bf16.msra.mxu0 %v9503_v24  ;;  %v9569_v24 = vld [vmem:[#allocation8 + $0x5e0] ss:$16 sps:$4 sm:$0xff]  }
 0x332   : > { %7668 = vmatpush1.bf16.msra.mxu1 %v9506_v58  ;;  %7341 = vmatprep.subr.bf16.mxu0 %v9511_v59  ;;  %v4127_v58 = vmax.f32 %v9088_v51, 0.0  ;;  %v9572_v59 = vld [vmem:[#allocation8 + $0x5e8] ss:$16 sps:$4 sm:$0xff]   ;;  %v9625_v51 = vld [vmem:[#allocation8 + $0x704] ss:$16 sps:$4 sm:$0xff]  }
 0x333   : > { %7669 = vmatprep.subr.bf16.mxu1 %v9514_v60  ;;  %v9577_v60 = vld [vmem:[#allocation8 + $0x604] ss:$16 sps:$4 sm:$0xff]  }
 0x335   : > { %7342 = vmatpush1.bf16.msra.mxu0 %v9509_v61  ;;  %v4130_v61 = vmax.f32 %v9091_v56, 0.0  ;;  %v9631_v56 = vld [vmem:[#allocation8 + $0x724] ss:$16 sps:$4 sm:$0xff]  }
 0x336   : > { %7670 = vmatpush1.bf16.msra.mxu1 %v9512_v62  ;;  %7343 = vmatprep.subr.bf16.mxu0 %v9517_v32  ;;  %v4143_v62 = vpack.c.bf16 %v4127_v58, %v4127_v58  ;;  %v9578_v32 = vld [vmem:[#allocation8 + $0x608] ss:$16 sps:$4 sm:$0xff]   ;;  %v9629_v58 = vld [vmem:[#allocation8 + $0x720] ss:$16 sps:$4 sm:$0xff]  }
 0x337   : > { %7671 = vmatprep.subr.bf16.mxu1 %v9520_v63  ;;  %v9583_v63 = vld [vmem:[#allocation8 + $0x624] ss:$16 sps:$4 sm:$0xff]  }
 0x339   : > { %7344 = vmatpush1.bf16.msra.mxu0 %v9515_v0  ;;  %v4146_v0 = vpack.c.bf16 %v4130_v61, %v4130_v61  ;;  %v9635_v61 = vld [vmem:[#allocation8 + $0x740] ss:$16 sps:$4 sm:$0xff]  }
 0x33a   : > { %7672 = vmatpush1.bf16.msra.mxu1 %v9518_v1  ;;  %7345 = vmatprep.subr.bf16.mxu0 %v9523_v2  ;;  %v9581_v1 = vld [vmem:[#allocation8 + $0x620] ss:$16 sps:$4 sm:$0xff]   ;;  %v9584_v2 = vld [vmem:[#allocation8 + $0x628] ss:$16 sps:$4 sm:$0xff]  }
 0x33b   : > { %7673 = vmatprep.subr.bf16.mxu1 %v9526_v3  ;;  %v9589_v3 = vld [vmem:[#allocation8 + $0x644] ss:$16 sps:$4 sm:$0xff]  }
 0x33d   : > { %7346 = vmatpush1.bf16.msra.mxu0 %v9521_v5  ;;  %v9592_v5 = vld [vmem:[#allocation8 + $0x64c] ss:$16 sps:$4 sm:$0xff]  }
 0x33e   : > { %7674 = vmatpush1.bf16.msra.mxu1 %v9524_v7  ;;  %7347 = vmatprep.subr.bf16.mxu0 %v9529_v11  ;;  %v9587_v7 = vld [vmem:[#allocation8 + $0x640] ss:$16 sps:$4 sm:$0xff]   ;;  %v9590_v11 = vld [vmem:[#allocation8 + $0x648] ss:$16 sps:$4 sm:$0xff]  }
 0x33f   : > { %7675 = vmatprep.subr.bf16.mxu1 %v9532_v14  ;;  %v9595_v14 = vld [vmem:[#allocation8 + $0x664] ss:$16 sps:$4 sm:$0xff]  }
 0x341   : > { %7348 = vmatpush1.bf16.msra.mxu0 %v9527_v16  ;;  %v9598_v16 = vld [vmem:[#allocation8 + $0x66c] ss:$16 sps:$4 sm:$0xff]  }
 0x342   : > { %7676 = vmatpush1.bf16.msra.mxu1 %v9530_v17  ;;  %7349 = vmatprep.subr.bf16.mxu0 %v9535_v18  ;;  %v9593_v17 = vld [vmem:[#allocation8 + $0x660] ss:$16 sps:$4 sm:$0xff]   ;;  %v9596_v18 = vld [vmem:[#allocation8 + $0x668] ss:$16 sps:$4 sm:$0xff]  }
 0x343   : > { %7677 = vmatprep.subr.bf16.mxu1 %v9538_v19  ;;  %v9601_v19 = vld [vmem:[#allocation8 + $0x684] ss:$16 sps:$4 sm:$0xff]  }
 0x345   : > { %7350 = vmatpush1.bf16.msra.mxu0 %v9533_v21  ;;  %v9604_v21 = vld [vmem:[#allocation8 + $0x68c] ss:$16 sps:$4 sm:$0xff]  }
 0x346   : > { %7678 = vmatpush1.bf16.msra.mxu1 %v9536_v22  ;;  %7351 = vmatprep.subr.bf16.mxu0 %v9541_v25  ;;  %v9599_v22 = vld [vmem:[#allocation8 + $0x680] ss:$16 sps:$4 sm:$0xff]   ;;  %v9602_v25 = vld [vmem:[#allocation8 + $0x688] ss:$16 sps:$4 sm:$0xff]  }
 0x347   : > { %7679 = vmatprep.subr.bf16.mxu1 %v9544_v26  ;;  %v9607_v26 = vld [vmem:[#allocation8 + $0x6a4] ss:$16 sps:$4 sm:$0xff]  }
 0x349   : > { %7352 = vmatpush1.bf16.msra.mxu0 %v9539_v27  ;;  %v9610_v27 = vld [vmem:[#allocation8 + $0x6ac] ss:$16 sps:$4 sm:$0xff]  }
 0x34a   : > { %7680 = vmatpush1.bf16.msra.mxu1 %v9542_v28  ;;  %7353 = vmatprep.subr.bf16.mxu0 %v9547_v29  ;;  %v9605_v28 = vld [vmem:[#allocation8 + $0x6a0] ss:$16 sps:$4 sm:$0xff]   ;;  %v9608_v29 = vld [vmem:[#allocation8 + $0x6a8] ss:$16 sps:$4 sm:$0xff]  }
 0x34b   : > { %7681 = vmatprep.subr.bf16.mxu1 %v9550_v30  ;;  %v9613_v30 = vld [vmem:[#allocation8 + $0x6c4] ss:$16 sps:$4 sm:$0xff]  }
 0x34d   : > { %7354 = vmatpush1.bf16.msra.mxu0 %v9545_v31 }
 0x34e   : > { %7682 = vmatpush1.bf16.msra.mxu1 %v9548_v15  ;;  %7355 = vmatprep.subr.bf16.mxu0 %v9553_v38  ;;  %v9616_v15 = vld [vmem:[#allocation8 + $0x6cc] ss:$16 sps:$4 sm:$0xff]  }
 0x34f   : > { %7683 = vmatprep.subr.bf16.mxu1 %v9556_v40 }
 0x351   : > { %7356 = vmatpush1.bf16.msra.mxu0 %v9551_v35 }
 0x352   : > { %7684 = vmatpush1.bf16.msra.mxu1 %v9554_v42  ;;  %7357 = vmatprep.subr.bf16.mxu0 %v9559_v43  ;;  %v9611_v43 = vld [vmem:[#allocation8 + $0x6c0] ss:$16 sps:$4 sm:$0xff]  }
 0x353   : > { %7685 = vmatprep.subr.bf16.mxu1 %v9562_v44 }
 0x355   : > { %7358 = vmatpush1.bf16.msra.mxu0 %v9557_v46 }
 0x356   : > { %7686 = vmatpush1.bf16.msra.mxu1 %v9560_v48  ;;  %7359 = vmatprep.subr.bf16.mxu0 %v9565_v36  ;;  %v9619_v48 = vld [vmem:[#allocation8 + $0x6e4] ss:$16 sps:$4 sm:$0xff]  }
 0x357   : > { %7687 = vmatprep.subr.bf16.mxu1 %v9568_v49  ;;  %v9622_v49 = vld [vmem:[#allocation8 + $0x6ec] ss:$16 sps:$4 sm:$0xff]  }
 0x359   : > { %7360 = vmatpush1.bf16.msra.mxu0 %v9563_v53  ;;  %v9620_v53 = vld [vmem:[#allocation8 + $0x6e8] ss:$16 sps:$4 sm:$0xff]  }
 0x35a   : > { %7688 = vmatpush1.bf16.msra.mxu1 %v9566_v52  ;;  %7361 = vmatprep.subr.bf16.mxu0 %v9571_v54  ;;  %v9628_v52 = vld [vmem:[#allocation8 + $0x70c] ss:$16 sps:$4 sm:$0xff]   ;;  %v9623_v54 = vld [vmem:[#allocation8 + $0x700] ss:$16 sps:$4 sm:$0xff]  }
 0x35b   : > { %7689 = vmatprep.subr.bf16.mxu1 %v9574_v55  ;;  %v9626_v55 = vld [vmem:[#allocation8 + $0x708] ss:$16 sps:$4 sm:$0xff]  }
 0x35d   : > { %7362 = vmatpush1.bf16.msra.mxu0 %v9569_v24  ;;  %v9634_v24 = vld [vmem:[#allocation8 + $0x72c] ss:$16 sps:$4 sm:$0xff]  }
 0x35e   : > { %7690 = vmatpush1.bf16.msra.mxu1 %v9572_v59  ;;  %7372 = vmatprep.subr.bf16.mxu0 %v9577_v60  ;;  %v9632_v59 = vld [vmem:[#allocation8 + $0x728] ss:$16 sps:$4 sm:$0xff]   ;;  %v9637_v60 = vld [vmem:[#allocation8 + $0x744] ss:$16 sps:$4 sm:$0xff]  }
 0x35f   : > { %7700 = vmatprep.subr.bf16.mxu1 %v9580_v23  ;;  %v9640_v23 = vld [vmem:[#allocation8 + $0x74c] ss:$16 sps:$4 sm:$0xff]  }
 0x360   : > { %7364 = vmatmul.mubr.bf16.vlgmr.msra.gmra.mrb[16].mxu0 %v4143_v62 }
 0x361   : > { %7692 = vmatmul.mubr.bf16.vlgmr.msra.gmra.mrb[16].mxu1 %v4143_v62  ;;  %7373 = vmatpush1.bf16.msra.mxu0 %v9575_v4  ;;  %v9638_v4 = vld [vmem:[#allocation8 + $0x748] ss:$16 sps:$4 sm:$0xff]   ;;  %v9643_v62 = vld [vmem:[#allocation8 + $0x764] ss:$16 sps:$4 sm:$0xff]  }
 0x362   : > { %7404 = vmatprep.mubr.bf16.mxu0 %v4146_v0  ;;  %7701 = vmatpush1.bf16.msra.mxu1 %v9578_v32  ;;  %v9646_v32 = vld [vmem:[#allocation8 + $0x76c] ss:$16 sps:$4 sm:$0xff]  }
 0x363   : > { %7732 = vmatprep.mubr.bf16.mxu1 %v4146_v0  ;;  %7374 = vmatprep.subr.bf16.mxu0 %v9583_v63  ;;  %v9641_v63 = vld [vmem:[#allocation8 + $0x760] ss:$16 sps:$4 sm:$0xff]   ;;  %v9644_v0 = vld [vmem:[#allocation8 + $0x768] ss:$16 sps:$4 sm:$0xff]  }
 0x364   : > { %7702 = vmatprep.subr.bf16.mxu1 %v9586_v13  ;;  %v9649_v13 = vld [vmem:[#allocation8 + $0x784] ss:$16 sps:$4 sm:$0xff]  }
 0x365   : > { %7375 = vmatpush1.bf16.msra.mxu0 %v9581_v1  ;;  %v9652_v1 = vld [vmem:[#allocation8 + $0x78c] ss:$16 sps:$4 sm:$0xff]  }
 0x366   : > { %7703 = vmatpush1.bf16.msra.mxu1 %v9584_v2  ;;  %7376 = vmatprep.subr.bf16.mxu0 %v9589_v3  ;;  %v9647_v2 = vld [vmem:[#allocation8 + $0x780] ss:$16 sps:$4 sm:$0xff]   ;;  %v839_v3 = vsub.s32 6, %v10613_v6 }
 0x367   : > { %7704 = vmatprep.subr.bf16.mxu1 %v9592_v5  ;;  %v9650_v5 = vld [vmem:[#allocation8 + $0x788] ss:$16 sps:$4 sm:$0xff]   ;;  %v10049_v6 = vld [vmem:[#allocation8 + $0xfe0] ss:$16 sps:$4 sm:$0xff]  }
 0x369   : > { %7377 = vmatpush1.bf16.msra.mxu0 %v9587_v7  ;;  %v9655_v7 = vld [vmem:[#allocation8 + $0x7a4] ss:$16 sps:$4 sm:$0xff]  }
 0x36a   : > { %7705 = vmatpush1.bf16.msra.mxu1 %v9590_v11  ;;  %7378 = vmatprep.subr.bf16.mxu0 %v9595_v14  ;;  %v9658_v11 = vld [vmem:[#allocation8 + $0x7ac] ss:$16 sps:$4 sm:$0xff]  }
 0x36b   : > { %7706 = vmatprep.subr.bf16.mxu1 %v9598_v16  ;;  %v10675_v14 = vld [vmem:[#allocation7 + $0x8] sm:$0xff]  ;;  %v9653_v16 = vld [vmem:[#allocation8 + $0x7a0] ss:$16 sps:$4 sm:$0xff]  }
 0x36d   : > { %7379 = vmatpush1.bf16.msra.mxu0 %v9593_v17  ;;  %v10055_v17 = vld [vmem:[#allocation7] sm:$0xff] }
 0x36e   : > { %7707 = vmatpush1.bf16.msra.mxu1 %v9596_v18  ;;  %7380 = vmatprep.subr.bf16.mxu0 %v9601_v19  ;;  %v840_v18 = vrot.slane %v10055_v17, %v839_v3  ;;  %v9656_v19 = vld [vmem:[#allocation8 + $0x7a8] ss:$16 sps:$4 sm:$0xff]   ;;  %v9718_v17 = vld [vmem:[#allocation8 + $0x8ec] ss:$16 sps:$4 sm:$0xff]  }
 0x36f   : > { %7708 = vmatprep.subr.bf16.mxu1 %v9604_v21  ;;  %v9661_v21 = vld [vmem:[#allocation8 + $0x7c4] ss:$16 sps:$4 sm:$0xff]  }
 0x371   : > { %7381 = vmatpush1.bf16.msra.mxu0 %v9599_v22  ;;  %v9664_v22 = vld [vmem:[#allocation8 + $0x7cc] ss:$16 sps:$4 sm:$0xff]  }
 0x372   : > { %7709 = vmatpush1.bf16.msra.mxu1 %v9602_v25  ;;  %7382 = vmatprep.subr.bf16.mxu0 %v9607_v26  ;;  %v852_v25 = vrot.slane %v10675_v14, %v10616_v20  ;;  %v9659_v26 = vld [vmem:[#allocation8 + $0x7c0] ss:$16 sps:$4 sm:$0xff]  }
 0x373   : > { %v10666_v31 = vpop.f32.mrb[12].mxu0  ;;  %7710 = vmatprep.subr.bf16.mxu1 %v9610_v27  ;;  %v10668_v38 = vpop.f32.mrb[12].mxu1  ;;  %v9090_v27 = vadd.f32 %v10607_v8, %v840_v18  ;;  %v9671_v8 = vld [vmem:[#allocation8 + $0x800] ss:$16 sps:$4 sm:$0xff]  }
 0x374   : > { %v10670_v40 = vpop.f32.mrb[13].mxu0  ;;  %v10672_v35 = vpop.f32.mrb[13].mxu1  ;;  %v9713_v18 = vld [vmem:[#allocation8 + $0x8e0] ss:$16 sps:$4 sm:$0xff]  }
 0x375   : > { %v4038_v42 = vpop.f32.mrb[14].mxu0  ;;  %7383 = vmatpush1.bf16.msra.mxu0 %v9605_v28  ;;  %v4120_v44 = vpop.f32.mrb[14].mxu1  ;;  %v9662_v28 = vld [vmem:[#allocation8 + $0x7c8] ss:$16 sps:$4 sm:$0xff]  }
 0x376   : > { %7711 = vmatpush1.bf16.msra.mxu1 %v9608_v29  ;;  %v4039_v46 = vpop.f32.mrb[15].mxu0  ;;  %7384 = vmatprep.subr.bf16.mxu0 %v9613_v30  ;;  %v4121_v36 = vpop.f32.mrb[15].mxu1  ;;  %v9667_v29 = vld [vmem:[#allocation8 + $0x7e4] ss:$16 sps:$4 sm:$0xff]   ;;  %v9670_v30 = vld [vmem:[#allocation8 + $0x7ec] ss:$16 sps:$4 sm:$0xff]  }
 0x377   : > { %7712 = vmatprep.subr.bf16.mxu1 %v9616_v15  ;;  %v9093_v15 = vadd.f32 %v10641_v37, %v852_v25  ;;  %v9665_v42 = vld [vmem:[#allocation8 + $0x7e0] ss:$16 sps:$4 sm:$0xff]   ;;  %v9668_v44 = vld [vmem:[#allocation8 + $0x7e8] ss:$16 sps:$4 sm:$0xff]   ;;  %v9673_v46 = vld [vmem:[#allocation8 + $0x804] ss:$16 sps:$4 sm:$0xff]  }
 0x378   : > { %v9682_v37 = vld [vmem:[#allocation8 + $0x82c] ss:$16 sps:$4 sm:$0xff]   ;;  %v9719_v25 = vld [vmem:[#allocation8 + $0x900] ss:$16 sps:$4 sm:$0xff]  }
 0x379   : > { %7385 = vmatpush1.bf16.msra.mxu0 %v9611_v43  ;;  %v4129_v43 = vmax.f32 %v9090_v27, 0.0  ;;  %v9727_v27 = vld [vmem:[#allocation8 + $0x924] ss:$16 sps:$4 sm:$0xff]  }
 0x37a   : > { %7713 = vmatpush1.bf16.msra.mxu1 %v9614_v47  ;;  %7386 = vmatprep.subr.bf16.mxu0 %v9619_v48  ;;  %v9676_v47 = vld [vmem:[#allocation8 + $0x80c] ss:$16 sps:$4 sm:$0xff]   ;;  %v4132_v48 = vmax.f32 %v9093_v15, 0.0  ;;  %v9733_v15 = vld [vmem:[#allocation8 + $0x944] ss:$16 sps:$4 sm:$0xff]  }
 0x37b   : > { %7714 = vmatprep.subr.bf16.mxu1 %v9622_v49  ;;  %v4145_v36 = vpack.c.bf16 %v4129_v43, %v4129_v43  ;;  %v9674_v49 = vld [vmem:[#allocation8 + $0x808] ss:$16 sps:$4 sm:$0xff]   ;;  %v9731_v43 = vld [vmem:[#allocation8 + $0x940] ss:$16 sps:$4 sm:$0xff]  }
 0x37d   : > { %7387 = vmatpush1.bf16.msra.mxu0 %v9617_v50  ;;  %v9679_v50 = vld [vmem:[#allocation8 + $0x824] ss:$16 sps:$4 sm:$0xff]  }
 0x37e   : > { %7715 = vmatpush1.bf16.msra.mxu1 %v9620_v53  ;;  %7388 = vmatprep.subr.bf16.mxu0 %v9625_v51  ;;  %v4148_v53 = vpack.c.bf16 %v4132_v48, %v4132_v48  ;;  %v9677_v51 = vld [vmem:[#allocation8 + $0x820] ss:$16 sps:$4 sm:$0xff]  }
 0x37f   : > { %7716 = vmatprep.subr.bf16.mxu1 %v9628_v52  ;;  %v9680_v52 = vld [vmem:[#allocation8 + $0x828] ss:$16 sps:$4 sm:$0xff]   ;;  %v9737_v48 = vld [vmem:[#allocation8 + $0x960] ss:$16 sps:$4 sm:$0xff]  }
 0x381   : > { %7389 = vmatpush1.bf16.msra.mxu0 %v9623_v54  ;;  %v9685_v54 = vld [vmem:[#allocation8 + $0x844] ss:$16 sps:$4 sm:$0xff]  }
 0x382   : > { %7717 = vmatpush1.bf16.msra.mxu1 %v9626_v55  ;;  %7390 = vmatprep.subr.bf16.mxu0 %v9631_v56  ;;  %v9688_v55 = vld [vmem:[#allocation8 + $0x84c] ss:$16 sps:$4 sm:$0xff]   ;;  %v9683_v56 = vld [vmem:[#allocation8 + $0x840] ss:$16 sps:$4 sm:$0xff]  }
 0x383   : > { %7718 = vmatprep.subr.bf16.mxu1 %v9634_v24  ;;  %v9686_v24 = vld [vmem:[#allocation8 + $0x848] ss:$16 sps:$4 sm:$0xff]  }
 0x385   : > { %7391 = vmatpush1.bf16.msra.mxu0 %v9629_v58  ;;  %v9691_v58 = vld [vmem:[#allocation8 + $0x864] ss:$16 sps:$4 sm:$0xff]  }
 0x386   : > { %7719 = vmatpush1.bf16.msra.mxu1 %v9632_v59  ;;  %7392 = vmatprep.subr.bf16.mxu0 %v9637_v60  ;;  %v9694_v59 = vld [vmem:[#allocation8 + $0x86c] ss:$16 sps:$4 sm:$0xff]   ;;  %v9689_v60 = vld [vmem:[#allocation8 + $0x860] ss:$16 sps:$4 sm:$0xff]  }
 0x387   : > { %7720 = vmatprep.subr.bf16.mxu1 %v9640_v23  ;;  %v9692_v23 = vld [vmem:[#allocation8 + $0x868] ss:$16 sps:$4 sm:$0xff]  }
 0x389   : > { %7393 = vmatpush1.bf16.msra.mxu0 %v9635_v61  ;;  %v9697_v61 = vld [vmem:[#allocation8 + $0x884] ss:$16 sps:$4 sm:$0xff]  }
 0x38a   : > { %7721 = vmatpush1.bf16.msra.mxu1 %v9638_v4  ;;  %7394 = vmatprep.subr.bf16.mxu0 %v9643_v62  ;;  %v9700_v4 = vld [vmem:[#allocation8 + $0x88c] ss:$16 sps:$4 sm:$0xff]   ;;  %v9695_v62 = vld [vmem:[#allocation8 + $0x880] ss:$16 sps:$4 sm:$0xff]  }
 0x38b   : > { %7722 = vmatprep.subr.bf16.mxu1 %v9646_v32  ;;  %v9698_v32 = vld [vmem:[#allocation8 + $0x888] ss:$16 sps:$4 sm:$0xff]  }
 0x38d   : > { %7395 = vmatpush1.bf16.msra.mxu0 %v9641_v63  ;;  %v9703_v63 = vld [vmem:[#allocation8 + $0x8a4] ss:$16 sps:$4 sm:$0xff]  }
 0x38e   : > { %7723 = vmatpush1.bf16.msra.mxu1 %v9644_v0  ;;  %7396 = vmatprep.subr.bf16.mxu0 %v9649_v13  ;;  %v9706_v0 = vld [vmem:[#allocation8 + $0x8ac] ss:$16 sps:$4 sm:$0xff]   ;;  %v9701_v13 = vld [vmem:[#allocation8 + $0x8a0] ss:$16 sps:$4 sm:$0xff]  }
 0x38f   : > { %7724 = vmatprep.subr.bf16.mxu1 %v9652_v1  ;;  %v9704_v1 = vld [vmem:[#allocation8 + $0x8a8] ss:$16 sps:$4 sm:$0xff]  }
 0x391   : > { %7397 = vmatpush1.bf16.msra.mxu0 %v9647_v2  ;;  %v9709_v2 = vld [vmem:[#allocation8 + $0x8c4] ss:$16 sps:$4 sm:$0xff]  }
 0x392   : > { %7725 = vmatpush1.bf16.msra.mxu1 %v9650_v5  ;;  %7398 = vmatprep.subr.bf16.mxu0 %v9655_v7  ;;  %v9712_v5 = vld [vmem:[#allocation8 + $0x8cc] ss:$16 sps:$4 sm:$0xff]   ;;  %v9707_v7 = vld [vmem:[#allocation8 + $0x8c0] ss:$16 sps:$4 sm:$0xff]  }
 0x393   : > { %7726 = vmatprep.subr.bf16.mxu1 %v9658_v11  ;;  %v9710_v11 = vld [vmem:[#allocation8 + $0x8c8] ss:$16 sps:$4 sm:$0xff]  }
 0x395   : > { %7399 = vmatpush1.bf16.msra.mxu0 %v9653_v16  ;;  %v9715_v16 = vld [vmem:[#allocation8 + $0x8e4] ss:$16 sps:$4 sm:$0xff]  }
 0x396   : > { %7727 = vmatpush1.bf16.msra.mxu1 %v9656_v19  ;;  %7400 = vmatprep.subr.bf16.mxu0 %v9661_v21  ;;  %v9716_v19 = vld [vmem:[#allocation8 + $0x8e8] ss:$16 sps:$4 sm:$0xff]   ;;  %v9721_v21 = vld [vmem:[#allocation8 + $0x904] ss:$16 sps:$4 sm:$0xff]  }
 0x397   : > { %7728 = vmatprep.subr.bf16.mxu1 %v9664_v22  ;;  %v9724_v22 = vld [vmem:[#allocation8 + $0x90c] ss:$16 sps:$4 sm:$0xff]  }
 0x399   : > { %7401 = vmatpush1.bf16.msra.mxu0 %v9659_v26  ;;  %v9722_v26 = vld [vmem:[#allocation8 + $0x908] ss:$16 sps:$4 sm:$0xff]  }
 0x39a   : > { %7729 = vmatpush1.bf16.msra.mxu1 %v9662_v28  ;;  %7402 = vmatprep.subr.bf16.mxu0 %v9667_v29  ;;  %v9730_v28 = vld [vmem:[#allocation8 + $0x92c] ss:$16 sps:$4 sm:$0xff]   ;;  %v9725_v29 = vld [vmem:[#allocation8 + $0x920] ss:$16 sps:$4 sm:$0xff]  }
 0x39b   : > { %7730 = vmatprep.subr.bf16.mxu1 %v9670_v30  ;;  %v9728_v30 = vld [vmem:[#allocation8 + $0x928] ss:$16 sps:$4 sm:$0xff]  }
 0x39d   : > { %7403 = vmatpush1.bf16.msra.mxu0 %v9665_v42  ;;  %v9736_v42 = vld [vmem:[#allocation8 + $0x94c] ss:$16 sps:$4 sm:$0xff]  }
 0x39e   : > { %7731 = vmatpush1.bf16.msra.mxu1 %v9668_v44  ;;  %7413 = vmatprep.subr.bf16.mxu0 %v9673_v46  ;;  %v9734_v44 = vld [vmem:[#allocation8 + $0x948] ss:$16 sps:$4 sm:$0xff]   ;;  %v9739_v46 = vld [vmem:[#allocation8 + $0x964] ss:$16 sps:$4 sm:$0xff]  }
 0x39f   : > { %7741 = vmatprep.subr.bf16.mxu1 %v9676_v47  ;;  %v9742_v47 = vld [vmem:[#allocation8 + $0x96c] ss:$16 sps:$4 sm:$0xff]  }
 0x3a0   : > { %7405 = vmatmul.mubr.bf16.vlgmr.msra.gmra.mrb[16].mxu0 %v4145_v36 }
 0x3a1   : > { %7733 = vmatmul.mubr.bf16.vlgmr.msra.gmra.mrb[16].mxu1 %v4145_v36  ;;  %7414 = vmatpush1.bf16.msra.mxu0 %v9671_v8  ;;  %v9740_v8 = vld [vmem:[#allocation8 + $0x968] ss:$16 sps:$4 sm:$0xff]   ;;  %v9745_v36 = vld [vmem:[#allocation8 + $0x984] ss:$16 sps:$4 sm:$0xff]  }
 0x3a2   : > { %7445 = vmatprep.mubr.bf16.mxu0 %v4148_v53  ;;  %7742 = vmatpush1.bf16.msra.mxu1 %v9674_v49  ;;  %v9748_v49 = vld [vmem:[#allocation8 + $0x98c] ss:$16 sps:$4 sm:$0xff]  }
 0x3a3   : > { %7773 = vmatprep.mubr.bf16.mxu1 %v4148_v53  ;;  %7415 = vmatprep.subr.bf16.mxu0 %v9679_v50  ;;  %v9743_v50 = vld [vmem:[#allocation8 + $0x980] ss:$16 sps:$4 sm:$0xff]   ;;  %v9746_v53 = vld [vmem:[#allocation8 + $0x988] ss:$16 sps:$4 sm:$0xff]  }
 0x3a4   : > { %7743 = vmatprep.subr.bf16.mxu1 %v9682_v37  ;;  %v9751_v37 = vld [vmem:[#allocation8 + $0x9a4] ss:$16 sps:$4 sm:$0xff]  }
 0x3a5   : > { %7416 = vmatpush1.bf16.msra.mxu0 %v9677_v51  ;;  %v9754_v51 = vld [vmem:[#allocation8 + $0x9ac] ss:$16 sps:$4 sm:$0xff]  }
 0x3a6   : > { %7744 = vmatpush1.bf16.msra.mxu1 %v9680_v52  ;;  %7417 = vmatprep.subr.bf16.mxu0 %v9685_v54  ;;  %v9749_v52 = vld [vmem:[#allocation8 + $0x9a0] ss:$16 sps:$4 sm:$0xff]   ;;  %v848_v54 = vrot.slane %v10675_v14, %v10626_v12 }
 0x3a7   : > { %7745 = vmatprep.subr.bf16.mxu1 %v9688_v55  ;;  %v9752_v55 = vld [vmem:[#allocation8 + $0x9a8] ss:$16 sps:$4 sm:$0xff]  }
 0x3a9   : > { %7418 = vmatpush1.bf16.msra.mxu0 %v9683_v56  ;;  %v9757_v56 = vld [vmem:[#allocation8 + $0x9c4] ss:$16 sps:$4 sm:$0xff]  }
 0x3aa   : > { %7746 = vmatpush1.bf16.msra.mxu1 %v9686_v24  ;;  %7419 = vmatprep.subr.bf16.mxu0 %v9691_v58  ;;  %v9760_v24 = vld [vmem:[#allocation8 + $0x9cc] ss:$16 sps:$4 sm:$0xff]   ;;  %v860_v58 = vrot.slane %v10675_v14, %v10629_v45 }
 0x3ab   : > { %7747 = vmatprep.subr.bf16.mxu1 %v9694_v59  ;;  %v9755_v59 = vld [vmem:[#allocation8 + $0x9c0] ss:$16 sps:$4 sm:$0xff]  }
 0x3ad   : > { %7420 = vmatpush1.bf16.msra.mxu0 %v9689_v60  ;;  %v9092_v60 = vadd.f32 %v10637_v33, %v848_v54  ;;  %v9767_v33 = vld [vmem:[#allocation8 + $0xa00] ss:$16 sps:$4 sm:$0xff]   ;;  %v9817_v54 = vld [vmem:[#allocation8 + $0xb04] ss:$16 sps:$4 sm:$0xff]  }
 0x3ae   : > { %7748 = vmatpush1.bf16.msra.mxu1 %v9692_v23  ;;  %7421 = vmatprep.subr.bf16.mxu0 %v9697_v61  ;;  %v9758_v23 = vld [vmem:[#allocation8 + $0x9c8] ss:$16 sps:$4 sm:$0xff]   ;;  %v9763_v61 = vld [vmem:[#allocation8 + $0x9e4] ss:$16 sps:$4 sm:$0xff]  }
 0x3af   : > { %7749 = vmatprep.subr.bf16.mxu1 %v9700_v4  ;;  %v9766_v4 = vld [vmem:[#allocation8 + $0x9ec] ss:$16 sps:$4 sm:$0xff]  }
 0x3b1   : > { %7422 = vmatpush1.bf16.msra.mxu0 %v9695_v62  ;;  %v9095_v62 = vadd.f32 %v10643_v57, %v860_v58  ;;  %v9778_v57 = vld [vmem:[#allocation8 + $0xa2c] ss:$16 sps:$4 sm:$0xff]   ;;  %v9823_v58 = vld [vmem:[#allocation8 + $0xb24] ss:$16 sps:$4 sm:$0xff]  }
 0x3b2   : > { %7750 = vmatpush1.bf16.msra.mxu1 %v9698_v32  ;;  %7423 = vmatprep.subr.bf16.mxu0 %v9703_v63  ;;  %v9761_v32 = vld [vmem:[#allocation8 + $0x9e0] ss:$16 sps:$4 sm:$0xff]   ;;  %v4131_v63 = vmax.f32 %v9092_v60, 0.0 }
 0x3b3   : > { %7751 = vmatprep.subr.bf16.mxu1 %v9706_v0  ;;  %v9764_v0 = vld [vmem:[#allocation8 + $0x9e8] ss:$16 sps:$4 sm:$0xff]   ;;  %v9821_v60 = vld [vmem:[#allocation8 + $0xb20] ss:$16 sps:$4 sm:$0xff]  }
 0x3b5   : > { %7424 = vmatpush1.bf16.msra.mxu0 %v9701_v13  ;;  %v9769_v13 = vld [vmem:[#allocation8 + $0xa04] ss:$16 sps:$4 sm:$0xff]  }
 0x3b6   : > { %7752 = vmatpush1.bf16.msra.mxu1 %v9704_v1  ;;  %7425 = vmatprep.subr.bf16.mxu0 %v9709_v2  ;;  %v9772_v1 = vld [vmem:[#allocation8 + $0xa0c] ss:$16 sps:$4 sm:$0xff]   ;;  %v4134_v2 = vmax.f32 %v9095_v62, 0.0  ;;  %v9827_v62 = vld [vmem:[#allocation8 + $0xb40] ss:$16 sps:$4 sm:$0xff]  }
 0x3b7   : > { %7753 = vmatprep.subr.bf16.mxu1 %v9712_v5  ;;  %v4147_v5 = vpack.c.bf16 %v4131_v63, %v4131_v63  ;;  %v9835_v63 = vld [vmem:[#allocation8 + $0xb64] ss:$16 sps:$4 sm:$0xff]  }
 0x3b9   : > { %7426 = vmatpush1.bf16.msra.mxu0 %v9707_v7  ;;  %v9770_v7 = vld [vmem:[#allocation8 + $0xa08] ss:$16 sps:$4 sm:$0xff]  }
 0x3ba   : > { %7754 = vmatpush1.bf16.msra.mxu1 %v9710_v11  ;;  %7427 = vmatprep.subr.bf16.mxu0 %v9715_v16  ;;  %v9775_v11 = vld [vmem:[#allocation8 + $0xa24] ss:$16 sps:$4 sm:$0xff]   ;;  %v4150_v16 = vpack.c.bf16 %v4134_v2, %v4134_v2 }
 0x3bb   : > { %7755 = vmatprep.subr.bf16.mxu1 %v9718_v17  ;;  %v9773_v17 = vld [vmem:[#allocation8 + $0xa20] ss:$16 sps:$4 sm:$0xff]   ;;  %v9841_v2 = vld [vmem:[#allocation8 + $0xb84] ss:$16 sps:$4 sm:$0xff]  }
 0x3bd   : > { %7428 = vmatpush1.bf16.msra.mxu0 %v9713_v18  ;;  %v9776_v18 = vld [vmem:[#allocation8 + $0xa28] ss:$16 sps:$4 sm:$0xff]  }
 0x3be   : > { %7756 = vmatpush1.bf16.msra.mxu1 %v9716_v19  ;;  %7429 = vmatprep.subr.bf16.mxu0 %v9721_v21  ;;  %v9781_v19 = vld [vmem:[#allocation8 + $0xa44] ss:$16 sps:$4 sm:$0xff]   ;;  %v9784_v21 = vld [vmem:[#allocation8 + $0xa4c] ss:$16 sps:$4 sm:$0xff]  }
 0x3bf   : > { %7757 = vmatprep.subr.bf16.mxu1 %v9724_v22  ;;  %v9779_v22 = vld [vmem:[#allocation8 + $0xa40] ss:$16 sps:$4 sm:$0xff]  }
 0x3c1   : > { %7430 = vmatpush1.bf16.msra.mxu0 %v9719_v25  ;;  %v9782_v25 = vld [vmem:[#allocation8 + $0xa48] ss:$16 sps:$4 sm:$0xff]  }
 0x3c2   : > { %7758 = vmatpush1.bf16.msra.mxu1 %v9722_v26  ;;  %7431 = vmatprep.subr.bf16.mxu0 %v9727_v27  ;;  %v9787_v26 = vld [vmem:[#allocation8 + $0xa64] ss:$16 sps:$4 sm:$0xff]   ;;  %v9790_v27 = vld [vmem:[#allocation8 + $0xa6c] ss:$16 sps:$4 sm:$0xff]  }
 0x3c3   : > { %7759 = vmatprep.subr.bf16.mxu1 %v9730_v28  ;;  %v9785_v28 = vld [vmem:[#allocation8 + $0xa60] ss:$16 sps:$4 sm:$0xff]  }
 0x3c5   : > { %7432 = vmatpush1.bf16.msra.mxu0 %v9725_v29  ;;  %v9788_v29 = vld [vmem:[#allocation8 + $0xa68] ss:$16 sps:$4 sm:$0xff]  }
 0x3c6   : > { %7760 = vmatpush1.bf16.msra.mxu1 %v9728_v30  ;;  %7433 = vmatprep.subr.bf16.mxu0 %v9733_v15  ;;  %v9793_v30 = vld [vmem:[#allocation8 + $0xa84] ss:$16 sps:$4 sm:$0xff]   ;;  %v9796_v15 = vld [vmem:[#allocation8 + $0xa8c] ss:$16 sps:$4 sm:$0xff]  }
 0x3c7   : > { %7761 = vmatprep.subr.bf16.mxu1 %v9736_v42  ;;  %v9791_v42 = vld [vmem:[#allocation8 + $0xa80] ss:$16 sps:$4 sm:$0xff]  }
 0x3c9   : > { %7434 = vmatpush1.bf16.msra.mxu0 %v9731_v43  ;;  %v9794_v43 = vld [vmem:[#allocation8 + $0xa88] ss:$16 sps:$4 sm:$0xff]  }
 0x3ca   : > { %7762 = vmatpush1.bf16.msra.mxu1 %v9734_v44  ;;  %7435 = vmatprep.subr.bf16.mxu0 %v9739_v46  ;;  %v9799_v44 = vld [vmem:[#allocation8 + $0xaa4] ss:$16 sps:$4 sm:$0xff]   ;;  %v9802_v46 = vld [vmem:[#allocation8 + $0xaac] ss:$16 sps:$4 sm:$0xff]  }
 0x3cb   : > { %7763 = vmatprep.subr.bf16.mxu1 %v9742_v47  ;;  %v9797_v47 = vld [vmem:[#allocation8 + $0xaa0] ss:$16 sps:$4 sm:$0xff]  }
 0x3cd   : > { %7436 = vmatpush1.bf16.msra.mxu0 %v9737_v48  ;;  %v9800_v48 = vld [vmem:[#allocation8 + $0xaa8] ss:$16 sps:$4 sm:$0xff]  }
 0x3ce   : > { %7764 = vmatpush1.bf16.msra.mxu1 %v9740_v8  ;;  %7437 = vmatprep.subr.bf16.mxu0 %v9745_v36  ;;  %v9805_v8 = vld [vmem:[#allocation8 + $0xac4] ss:$16 sps:$4 sm:$0xff]   ;;  %v9808_v36 = vld [vmem:[#allocation8 + $0xacc] ss:$16 sps:$4 sm:$0xff]  }
 0x3cf   : > { %7765 = vmatprep.subr.bf16.mxu1 %v9748_v49  ;;  %v9803_v49 = vld [vmem:[#allocation8 + $0xac0] ss:$16 sps:$4 sm:$0xff]  }
 0x3d1   : > { %7438 = vmatpush1.bf16.msra.mxu0 %v9743_v50  ;;  %v9806_v50 = vld [vmem:[#allocation8 + $0xac8] ss:$16 sps:$4 sm:$0xff]  }
 0x3d2   : > { %7766 = vmatpush1.bf16.msra.mxu1 %v9746_v53  ;;  %7439 = vmatprep.subr.bf16.mxu0 %v9751_v37  ;;  %v9811_v53 = vld [vmem:[#allocation8 + $0xae4] ss:$16 sps:$4 sm:$0xff]   ;;  %v9814_v37 = vld [vmem:[#allocation8 + $0xaec] ss:$16 sps:$4 sm:$0xff]  }
 0x3d3   : > { %7767 = vmatprep.subr.bf16.mxu1 %v9754_v51  ;;  %v9809_v51 = vld [vmem:[#allocation8 + $0xae0] ss:$16 sps:$4 sm:$0xff]  }
 0x3d5   : > { %7440 = vmatpush1.bf16.msra.mxu0 %v9749_v52  ;;  %v9812_v52 = vld [vmem:[#allocation8 + $0xae8] ss:$16 sps:$4 sm:$0xff]  }
 0x3d6   : > { %7768 = vmatpush1.bf16.msra.mxu1 %v9752_v55  ;;  %7441 = vmatprep.subr.bf16.mxu0 %v9757_v56  ;;  %v9820_v55 = vld [vmem:[#allocation8 + $0xb0c] ss:$16 sps:$4 sm:$0xff]   ;;  %v9815_v56 = vld [vmem:[#allocation8 + $0xb00] ss:$16 sps:$4 sm:$0xff]  }
 0x3d7   : > { %7769 = vmatprep.subr.bf16.mxu1 %v9760_v24  ;;  %v9818_v24 = vld [vmem:[#allocation8 + $0xb08] ss:$16 sps:$4 sm:$0xff]  }
 0x3d9   : > { %7442 = vmatpush1.bf16.msra.mxu0 %v9755_v59  ;;  %v9826_v59 = vld [vmem:[#allocation8 + $0xb2c] ss:$16 sps:$4 sm:$0xff]  }
 0x3da   : > { %7770 = vmatpush1.bf16.msra.mxu1 %v9758_v23  ;;  %7443 = vmatprep.subr.bf16.mxu0 %v9763_v61  ;;  %v9824_v23 = vld [vmem:[#allocation8 + $0xb28] ss:$16 sps:$4 sm:$0xff]   ;;  %v9829_v61 = vld [vmem:[#allocation8 + $0xb44] ss:$16 sps:$4 sm:$0xff]  }
 0x3db   : > { %7771 = vmatprep.subr.bf16.mxu1 %v9766_v4  ;;  %v9832_v4 = vld [vmem:[#allocation8 + $0xb4c] ss:$16 sps:$4 sm:$0xff]  }
 0x3dd   : > { %7444 = vmatpush1.bf16.msra.mxu0 %v9761_v32  ;;  %v9830_v32 = vld [vmem:[#allocation8 + $0xb48] ss:$16 sps:$4 sm:$0xff]  }
 0x3de   : > { %7772 = vmatpush1.bf16.msra.mxu1 %v9764_v0  ;;  %7454 = vmatprep.subr.bf16.mxu0 %v9769_v13  ;;  %v9838_v0 = vld [vmem:[#allocation8 + $0xb6c] ss:$16 sps:$4 sm:$0xff]   ;;  %v9833_v13 = vld [vmem:[#allocation8 + $0xb60] ss:$16 sps:$4 sm:$0xff]  }
 0x3df   : > { %7782 = vmatprep.subr.bf16.mxu1 %v9772_v1  ;;  %v9836_v1 = vld [vmem:[#allocation8 + $0xb68] ss:$16 sps:$4 sm:$0xff]  }
 0x3e0   : > { %7446 = vmatmul.mubr.bf16.vlgmr.msra.gmra.mrb[16].mxu0 %v4147_v5 }
 0x3e1   : > { %7774 = vmatmul.mubr.bf16.vlgmr.msra.gmra.mrb[16].mxu1 %v4147_v5  ;;  %7455 = vmatpush1.bf16.msra.mxu0 %v9767_v33  ;;  %v9844_v33 = vld [vmem:[#allocation8 + $0xb8c] ss:$16 sps:$4 sm:$0xff]   ;;  %v9839_v5 = vld [vmem:[#allocation8 + $0xb80] ss:$16 sps:$4 sm:$0xff]  }
 0x3e2   : > { %7486 = vmatprep.mubr.bf16.mxu0 %v4150_v16  ;;  %7783 = vmatpush1.bf16.msra.mxu1 %v9770_v7  ;;  %v9842_v7 = vld [vmem:[#allocation8 + $0xb88] ss:$16 sps:$4 sm:$0xff]  }
 0x3e3   : > { %7814 = vmatprep.mubr.bf16.mxu1 %v4150_v16  ;;  %7456 = vmatprep.subr.bf16.mxu0 %v9775_v11  ;;  %v9847_v11 = vld [vmem:[#allocation8 + $0xba4] ss:$16 sps:$4 sm:$0xff]   ;;  %v9850_v16 = vld [vmem:[#allocation8 + $0xbac] ss:$16 sps:$4 sm:$0xff]  }
 0x3e4   : > { %7784 = vmatprep.subr.bf16.mxu1 %v9778_v57  ;;  %v9845_v57 = vld [vmem:[#allocation8 + $0xba0] ss:$16 sps:$4 sm:$0xff]  }
 0x3e5   : > { %7457 = vmatpush1.bf16.msra.mxu0 %v9773_v17  ;;  %v856_v17 = vrot.slane %v10675_v14, %v10646_v39 }
 0x3e6   : > { %7785 = vmatpush1.bf16.msra.mxu1 %v9776_v18  ;;  %7458 = vmatprep.subr.bf16.mxu0 %v9781_v19  ;;  %v9848_v18 = vld [vmem:[#allocation8 + $0xba8] ss:$16 sps:$4 sm:$0xff]   ;;  %v9853_v19 = vld [vmem:[#allocation8 + $0xbc4] ss:$16 sps:$4 sm:$0xff]  }
 0x3e7   : > { %7786 = vmatprep.subr.bf16.mxu1 %v9784_v21  ;;  %v9856_v21 = vld [vmem:[#allocation8 + $0xbcc] ss:$16 sps:$4 sm:$0xff]  }
 0x3e9   : > { %7459 = vmatpush1.bf16.msra.mxu0 %v9779_v22  ;;  %v868_v22 = vrot.slane %v10675_v14, %v835_v10  ;;  %v9868_v10 = vld [vmem:[#allocation8 + $0xc0c] ss:$16 sps:$4 sm:$0xff]  }
 0x3ea   : > { %7787 = vmatpush1.bf16.msra.mxu1 %v9782_v25  ;;  %7460 = vmatprep.subr.bf16.mxu0 %v9787_v26  ;;  %v9851_v25 = vld [vmem:[#allocation8 + $0xbc0] ss:$16 sps:$4 sm:$0xff]   ;;  %v9094_v26 = vadd.f32 %v10639_v34, %v856_v17  ;;  %v9914_v17 = vld [vmem:[#allocation8 + $0xd08] ss:$16 sps:$4 sm:$0xff]  }
 0x3eb   : > { %7788 = vmatprep.subr.bf16.mxu1 %v9790_v27  ;;  %v9854_v27 = vld [vmem:[#allocation8 + $0xbc8] ss:$16 sps:$4 sm:$0xff]   ;;  %v9863_v34 = vld [vmem:[#allocation8 + $0xc00] ss:$16 sps:$4 sm:$0xff]  }
 0x3ed   : > { %7461 = vmatpush1.bf16.msra.mxu0 %v9785_v28  ;;  %v9859_v28 = vld [vmem:[#allocation8 + $0xbe4] ss:$16 sps:$4 sm:$0xff]  }
 0x3ee   : > { %7789 = vmatpush1.bf16.msra.mxu1 %v9788_v29  ;;  %7462 = vmatprep.subr.bf16.mxu0 %v9793_v30  ;;  %v9862_v29 = vld [vmem:[#allocation8 + $0xbec] ss:$16 sps:$4 sm:$0xff]   ;;  %v9097_v30 = vadd.f32 %v10670_v40, %v868_v22  ;;  %v9920_v22 = vld [vmem:[#allocation8 + $0xd28] ss:$16 sps:$4 sm:$0xff]  }
 0x3ef   : > { %7790 = vmatprep.subr.bf16.mxu1 %v9796_v15  ;;  %v9857_v15 = vld [vmem:[#allocation8 + $0xbe0] ss:$16 sps:$4 sm:$0xff]   ;;  %v9874_v40 = vld [vmem:[#allocation8 + $0xc2c] ss:$16 sps:$4 sm:$0xff]  }
 0x3f1   : > { %7463 = vmatpush1.bf16.msra.mxu0 %v9791_v42  ;;  %v4133_v42 = vmax.f32 %v9094_v26, 0.0  ;;  %v9928_v26 = vld [vmem:[#allocation8 + $0xd4c] ss:$16 sps:$4 sm:$0xff]  }
 0x3f2   : > { %7791 = vmatpush1.bf16.msra.mxu1 %v9794_v43  ;;  %7464 = vmatprep.subr.bf16.mxu0 %v9799_v44  ;;  %v9860_v43 = vld [vmem:[#allocation8 + $0xbe8] ss:$16 sps:$4 sm:$0xff]   ;;  %v9865_v44 = vld [vmem:[#allocation8 + $0xc04] ss:$16 sps:$4 sm:$0xff]  }
 0x3f3   : > { %7792 = vmatprep.subr.bf16.mxu1 %v9802_v46  ;;  %v4136_v46 = vmax.f32 %v9097_v30, 0.0  ;;  %v9934_v30 = vld [vmem:[#allocation8 + $0xd6c] ss:$16 sps:$4 sm:$0xff]  }
 0x3f5   : > { %7465 = vmatpush1.bf16.msra.mxu0 %v9797_v47  ;;  %v4149_v47 = vpack.c.bf16 %v4133_v42, %v4133_v42  ;;  %v9932_v42 = vld [vmem:[#allocation8 + $0xd68] ss:$16 sps:$4 sm:$0xff]  }
 0x3f6   : > { %7793 = vmatpush1.bf16.msra.mxu1 %v9800_v48  ;;  %7466 = vmatprep.subr.bf16.mxu0 %v9805_v8  ;;  %v9866_v48 = vld [vmem:[#allocation8 + $0xc08] ss:$16 sps:$4 sm:$0xff]   ;;  %v9871_v8 = vld [vmem:[#allocation8 + $0xc24] ss:$16 sps:$4 sm:$0xff]  }
 0x3f7   : > { %7794 = vmatprep.subr.bf16.mxu1 %v9808_v36  ;;  %v4152_v36 = vpack.c.bf16 %v4136_v46, %v4136_v46  ;;  %v9938_v46 = vld [vmem:[#allocation8 + $0xd88] ss:$16 sps:$4 sm:$0xff]  }
 0x3f9   : > { %7467 = vmatpush1.bf16.msra.mxu0 %v9803_v49  ;;  %v9869_v49 = vld [vmem:[#allocation8 + $0xc20] ss:$16 sps:$4 sm:$0xff]  }
 0x3fa   : > { %7795 = vmatpush1.bf16.msra.mxu1 %v9806_v50  ;;  %7468 = vmatprep.subr.bf16.mxu0 %v9811_v53  ;;  %v9872_v50 = vld [vmem:[#allocation8 + $0xc28] ss:$16 sps:$4 sm:$0xff]   ;;  %v9877_v53 = vld [vmem:[#allocation8 + $0xc44] ss:$16 sps:$4 sm:$0xff]  }
 0x3fb   : > { %7796 = vmatprep.subr.bf16.mxu1 %v9814_v37  ;;  %v9880_v37 = vld [vmem:[#allocation8 + $0xc4c] ss:$16 sps:$4 sm:$0xff]  }
 0x3fd   : > { %7469 = vmatpush1.bf16.msra.mxu0 %v9809_v51  ;;  %v9875_v51 = vld [vmem:[#allocation8 + $0xc40] ss:$16 sps:$4 sm:$0xff]  }
 0x3fe   : > { %7797 = vmatpush1.bf16.msra.mxu1 %v9812_v52  ;;  %7470 = vmatprep.subr.bf16.mxu0 %v9817_v54  ;;  %v9878_v52 = vld [vmem:[#allocation8 + $0xc48] ss:$16 sps:$4 sm:$0xff]   ;;  %v9883_v54 = vld [vmem:[#allocation8 + $0xc64] ss:$16 sps:$4 sm:$0xff]  }
 0x3ff   : > { %7798 = vmatprep.subr.bf16.mxu1 %v9820_v55  ;;  %v9886_v55 = vld [vmem:[#allocation8 + $0xc6c] ss:$16 sps:$4 sm:$0xff]  }
 0x401   : > { %7471 = vmatpush1.bf16.msra.mxu0 %v9815_v56  ;;  %v9881_v56 = vld [vmem:[#allocation8 + $0xc60] ss:$16 sps:$4 sm:$0xff]  }
 0x402   : > { %7799 = vmatpush1.bf16.msra.mxu1 %v9818_v24  ;;  %7472 = vmatprep.subr.bf16.mxu0 %v9823_v58  ;;  %v9884_v24 = vld [vmem:[#allocation8 + $0xc68] ss:$16 sps:$4 sm:$0xff]   ;;  %v9889_v58 = vld [vmem:[#allocation8 + $0xc84] ss:$16 sps:$4 sm:$0xff]  }
 0x403   : > { %7800 = vmatprep.subr.bf16.mxu1 %v9826_v59  ;;  %v9892_v59 = vld [vmem:[#allocation8 + $0xc8c] ss:$16 sps:$4 sm:$0xff]  }
 0x405   : > { %7473 = vmatpush1.bf16.msra.mxu0 %v9821_v60  ;;  %v9887_v60 = vld [vmem:[#allocation8 + $0xc80] ss:$16 sps:$4 sm:$0xff]  }
 0x406   : > { %7801 = vmatpush1.bf16.msra.mxu1 %v9824_v23  ;;  %7474 = vmatprep.subr.bf16.mxu0 %v9829_v61  ;;  %v9890_v23 = vld [vmem:[#allocation8 + $0xc88] ss:$16 sps:$4 sm:$0xff]   ;;  %v9895_v61 = vld [vmem:[#allocation8 + $0xca4] ss:$16 sps:$4 sm:$0xff]  }
 0x407   : > { %7802 = vmatprep.subr.bf16.mxu1 %v9832_v4  ;;  %v9898_v4 = vld [vmem:[#allocation8 + $0xcac] ss:$16 sps:$4 sm:$0xff]  }
 0x409   : > { %7475 = vmatpush1.bf16.msra.mxu0 %v9827_v62  ;;  %v9893_v62 = vld [vmem:[#allocation8 + $0xca0] ss:$16 sps:$4 sm:$0xff]  }
 0x40a   : > { %7803 = vmatpush1.bf16.msra.mxu1 %v9830_v32  ;;  %7476 = vmatprep.subr.bf16.mxu0 %v9835_v63  ;;  %v9896_v32 = vld [vmem:[#allocation8 + $0xca8] ss:$16 sps:$4 sm:$0xff]   ;;  %v9901_v63 = vld [vmem:[#allocation8 + $0xcc4] ss:$16 sps:$4 sm:$0xff]  }
 0x40b   : > { %7804 = vmatprep.subr.bf16.mxu1 %v9838_v0  ;;  %v9904_v0 = vld [vmem:[#allocation8 + $0xccc] ss:$16 sps:$4 sm:$0xff]  }
 0x40d   : > { %7477 = vmatpush1.bf16.msra.mxu0 %v9833_v13  ;;  %v9899_v13 = vld [vmem:[#allocation8 + $0xcc0] ss:$16 sps:$4 sm:$0xff]  }
 0x40e   : > { %7805 = vmatpush1.bf16.msra.mxu1 %v9836_v1  ;;  %7478 = vmatprep.subr.bf16.mxu0 %v9841_v2  ;;  %v9902_v1 = vld [vmem:[#allocation8 + $0xcc8] ss:$16 sps:$4 sm:$0xff]   ;;  %v9907_v2 = vld [vmem:[#allocation8 + $0xce4] ss:$16 sps:$4 sm:$0xff]  }
 0x40f   : > { %7806 = vmatprep.subr.bf16.mxu1 %v9844_v33  ;;  %v9910_v33 = vld [vmem:[#allocation8 + $0xcec] ss:$16 sps:$4 sm:$0xff]  }
 0x411   : > { %7479 = vmatpush1.bf16.msra.mxu0 %v9839_v5  ;;  %v9905_v5 = vld [vmem:[#allocation8 + $0xce0] ss:$16 sps:$4 sm:$0xff]  }
 0x412   : > { %7807 = vmatpush1.bf16.msra.mxu1 %v9842_v7  ;;  %7480 = vmatprep.subr.bf16.mxu0 %v9847_v11  ;;  %v9908_v7 = vld [vmem:[#allocation8 + $0xce8] ss:$16 sps:$4 sm:$0xff]   ;;  %v9913_v11 = vld [vmem:[#allocation8 + $0xd04] ss:$16 sps:$4 sm:$0xff]  }
 0x413   : > { %7808 = vmatprep.subr.bf16.mxu1 %v9850_v16  ;;  %v9916_v16 = vld [vmem:[#allocation8 + $0xd0c] ss:$16 sps:$4 sm:$0xff]  }
 0x415   : > { %7481 = vmatpush1.bf16.msra.mxu0 %v9845_v57  ;;  %v9911_v57 = vld [vmem:[#allocation8 + $0xd00] ss:$16 sps:$4 sm:$0xff]  }
 0x416   : > { %7809 = vmatpush1.bf16.msra.mxu1 %v9848_v18  ;;  %7482 = vmatprep.subr.bf16.mxu0 %v9853_v19  ;;  %v9919_v18 = vld [vmem:[#allocation8 + $0xd24] ss:$16 sps:$4 sm:$0xff]   ;;  %v9922_v19 = vld [vmem:[#allocation8 + $0xd2c] ss:$16 sps:$4 sm:$0xff]  }
 0x417   : > { %7810 = vmatprep.subr.bf16.mxu1 %v9856_v21  ;;  %v9917_v21 = vld [vmem:[#allocation8 + $0xd20] ss:$16 sps:$4 sm:$0xff]  }
 0x419   : > { %7483 = vmatpush1.bf16.msra.mxu0 %v9851_v25  ;;  %v9925_v25 = vld [vmem:[#allocation8 + $0xd44] ss:$16 sps:$4 sm:$0xff]  }
 0x41a   : > { %7811 = vmatpush1.bf16.msra.mxu1 %v9854_v27  ;;  %7484 = vmatprep.subr.bf16.mxu0 %v9859_v28  ;;  %v9923_v27 = vld [vmem:[#allocation8 + $0xd40] ss:$16 sps:$4 sm:$0xff]   ;;  %v9926_v28 = vld [vmem:[#allocation8 + $0xd48] ss:$16 sps:$4 sm:$0xff]  }
 0x41b   : > { %7812 = vmatprep.subr.bf16.mxu1 %v9862_v29  ;;  %v9931_v29 = vld [vmem:[#allocation8 + $0xd64] ss:$16 sps:$4 sm:$0xff]  }
 0x41d   : > { %7485 = vmatpush1.bf16.msra.mxu0 %v9857_v15  ;;  %v9929_v15 = vld [vmem:[#allocation8 + $0xd60] ss:$16 sps:$4 sm:$0xff]  }
 0x41e   : > { %7813 = vmatpush1.bf16.msra.mxu1 %v9860_v43  ;;  %7495 = vmatprep.subr.bf16.mxu0 %v9865_v44  ;;  %v9937_v43 = vld [vmem:[#allocation8 + $0xd84] ss:$16 sps:$4 sm:$0xff]   ;;  %v9940_v44 = vld [vmem:[#allocation8 + $0xd8c] ss:$16 sps:$4 sm:$0xff]  }
 0x41f   : > { %7823 = vmatprep.subr.bf16.mxu1 %v9868_v10  ;;  %v9935_v10 = vld [vmem:[#allocation8 + $0xd80] ss:$16 sps:$4 sm:$0xff]  }
 0x420   : > { %7487 = vmatmul.mubr.bf16.vlgmr.msra.gmra.mrb[16].mxu0 %v4149_v47 }
 0x421   : > { %7815 = vmatmul.mubr.bf16.vlgmr.msra.gmra.mrb[16].mxu1 %v4149_v47  ;;  %7496 = vmatpush1.bf16.msra.mxu0 %v9863_v34  ;;  %v9943_v34 = vld [vmem:[#allocation8 + $0xda4] ss:$16 sps:$4 sm:$0xff]   ;;  %v9946_v47 = vld [vmem:[#allocation8 + $0xdac] ss:$16 sps:$4 sm:$0xff]  }
 0x422   : > { %7527 = vmatprep.mubr.bf16.mxu0 %v4152_v36  ;;  %7824 = vmatpush1.bf16.msra.mxu1 %v9866_v48  ;;  %v9941_v48 = vld [vmem:[#allocation8 + $0xda0] ss:$16 sps:$4 sm:$0xff]  }
 0x423   : > { %7855 = vmatprep.mubr.bf16.mxu1 %v4152_v36  ;;  %7497 = vmatprep.subr.bf16.mxu0 %v9871_v8  ;;  %v864_v8 = vrot.slane %v10675_v14, %v831_v41  ;;  %v9944_v36 = vld [vmem:[#allocation8 + $0xda8] ss:$16 sps:$4 sm:$0xff]   ;;  %v9958_v41 = vld [vmem:[#allocation8 + $0xdec] ss:$16 sps:$4 sm:$0xff]  }
 0x424   : > { %7825 = vmatprep.subr.bf16.mxu1 %v9874_v40  ;;  %v9949_v40 = vld [vmem:[#allocation8 + $0xdc4] ss:$16 sps:$4 sm:$0xff]  }
 0x425   : > { %7498 = vmatpush1.bf16.msra.mxu0 %v9869_v49  ;;  %v9952_v49 = vld [vmem:[#allocation8 + $0xdcc] ss:$16 sps:$4 sm:$0xff]  }
 0x426   : > { %7826 = vmatpush1.bf16.msra.mxu1 %v9872_v50  ;;  %7499 = vmatprep.subr.bf16.mxu0 %v9877_v53  ;;  %v876_v50 = vrot.slane %v10675_v14, %v843_v9  ;;  %v9947_v53 = vld [vmem:[#allocation8 + $0xdc0] ss:$16 sps:$4 sm:$0xff]   ;;  %v9964_v9 = vld [vmem:[#allocation8 + $0xe0c] ss:$16 sps:$4 sm:$0xff]  }
 0x427   : > { %7827 = vmatprep.subr.bf16.mxu1 %v9880_v37  ;;  %v9096_v37 = vadd.f32 %v10666_v31, %v864_v8  ;;  %v9959_v31 = vld [vmem:[#allocation8 + $0xe00] ss:$16 sps:$4 sm:$0xff]   ;;  %v10021_v8 = vld [vmem:[#allocation8 + $0xf44] ss:$16 sps:$4 sm:$0xff]  }
 0x429   : > { %7500 = vmatpush1.bf16.msra.mxu0 %v9875_v51  ;;  %v9950_v51 = vld [vmem:[#allocation8 + $0xdc8] ss:$16 sps:$4 sm:$0xff]  }
 0x42a   : > { %7828 = vmatpush1.bf16.msra.mxu1 %v9878_v52  ;;  %7501 = vmatprep.subr.bf16.mxu0 %v9883_v54  ;;  %v9955_v52 = vld [vmem:[#allocation8 + $0xde4] ss:$16 sps:$4 sm:$0xff]   ;;  %v9099_v54 = vadd.f32 %v10672_v35, %v876_v50  ;;  %v9970_v35 = vld [vmem:[#allocation8 + $0xe2c] ss:$16 sps:$4 sm:$0xff]  }
 0x42b   : > { %7829 = vmatprep.subr.bf16.mxu1 %v9886_v55  ;;  %v9953_v55 = vld [vmem:[#allocation8 + $0xde0] ss:$16 sps:$4 sm:$0xff]   ;;  %v10027_v50 = vld [vmem:[#allocation8 + $0xf64] ss:$16 sps:$4 sm:$0xff]  }
 0x42c   : > { %v4138_v14 = vmax.f32 %v9099_v54, 0.0  ;;  %v10031_v54 = vld [vmem:[#allocation8 + $0xf80] ss:$16 sps:$4 sm:$0xff]  }
 0x42d   : > { %7502 = vmatpush1.bf16.msra.mxu0 %v9881_v56  ;;  %v4135_v56 = vmax.f32 %v9096_v37, 0.0  ;;  %v10025_v37 = vld [vmem:[#allocation8 + $0xf60] ss:$16 sps:$4 sm:$0xff]  }
 0x42e   : > { %7830 = vmatpush1.bf16.msra.mxu1 %v9884_v24  ;;  %7503 = vmatprep.subr.bf16.mxu0 %v9889_v58  ;;  %v9956_v24 = vld [vmem:[#allocation8 + $0xde8] ss:$16 sps:$4 sm:$0xff]   ;;  %v9961_v58 = vld [vmem:[#allocation8 + $0xe04] ss:$16 sps:$4 sm:$0xff]  }
 0x42f   : > { %7831 = vmatprep.subr.bf16.mxu1 %v9892_v59  ;;  %v4151_v59 = vpack.c.bf16 %v4135_v56, %v4135_v56  ;;  %v10039_v56 = vld [vmem:[#allocation8 + $0xfa4] ss:$16 sps:$4 sm:$0xff]  }
 0x431   : > { %7504 = vmatpush1.bf16.msra.mxu0 %v9887_v60  ;;  %v9962_v60 = vld [vmem:[#allocation8 + $0xe08] ss:$16 sps:$4 sm:$0xff]  }
 0x432   : > { %7832 = vmatpush1.bf16.msra.mxu1 %v9890_v23  ;;  %7505 = vmatprep.subr.bf16.mxu0 %v9895_v61  ;;  %v9967_v23 = vld [vmem:[#allocation8 + $0xe24] ss:$16 sps:$4 sm:$0xff]   ;;  %v4154_v61 = vpack.c.bf16 %v4138_v14, %v4138_v14 }
 0x433   : > { %7833 = vmatprep.subr.bf16.mxu1 %v9898_v4  ;;  %v9965_v4 = vld [vmem:[#allocation8 + $0xe20] ss:$16 sps:$4 sm:$0xff]  }
 0x435   : > { %7506 = vmatpush1.bf16.msra.mxu0 %v9893_v62  ;;  %v9968_v62 = vld [vmem:[#allocation8 + $0xe28] ss:$16 sps:$4 sm:$0xff]  }
 0x436   : > { %7834 = vmatpush1.bf16.msra.mxu1 %v9896_v32  ;;  %7507 = vmatprep.subr.bf16.mxu0 %v9901_v63  ;;  %v9973_v32 = vld [vmem:[#allocation8 + $0xe44] ss:$16 sps:$4 sm:$0xff]   ;;  %v9976_v63 = vld [vmem:[#allocation8 + $0xe4c] ss:$16 sps:$4 sm:$0xff]  }
 0x437   : > { %7835 = vmatprep.subr.bf16.mxu1 %v9904_v0  ;;  %v9971_v0 = vld [vmem:[#allocation8 + $0xe40] ss:$16 sps:$4 sm:$0xff]  }
 0x439   : > { %7508 = vmatpush1.bf16.msra.mxu0 %v9899_v13  ;;  %v9974_v13 = vld [vmem:[#allocation8 + $0xe48] ss:$16 sps:$4 sm:$0xff]  }
 0x43a   : > { %7836 = vmatpush1.bf16.msra.mxu1 %v9902_v1  ;;  %7509 = vmatprep.subr.bf16.mxu0 %v9907_v2  ;;  %v9979_v1 = vld [vmem:[#allocation8 + $0xe64] ss:$16 sps:$4 sm:$0xff]   ;;  %v9982_v2 = vld [vmem:[#allocation8 + $0xe6c] ss:$16 sps:$4 sm:$0xff]  }
 0x43b   : > { %7837 = vmatprep.subr.bf16.mxu1 %v9910_v33  ;;  %v9977_v33 = vld [vmem:[#allocation8 + $0xe60] ss:$16 sps:$4 sm:$0xff]  }
 0x43d   : > { %7510 = vmatpush1.bf16.msra.mxu0 %v9905_v5  ;;  %v9980_v5 = vld [vmem:[#allocation8 + $0xe68] ss:$16 sps:$4 sm:$0xff]  }
 0x43e   : > { %7838 = vmatpush1.bf16.msra.mxu1 %v9908_v7  ;;  %7511 = vmatprep.subr.bf16.mxu0 %v9913_v11  ;;  %v9985_v7 = vld [vmem:[#allocation8 + $0xe84] ss:$16 sps:$4 sm:$0xff]   ;;  %v9988_v11 = vld [vmem:[#allocation8 + $0xe8c] ss:$16 sps:$4 sm:$0xff]  }
 0x43f   : > { %7839 = vmatprep.subr.bf16.mxu1 %v9916_v16  ;;  %v9983_v16 = vld [vmem:[#allocation8 + $0xe80] ss:$16 sps:$4 sm:$0xff]  }
 0x441   : > { %7512 = vmatpush1.bf16.msra.mxu0 %v9911_v57  ;;  %v9986_v57 = vld [vmem:[#allocation8 + $0xe88] ss:$16 sps:$4 sm:$0xff]  }
 0x442   : > { %7840 = vmatpush1.bf16.msra.mxu1 %v9914_v17  ;;  %7513 = vmatprep.subr.bf16.mxu0 %v9919_v18  ;;  %v9991_v17 = vld [vmem:[#allocation8 + $0xea4] ss:$16 sps:$4 sm:$0xff]   ;;  %v9994_v18 = vld [vmem:[#allocation8 + $0xeac] ss:$16 sps:$4 sm:$0xff]  }
 0x443   : > { %7841 = vmatprep.subr.bf16.mxu1 %v9922_v19  ;;  %v9989_v19 = vld [vmem:[#allocation8 + $0xea0] ss:$16 sps:$4 sm:$0xff]  }
 0x445   : > { %7514 = vmatpush1.bf16.msra.mxu0 %v9917_v21  ;;  %v9992_v21 = vld [vmem:[#allocation8 + $0xea8] ss:$16 sps:$4 sm:$0xff]  }
 0x446   : > { %7842 = vmatpush1.bf16.msra.mxu1 %v9920_v22  ;;  %7515 = vmatprep.subr.bf16.mxu0 %v9925_v25  ;;  %v9997_v22 = vld [vmem:[#allocation8 + $0xec4] ss:$16 sps:$4 sm:$0xff]   ;;  %v10000_v25 = vld [vmem:[#allocation8 + $0xecc] ss:$16 sps:$4 sm:$0xff]  }
 0x447   : > { %7843 = vmatprep.subr.bf16.mxu1 %v9928_v26  ;;  %v9995_v26 = vld [vmem:[#allocation8 + $0xec0] ss:$16 sps:$4 sm:$0xff]  }
 0x449   : > { %7516 = vmatpush1.bf16.msra.mxu0 %v9923_v27  ;;  %v9998_v27 = vld [vmem:[#allocation8 + $0xec8] ss:$16 sps:$4 sm:$0xff]  }
 0x44a   : > { %7844 = vmatpush1.bf16.msra.mxu1 %v9926_v28  ;;  %7517 = vmatprep.subr.bf16.mxu0 %v9931_v29  ;;  %v10003_v28 = vld [vmem:[#allocation8 + $0xee4] ss:$16 sps:$4 sm:$0xff]   ;;  %v10006_v29 = vld [vmem:[#allocation8 + $0xeec] ss:$16 sps:$4 sm:$0xff]  }
 0x44b   : > { %7845 = vmatprep.subr.bf16.mxu1 %v9934_v30  ;;  %v10001_v30 = vld [vmem:[#allocation8 + $0xee0] ss:$16 sps:$4 sm:$0xff]  }
 0x44d   : > { %7518 = vmatpush1.bf16.msra.mxu0 %v9929_v15  ;;  %v10004_v15 = vld [vmem:[#allocation8 + $0xee8] ss:$16 sps:$4 sm:$0xff]  }
 0x44e   : > { %7846 = vmatpush1.bf16.msra.mxu1 %v9932_v42  ;;  %7519 = vmatprep.subr.bf16.mxu0 %v9937_v43  ;;  %v10009_v42 = vld [vmem:[#allocation8 + $0xf04] ss:$16 sps:$4 sm:$0xff]   ;;  %v10012_v43 = vld [vmem:[#allocation8 + $0xf0c] ss:$16 sps:$4 sm:$0xff]  }
 0x44f   : > { %7847 = vmatprep.subr.bf16.mxu1 %v9940_v44  ;;  %v10007_v44 = vld [vmem:[#allocation8 + $0xf00] ss:$16 sps:$4 sm:$0xff]  }
 0x451   : > { %7520 = vmatpush1.bf16.msra.mxu0 %v9935_v10  ;;  %v10010_v10 = vld [vmem:[#allocation8 + $0xf08] ss:$16 sps:$4 sm:$0xff]  }
 0x452   : > { %7848 = vmatpush1.bf16.msra.mxu1 %v9938_v46  ;;  %7521 = vmatprep.subr.bf16.mxu0 %v9943_v34  ;;  %v10015_v46 = vld [vmem:[#allocation8 + $0xf24] ss:$16 sps:$4 sm:$0xff]   ;;  %v10018_v34 = vld [vmem:[#allocation8 + $0xf2c] ss:$16 sps:$4 sm:$0xff]  }
 0x453   : > { %7849 = vmatprep.subr.bf16.mxu1 %v9946_v47  ;;  %v10013_v47 = vld [vmem:[#allocation8 + $0xf20] ss:$16 sps:$4 sm:$0xff]  }
 0x455   : > { %7522 = vmatpush1.bf16.msra.mxu0 %v9941_v48  ;;  %v10016_v48 = vld [vmem:[#allocation8 + $0xf28] ss:$16 sps:$4 sm:$0xff]  }
 0x456   : > { %7850 = vmatpush1.bf16.msra.mxu1 %v9944_v36  ;;  %7523 = vmatprep.subr.bf16.mxu0 %v9949_v40  ;;  %v10024_v36 = vld [vmem:[#allocation8 + $0xf4c] ss:$16 sps:$4 sm:$0xff]   ;;  %v10019_v40 = vld [vmem:[#allocation8 + $0xf40] ss:$16 sps:$4 sm:$0xff]  }
 0x457   : > { %7851 = vmatprep.subr.bf16.mxu1 %v9952_v49  ;;  %v10022_v49 = vld [vmem:[#allocation8 + $0xf48] ss:$16 sps:$4 sm:$0xff]  }
 0x459   : > { %7524 = vmatpush1.bf16.msra.mxu0 %v9947_v53  ;;  %v10030_v53 = vld [vmem:[#allocation8 + $0xf6c] ss:$16 sps:$4 sm:$0xff]  }
 0x45a   : > { %7852 = vmatpush1.bf16.msra.mxu1 %v9950_v51  ;;  %7525 = vmatprep.subr.bf16.mxu0 %v9955_v52  ;;  %v10028_v51 = vld [vmem:[#allocation8 + $0xf68] ss:$16 sps:$4 sm:$0xff]   ;;  %v10033_v52 = vld [vmem:[#allocation8 + $0xf84] ss:$16 sps:$4 sm:$0xff]  }
 0x45b   : > { %7853 = vmatprep.subr.bf16.mxu1 %v9958_v41  ;;  %v10036_v41 = vld [vmem:[#allocation8 + $0xf8c] ss:$16 sps:$4 sm:$0xff]  }
 0x45d   : > { %7526 = vmatpush1.bf16.msra.mxu0 %v9953_v55  ;;  %v10034_v55 = vld [vmem:[#allocation8 + $0xf88] ss:$16 sps:$4 sm:$0xff]  }
 0x45e   : > { %7854 = vmatpush1.bf16.msra.mxu1 %v9956_v24  ;;  %7536 = vmatprep.subr.bf16.mxu0 %v9961_v58  ;;  %v10042_v24 = vld [vmem:[#allocation8 + $0xfac] ss:$16 sps:$4 sm:$0xff]   ;;  %v10037_v58 = vld [vmem:[#allocation8 + $0xfa0] ss:$16 sps:$4 sm:$0xff]  }
 0x45f   : > { %7864 = vmatprep.subr.bf16.mxu1 %v9964_v9  ;;  %v10056_v9 = vld [vmem:[#allocation7 + $0x8] sm:$0xff] }
 0x460   : > { %7528 = vmatmul.mubr.bf16.vlgmr.msra.gmra.mrb[16].mxu0 %v4151_v59  ;;  %v872_v14 = vrot.slane %v10056_v9, %v839_v3 }
 0x461   : > { %7856 = vmatmul.mubr.bf16.vlgmr.msra.gmra.mrb[16].mxu1 %v4151_v59  ;;  %7537 = vmatpush1.bf16.msra.mxu0 %v9959_v31  ;;  %v10040_v31 = vld [vmem:[#allocation8 + $0xfa8] ss:$16 sps:$4 sm:$0xff]   ;;  %v10045_v59 = vld [vmem:[#allocation8 + $0xfc4] ss:$16 sps:$4 sm:$0xff]  }
 0x462   : > { %7568 = vmatprep.mubr.bf16.mxu0 %v4154_v61  ;;  %7865 = vmatpush1.bf16.msra.mxu1 %v9962_v60  ;;  %v10048_v60 = vld [vmem:[#allocation8 + $0xfcc] ss:$16 sps:$4 sm:$0xff]  }
 0x463   : > { %7896 = vmatprep.mubr.bf16.mxu1 %v4154_v61  ;;  %7538 = vmatprep.subr.bf16.mxu0 %v9967_v23  ;;  %v10043_v23 = vld [vmem:[#allocation8 + $0xfc0] ss:$16 sps:$4 sm:$0xff]   ;;  %v9098_v61 = vadd.f32 %v10668_v38, %v872_v14 }
 0x464   : > { %7866 = vmatprep.subr.bf16.mxu1 %v9970_v35  ;;  %v10046_v35 = vld [vmem:[#allocation8 + $0xfc8] ss:$16 sps:$4 sm:$0xff]   ;;  %v4667_v38 = vld [vmem:[#allocation10] sm:$0xf] }
 0x465   : > { %7539 = vmatpush1.bf16.msra.mxu0 %v9965_v4  ;;  %v10051_v4 = vld [vmem:[#allocation8 + $0xfe4] ss:$16 sps:$4 sm:$0xff]   ;;  %v4137_v3 = vmax.f32 %v9098_v61, 0.0 }
 0x466   : > { %7867 = vmatpush1.bf16.msra.mxu1 %v9968_v62  ;;  %7540 = vmatprep.subr.bf16.mxu0 %v9973_v32  ;;  %v10054_v62 = vld [vmem:[#allocation8 + $0xfec] ss:$16 sps:$4 sm:$0xff]   ;;  %v10052_v32 = vld [vmem:[#allocation8 + $0xfe8] ss:$16 sps:$4 sm:$0xff]  }
 0x467   : > { %7868 = vmatprep.subr.bf16.mxu1 %v9976_v63  ;;  %v4153_v63 = vpack.c.bf16 %v4137_v3, %v4137_v3 }
 0x469   : > { %7541 = vmatpush1.bf16.msra.mxu0 %v9971_v0  ;;  %v4672_v0 = vrot.slane %v4667_v38, %v10626_v12 }
 0x46a   : > { %7869 = vmatpush1.bf16.msra.mxu1 %v9974_v13  ;;  %7542 = vmatprep.subr.bf16.mxu0 %v9979_v1  ;;  %v4680_v13 = vrot.slane %v4667_v38, %v10646_v39  ;;  %v4676_v1 = vrot.slane %v4667_v38, %v10616_v20 }
 0x46b   : > { %7870 = vmatprep.subr.bf16.mxu1 %v9982_v2  ;;  %v4684_v2 = vrot.slane %v4667_v38, %v10629_v45 }
 0x46d   : > { %7543 = vmatpush1.bf16.msra.mxu0 %v9977_v33 }
 0x46e   : > { %7871 = vmatpush1.bf16.msra.mxu1 %v9980_v5  ;;  %7544 = vmatprep.subr.bf16.mxu0 %v9985_v7 }
 0x46f   : > { %7872 = vmatprep.subr.bf16.mxu1 %v9988_v11 }
 0x471   : > { %7545 = vmatpush1.bf16.msra.mxu0 %v9983_v16 }
 0x472   : > { %7873 = vmatpush1.bf16.msra.mxu1 %v9986_v57  ;;  %7546 = vmatprep.subr.bf16.mxu0 %v9991_v17 }
 0x473   : > { %7874 = vmatprep.subr.bf16.mxu1 %v9994_v18 }
 0x475   : > { %7547 = vmatpush1.bf16.msra.mxu0 %v9989_v19 }
 0x476   : > { %7875 = vmatpush1.bf16.msra.mxu1 %v9992_v21  ;;  %7548 = vmatprep.subr.bf16.mxu0 %v9997_v22 }
 0x477   : > { %7876 = vmatprep.subr.bf16.mxu1 %v10000_v25 }
 0x479   : > { %7549 = vmatpush1.bf16.msra.mxu0 %v9995_v26 }
 0x47a   : > { %7877 = vmatpush1.bf16.msra.mxu1 %v9998_v27  ;;  %7550 = vmatprep.subr.bf16.mxu0 %v10003_v28 }
 0x47b   : > { %7878 = vmatprep.subr.bf16.mxu1 %v10006_v29 }
 0x47d   : > { %7551 = vmatpush1.bf16.msra.mxu0 %v10001_v30 }
 0x47e   : > { %7879 = vmatpush1.bf16.msra.mxu1 %v10004_v15  ;;  %7552 = vmatprep.subr.bf16.mxu0 %v10009_v42 }
 0x47f   : > { %7880 = vmatprep.subr.bf16.mxu1 %v10012_v43 }
 0x481   : > { %7553 = vmatpush1.bf16.msra.mxu0 %v10007_v44 }
 0x482   : > { %7881 = vmatpush1.bf16.msra.mxu1 %v10010_v10  ;;  %7554 = vmatprep.subr.bf16.mxu0 %v10015_v46 }
 0x483   : > { %7882 = vmatprep.subr.bf16.mxu1 %v10018_v34 }
 0x485   : > { %7555 = vmatpush1.bf16.msra.mxu0 %v10013_v47 }
 0x486   : > { %7883 = vmatpush1.bf16.msra.mxu1 %v10016_v48  ;;  %7556 = vmatprep.subr.bf16.mxu0 %v10021_v8 }
 0x487   : > { %7884 = vmatprep.subr.bf16.mxu1 %v10024_v36 }
 0x489   : > { %7557 = vmatpush1.bf16.msra.mxu0 %v10019_v40 }
 0x48a   : > { %7885 = vmatpush1.bf16.msra.mxu1 %v10022_v49  ;;  %7558 = vmatprep.subr.bf16.mxu0 %v10027_v50 }
 0x48b   : > { %7886 = vmatprep.subr.bf16.mxu1 %v10030_v53 }
 0x48d   : > { %7559 = vmatpush1.bf16.msra.mxu0 %v10025_v37 }
 0x48e   : > { %7887 = vmatpush1.bf16.msra.mxu1 %v10028_v51  ;;  %7560 = vmatprep.subr.bf16.mxu0 %v10033_v52 }
 0x48f   : > { %7888 = vmatprep.subr.bf16.mxu1 %v10036_v41 }
 0x491   : > { %7561 = vmatpush1.bf16.msra.mxu0 %v10031_v54 }
 0x492   : > { %7889 = vmatpush1.bf16.msra.mxu1 %v10034_v55  ;;  %7562 = vmatprep.subr.bf16.mxu0 %v10039_v56 }
 0x493   : > { %7890 = vmatprep.subr.bf16.mxu1 %v10042_v24 }
 0x495   : > { %7563 = vmatpush1.bf16.msra.mxu0 %v10037_v58 }
 0x496   : > { %7891 = vmatpush1.bf16.msra.mxu1 %v10040_v31  ;;  %7564 = vmatprep.subr.bf16.mxu0 %v10045_v59 }
 0x497   : > { %7892 = vmatprep.subr.bf16.mxu1 %v10048_v60 }
 0x499   : > { %7565 = vmatpush1.bf16.msra.mxu0 %v10043_v23 }
 0x49a   : > { %7893 = vmatpush1.bf16.msra.mxu1 %v10046_v35  ;;  %7566 = vmatprep.subr.bf16.mxu0 %v10051_v4 }
 0x49b   : > { %7894 = vmatprep.subr.bf16.mxu1 %v10054_v62 }
 0x49d   : > { %7567 = vmatpush1.bf16.msra.mxu0 %v10049_v6 }
 0x49e   : > { %7895 = vmatpush1.bf16.msra.mxu1 %v10052_v32 }
 0x4a0   : > { %7569 = vmatmul.mubr.bf16.vlgmr.msra.gmra.mrb[16].mxu0 %v4153_v63 }
 0x4a1   : > { %7897 = vmatmul.mubr.bf16.vlgmr.msra.gmra.mrb[16].mxu1 %v4153_v63 }
 0x573   : > { %v7570_v33 = vpop.f32.mrb[16].mxu0 }
 0x574   : > { %v9100_v5 = vadd.f32 %v7570_v33, %v4672_v0  ;;  %v7898_v7 = vpop.f32.mrb[16].mxu1  ;;  %v7572_v11 = vpop.f32.mrb[17].mxu0 }
 0x575   : > { %v9102_v16 = vadd.f32 %v7898_v7, %v4680_v13  ;;  %v9101_v57 = vadd.f32 %v7572_v11, %v4676_v1  ;;  %v7900_v17 = vpop.f32.mrb[17].mxu1  ;;  %v7574_v18 = vpop.f32.mrb[18].mxu0 }
 0x576   : > { %7905 = vst [vmem:[%s294_s17] sm:$0xff] %v9100_v5  ;;  %v9103_v12 = vadd.f32 %v7900_v17, %v4684_v2  ;;  %v7902_v39 = vpop.f32.mrb[18].mxu1  ;;  %v7575_v19 = vpop.f32.mrb[19].mxu0 }
 0x577   : > { %7907 = vst [vmem:[%s294_s17 + $0x10] sm:$0xff] %v9102_v16  ;;  %7906 = vst [vmem:[%s294_s17 + $0x8] sm:$0xff] %v9101_v57  ;;  %v7903_v20 = vpop.f32.mrb[19].mxu1 }
 0x578   : > { %7908 = vst [vmem:[%s294_s17 + $0x18] sm:$0xff] %v9103_v12 }
 0x579   : > { %10212 = shalt.err (!%p10209_p12)
}
 0x57a   : > { %s10213_s22 = scalar_lea.hbm %s10716_s27, 512  ;;  %s10217_s7 = scalar_lea.hbm %s10765_s5, 1024 }
 0x57b   : > { %p10214_p13 = scmp.ne.s32.totalorder %s10716_s27, %s10213_s22  ;;  %p10218_p9 = scmp.lt.u32.totalorder %s10716_s27, %s10765_s5 }
 0x57c   : > { %p10219_p4 = scmp.lt.u32.totalorder %s10217_s7, %s10213_s22  ;;  %p10221_p6 = scmp.lt.u32.totalorder %s10213_s22, %s10716_s27 }
 0x57d   : > { %p10215_p1 = pnand %p10214_p13, %p10783_p0 }
 0x57e   : > { %p10220_p8 = por %p10219_p4, %p10218_p9 }
 0x57f   : > { %p10216_p7 = pneg %p10215_p1 }
 0x580   : > { %p10222_p2 = por %p10221_p6, %p10220_p8 }
 0x582   : > { %p10223_p5 = pnand %p10222_p2, %p10216_p7 }
 0x584   : > { %10226 = shalt.err (!%p10223_p5)
}
 0x585   : > { %9210 = dma.vmem_to_hbm [thread:$0]  (%p10783_p0), %s10718_s30, 512, %s10716_s27, %s7910_s24  }
 0x586 PF: > { %s7936_s9 = sand.u32 1, %s10261_s18   ;;  %p10784_p10 = scmp.ne.s32.totalorder %s10776_s12, 0 }
 0x587   : > { %p10785_p11 = scmp.ge.s32.totalorder %s10273_s21, 2  ;;  %s7937_s17 = scalar_lea.sflag [#allocation4], %s7936_s9 }
 0x589   : > { %p9230_p3 = pnand %p10785_p11, %p10784_p10 }
 0x58b   : > { %10256 = dma.done.wait (!%p9230_p3), %s7937_s17, 512  }
 0x58c   : > { %10258 = vsyncadd (!%p9230_p3), %s7937_s17, 4294966784  ;;  %p20_p12 = scmp.ge.s32.totalorder %s10451_s28, 4   ;;  %s10786_s18 = smov %s10265_s19 }
 0x58d   : > { %s10787_s19 = smov %s10269_s20  ;;  %s10788_s20 = smov %s10462_s8 }
 0x58e   : > { %s10789_s21 = smov %s10451_s28  ;;  %22 = sbr.rel (!%p20_p12) target bundleno = 7 (0x7), region = 101 }
 0x595   :  { %7942 = vsyncpa [#allocation3], 1 }
 0x596   :  { %7944 = vsyncpa [#allocation3 + $0x1], 1 }
 0x597   :  { %7945 = vsyncpa [#allocation6], 1 }
 0x598   :  { %7946 = vsyncpa [#allocation9], 1 }
 0x599   :  { %7947 = vsyncpa [#allocation4], 1 }
 0x59a   :  { %7949 = vsyncpa [#allocation4 + $0x1], 1 }

</bundles_post_ra>
